<compile_context>
chip_gen: v7x
topology: tpu7x:2x2x1
jax: 0.10.0
libtpu: 0.0.40
codegen_flags: <defaults>
</compile_context>

<pallas_src>
import functools

import numpy as np
import jax
import jax.numpy as jnp
from jax.experimental import pallas as pl
from jax.experimental.pallas import tpu as pltpu

EPS = 1e-5


# ---------------------------------------------------------------------------
# Fused whole-network kernel (one image per grid step)
# ---------------------------------------------------------------------------
def cnn_fused_kernel(x_ref, *refs, layer_dims):
    """refs = 12 conv operands (w, b, pool-select) + 6 fc operands + o_ref
              + 4 conv-activation scratch + 3 next-layer-buffer scratch."""
    conv_refs = refs[0:12]
    fw1_ref, fb1_ref, fw2_ref, fb2_ref, fw3_ref, fb3_ref = refs[12:18]
    o_ref = refs[18]
    act_scr = refs[19:23]
    buf_scr = (x_ref,) + tuple(refs[23:26])  # per-layer padded+guarded flat inputs

    feat = None
    for li, (wp, cin) in enumerate(layer_dims):
        w_ref, b_ref, s_ref = conv_refs[3 * li:3 * li + 3]
        src = buf_scr[li]
        mi = src.shape[0] - 2 * (wp + 1)          # number of padded pixel positions

        # conv + BN + ReLU: 9 accumulated dots over contiguous row-shifted
        # windows of the flat padded buffer (im2col entirely in VMEM).
        acc = jnp.dot(src[0:mi, :], w_ref[0:cin, :],
                      preferred_element_type=jnp.float32)
        for k in range(1, 9):
            start = (k // 3) * wp + (k % 3)
            acc = acc + jnp.dot(src[start:start + mi, :],
                                w_ref[k * cin:(k + 1) * cin, :],
                                preferred_element_type=jnp.float32)
        act_scr[li][...] = jnp.maximum(acc + b_ref[...], 0.0)

        # fused 2x2 maxpool: max over 4 shifted windows, then one matmul with a
        # constant selection matrix picks stride-2 anchors and rebuilds the next
        # layer's zero-padded buffer (last layer: the matrix is the global-avg-pool).
        a = mi - wp - 1
        act = act_scr[li]
        pooled = jnp.maximum(
            jnp.maximum(act[0:a, :], act[1:a + 1, :]),
            jnp.maximum(act[wp:wp + a, :], act[wp + 1:wp + 1 + a, :]))
        nxt = jnp.dot(s_ref[...], pooled, preferred_element_type=jnp.float32)
        if li + 1 < len(layer_dims):
            buf_scr[li + 1][...] = nxt
        else:
            feat = nxt                             # (1, 256) GAP features

    # fused MLP head (BN folded into weights).
    # TODO(synk): nn.Dropout(p=0.5) is identity in inference mode; not applied.
    h = jnp.maximum(
        jnp.dot(feat, fw1_ref[...], preferred_element_type=jnp.float32) + fb1_ref[...], 0.0)
    h = jnp.maximum(
        jnp.dot(h, fw2_ref[...], preferred_element_type=jnp.float32) + fb2_ref[...], 0.0)
    z = jnp.dot(h, fw3_ref[...], preferred_element_type=jnp.float32) + fb3_ref[...]
    e = jnp.exp(-jnp.abs(z))                       # numerically stable sigmoid
    sg = 1.0 / (1.0 + e)
    o_ref[...] = jnp.where(z >= 0.0, sg, 1.0 - sg)


# ---------------------------------------------------------------------------
# Host-side folding / constant construction
# ---------------------------------------------------------------------------
def _bn_scale_shift(bn):
    scale = bn["gamma"] / jnp.sqrt(bn["var"] + EPS)
    return scale, bn["beta"] - bn["mean"] * scale


def _fold_conv(w_oihw, bias, bn):
    cout, cin = w_oihw.shape[0], w_oihw.shape[1]
    scale, shift = _bn_scale_shift(bn)
    w_mat = jnp.transpose(w_oihw, (2, 3, 1, 0)).reshape(9 * cin, cout) * scale[None, :]
    return w_mat, (bias * scale + shift).reshape(1, cout)


def _fold_fc(w_io, bias, bn=None):
    if bn is None:
        return w_io, bias.reshape(1, -1)
    scale, shift = _bn_scale_shift(bn)
    return w_io * scale[None, :], (bias * scale + shift).reshape(1, -1)


def _pool_select_np(h, w, *, last):
    """Constant matrix mapping 2x2-maxpool anchor rows (flat padded layout of a
    conv layer with input spatial (h, w)) either to the next layer's guarded,
    zero-padded flat buffer (all-zero rows create halo/guard zeros) or, for the
    last layer, to one row of 1/(pooled pixels) weights == global average pool."""
    wp = w + 2
    a_rows = (h + 2) * wp - wp - 1
    hn, wn = h // 2, w // 2
    if last:
        sel = np.zeros((1, a_rows), np.float32)
        for yn in range(1, hn + 1):
            for xn in range(1, wn + 1):
                sel[0, (2 * yn - 1) * wp + (2 * xn - 1)] = 1.0 / (hn * wn)
        return sel
    hpn, wpn = hn + 2, wn + 2
    gn = wpn + 1
    sel = np.zeros((hpn * wpn + 2 * gn, a_rows), np.float32)
    for yn in range(1, hn + 1):
        for xn in range(1, wn + 1):
            sel[gn + yn * wpn + xn, (2 * yn - 1) * wp + (2 * xn - 1)] = 1.0
    return sel


@jax.jit
def cnn_forward(x_nchw, params):
    # TODO(synk): BatchNorm uses inference (running-stat) semantics and dropout is
    # identity; PyTorch train-mode batch statistics are not reproduced.
    n, c, h, w = x_nchw.shape
    assert h % 16 == 0 and w % 16 == 0, "needs four rounds of 2x2 pooling"

    # Input: NCHW -> NHWC -> zero halo -> flatten pixels -> zero guard rows.
    x = jnp.transpose(x_nchw, (0, 2, 3, 1)).astype(jnp.float32)
    xp = jnp.pad(x, ((0, 0), (1, 1), (1, 1), (0, 0)))
    hp, wp = h + 2, w + 2
    x0 = jnp.pad(xp.reshape(n, hp * wp, c), ((0, 0), (wp + 1, wp + 1), (0, 0)))

    # Per-layer folded conv weights, pooling/GAP selection constants, scratch.
    conv_args, layer_dims, act_scratch, buf_scratch = [], [], [], []
    hh, ww, cin = h, w, c
    for i in range(1, 5):
        w_mat, b_vec = _fold_conv(params[f"conv{i}_w"], params[f"conv{i}_b"],
                                  params[f"bn{i}"])
        cout = w_mat.shape[1]
        sel = jnp.asarray(_pool_select_np(hh, ww, last=(i == 4)))
        conv_args += [w_mat, b_vec, sel]
        layer_dims.append((ww + 2, cin))
        act_scratch.append(pltpu.VMEM(((hh + 2) * (ww + 2), cout), jnp.float32))
        if i < 4:
            buf_scratch.append(pltpu.VMEM((sel.shape[0], cout), jnp.float32))
        cin = cout
        hh, ww = hh // 2, ww // 2

    fw1, fb1 = _fold_fc(params["fc1_w"], params["fc1_b"], params["bn_fc1"])
    fw2, fb2 = _fold_fc(params["fc2_w"], params["fc2_b"], params["bn_fc2"])
    fw3, fb3 = _fold_fc(params["fc3_w"], params["fc3_b"])
    const_args = conv_args + [fw1, fb1, fw2, fb2, fw3, fb3]

    in_specs = [pl.BlockSpec((None,) + x0.shape[1:], lambda b: (b, 0, 0))]
    in_specs += [pl.BlockSpec(a.shape, lambda b: (0, 0)) for a in const_args]

    out = pl.pallas_call(
        functools.partial(cnn_fused_kernel, layer_dims=tuple(layer_dims)),
        out_shape=jax.ShapeDtypeStruct((n, 1, 1), jnp.float32),
        grid=(n,),
        in_specs=in_specs,
        out_specs=pl.BlockSpec((None, 1, 1), lambda b: (b, 0, 0)),
        scratch_shapes=act_scratch + buf_scratch,
        compiler_params=pltpu.CompilerParams(dimension_semantics=("parallel",)),
    )(x0, *const_args)
    return out.reshape(n, 1)


# ---------------------------------------------------------------------------
# Pure-JAX reference (for correctness check) and deterministic params
# ---------------------------------------------------------------------------
def _reference_forward(x_nchw, params):
    x = jnp.transpose(x_nchw, (0, 2, 3, 1)).astype(jnp.float32)
    for i in range(1, 5):
        wmat = jnp.transpose(params[f"conv{i}_w"], (2, 3, 1, 0))   # HWIO
        y = jax.lax.conv_general_dilated(
            x, wmat, window_strides=(1, 1), padding="SAME",
            dimension_numbers=("NHWC", "HWIO", "NHWC"))
        scale, shift = _bn_scale_shift(params[f"bn{i}"])
        y = jnp.maximum((y + params[f"conv{i}_b"]) * scale + shift, 0.0)
        nb, hb, wb, cb = y.shape
        x = jnp.max(y.reshape(nb, hb // 2, 2, wb // 2, 2, cb), axis=(2, 4))
    feat = jnp.mean(x, axis=(1, 2))
    s1, t1 = _bn_scale_shift(params["bn_fc1"])
    s2, t2 = _bn_scale_shift(params["bn_fc2"])
    h1 = jnp.maximum((feat @ params["fc1_w"] + params["fc1_b"]) * s1 + t1, 0.0)
    h2 = jnp.maximum((h1 @ params["fc2_w"] + params["fc2_b"]) * s2 + t2, 0.0)
    return jax.nn.sigmoid(h2 @ params["fc3_w"] + params["fc3_b"])


def init_params(key):
    keys = iter(jax.random.split(key, 64))

    def nrm(shape, scale=0.05):
        return scale * jax.random.normal(next(keys), shape, jnp.float32)

    def bn(c):
        return dict(
            gamma=1.0 + 0.2 * jax.random.normal(next(keys), (c,), jnp.float32),
            beta=0.1 * jax.random.normal(next(keys), (c,), jnp.float32),
            mean=0.1 * jax.random.normal(next(keys), (c,), jnp.float32),
            var=0.5 + jax.random.uniform(next(keys), (c,), jnp.float32),
        )

    p = {}
    for i, (ci, co) in enumerate([(3, 32), (32, 64), (64, 128), (128, 256)], 1):
        p[f"conv{i}_w"] = nrm((co, ci, 3, 3))          # PyTorch OIHW layout
        p[f"conv{i}_b"] = nrm((co,), 0.01)
        p[f"bn{i}"] = bn(co)
    for i, (fi, fo) in enumerate([(256, 128), (128, 64), (64, 1)], 1):
        p[f"fc{i}_w"] = nrm((fi, fo))                  # stored (in, out) for x @ W
        p[f"fc{i}_b"] = nrm((fo,), 0.01)
    p["bn_fc1"] = bn(128)
    p["bn_fc2"] = bn(64)
    return p


if __name__ == "__main__":
    key = jax.random.PRNGKey(0)
    kx, kp = jax.random.split(key)
    # Matches the PyTorch module's expected input: NCHW with 3 input channels.
    x = jax.random.normal(kx, (2, 3, 16, 16), jnp.float32)
    params = init_params(kp)

    y = jax.block_until_ready(cnn_forward(x, params))
    assert y.shape == (2, 1), y.shape
    assert bool(jnp.all(jnp.isfinite(y)))
    assert bool(jnp.all((y >= 0.0) & (y <= 1.0)))

    y_ref = _reference_forward(x, params)
    assert bool(jnp.allclose(y, y_ref, atol=5e-3, rtol=5e-3))
    print("KERNEL_OK")
</pallas_src>

<mosaic_0001>
module attributes {stable_mosaic.version = 11 : i64} {
  func.func @cnn_fused_kernel(%arg0: i32, %arg1: memref<1x362x3xf32, #tpu.memory_space<vmem>>, %arg2: memref<27x32xf32, #tpu.memory_space<vmem>>, %arg3: memref<1x32xf32, #tpu.memory_space<vmem>>, %arg4: memref<122x305xf32, #tpu.memory_space<vmem>>, %arg5: memref<288x64xf32, #tpu.memory_space<vmem>>, %arg6: memref<1x64xf32, #tpu.memory_space<vmem>>, %arg7: memref<50x89xf32, #tpu.memory_space<vmem>>, %arg8: memref<576x128xf32, #tpu.memory_space<vmem>>, %arg9: memref<1x128xf32, #tpu.memory_space<vmem>>, %arg10: memref<26x29xf32, #tpu.memory_space<vmem>>, %arg11: memref<1152x256xf32, #tpu.memory_space<vmem>>, %arg12: memref<1x256xf32, #tpu.memory_space<vmem>>, %arg13: memref<1x11xf32, #tpu.memory_space<vmem>>, %arg14: memref<256x128xf32, #tpu.memory_space<vmem>>, %arg15: memref<1x128xf32, #tpu.memory_space<vmem>>, %arg16: memref<128x64xf32, #tpu.memory_space<vmem>>, %arg17: memref<1x64xf32, #tpu.memory_space<vmem>>, %arg18: memref<64x1xf32, #tpu.memory_space<vmem>>, %arg19: memref<1x1xf32, #tpu.memory_space<vmem>>, %arg20: memref<1x1x1xf32, #tpu.memory_space<vmem>>, %arg21: memref<324x32xf32, #tpu.memory_space<vmem>>, %arg22: memref<100x64xf32, #tpu.memory_space<vmem>>, %arg23: memref<36x128xf32, #tpu.memory_space<vmem>>, %arg24: memref<16x256xf32, #tpu.memory_space<vmem>>, %arg25: memref<122x32xf32, #tpu.memory_space<vmem>>, %arg26: memref<50x64xf32, #tpu.memory_space<vmem>>, %arg27: memref<26x128xf32, #tpu.memory_space<vmem>>) attributes {dimension_semantics = [#tpu.dimension_semantics<parallel>], iteration_bounds = array<i64: 2>, scalar_prefetch = 0 : i64, scratch_operands = 7 : i64, tpu.core_type = #tpu.core_type<tc>, window_params = [{transform_indices = @transform_0, window_bounds = array<i64: 1, 362, 3>}, {pipeline_mode = #tpu.pipeline_mode<synchronous>, transform_indices = @transform_1, window_bounds = array<i64: 27, 32>}, {pipeline_mode = #tpu.pipeline_mode<synchronous>, transform_indices = @transform_2, window_bounds = array<i64: 1, 32>}, {pipeline_mode = #tpu.pipeline_mode<synchronous>, transform_indices = @transform_3, window_bounds = array<i64: 122, 305>}, {pipeline_mode = #tpu.pipeline_mode<synchronous>, transform_indices = @transform_4, window_bounds = array<i64: 288, 64>}, {pipeline_mode = #tpu.pipeline_mode<synchronous>, transform_indices = @transform_5, window_bounds = array<i64: 1, 64>}, {pipeline_mode = #tpu.pipeline_mode<synchronous>, transform_indices = @transform_6, window_bounds = array<i64: 50, 89>}, {pipeline_mode = #tpu.pipeline_mode<synchronous>, transform_indices = @transform_7, window_bounds = array<i64: 576, 128>}, {pipeline_mode = #tpu.pipeline_mode<synchronous>, transform_indices = @transform_8, window_bounds = array<i64: 1, 128>}, {pipeline_mode = #tpu.pipeline_mode<synchronous>, transform_indices = @transform_9, window_bounds = array<i64: 26, 29>}, {pipeline_mode = #tpu.pipeline_mode<synchronous>, transform_indices = @transform_10, window_bounds = array<i64: 1152, 256>}, {pipeline_mode = #tpu.pipeline_mode<synchronous>, transform_indices = @transform_11, window_bounds = array<i64: 1, 256>}, {pipeline_mode = #tpu.pipeline_mode<synchronous>, transform_indices = @transform_12, window_bounds = array<i64: 1, 11>}, {pipeline_mode = #tpu.pipeline_mode<synchronous>, transform_indices = @transform_13, window_bounds = array<i64: 256, 128>}, {pipeline_mode = #tpu.pipeline_mode<synchronous>, transform_indices = @transform_14, window_bounds = array<i64: 1, 128>}, {pipeline_mode = #tpu.pipeline_mode<synchronous>, transform_indices = @transform_15, window_bounds = array<i64: 128, 64>}, {pipeline_mode = #tpu.pipeline_mode<synchronous>, transform_indices = @transform_16, window_bounds = array<i64: 1, 64>}, {pipeline_mode = #tpu.pipeline_mode<synchronous>, transform_indices = @transform_17, window_bounds = array<i64: 64, 1>}, {pipeline_mode = #tpu.pipeline_mode<synchronous>, transform_indices = @transform_18, window_bounds = array<i64: 1, 1>}, {transform_indices = @transform_19, window_bounds = array<i64: 1, 1, 1>}]} {
    %c0 = arith.constant 0 : index
    %c0_0 = arith.constant 0 : index
    %c0_1 = arith.constant 0 : index
    %0 = vector.load %arg1[%c0, %c0_0, %c0_1] : memref<1x362x3xf32, #tpu.memory_space<vmem>>, vector<1x324x3xf32>
    %1 = vector.shape_cast %0 : vector<1x324x3xf32> to vector<324x3xf32>
    %c0_2 = arith.constant 0 : index
    %c0_3 = arith.constant 0 : index
    %2 = vector.load %arg2[%c0_2, %c0_3] : memref<27x32xf32, #tpu.memory_space<vmem>>, vector<3x32xf32>
    %cst = arith.constant dense<0.000000e+00> : vector<324x32xf32>
    %3 = tpu.matmul %1, %2, %cst {dimension_numbers = #tpu.dot_dimension_numbers<[1], [0], [0], [1], [0, 0, 1, 1], [], []>} : vector<324x3xf32>, vector<3x32xf32>, vector<324x32xf32> -> vector<324x32xf32>
    %c0_4 = arith.constant 0 : index
    %c1 = arith.constant 1 : index
    %c0_5 = arith.constant 0 : index
    %4 = vector.load %arg1[%c0_4, %c1, %c0_5] : memref<1x362x3xf32, #tpu.memory_space<vmem>>, vector<1x324x3xf32>
    %5 = vector.shape_cast %4 : vector<1x324x3xf32> to vector<324x3xf32>
    %c3 = arith.constant 3 : index
    %c0_6 = arith.constant 0 : index
    %6 = vector.load %arg2[%c3, %c0_6] : memref<27x32xf32, #tpu.memory_space<vmem>>, vector<3x32xf32>
    %cst_7 = arith.constant dense<0.000000e+00> : vector<324x32xf32>
    %7 = tpu.matmul %5, %6, %cst_7 {dimension_numbers = #tpu.dot_dimension_numbers<[1], [0], [0], [1], [0, 0, 1, 1], [], []>} : vector<324x3xf32>, vector<3x32xf32>, vector<324x32xf32> -> vector<324x32xf32>
    %8 = arith.addf %3, %7 : vector<324x32xf32>
    %c0_8 = arith.constant 0 : index
    %c2 = arith.constant 2 : index
    %c0_9 = arith.constant 0 : index
    %9 = vector.load %arg1[%c0_8, %c2, %c0_9] : memref<1x362x3xf32, #tpu.memory_space<vmem>>, vector<1x324x3xf32>
    %10 = vector.shape_cast %9 : vector<1x324x3xf32> to vector<324x3xf32>
    %c6 = arith.constant 6 : index
    %c0_10 = arith.constant 0 : index
    %11 = vector.load %arg2[%c6, %c0_10] : memref<27x32xf32, #tpu.memory_space<vmem>>, vector<3x32xf32>
    %cst_11 = arith.constant dense<0.000000e+00> : vector<324x32xf32>
    %12 = tpu.matmul %10, %11, %cst_11 {dimension_numbers = #tpu.dot_dimension_numbers<[1], [0], [0], [1], [0, 0, 1, 1], [], []>} : vector<324x3xf32>, vector<3x32xf32>, vector<324x32xf32> -> vector<324x32xf32>
    %13 = arith.addf %8, %12 : vector<324x32xf32>
    %c0_12 = arith.constant 0 : index
    %c18 = arith.constant 18 : index
    %c0_13 = arith.constant 0 : index
    %14 = vector.load %arg1[%c0_12, %c18, %c0_13] : memref<1x362x3xf32, #tpu.memory_space<vmem>>, vector<1x324x3xf32>
    %15 = vector.shape_cast %14 : vector<1x324x3xf32> to vector<324x3xf32>
    %c9 = arith.constant 9 : index
    %c0_14 = arith.constant 0 : index
    %16 = vector.load %arg2[%c9, %c0_14] : memref<27x32xf32, #tpu.memory_space<vmem>>, vector<3x32xf32>
    %cst_15 = arith.constant dense<0.000000e+00> : vector<324x32xf32>
    %17 = tpu.matmul %15, %16, %cst_15 {dimension_numbers = #tpu.dot_dimension_numbers<[1], [0], [0], [1], [0, 0, 1, 1], [], []>} : vector<324x3xf32>, vector<3x32xf32>, vector<324x32xf32> -> vector<324x32xf32>
    %18 = arith.addf %13, %17 : vector<324x32xf32>
    %c0_16 = arith.constant 0 : index
    %c19 = arith.constant 19 : index
    %c0_17 = arith.constant 0 : index
    %19 = vector.load %arg1[%c0_16, %c19, %c0_17] : memref<1x362x3xf32, #tpu.memory_space<vmem>>, vector<1x324x3xf32>
    %20 = vector.shape_cast %19 : vector<1x324x3xf32> to vector<324x3xf32>
    %c12 = arith.constant 12 : index
    %c0_18 = arith.constant 0 : index
    %21 = vector.load %arg2[%c12, %c0_18] : memref<27x32xf32, #tpu.memory_space<vmem>>, vector<3x32xf32>
    %cst_19 = arith.constant dense<0.000000e+00> : vector<324x32xf32>
    %22 = tpu.matmul %20, %21, %cst_19 {dimension_numbers = #tpu.dot_dimension_numbers<[1], [0], [0], [1], [0, 0, 1, 1], [], []>} : vector<324x3xf32>, vector<3x32xf32>, vector<324x32xf32> -> vector<324x32xf32>
    %23 = arith.addf %18, %22 : vector<324x32xf32>
    %c0_20 = arith.constant 0 : index
    %c20 = arith.constant 20 : index
    %c0_21 = arith.constant 0 : index
    %24 = vector.load %arg1[%c0_20, %c20, %c0_21] : memref<1x362x3xf32, #tpu.memory_space<vmem>>, vector<1x324x3xf32>
    %25 = vector.shape_cast %24 : vector<1x324x3xf32> to vector<324x3xf32>
    %c15 = arith.constant 15 : index
    %c0_22 = arith.constant 0 : index
    %26 = vector.load %arg2[%c15, %c0_22] : memref<27x32xf32, #tpu.memory_space<vmem>>, vector<3x32xf32>
    %cst_23 = arith.constant dense<0.000000e+00> : vector<324x32xf32>
    %27 = tpu.matmul %25, %26, %cst_23 {dimension_numbers = #tpu.dot_dimension_numbers<[1], [0], [0], [1], [0, 0, 1, 1], [], []>} : vector<324x3xf32>, vector<3x32xf32>, vector<324x32xf32> -> vector<324x32xf32>
    %28 = arith.addf %23, %27 : vector<324x32xf32>
    %c0_24 = arith.constant 0 : index
    %c36 = arith.constant 36 : index
    %c0_25 = arith.constant 0 : index
    %29 = vector.load %arg1[%c0_24, %c36, %c0_25] : memref<1x362x3xf32, #tpu.memory_space<vmem>>, vector<1x324x3xf32>
    %30 = vector.shape_cast %29 : vector<1x324x3xf32> to vector<324x3xf32>
    %c18_26 = arith.constant 18 : index
    %c0_27 = arith.constant 0 : index
    %31 = vector.load %arg2[%c18_26, %c0_27] : memref<27x32xf32, #tpu.memory_space<vmem>>, vector<3x32xf32>
    %cst_28 = arith.constant dense<0.000000e+00> : vector<324x32xf32>
    %32 = tpu.matmul %30, %31, %cst_28 {dimension_numbers = #tpu.dot_dimension_numbers<[1], [0], [0], [1], [0, 0, 1, 1], [], []>} : vector<324x3xf32>, vector<3x32xf32>, vector<324x32xf32> -> vector<324x32xf32>
    %33 = arith.addf %28, %32 : vector<324x32xf32>
    %c0_29 = arith.constant 0 : index
    %c37 = arith.constant 37 : index
    %c0_30 = arith.constant 0 : index
    %34 = vector.load %arg1[%c0_29, %c37, %c0_30] : memref<1x362x3xf32, #tpu.memory_space<vmem>>, vector<1x324x3xf32>
    %35 = vector.shape_cast %34 : vector<1x324x3xf32> to vector<324x3xf32>
    %c21 = arith.constant 21 : index
    %c0_31 = arith.constant 0 : index
    %36 = vector.load %arg2[%c21, %c0_31] : memref<27x32xf32, #tpu.memory_space<vmem>>, vector<3x32xf32>
    %cst_32 = arith.constant dense<0.000000e+00> : vector<324x32xf32>
    %37 = tpu.matmul %35, %36, %cst_32 {dimension_numbers = #tpu.dot_dimension_numbers<[1], [0], [0], [1], [0, 0, 1, 1], [], []>} : vector<324x3xf32>, vector<3x32xf32>, vector<324x32xf32> -> vector<324x32xf32>
    %38 = arith.addf %33, %37 : vector<324x32xf32>
    %c0_33 = arith.constant 0 : index
    %c38 = arith.constant 38 : index
    %c0_34 = arith.constant 0 : index
    %39 = vector.load %arg1[%c0_33, %c38, %c0_34] : memref<1x362x3xf32, #tpu.memory_space<vmem>>, vector<1x324x3xf32>
    %40 = vector.shape_cast %39 : vector<1x324x3xf32> to vector<324x3xf32>
    %c24 = arith.constant 24 : index
    %c0_35 = arith.constant 0 : index
    %41 = vector.load %arg2[%c24, %c0_35] : memref<27x32xf32, #tpu.memory_space<vmem>>, vector<3x32xf32>
    %cst_36 = arith.constant dense<0.000000e+00> : vector<324x32xf32>
    %42 = tpu.matmul %40, %41, %cst_36 {dimension_numbers = #tpu.dot_dimension_numbers<[1], [0], [0], [1], [0, 0, 1, 1], [], []>} : vector<324x3xf32>, vector<3x32xf32>, vector<324x32xf32> -> vector<324x32xf32>
    %43 = arith.addf %38, %42 : vector<324x32xf32>
    %c0_37 = arith.constant 0 : index
    %c0_38 = arith.constant 0 : index
    %44 = vector.load %arg3[%c0_37, %c0_38] : memref<1x32xf32, #tpu.memory_space<vmem>>, vector<1x32xf32>
    %45 = vector.broadcast %44 : vector<1x32xf32> to vector<324x32xf32>
    %46 = arith.addf %43, %45 : vector<324x32xf32>
    %cst_39 = arith.constant 0.000000e+00 : f32
    %47 = vector.broadcast %cst_39 : f32 to vector<324x32xf32>
    %48 = arith.maximumf %46, %47 : vector<324x32xf32>
    %c0_40 = arith.constant 0 : index
    %c0_41 = arith.constant 0 : index
    %49 = vector.load %arg21[%c0_40, %c0_41] : memref<324x32xf32, #tpu.memory_space<vmem>>, vector<324x32xf32>
    tpu.vector_store %arg21[%c0_40, %c0_41], %48 {strides = array<i32>} : memref<324x32xf32, #tpu.memory_space<vmem>>, vector<324x32xf32>,
    %c0_42 = arith.constant 0 : index
    %c0_43 = arith.constant 0 : index
    %50 = vector.load %arg21[%c0_42, %c0_43] : memref<324x32xf32, #tpu.memory_space<vmem>>, vector<305x32xf32>
    %c1_44 = arith.constant 1 : index
    %c0_45 = arith.constant 0 : index
    %51 = vector.load %arg21[%c1_44, %c0_45] : memref<324x32xf32, #tpu.memory_space<vmem>>, vector<305x32xf32>
    %52 = arith.maximumf %50, %51 : vector<305x32xf32>
    %c18_46 = arith.constant 18 : index
    %c0_47 = arith.constant 0 : index
    %53 = vector.load %arg21[%c18_46, %c0_47] : memref<324x32xf32, #tpu.memory_space<vmem>>, vector<305x32xf32>
    %c19_48 = arith.constant 19 : index
    %c0_49 = arith.constant 0 : index
    %54 = vector.load %arg21[%c19_48, %c0_49] : memref<324x32xf32, #tpu.memory_space<vmem>>, vector<305x32xf32>
    %55 = arith.maximumf %53, %54 : vector<305x32xf32>
    %56 = arith.maximumf %52, %55 : vector<305x32xf32>
    %c0_50 = arith.constant 0 : index
    %c0_51 = arith.constant 0 : index
    %57 = vector.load %arg4[%c0_50, %c0_51] : memref<122x305xf32, #tpu.memory_space<vmem>>, vector<122x305xf32>
    %cst_52 = arith.constant dense<0.000000e+00> : vector<122x32xf32>
    %58 = tpu.matmul %57, %56, %cst_52 {dimension_numbers = #tpu.dot_dimension_numbers<[1], [0], [0], [1], [0, 0, 1, 1], [], []>} : vector<122x305xf32>, vector<305x32xf32>, vector<122x32xf32> -> vector<122x32xf32>
    %c0_53 = arith.constant 0 : index
    %c0_54 = arith.constant 0 : index
    %59 = vector.load %arg25[%c0_53, %c0_54] : memref<122x32xf32, #tpu.memory_space<vmem>>, vector<122x32xf32>
    tpu.vector_store %arg25[%c0_53, %c0_54], %58 {strides = array<i32>} : memref<122x32xf32, #tpu.memory_space<vmem>>, vector<122x32xf32>,
    %c0_55 = arith.constant 0 : index
    %c0_56 = arith.constant 0 : index
    %60 = vector.load %arg25[%c0_55, %c0_56] : memref<122x32xf32, #tpu.memory_space<vmem>>, vector<100x32xf32>
    %c0_57 = arith.constant 0 : index
    %c0_58 = arith.constant 0 : index
    %61 = vector.load %arg5[%c0_57, %c0_58] : memref<288x64xf32, #tpu.memory_space<vmem>>, vector<32x64xf32>
    %cst_59 = arith.constant dense<0.000000e+00> : vector<100x64xf32>
    %62 = tpu.matmul %60, %61, %cst_59 {dimension_numbers = #tpu.dot_dimension_numbers<[1], [0], [0], [1], [0, 0, 1, 1], [], []>} : vector<100x32xf32>, vector<32x64xf32>, vector<100x64xf32> -> vector<100x64xf32>
    %c1_60 = arith.constant 1 : index
    %c0_61 = arith.constant 0 : index
    %63 = vector.load %arg25[%c1_60, %c0_61] : memref<122x32xf32, #tpu.memory_space<vmem>>, vector<100x32xf32>
    %c32 = arith.constant 32 : index
    %c0_62 = arith.constant 0 : index
    %64 = vector.load %arg5[%c32, %c0_62] : memref<288x64xf32, #tpu.memory_space<vmem>>, vector<32x64xf32>
    %cst_63 = arith.constant dense<0.000000e+00> : vector<100x64xf32>
    %65 = tpu.matmul %63, %64, %cst_63 {dimension_numbers = #tpu.dot_dimension_numbers<[1], [0], [0], [1], [0, 0, 1, 1], [], []>} : vector<100x32xf32>, vector<32x64xf32>, vector<100x64xf32> -> vector<100x64xf32>
    %66 = arith.addf %62, %65 : vector<100x64xf32>
    %c2_64 = arith.constant 2 : index
    %c0_65 = arith.constant 0 : index
    %67 = vector.load %arg25[%c2_64, %c0_65] : memref<122x32xf32, #tpu.memory_space<vmem>>, vector<100x32xf32>
    %c64 = arith.constant 64 : index
    %c0_66 = arith.constant 0 : index
    %68 = vector.load %arg5[%c64, %c0_66] : memref<288x64xf32, #tpu.memory_space<vmem>>, vector<32x64xf32>
    %cst_67 = arith.constant dense<0.000000e+00> : vector<100x64xf32>
    %69 = tpu.matmul %67, %68, %cst_67 {dimension_numbers = #tpu.dot_dimension_numbers<[1], [0], [0], [1], [0, 0, 1, 1], [], []>} : vector<100x32xf32>, vector<32x64xf32>, vector<100x64xf32> -> vector<100x64xf32>
    %70 = arith.addf %66, %69 : vector<100x64xf32>
    %c10 = arith.constant 10 : index
    %c0_68 = arith.constant 0 : index
    %71 = vector.load %arg25[%c10, %c0_68] : memref<122x32xf32, #tpu.memory_space<vmem>>, vector<100x32xf32>
    %c96 = arith.constant 96 : index
    %c0_69 = arith.constant 0 : index
    %72 = vector.load %arg5[%c96, %c0_69] : memref<288x64xf32, #tpu.memory_space<vmem>>, vector<32x64xf32>
    %cst_70 = arith.constant dense<0.000000e+00> : vector<100x64xf32>
    %73 = tpu.matmul %71, %72, %cst_70 {dimension_numbers = #tpu.dot_dimension_numbers<[1], [0], [0], [1], [0, 0, 1, 1], [], []>} : vector<100x32xf32>, vector<32x64xf32>, vector<100x64xf32> -> vector<100x64xf32>
    %74 = arith.addf %70, %73 : vector<100x64xf32>
    %c11 = arith.constant 11 : index
    %c0_71 = arith.constant 0 : index
    %75 = vector.load %arg25[%c11, %c0_71] : memref<122x32xf32, #tpu.memory_space<vmem>>, vector<100x32xf32>
    %c128 = arith.constant 128 : index
    %c0_72 = arith.constant 0 : index
    %76 = vector.load %arg5[%c128, %c0_72] : memref<288x64xf32, #tpu.memory_space<vmem>>, vector<32x64xf32>
    %cst_73 = arith.constant dense<0.000000e+00> : vector<100x64xf32>
    %77 = tpu.matmul %75, %76, %cst_73 {dimension_numbers = #tpu.dot_dimension_numbers<[1], [0], [0], [1], [0, 0, 1, 1], [], []>} : vector<100x32xf32>, vector<32x64xf32>, vector<100x64xf32> -> vector<100x64xf32>
    %78 = arith.addf %74, %77 : vector<100x64xf32>
    %c12_74 = arith.constant 12 : index
    %c0_75 = arith.constant 0 : index
    %79 = vector.load %arg25[%c12_74, %c0_75] : memref<122x32xf32, #tpu.memory_space<vmem>>, vector<100x32xf32>
    %c160 = arith.constant 160 : index
    %c0_76 = arith.constant 0 : index
    %80 = vector.load %arg5[%c160, %c0_76] : memref<288x64xf32, #tpu.memory_space<vmem>>, vector<32x64xf32>
    %cst_77 = arith.constant dense<0.000000e+00> : vector<100x64xf32>
    %81 = tpu.matmul %79, %80, %cst_77 {dimension_numbers = #tpu.dot_dimension_numbers<[1], [0], [0], [1], [0, 0, 1, 1], [], []>} : vector<100x32xf32>, vector<32x64xf32>, vector<100x64xf32> -> vector<100x64xf32>
    %82 = arith.addf %78, %81 : vector<100x64xf32>
    %c20_78 = arith.constant 20 : index
    %c0_79 = arith.constant 0 : index
    %83 = vector.load %arg25[%c20_78, %c0_79] : memref<122x32xf32, #tpu.memory_space<vmem>>, vector<100x32xf32>
    %c192 = arith.constant 192 : index
    %c0_80 = arith.constant 0 : index
    %84 = vector.load %arg5[%c192, %c0_80] : memref<288x64xf32, #tpu.memory_space<vmem>>, vector<32x64xf32>
    %cst_81 = arith.constant dense<0.000000e+00> : vector<100x64xf32>
    %85 = tpu.matmul %83, %84, %cst_81 {dimension_numbers = #tpu.dot_dimension_numbers<[1], [0], [0], [1], [0, 0, 1, 1], [], []>} : vector<100x32xf32>, vector<32x64xf32>, vector<100x64xf32> -> vector<100x64xf32>
    %86 = arith.addf %82, %85 : vector<100x64xf32>
    %c21_82 = arith.constant 21 : index
    %c0_83 = arith.constant 0 : index
    %87 = vector.load %arg25[%c21_82, %c0_83] : memref<122x32xf32, #tpu.memory_space<vmem>>, vector<100x32xf32>
    %c224 = arith.constant 224 : index
    %c0_84 = arith.constant 0 : index
    %88 = vector.load %arg5[%c224, %c0_84] : memref<288x64xf32, #tpu.memory_space<vmem>>, vector<32x64xf32>
    %cst_85 = arith.constant dense<0.000000e+00> : vector<100x64xf32>
    %89 = tpu.matmul %87, %88, %cst_85 {dimension_numbers = #tpu.dot_dimension_numbers<[1], [0], [0], [1], [0, 0, 1, 1], [], []>} : vector<100x32xf32>, vector<32x64xf32>, vector<100x64xf32> -> vector<100x64xf32>
    %90 = arith.addf %86, %89 : vector<100x64xf32>
    %c22 = arith.constant 22 : index
    %c0_86 = arith.constant 0 : index
    %91 = vector.load %arg25[%c22, %c0_86] : memref<122x32xf32, #tpu.memory_space<vmem>>, vector<100x32xf32>
    %c256 = arith.constant 256 : index
    %c0_87 = arith.constant 0 : index
    %92 = vector.load %arg5[%c256, %c0_87] : memref<288x64xf32, #tpu.memory_space<vmem>>, vector<32x64xf32>
    %cst_88 = arith.constant dense<0.000000e+00> : vector<100x64xf32>
    %93 = tpu.matmul %91, %92, %cst_88 {dimension_numbers = #tpu.dot_dimension_numbers<[1], [0], [0], [1], [0, 0, 1, 1], [], []>} : vector<100x32xf32>, vector<32x64xf32>, vector<100x64xf32> -> vector<100x64xf32>
    %94 = arith.addf %90, %93 : vector<100x64xf32>
    %c0_89 = arith.constant 0 : index
    %c0_90 = arith.constant 0 : index
    %95 = vector.load %arg6[%c0_89, %c0_90] : memref<1x64xf32, #tpu.memory_space<vmem>>, vector<1x64xf32>
    %96 = vector.broadcast %95 : vector<1x64xf32> to vector<100x64xf32>
    %97 = arith.addf %94, %96 : vector<100x64xf32>
    %cst_91 = arith.constant 0.000000e+00 : f32
    %98 = vector.broadcast %cst_91 : f32 to vector<100x64xf32>
    %99 = arith.maximumf %97, %98 : vector<100x64xf32>
    %c0_92 = arith.constant 0 : index
    %c0_93 = arith.constant 0 : index
    %100 = vector.load %arg22[%c0_92, %c0_93] : memref<100x64xf32, #tpu.memory_space<vmem>>, vector<100x64xf32>
    tpu.vector_store %arg22[%c0_92, %c0_93], %99 {strides = array<i32>} : memref<100x64xf32, #tpu.memory_space<vmem>>, vector<100x64xf32>,
    %c0_94 = arith.constant 0 : index
    %c0_95 = arith.constant 0 : index
    %101 = vector.load %arg22[%c0_94, %c0_95] : memref<100x64xf32, #tpu.memory_space<vmem>>, vector<89x64xf32>
    %c1_96 = arith.constant 1 : index
    %c0_97 = arith.constant 0 : index
    %102 = vector.load %arg22[%c1_96, %c0_97] : memref<100x64xf32, #tpu.memory_space<vmem>>, vector<89x64xf32>
    %103 = arith.maximumf %101, %102 : vector<89x64xf32>
    %c10_98 = arith.constant 10 : index
    %c0_99 = arith.constant 0 : index
    %104 = vector.load %arg22[%c10_98, %c0_99] : memref<100x64xf32, #tpu.memory_space<vmem>>, vector<89x64xf32>
    %c11_100 = arith.constant 11 : index
    %c0_101 = arith.constant 0 : index
    %105 = vector.load %arg22[%c11_100, %c0_101] : memref<100x64xf32, #tpu.memory_space<vmem>>, vector<89x64xf32>
    %106 = arith.maximumf %104, %105 : vector<89x64xf32>
    %107 = arith.maximumf %103, %106 : vector<89x64xf32>
    %c0_102 = arith.constant 0 : index
    %c0_103 = arith.constant 0 : index
    %108 = vector.load %arg7[%c0_102, %c0_103] : memref<50x89xf32, #tpu.memory_space<vmem>>, vector<50x89xf32>
    %cst_104 = arith.constant dense<0.000000e+00> : vector<50x64xf32>
    %109 = tpu.matmul %108, %107, %cst_104 {dimension_numbers = #tpu.dot_dimension_numbers<[1], [0], [0], [1], [0, 0, 1, 1], [], []>} : vector<50x89xf32>, vector<89x64xf32>, vector<50x64xf32> -> vector<50x64xf32>
    %c0_105 = arith.constant 0 : index
    %c0_106 = arith.constant 0 : index
    %110 = vector.load %arg26[%c0_105, %c0_106] : memref<50x64xf32, #tpu.memory_space<vmem>>, vector<50x64xf32>
    tpu.vector_store %arg26[%c0_105, %c0_106], %109 {strides = array<i32>} : memref<50x64xf32, #tpu.memory_space<vmem>>, vector<50x64xf32>,
    %c0_107 = arith.constant 0 : index
    %c0_108 = arith.constant 0 : index
    %111 = vector.load %arg26[%c0_107, %c0_108] : memref<50x64xf32, #tpu.memory_space<vmem>>, vector<36x64xf32>
    %c0_109 = arith.constant 0 : index
    %c0_110 = arith.constant 0 : index
    %112 = vector.load %arg8[%c0_109, %c0_110] : memref<576x128xf32, #tpu.memory_space<vmem>>, vector<64x128xf32>
    %cst_111 = arith.constant dense<0.000000e+00> : vector<36x128xf32>
    %113 = tpu.matmul %111, %112, %cst_111 {dimension_numbers = #tpu.dot_dimension_numbers<[1], [0], [0], [1], [0, 0, 1, 1], [], []>} : vector<36x64xf32>, vector<64x128xf32>, vector<36x128xf32> -> vector<36x128xf32>
    %c1_112 = arith.constant 1 : index
    %c0_113 = arith.constant 0 : index
    %114 = vector.load %arg26[%c1_112, %c0_113] : memref<50x64xf32, #tpu.memory_space<vmem>>, vector<36x64xf32>
    %c64_114 = arith.constant 64 : index
    %c0_115 = arith.constant 0 : index
    %115 = vector.load %arg8[%c64_114, %c0_115] : memref<576x128xf32, #tpu.memory_space<vmem>>, vector<64x128xf32>
    %cst_116 = arith.constant dense<0.000000e+00> : vector<36x128xf32>
    %116 = tpu.matmul %114, %115, %cst_116 {dimension_numbers = #tpu.dot_dimension_numbers<[1], [0], [0], [1], [0, 0, 1, 1], [], []>} : vector<36x64xf32>, vector<64x128xf32>, vector<36x128xf32> -> vector<36x128xf32>
    %117 = arith.addf %113, %116 : vector<36x128xf32>
    %c2_117 = arith.constant 2 : index
    %c0_118 = arith.constant 0 : index
    %118 = vector.load %arg26[%c2_117, %c0_118] : memref<50x64xf32, #tpu.memory_space<vmem>>, vector<36x64xf32>
    %c128_119 = arith.constant 128 : index
    %c0_120 = arith.constant 0 : index
    %119 = vector.load %arg8[%c128_119, %c0_120] : memref<576x128xf32, #tpu.memory_space<vmem>>, vector<64x128xf32>
    %cst_121 = arith.constant dense<0.000000e+00> : vector<36x128xf32>
    %120 = tpu.matmul %118, %119, %cst_121 {dimension_numbers = #tpu.dot_dimension_numbers<[1], [0], [0], [1], [0, 0, 1, 1], [], []>} : vector<36x64xf32>, vector<64x128xf32>, vector<36x128xf32> -> vector<36x128xf32>
    %121 = arith.addf %117, %120 : vector<36x128xf32>
    %c6_122 = arith.constant 6 : index
    %c0_123 = arith.constant 0 : index
    %122 = vector.load %arg26[%c6_122, %c0_123] : memref<50x64xf32, #tpu.memory_space<vmem>>, vector<36x64xf32>
    %c192_124 = arith.constant 192 : index
    %c0_125 = arith.constant 0 : index
    %123 = vector.load %arg8[%c192_124, %c0_125] : memref<576x128xf32, #tpu.memory_space<vmem>>, vector<64x128xf32>
    %cst_126 = arith.constant dense<0.000000e+00> : vector<36x128xf32>
    %124 = tpu.matmul %122, %123, %cst_126 {dimension_numbers = #tpu.dot_dimension_numbers<[1], [0], [0], [1], [0, 0, 1, 1], [], []>} : vector<36x64xf32>, vector<64x128xf32>, vector<36x128xf32> -> vector<36x128xf32>
    %125 = arith.addf %121, %124 : vector<36x128xf32>
    %c7 = arith.constant 7 : index
    %c0_127 = arith.constant 0 : index
    %126 = vector.load %arg26[%c7, %c0_127] : memref<50x64xf32, #tpu.memory_space<vmem>>, vector<36x64xf32>
    %c256_128 = arith.constant 256 : index
    %c0_129 = arith.constant 0 : index
    %127 = vector.load %arg8[%c256_128, %c0_129] : memref<576x128xf32, #tpu.memory_space<vmem>>, vector<64x128xf32>
    %cst_130 = arith.constant dense<0.000000e+00> : vector<36x128xf32>
    %128 = tpu.matmul %126, %127, %cst_130 {dimension_numbers = #tpu.dot_dimension_numbers<[1], [0], [0], [1], [0, 0, 1, 1], [], []>} : vector<36x64xf32>, vector<64x128xf32>, vector<36x128xf32> -> vector<36x128xf32>
    %129 = arith.addf %125, %128 : vector<36x128xf32>
    %c8 = arith.constant 8 : index
    %c0_131 = arith.constant 0 : index
    %130 = vector.load %arg26[%c8, %c0_131] : memref<50x64xf32, #tpu.memory_space<vmem>>, vector<36x64xf32>
    %c320 = arith.constant 320 : index
    %c0_132 = arith.constant 0 : index
    %131 = vector.load %arg8[%c320, %c0_132] : memref<576x128xf32, #tpu.memory_space<vmem>>, vector<64x128xf32>
    %cst_133 = arith.constant dense<0.000000e+00> : vector<36x128xf32>
    %132 = tpu.matmul %130, %131, %cst_133 {dimension_numbers = #tpu.dot_dimension_numbers<[1], [0], [0], [1], [0, 0, 1, 1], [], []>} : vector<36x64xf32>, vector<64x128xf32>, vector<36x128xf32> -> vector<36x128xf32>
    %133 = arith.addf %129, %132 : vector<36x128xf32>
    %c12_134 = arith.constant 12 : index
    %c0_135 = arith.constant 0 : index
    %134 = vector.load %arg26[%c12_134, %c0_135] : memref<50x64xf32, #tpu.memory_space<vmem>>, vector<36x64xf32>
    %c384 = arith.constant 384 : index
    %c0_136 = arith.constant 0 : index
    %135 = vector.load %arg8[%c384, %c0_136] : memref<576x128xf32, #tpu.memory_space<vmem>>, vector<64x128xf32>
    %cst_137 = arith.constant dense<0.000000e+00> : vector<36x128xf32>
    %136 = tpu.matmul %134, %135, %cst_137 {dimension_numbers = #tpu.dot_dimension_numbers<[1], [0], [0], [1], [0, 0, 1, 1], [], []>} : vector<36x64xf32>, vector<64x128xf32>, vector<36x128xf32> -> vector<36x128xf32>
    %137 = arith.addf %133, %136 : vector<36x128xf32>
    %c13 = arith.constant 13 : index
    %c0_138 = arith.constant 0 : index
    %138 = vector.load %arg26[%c13, %c0_138] : memref<50x64xf32, #tpu.memory_space<vmem>>, vector<36x64xf32>
    %c448 = arith.constant 448 : index
    %c0_139 = arith.constant 0 : index
    %139 = vector.load %arg8[%c448, %c0_139] : memref<576x128xf32, #tpu.memory_space<vmem>>, vector<64x128xf32>
    %cst_140 = arith.constant dense<0.000000e+00> : vector<36x128xf32>
    %140 = tpu.matmul %138, %139, %cst_140 {dimension_numbers = #tpu.dot_dimension_numbers<[1], [0], [0], [1], [0, 0, 1, 1], [], []>} : vector<36x64xf32>, vector<64x128xf32>, vector<36x128xf32> -> vector<36x128xf32>
    %141 = arith.addf %137, %140 : vector<36x128xf32>
    %c14 = arith.constant 14 : index
    %c0_141 = arith.constant 0 : index
    %142 = vector.load %arg26[%c14, %c0_141] : memref<50x64xf32, #tpu.memory_space<vmem>>, vector<36x64xf32>
    %c512 = arith.constant 512 : index
    %c0_142 = arith.constant 0 : index
    %143 = vector.load %arg8[%c512, %c0_142] : memref<576x128xf32, #tpu.memory_space<vmem>>, vector<64x128xf32>
    %cst_143 = arith.constant dense<0.000000e+00> : vector<36x128xf32>
    %144 = tpu.matmul %142, %143, %cst_143 {dimension_numbers = #tpu.dot_dimension_numbers<[1], [0], [0], [1], [0, 0, 1, 1], [], []>} : vector<36x64xf32>, vector<64x128xf32>, vector<36x128xf32> -> vector<36x128xf32>
    %145 = arith.addf %141, %144 : vector<36x128xf32>
    %c0_144 = arith.constant 0 : index
    %c0_145 = arith.constant 0 : index
    %146 = vector.load %arg9[%c0_144, %c0_145] : memref<1x128xf32, #tpu.memory_space<vmem>>, vector<1x128xf32>
    %147 = vector.broadcast %146 : vector<1x128xf32> to vector<36x128xf32>
    %148 = arith.addf %145, %147 : vector<36x128xf32>
    %cst_146 = arith.constant 0.000000e+00 : f32
    %149 = vector.broadcast %cst_146 : f32 to vector<36x128xf32>
    %150 = arith.maximumf %148, %149 : vector<36x128xf32>
    %c0_147 = arith.constant 0 : index
    %c0_148 = arith.constant 0 : index
    %151 = vector.load %arg23[%c0_147, %c0_148] : memref<36x128xf32, #tpu.memory_space<vmem>>, vector<36x128xf32>
    tpu.vector_store %arg23[%c0_147, %c0_148], %150 {strides = array<i32>} : memref<36x128xf32, #tpu.memory_space<vmem>>, vector<36x128xf32>,
    %c0_149 = arith.constant 0 : index
    %c0_150 = arith.constant 0 : index
    %152 = vector.load %arg23[%c0_149, %c0_150] : memref<36x128xf32, #tpu.memory_space<vmem>>, vector<29x128xf32>
    %c1_151 = arith.constant 1 : index
    %c0_152 = arith.constant 0 : index
    %153 = vector.load %arg23[%c1_151, %c0_152] : memref<36x128xf32, #tpu.memory_space<vmem>>, vector<29x128xf32>
    %154 = arith.maximumf %152, %153 : vector<29x128xf32>
    %c6_153 = arith.constant 6 : index
    %c0_154 = arith.constant 0 : index
    %155 = vector.load %arg23[%c6_153, %c0_154] : memref<36x128xf32, #tpu.memory_space<vmem>>, vector<29x128xf32>
    %c7_155 = arith.constant 7 : index
    %c0_156 = arith.constant 0 : index
    %156 = vector.load %arg23[%c7_155, %c0_156] : memref<36x128xf32, #tpu.memory_space<vmem>>, vector<29x128xf32>
    %157 = arith.maximumf %155, %156 : vector<29x128xf32>
    %158 = arith.maximumf %154, %157 : vector<29x128xf32>
    %c0_157 = arith.constant 0 : index
    %c0_158 = arith.constant 0 : index
    %159 = vector.load %arg10[%c0_157, %c0_158] : memref<26x29xf32, #tpu.memory_space<vmem>>, vector<26x29xf32>
    %cst_159 = arith.constant dense<0.000000e+00> : vector<26x128xf32>
    %160 = tpu.matmul %159, %158, %cst_159 {dimension_numbers = #tpu.dot_dimension_numbers<[1], [0], [0], [1], [0, 0, 1, 1], [], []>} : vector<26x29xf32>, vector<29x128xf32>, vector<26x128xf32> -> vector<26x128xf32>
    %c0_160 = arith.constant 0 : index
    %c0_161 = arith.constant 0 : index
    %161 = vector.load %arg27[%c0_160, %c0_161] : memref<26x128xf32, #tpu.memory_space<vmem>>, vector<26x128xf32>
    tpu.vector_store %arg27[%c0_160, %c0_161], %160 {strides = array<i32>} : memref<26x128xf32, #tpu.memory_space<vmem>>, vector<26x128xf32>,
    %c0_162 = arith.constant 0 : index
    %c0_163 = arith.constant 0 : index
    %162 = vector.load %arg27[%c0_162, %c0_163] : memref<26x128xf32, #tpu.memory_space<vmem>>, vector<16x128xf32>
    %c0_164 = arith.constant 0 : index
    %c0_165 = arith.constant 0 : index
    %163 = vector.load %arg11[%c0_164, %c0_165] : memref<1152x256xf32, #tpu.memory_space<vmem>>, vector<128x256xf32>
    %cst_166 = arith.constant dense<0.000000e+00> : vector<16x256xf32>
    %164 = tpu.matmul %162, %163, %cst_166 {dimension_numbers = #tpu.dot_dimension_numbers<[1], [0], [0], [1], [0, 0, 1, 1], [], []>} : vector<16x128xf32>, vector<128x256xf32>, vector<16x256xf32> -> vector<16x256xf32>
    %c1_167 = arith.constant 1 : index
    %c0_168 = arith.constant 0 : index
    %165 = vector.load %arg27[%c1_167, %c0_168] : memref<26x128xf32, #tpu.memory_space<vmem>>, vector<16x128xf32>
    %c128_169 = arith.constant 128 : index
    %c0_170 = arith.constant 0 : index
    %166 = vector.load %arg11[%c128_169, %c0_170] : memref<1152x256xf32, #tpu.memory_space<vmem>>, vector<128x256xf32>
    %cst_171 = arith.constant dense<0.000000e+00> : vector<16x256xf32>
    %167 = tpu.matmul %165, %166, %cst_171 {dimension_numbers = #tpu.dot_dimension_numbers<[1], [0], [0], [1], [0, 0, 1, 1], [], []>} : vector<16x128xf32>, vector<128x256xf32>, vector<16x256xf32> -> vector<16x256xf32>
    %168 = arith.addf %164, %167 : vector<16x256xf32>
    %c2_172 = arith.constant 2 : index
    %c0_173 = arith.constant 0 : index
    %169 = vector.load %arg27[%c2_172, %c0_173] : memref<26x128xf32, #tpu.memory_space<vmem>>, vector<16x128xf32>
    %c256_174 = arith.constant 256 : index
    %c0_175 = arith.constant 0 : index
    %170 = vector.load %arg11[%c256_174, %c0_175] : memref<1152x256xf32, #tpu.memory_space<vmem>>, vector<128x256xf32>
    %cst_176 = arith.constant dense<0.000000e+00> : vector<16x256xf32>
    %171 = tpu.matmul %169, %170, %cst_176 {dimension_numbers = #tpu.dot_dimension_numbers<[1], [0], [0], [1], [0, 0, 1, 1], [], []>} : vector<16x128xf32>, vector<128x256xf32>, vector<16x256xf32> -> vector<16x256xf32>
    %172 = arith.addf %168, %171 : vector<16x256xf32>
    %c4 = arith.constant 4 : index
    %c0_177 = arith.constant 0 : index
    %173 = vector.load %arg27[%c4, %c0_177] : memref<26x128xf32, #tpu.memory_space<vmem>>, vector<16x128xf32>
    %c384_178 = arith.constant 384 : index
    %c0_179 = arith.constant 0 : index
    %174 = vector.load %arg11[%c384_178, %c0_179] : memref<1152x256xf32, #tpu.memory_space<vmem>>, vector<128x256xf32>
    %cst_180 = arith.constant dense<0.000000e+00> : vector<16x256xf32>
    %175 = tpu.matmul %173, %174, %cst_180 {dimension_numbers = #tpu.dot_dimension_numbers<[1], [0], [0], [1], [0, 0, 1, 1], [], []>} : vector<16x128xf32>, vector<128x256xf32>, vector<16x256xf32> -> vector<16x256xf32>
    %176 = arith.addf %172, %175 : vector<16x256xf32>
    %c5 = arith.constant 5 : index
    %c0_181 = arith.constant 0 : index
    %177 = vector.load %arg27[%c5, %c0_181] : memref<26x128xf32, #tpu.memory_space<vmem>>, vector<16x128xf32>
    %c512_182 = arith.constant 512 : index
    %c0_183 = arith.constant 0 : index
    %178 = vector.load %arg11[%c512_182, %c0_183] : memref<1152x256xf32, #tpu.memory_space<vmem>>, vector<128x256xf32>
    %cst_184 = arith.constant dense<0.000000e+00> : vector<16x256xf32>
    %179 = tpu.matmul %177, %178, %cst_184 {dimension_numbers = #tpu.dot_dimension_numbers<[1], [0], [0], [1], [0, 0, 1, 1], [], []>} : vector<16x128xf32>, vector<128x256xf32>, vector<16x256xf32> -> vector<16x256xf32>
    %180 = arith.addf %176, %179 : vector<16x256xf32>
    %c6_185 = arith.constant 6 : index
    %c0_186 = arith.constant 0 : index
    %181 = vector.load %arg27[%c6_185, %c0_186] : memref<26x128xf32, #tpu.memory_space<vmem>>, vector<16x128xf32>
    %c640 = arith.constant 640 : index
    %c0_187 = arith.constant 0 : index
    %182 = vector.load %arg11[%c640, %c0_187] : memref<1152x256xf32, #tpu.memory_space<vmem>>, vector<128x256xf32>
    %cst_188 = arith.constant dense<0.000000e+00> : vector<16x256xf32>
    %183 = tpu.matmul %181, %182, %cst_188 {dimension_numbers = #tpu.dot_dimension_numbers<[1], [0], [0], [1], [0, 0, 1, 1], [], []>} : vector<16x128xf32>, vector<128x256xf32>, vector<16x256xf32> -> vector<16x256xf32>
    %184 = arith.addf %180, %183 : vector<16x256xf32>
    %c8_189 = arith.constant 8 : index
    %c0_190 = arith.constant 0 : index
    %185 = vector.load %arg27[%c8_189, %c0_190] : memref<26x128xf32, #tpu.memory_space<vmem>>, vector<16x128xf32>
    %c768 = arith.constant 768 : index
    %c0_191 = arith.constant 0 : index
    %186 = vector.load %arg11[%c768, %c0_191] : memref<1152x256xf32, #tpu.memory_space<vmem>>, vector<128x256xf32>
    %cst_192 = arith.constant dense<0.000000e+00> : vector<16x256xf32>
    %187 = tpu.matmul %185, %186, %cst_192 {dimension_numbers = #tpu.dot_dimension_numbers<[1], [0], [0], [1], [0, 0, 1, 1], [], []>} : vector<16x128xf32>, vector<128x256xf32>, vector<16x256xf32> -> vector<16x256xf32>
    %188 = arith.addf %184, %187 : vector<16x256xf32>
    %c9_193 = arith.constant 9 : index
    %c0_194 = arith.constant 0 : index
    %189 = vector.load %arg27[%c9_193, %c0_194] : memref<26x128xf32, #tpu.memory_space<vmem>>, vector<16x128xf32>
    %c896 = arith.constant 896 : index
    %c0_195 = arith.constant 0 : index
    %190 = vector.load %arg11[%c896, %c0_195] : memref<1152x256xf32, #tpu.memory_space<vmem>>, vector<128x256xf32>
    %cst_196 = arith.constant dense<0.000000e+00> : vector<16x256xf32>
    %191 = tpu.matmul %189, %190, %cst_196 {dimension_numbers = #tpu.dot_dimension_numbers<[1], [0], [0], [1], [0, 0, 1, 1], [], []>} : vector<16x128xf32>, vector<128x256xf32>, vector<16x256xf32> -> vector<16x256xf32>
    %192 = arith.addf %188, %191 : vector<16x256xf32>
    %c10_197 = arith.constant 10 : index
    %c0_198 = arith.constant 0 : index
    %193 = vector.load %arg27[%c10_197, %c0_198] : memref<26x128xf32, #tpu.memory_space<vmem>>, vector<16x128xf32>
    %c1024 = arith.constant 1024 : index
    %c0_199 = arith.constant 0 : index
    %194 = vector.load %arg11[%c1024, %c0_199] : memref<1152x256xf32, #tpu.memory_space<vmem>>, vector<128x256xf32>
    %cst_200 = arith.constant dense<0.000000e+00> : vector<16x256xf32>
    %195 = tpu.matmul %193, %194, %cst_200 {dimension_numbers = #tpu.dot_dimension_numbers<[1], [0], [0], [1], [0, 0, 1, 1], [], []>} : vector<16x128xf32>, vector<128x256xf32>, vector<16x256xf32> -> vector<16x256xf32>
    %196 = arith.addf %192, %195 : vector<16x256xf32>
    %c0_201 = arith.constant 0 : index
    %c0_202 = arith.constant 0 : index
    %197 = vector.load %arg12[%c0_201, %c0_202] : memref<1x256xf32, #tpu.memory_space<vmem>>, vector<1x256xf32>
    %198 = vector.broadcast %197 : vector<1x256xf32> to vector<16x256xf32>
    %199 = arith.addf %196, %198 : vector<16x256xf32>
    %cst_203 = arith.constant 0.000000e+00 : f32
    %200 = vector.broadcast %cst_203 : f32 to vector<16x256xf32>
    %201 = arith.maximumf %199, %200 : vector<16x256xf32>
    %c0_204 = arith.constant 0 : index
    %c0_205 = arith.constant 0 : index
    %202 = vector.load %arg24[%c0_204, %c0_205] : memref<16x256xf32, #tpu.memory_space<vmem>>, vector<16x256xf32>
    tpu.vector_store %arg24[%c0_204, %c0_205], %201 {strides = array<i32>} : memref<16x256xf32, #tpu.memory_space<vmem>>, vector<16x256xf32>,
    %c0_206 = arith.constant 0 : index
    %c0_207 = arith.constant 0 : index
    %203 = vector.load %arg24[%c0_206, %c0_207] : memref<16x256xf32, #tpu.memory_space<vmem>>, vector<11x256xf32>
    %c1_208 = arith.constant 1 : index
    %c0_209 = arith.constant 0 : index
    %204 = vector.load %arg24[%c1_208, %c0_209] : memref<16x256xf32, #tpu.memory_space<vmem>>, vector<11x256xf32>
    %205 = arith.maximumf %203, %204 : vector<11x256xf32>
    %c4_210 = arith.constant 4 : index
    %c0_211 = arith.constant 0 : index
    %206 = vector.load %arg24[%c4_210, %c0_211] : memref<16x256xf32, #tpu.memory_space<vmem>>, vector<11x256xf32>
    %c5_212 = arith.constant 5 : index
    %c0_213 = arith.constant 0 : index
    %207 = vector.load %arg24[%c5_212, %c0_213] : memref<16x256xf32, #tpu.memory_space<vmem>>, vector<11x256xf32>
    %208 = arith.maximumf %206, %207 : vector<11x256xf32>
    %209 = arith.maximumf %205, %208 : vector<11x256xf32>
    %c0_214 = arith.constant 0 : index
    %c0_215 = arith.constant 0 : index
    %210 = vector.load %arg13[%c0_214, %c0_215] : memref<1x11xf32, #tpu.memory_space<vmem>>, vector<1x11xf32>
    %cst_216 = arith.constant dense<0.000000e+00> : vector<1x256xf32>
    %211 = tpu.matmul %210, %209, %cst_216 {dimension_numbers = #tpu.dot_dimension_numbers<[1], [0], [0], [1], [0, 0, 1, 1], [], []>} : vector<1x11xf32>, vector<11x256xf32>, vector<1x256xf32> -> vector<1x256xf32>
    %c0_217 = arith.constant 0 : index
    %c0_218 = arith.constant 0 : index
    %212 = vector.load %arg14[%c0_217, %c0_218] : memref<256x128xf32, #tpu.memory_space<vmem>>, vector<256x128xf32>
    %cst_219 = arith.constant dense<0.000000e+00> : vector<1x128xf32>
    %213 = tpu.matmul %211, %212, %cst_219 {dimension_numbers = #tpu.dot_dimension_numbers<[1], [0], [0], [1], [0, 0, 1, 1], [], []>} : vector<1x256xf32>, vector<256x128xf32>, vector<1x128xf32> -> vector<1x128xf32>
    %c0_220 = arith.constant 0 : index
    %c0_221 = arith.constant 0 : index
    %214 = vector.load %arg15[%c0_220, %c0_221] : memref<1x128xf32, #tpu.memory_space<vmem>>, vector<1x128xf32>
    %215 = arith.addf %213, %214 : vector<1x128xf32>
    %cst_222 = arith.constant 0.000000e+00 : f32
    %216 = vector.broadcast %cst_222 : f32 to vector<1x128xf32>
    %217 = arith.maximumf %215, %216 : vector<1x128xf32>
    %c0_223 = arith.constant 0 : index
    %c0_224 = arith.constant 0 : index
    %218 = vector.load %arg16[%c0_223, %c0_224] : memref<128x64xf32, #tpu.memory_space<vmem>>, vector<128x64xf32>
    %cst_225 = arith.constant dense<0.000000e+00> : vector<1x64xf32>
    %219 = tpu.matmul %217, %218, %cst_225 {dimension_numbers = #tpu.dot_dimension_numbers<[1], [0], [0], [1], [0, 0, 1, 1], [], []>} : vector<1x128xf32>, vector<128x64xf32>, vector<1x64xf32> -> vector<1x64xf32>
    %c0_226 = arith.constant 0 : index
    %c0_227 = arith.constant 0 : index
    %220 = vector.load %arg17[%c0_226, %c0_227] : memref<1x64xf32, #tpu.memory_space<vmem>>, vector<1x64xf32>
    %221 = arith.addf %219, %220 : vector<1x64xf32>
    %cst_228 = arith.constant 0.000000e+00 : f32
    %222 = vector.broadcast %cst_228 : f32 to vector<1x64xf32>
    %223 = arith.maximumf %221, %222 : vector<1x64xf32>
    %c0_229 = arith.constant 0 : index
    %c0_230 = arith.constant 0 : index
    %224 = vector.load %arg18[%c0_229, %c0_230] : memref<64x1xf32, #tpu.memory_space<vmem>>, vector<64x1xf32>
    %cst_231 = arith.constant dense<0.000000e+00> : vector<1x1xf32>
    %225 = tpu.matmul %223, %224, %cst_231 {dimension_numbers = #tpu.dot_dimension_numbers<[1], [0], [0], [1], [0, 0, 1, 1], [], []>} : vector<1x64xf32>, vector<64x1xf32>, vector<1x1xf32> -> vector<1x1xf32>
    %c0_232 = arith.constant 0 : index
    %c0_233 = arith.constant 0 : index
    %226 = vector.load %arg19[%c0_232, %c0_233] : memref<1x1xf32, #tpu.memory_space<vmem>>, vector<1x1xf32>
    %227 = arith.addf %225, %226 : vector<1x1xf32>
    %228 = math.absf %227 : vector<1x1xf32>
    %cst_234 = arith.constant 0.000000e+00 : f32
    %229 = vector.broadcast %cst_234 : f32 to vector<1x1xf32>
    %230 = arith.subf %229, %228 : vector<1x1xf32>
    %231 = math.exp %230 : vector<1x1xf32>
    %cst_235 = arith.constant 1.000000e+00 : f32
    %232 = vector.broadcast %cst_235 : f32 to vector<1x1xf32>
    %233 = arith.addf %232, %231 : vector<1x1xf32>
    %cst_236 = arith.constant 1.000000e+00 : f32
    %234 = vector.broadcast %cst_236 : f32 to vector<1x1xf32>
    %235 = arith.divf %234, %233 : vector<1x1xf32>
    %cst_237 = arith.constant 0.000000e+00 : f32
    %236 = vector.broadcast %cst_237 : f32 to vector<1x1xf32>
    %237 = arith.cmpf oge, %227, %236 : vector<1x1xf32>
    %cst_238 = arith.constant 1.000000e+00 : f32
    %238 = vector.broadcast %cst_238 : f32 to vector<1x1xf32>
    %239 = arith.subf %238, %235 : vector<1x1xf32>
    %240 = arith.select %237, %235, %239 : vector<1x1xi1>, vector<1x1xf32>
    %c0_239 = arith.constant 0 : index
    %c0_240 = arith.constant 0 : index
    %c0_241 = arith.constant 0 : index
    %241 = vector.load %arg20[%c0_239, %c0_240, %c0_241] : memref<1x1x1xf32, #tpu.memory_space<vmem>>, vector<1x1x1xf32>
    %242 = vector.shape_cast %241 : vector<1x1x1xf32> to vector<1x1xf32>
    %243 = vector.shape_cast %240 : vector<1x1xf32> to vector<1x1x1xf32>
    tpu.vector_store %arg20[%c0_239, %c0_240, %c0_241], %243 {strides = array<i32>} : memref<1x1x1xf32, #tpu.memory_space<vmem>>, vector<1x1x1xf32>,
    return
  }
  func.func @transform_0(%arg0: i32) -> (i32, i32, i32) {
    %c0_i32 = arith.constant 0 : i32
    %c0_i32_0 = arith.constant 0 : i32
    %c0_i32_1 = arith.constant 0 : i32
    return %arg0, %c0_i32, %c0_i32_0 : i32, i32, i32
  }
  func.func @transform_1(%arg0: i32) -> (i32, i32) {
    %c0_i32 = arith.constant 0 : i32
    %c0_i32_0 = arith.constant 0 : i32
    %c0_i32_1 = arith.constant 0 : i32
    return %c0_i32, %c0_i32_0 : i32, i32
  }
  func.func @transform_2(%arg0: i32) -> (i32, i32) {
    %c0_i32 = arith.constant 0 : i32
    %c0_i32_0 = arith.constant 0 : i32
    %c0_i32_1 = arith.constant 0 : i32
    return %c0_i32, %c0_i32_0 : i32, i32
  }
  func.func @transform_3(%arg0: i32) -> (i32, i32) {
    %c0_i32 = arith.constant 0 : i32
    %c0_i32_0 = arith.constant 0 : i32
    %c0_i32_1 = arith.constant 0 : i32
    return %c0_i32, %c0_i32_0 : i32, i32
  }
  func.func @transform_4(%arg0: i32) -> (i32, i32) {
    %c0_i32 = arith.constant 0 : i32
    %c0_i32_0 = arith.constant 0 : i32
    %c0_i32_1 = arith.constant 0 : i32
    return %c0_i32, %c0_i32_0 : i32, i32
  }
  func.func @transform_5(%arg0: i32) -> (i32, i32) {
    %c0_i32 = arith.constant 0 : i32
    %c0_i32_0 = arith.constant 0 : i32
    %c0_i32_1 = arith.constant 0 : i32
    return %c0_i32, %c0_i32_0 : i32, i32
  }
  func.func @transform_6(%arg0: i32) -> (i32, i32) {
    %c0_i32 = arith.constant 0 : i32
    %c0_i32_0 = arith.constant 0 : i32
    %c0_i32_1 = arith.constant 0 : i32
    return %c0_i32, %c0_i32_0 : i32, i32
  }
  func.func @transform_7(%arg0: i32) -> (i32, i32) {
    %c0_i32 = arith.constant 0 : i32
    %c0_i32_0 = arith.constant 0 : i32
    %c0_i32_1 = arith.constant 0 : i32
    return %c0_i32, %c0_i32_0 : i32, i32
  }
  func.func @transform_8(%arg0: i32) -> (i32, i32) {
    %c0_i32 = arith.constant 0 : i32
    %c0_i32_0 = arith.constant 0 : i32
    %c0_i32_1 = arith.constant 0 : i32
    return %c0_i32, %c0_i32_0 : i32, i32
  }
  func.func @transform_9(%arg0: i32) -> (i32, i32) {
    %c0_i32 = arith.constant 0 : i32
    %c0_i32_0 = arith.constant 0 : i32
    %c0_i32_1 = arith.constant 0 : i32
    return %c0_i32, %c0_i32_0 : i32, i32
  }
  func.func @transform_10(%arg0: i32) -> (i32, i32) {
    %c0_i32 = arith.constant 0 : i32
    %c0_i32_0 = arith.constant 0 : i32
    %c0_i32_1 = arith.constant 0 : i32
    return %c0_i32, %c0_i32_0 : i32, i32
  }
  func.func @transform_11(%arg0: i32) -> (i32, i32) {
    %c0_i32 = arith.constant 0 : i32
    %c0_i32_0 = arith.constant 0 : i32
    %c0_i32_1 = arith.constant 0 : i32
    return %c0_i32, %c0_i32_0 : i32, i32
  }
  func.func @transform_12(%arg0: i32) -> (i32, i32) {
    %c0_i32 = arith.constant 0 : i32
    %c0_i32_0 = arith.constant 0 : i32
    %c0_i32_1 = arith.constant 0 : i32
    return %c0_i32, %c0_i32_0 : i32, i32
  }
  func.func @transform_13(%arg0: i32) -> (i32, i32) {
    %c0_i32 = arith.constant 0 : i32
    %c0_i32_0 = arith.constant 0 : i32
    %c0_i32_1 = arith.constant 0 : i32
    return %c0_i32, %c0_i32_0 : i32, i32
  }
  func.func @transform_14(%arg0: i32) -> (i32, i32) {
    %c0_i32 = arith.constant 0 : i32
    %c0_i32_0 = arith.constant 0 : i32
    %c0_i32_1 = arith.constant 0 : i32
    return %c0_i32, %c0_i32_0 : i32, i32
  }
  func.func @transform_15(%arg0: i32) -> (i32, i32) {
    %c0_i32 = arith.constant 0 : i32
    %c0_i32_0 = arith.constant 0 : i32
    %c0_i32_1 = arith.constant 0 : i32
    return %c0_i32, %c0_i32_0 : i32, i32
  }
  func.func @transform_16(%arg0: i32) -> (i32, i32) {
    %c0_i32 = arith.constant 0 : i32
    %c0_i32_0 = arith.constant 0 : i32
    %c0_i32_1 = arith.constant 0 : i32
    return %c0_i32, %c0_i32_0 : i32, i32
  }
  func.func @transform_17(%arg0: i32) -> (i32, i32) {
    %c0_i32 = arith.constant 0 : i32
    %c0_i32_0 = arith.constant 0 : i32
    %c0_i32_1 = arith.constant 0 : i32
    return %c0_i32, %c0_i32_0 : i32, i32
  }
  func.func @transform_18(%arg0: i32) -> (i32, i32) {
    %c0_i32 = arith.constant 0 : i32
    %c0_i32_0 = arith.constant 0 : i32
    %c0_i32_1 = arith.constant 0 : i32
    return %c0_i32, %c0_i32_0 : i32, i32
  }
  func.func @transform_19(%arg0: i32) -> (i32, i32, i32) {
    %c0_i32 = arith.constant 0 : i32
    %c0_i32_0 = arith.constant 0 : i32
    %c0_i32_1 = arith.constant 0 : i32
    return %arg0, %c0_i32, %c0_i32_0 : i32, i32, i32
  }
}

</mosaic_0001>

<bundles_post_ra>
// kernel: cnn_forward.1
= control target key start
LH: loop header
LB: loop body
LE: loop exit
PB: predicated region body
PF: predicated region fallthrough
CT: control target
= control target key end

     0   :  { %s14643_s20 = smov 0   ;;  %s20142_s0 = inlined_call_operand.vmem [shape: f32[2,362,3], index: 0, kind: input, shape index: {}]   ;;  %s20143_s1 = inlined_call_operand.vmem [shape: f32[27,32], index: 1, kind: input, shape index: {}]   ;;  %s20144_s2 = inlined_call_operand.vmem [shape: f32[1,32], index: 2, kind: input, shape index: {}]   ;;  %s20145_s3 = inlined_call_operand.vmem [shape: f32[122,305], index: 3, kind: input, shape index: {}]   ;;  %s20146_s4 = inlined_call_operand.vmem [shape: f32[288,64], index: 4, kind: input, shape index: {}]   ;;  %s20147_s5 = inlined_call_operand.vmem [shape: f32[1,64], index: 5, kind: input, shape index: {}]   ;;  %s20148_s6 = inlined_call_operand.vmem [shape: f32[50,89], index: 6, kind: input, shape index: {}]   ;;  %s20149_s7 = inlined_call_operand.vmem [shape: f32[576,128], index: 7, kind: input, shape index: {}]   ;;  %s20150_s8 = inlined_call_operand.vmem [shape: f32[1,128], index: 8, kind: input, shape index: {}]   ;;  %s20151_s9 = inlined_call_operand.vmem [shape: f32[26,29], index: 9, kind: input, shape index: {}]   ;;  %s20152_s10 = inlined_call_operand.vmem [shape: f32[1152,256], index: 10, kind: input, shape index: {}]   ;;  %s20153_s11 = inlined_call_operand.vmem [shape: f32[1,256], index: 11, kind: input, shape index: {}]   ;;  %s20154_s12 = inlined_call_operand.vmem [shape: f32[1,11], index: 12, kind: input, shape index: {}]   ;;  %s20155_s13 = inlined_call_operand.vmem [shape: f32[256,128], index: 13, kind: input, shape index: {}]   ;;  %s20156_s14 = inlined_call_operand.vmem [shape: f32[1,128], index: 14, kind: input, shape index: {}]   ;;  %s20157_s15 = inlined_call_operand.vmem [shape: f32[128,64], index: 15, kind: input, shape index: {}]   ;;  %s20158_s16 = inlined_call_operand.vmem [shape: f32[1,64], index: 16, kind: input, shape index: {}]   ;;  %s20159_s17 = inlined_call_operand.vmem [shape: f32[64,1], index: 17, kind: input, shape index: {}]   ;;  %s20160_s18 = inlined_call_operand.<no memory space> [shape: f32[1,1], index: 18, kind: input, shape index: {}]   ;;  %s20161_s19 = inlined_call_operand.vmem [shape: f32[2,1,1], index: 19, kind: output, shape index: {}]  }
   0x1   :  { %20169 = sst [smem:[#allocation29_spill]] %s20142_s0  ;;  %v24_v0 = vstv %s20160_s18 }
   0x2   :  { %20170 = sst [smem:[#allocation30_spill]] %s20143_s1  ;;  %25 = vst [vmem:[#allocation9] sm:$0x1] %v24_v0 }
   0x3   :  { %20171 = sst [smem:[#allocation31_spill]] %s20144_s2 }
   0x4   :  { %20172 = sst [smem:[#allocation32_spill]] %s20145_s3 }
   0x5 LB: > { %s10477_s21 = sadd.s32 4294967295, %s14534_s20   ;;  %p10481_p0 = scmp.ge.s32.totalorder %s14534_s20, 1  ;;  %s14534_s20 = sphi %s14643_s20, %s31_s20  }
   0x6   : > { %p539_p1 = scmp.lt.s32.totalorder %s14534_s20, 3 }
   0x8   : > { %p540_p2 = pnand %p10481_p0, %p539_p1 }
   0xa   : > { %543 = sbr.rel (%p540_p2) target bundleno = 3944 (0xf68), region = 96 }
  0x11   : > { %s20173_s2 = sld [smem:[#allocation30_spill]]  ;;  %vm809_vm0 = vcmask 1042432   ;;  %p593_p3 = scmp.lt.s32.totalorder %s10477_s21, 1  ;;  %v20167_v2 = vmov 0.0   ;;  %vm14537_vm1 = vmmov 0   ;;  %vm685_vm2 = vcmask 23552  }
  0x12   : > { %14476 = vmatprep.subr.mxu1 %v20167_v2  ;;  %11954 = vmatprep.mubr.msk.f32.mxu1 %vm14537_vm1, %v20167_v2  ;;  %s20174_s25 = sld [smem:[#allocation29_spill]]  ;;  %s20218_s30 = sld [smem:[#allocation31_spill]]  ;;  %vm4921_vm3 = vcmask 261120   ;;  %vm4962_vm4 = vcmask 257024   ;;  %vm5334_vm5 = vcmask 1040384   ;;  %vm5285_vm6 = vcmask 400384  }
  0x13   : > { %s20223_s21 = smov (!%p593_p3, %s10477_s21), 1  ;;  %11901 = vmatprep.subr.mxu0 %v20167_v2  ;;  %11903 = vmatprep.mubr.msk.f32.mxu0 %vm14537_vm1, %v20167_v2  ;;  %vm5643_vm7 = vcmask 254976   ;;  %vm7443_vm8 = vcmask 523264   ;;  %vm7456_vm9 = vcmask 519168   ;;  %vm14539_vm10 = vmmov 1  }
  0x14   : > { %s14510_s18 = smul.u32 368, %s20223_s21  ;;  %vm13994_vm11 = vmpackc.low %vm5334_vm5, %vm14539_vm10  ;;  %vm7549_vm12 = vcmask 728064   ;;  %vm7680_vm13 = vcmask 517120   ;;  %vm8833_vm14 = vcmask 236544   ;;  %vm8846_vm15 = vcmask 1044480  }
  0x17   : > { %v684_v1 = vld [vmem:[%s20173_s2 + $0x3] sm:$0x7]  ;;  %v642_v3 = vld [vmem:[%s20173_s2] sm:$0x7]  ;;  %v1520_v5 = vld [vmem:[%s20173_s2 + $0x6] sm:$0x7] }
  0x18   : > { %14477 = vmatpush3.msk.msra.mxu1 %vm809_vm0, %v684_v1  ;;  %11902 = vmatpush3.msk.msra.mxu0 %vm809_vm0, %v684_v1  ;;  %s14670_s3 = scalar_lea.vmem %s20174_s25, %s14510_s18  ;;  %v2478_v44 = vld [vmem:[%s20173_s2 + $0xc] sm:$0x7]  ;;  %v1999_v55 = vld [vmem:[%s20173_s2 + $0x9] sm:$0x7]  ;;  %s20219_s18 = sld [smem:[#allocation32_spill]] }
  0x19   : > { %12026 = vmatprep.subr.mxu1 %v20167_v2  ;;  %12151 = vmatprep.subr.mxu0 %v20167_v2  ;;  %v660_v4 = vld [vmem:[%s14670_s3 + $0x89] sm:$0xff]  ;;  %v661_v6 = vld [vmem:[%s14670_s3 + $0x91] sm:$0xff]  ;;  %v643_v7 = vld [vmem:[%s14670_s3 + $0x1] sm:$0xff]  ;;  %s600_s25 = scalar_lea.vmem %s20161_s19, %s20223_s21 }
  0x1a   : > { %11955 = vmatmul.mubr.msk.f32.vlgmr.msra.gmra.mrb[0].mxu1 %vm685_vm2, %v660_v4  ;;  %11904 = vmatmul.mubr.msk.f32.vlgmr.msra.gmra.mrb[0].mxu0 %vm685_vm2, %v643_v7  ;;  %v644_v8 = vld [vmem:[%s14670_s3 + $0x9] sm:$0xff]  ;;  %v662_v9 = vld [vmem:[%s14670_s3 + $0x99] sm:$0xff]  ;;  %v645_v10 = vld [vmem:[%s14670_s3 + $0x11] sm:$0xff] }
  0x1b   : > { %11957 = vmatprep.mubr.msk.f32.mxu1 %vm14537_vm1, %v20167_v2  ;;  %12027 = vmatpush3.msk.msra.mxu1 %vm809_vm0, %v642_v3  ;;  %v663_v11 = vld [vmem:[%s14670_s3 + $0xa1] sm:$0xff]  ;;  %v646_v12 = vld [vmem:[%s14670_s3 + $0x19] sm:$0xff]  ;;  %v664_v13 = vld [vmem:[%s14670_s3 + $0xa9] sm:$0xff] }
  0x1c   : > { %12276 = vmatprep.subr.mxu1 %v20167_v2  ;;  %11906 = vmatprep.mubr.msk.f32.mxu0 %vm14537_vm1, %v20167_v2  ;;  %v647_v14 = vld [vmem:[%s14670_s3 + $0x21] sm:$0xff]  ;;  %v665_v15 = vld [vmem:[%s14670_s3 + $0xb1] sm:$0xff]  ;;  %v648_v16 = vld [vmem:[%s14670_s3 + $0x29] sm:$0xff] }
  0x1d   : > { %12152 = vmatpush3.msk.msra.mxu0 %vm809_vm0, %v1520_v5  ;;  %v666_v17 = vld [vmem:[%s14670_s3 + $0xb9] sm:$0xff]  ;;  %v649_v18 = vld [vmem:[%s14670_s3 + $0x31] sm:$0xff]  ;;  %v667_v19 = vld [vmem:[%s14670_s3 + $0xc1] sm:$0xff] }
  0x1e   : > { %11958 = vmatmul.mubr.msk.f32.gmra.mrb[2].mxu1 %vm685_vm2, %v661_v6  ;;  %12401 = vmatprep.subr.mxu0 %v20167_v2  ;;  %v650_v20 = vld [vmem:[%s14670_s3 + $0x39] sm:$0xff]  ;;  %v668_v21 = vld [vmem:[%s14670_s3 + $0xc9] sm:$0xff]  ;;  %v651_v22 = vld [vmem:[%s14670_s3 + $0x41] sm:$0xff] }
  0x1f   : > { %11960 = vmatprep.mubr.msk.f32.mxu1 %vm14537_vm1, %v20167_v2  ;;  %11907 = vmatmul.mubr.msk.f32.gmra.mrb[2].mxu0 %vm685_vm2, %v644_v8  ;;  %v669_v23 = vld [vmem:[%s14670_s3 + $0xd1] sm:$0xff]  ;;  %v652_v24 = vld [vmem:[%s14670_s3 + $0x49] sm:$0xff]  ;;  %v670_v25 = vld [vmem:[%s14670_s3 + $0xd9] sm:$0xff] }
  0x20   : > { %11909 = vmatprep.mubr.msk.f32.mxu0 %vm14537_vm1, %v20167_v2  ;;  %v653_v26 = vld [vmem:[%s14670_s3 + $0x51] sm:$0xff]  ;;  %v671_v27 = vld [vmem:[%s14670_s3 + $0xe1] sm:$0xff]  ;;  %v654_v28 = vld [vmem:[%s14670_s3 + $0x59] sm:$0xff] }
  0x21   : > { %v672_v29 = vld [vmem:[%s14670_s3 + $0xe9] sm:$0xff]  ;;  %v655_v30 = vld [vmem:[%s14670_s3 + $0x61] sm:$0xff]  ;;  %v673_v31 = vld [vmem:[%s14670_s3 + $0xf1] sm:$0xff] }
  0x22   : > { %11961 = vmatmul.mubr.msk.f32.gmra.mrb[4].mxu1 %vm685_vm2, %v662_v9  ;;  %v656_v32 = vld [vmem:[%s14670_s3 + $0x69] sm:$0xff]  ;;  %v674_v33 = vld [vmem:[%s14670_s3 + $0xf9] sm:$0xff]  ;;  %v657_v34 = vld [vmem:[%s14670_s3 + $0x71] sm:$0xff] }
  0x23   : > { %11963 = vmatprep.mubr.msk.f32.mxu1 %vm14537_vm1, %v20167_v2  ;;  %11910 = vmatmul.mubr.msk.f32.gmra.mrb[4].mxu0 %vm685_vm2, %v645_v10  ;;  %v675_v35 = vld [vmem:[%s14670_s3 + $0x101] sm:$0xff]  ;;  %v658_v36 = vld [vmem:[%s14670_s3 + $0x79] sm:$0xff]  ;;  %v676_v37 = vld [vmem:[%s14670_s3 + $0x109] sm:$0xff] }
  0x24   : > { %11912 = vmatprep.mubr.msk.f32.mxu0 %vm14537_vm1, %v20167_v2  ;;  %v659_v38 = vld [vmem:[%s14670_s3 + $0x81] sm:$0xff]  ;;  %v677_v39 = vld [vmem:[%s14670_s3 + $0x111] sm:$0xff]  ;;  %v678_v41 = vld [vmem:[%s14670_s3 + $0x119] sm:$0xff] }
  0x25   : > { %v1479_v40 = vld [vmem:[%s14670_s3 + $0x2] sm:$0xff]  ;;  %v1480_v42 = vld [vmem:[%s14670_s3 + $0xa] sm:$0xff]  ;;  %v14839_v45 = vld [vmem:[%s14670_s3 + $0x12] sm:$0xff] }
  0x26   : > { %11964 = vmatmul.mubr.msk.f32.gmra.mrb[6].mxu1 %vm685_vm2, %v663_v11  ;;  %v679_v43 = vld [vmem:[%s14670_s3 + $0x121] sm:$0xff]  ;;  %v680_v46 = vld [vmem:[%s14670_s3 + $0x129] sm:$0xff]  ;;  %v681_v48 = vld [vmem:[%s14670_s3 + $0x131] sm:$0xff] }
  0x27   : > { %11966 = vmatprep.mubr.msk.f32.mxu1 %vm14537_vm1, %v20167_v2  ;;  %11913 = vmatmul.mubr.msk.f32.gmra.mrb[6].mxu0 %vm685_vm2, %v646_v12  ;;  %v14852_v47 = vld [vmem:[%s14670_s3 + $0x1a] sm:$0xff]  ;;  %v14863_v49 = vld [vmem:[%s14670_s3 + $0x22] sm:$0xff]  ;;  %v14874_v51 = vld [vmem:[%s14670_s3 + $0x2a] sm:$0xff] }
  0x28   : > { %11915 = vmatprep.mubr.msk.f32.mxu0 %vm14537_vm1, %v20167_v2  ;;  %v682_v50 = vld [vmem:[%s14670_s3 + $0x139] sm:$0xff]  ;;  %v683_v52 = vld [vmem:[%s14670_s3 + $0x141] sm:$0xf]  ;;  %v602_v57 = vld [vmem:[%s14670_s3 + $0x8] sm:$0xff] }
  0x29   : > { %v14885_v53 = vld [vmem:[%s14670_s3 + $0x32] sm:$0xff]  ;;  %v601_v54 = vld [vmem:[%s14670_s3] sm:$0xff]  ;;  %v14923_v60 = vld [vmem:[%s14670_s3 + $0x4a] sm:$0xff] }
  0x2a   : > { %11967 = vmatmul.mubr.msk.f32.gmra.mrb[8].mxu1 %vm685_vm2, %v664_v13  ;;  %v14899_v56 = vld [vmem:[%s14670_s3 + $0x3a] sm:$0xff]  ;;  %v14912_v58 = vld [vmem:[%s14670_s3 + $0x42] sm:$0xff]  ;;  %v603_v59 = vld [vmem:[%s14670_s3 + $0x10] sm:$0xff] }
  0x2b   : > { %11969 = vmatprep.mubr.msk.f32.mxu1 %vm14537_vm1, %v20167_v2  ;;  %11916 = vmatmul.mubr.msk.f32.gmra.mrb[8].mxu0 %vm685_vm2, %v647_v14  ;;  %v604_v61 = vld [vmem:[%s14670_s3 + $0x18] sm:$0xff]  ;;  %v605_v63 = vld [vmem:[%s14670_s3 + $0x20] sm:$0xff]  ;;  %v606_v1 = vld [vmem:[%s14670_s3 + $0x28] sm:$0xff] }
  0x2c   : > { %11918 = vmatprep.mubr.msk.f32.mxu0 %vm14537_vm1, %v20167_v2  ;;  %v14934_v62 = vld [vmem:[%s14670_s3 + $0x52] sm:$0xff]  ;;  %v14945_v0 = vld [vmem:[%s14670_s3 + $0x5a] sm:$0xff]  ;;  %v14956_v3 = vld [vmem:[%s14670_s3 + $0x62] sm:$0xff] }
  0x2d   : > { %v607_v4 = vld [vmem:[%s14670_s3 + $0x30] sm:$0xff]  ;;  %v608_v6 = vld [vmem:[%s14670_s3 + $0x38] sm:$0xff]  ;;  %v609_v8 = vld [vmem:[%s14670_s3 + $0x40] sm:$0xff] }
  0x2e   : > { %11970 = vmatmul.mubr.msk.f32.gmra.mrb[10].mxu1 %vm685_vm2, %v665_v15  ;;  %v14967_v5 = vld [vmem:[%s14670_s3 + $0x6a] sm:$0xff]  ;;  %v14978_v7 = vld [vmem:[%s14670_s3 + $0x72] sm:$0xff]  ;;  %v14989_v9 = vld [vmem:[%s14670_s3 + $0x7a] sm:$0xff] }
  0x2f   : > { %11972 = vmatprep.mubr.msk.f32.mxu1 %vm14537_vm1, %v20167_v2  ;;  %11919 = vmatmul.mubr.msk.f32.gmra.mrb[10].mxu0 %vm685_vm2, %v648_v16  ;;  %v610_v10 = vld [vmem:[%s14670_s3 + $0x48] sm:$0xff]  ;;  %v611_v12 = vld [vmem:[%s14670_s3 + $0x50] sm:$0xff]  ;;  %v612_v14 = vld [vmem:[%s14670_s3 + $0x58] sm:$0xff] }
  0x30   : > { %11921 = vmatprep.mubr.msk.f32.mxu0 %vm14537_vm1, %v20167_v2  ;;  %v15000_v11 = vld [vmem:[%s14670_s3 + $0x82] sm:$0xff]  ;;  %v15011_v13 = vld [vmem:[%s14670_s3 + $0x8a] sm:$0xff]  ;;  %v15022_v15 = vld [vmem:[%s14670_s3 + $0x92] sm:$0xff] }
  0x31   : > { %v613_v16 = vld [vmem:[%s14670_s3 + $0x60] sm:$0xff] }
  0x32   : > { %11973 = vmatmul.mubr.msk.f32.gmra.mrb[12].mxu1 %vm685_vm2, %v666_v17  ;;  %v15033_v17 = vld [vmem:[%s14670_s3 + $0x9a] sm:$0xff] }
  0x33   : > { %11975 = vmatprep.mubr.msk.f32.mxu1 %vm14537_vm1, %v20167_v2  ;;  %11922 = vmatmul.mubr.msk.f32.gmra.mrb[12].mxu0 %vm685_vm2, %v649_v18  ;;  %v614_v18 = vld [vmem:[%s14670_s3 + $0x68] sm:$0xff] }
  0x34   : > { %11924 = vmatprep.mubr.msk.f32.mxu0 %vm14537_vm1, %v20167_v2 }
  0x36   : > { %11976 = vmatmul.mubr.msk.f32.gmra.mrb[14].mxu1 %vm685_vm2, %v667_v19  ;;  %v15044_v19 = vld [vmem:[%s14670_s3 + $0xa2] sm:$0xff] }
  0x37   : > { %11978 = vmatprep.mubr.msk.f32.mxu1 %vm14537_vm1, %v20167_v2  ;;  %11925 = vmatmul.mubr.msk.f32.gmra.mrb[14].mxu0 %vm685_vm2, %v650_v20  ;;  %v615_v20 = vld [vmem:[%s14670_s3 + $0x70] sm:$0xff] }
  0x38   : > { %11927 = vmatprep.mubr.msk.f32.mxu0 %vm14537_vm1, %v20167_v2 }
  0x3a   : > { %11979 = vmatmul.mubr.msk.f32.gmra.mrb[16].mxu1 %vm685_vm2, %v668_v21  ;;  %v15055_v21 = vld [vmem:[%s14670_s3 + $0xaa] sm:$0xff] }
  0x3b   : > { %11981 = vmatprep.mubr.msk.f32.mxu1 %vm14537_vm1, %v20167_v2  ;;  %11928 = vmatmul.mubr.msk.f32.gmra.mrb[16].mxu0 %vm685_vm2, %v651_v22  ;;  %v616_v22 = vld [vmem:[%s14670_s3 + $0x78] sm:$0xff] }
  0x3c   : > { %11930 = vmatprep.mubr.msk.f32.mxu0 %vm14537_vm1, %v20167_v2 }
  0x3e   : > { %11982 = vmatmul.mubr.msk.f32.gmra.mrb[18].mxu1 %vm685_vm2, %v669_v23  ;;  %v15066_v23 = vld [vmem:[%s14670_s3 + $0xb2] sm:$0xff] }
  0x3f   : > { %11984 = vmatprep.mubr.msk.f32.mxu1 %vm14537_vm1, %v20167_v2  ;;  %11931 = vmatmul.mubr.msk.f32.gmra.mrb[18].mxu0 %vm685_vm2, %v652_v24  ;;  %v617_v24 = vld [vmem:[%s14670_s3 + $0x80] sm:$0xff] }
  0x40   : > { %11933 = vmatprep.mubr.msk.f32.mxu0 %vm14537_vm1, %v20167_v2 }
  0x42   : > { %11985 = vmatmul.mubr.msk.f32.gmra.mrb[20].mxu1 %vm685_vm2, %v670_v25  ;;  %v15077_v25 = vld [vmem:[%s14670_s3 + $0xba] sm:$0xff] }
  0x43   : > { %11987 = vmatprep.mubr.msk.f32.mxu1 %vm14537_vm1, %v20167_v2  ;;  %11934 = vmatmul.mubr.msk.f32.gmra.mrb[20].mxu0 %vm685_vm2, %v653_v26  ;;  %v618_v26 = vld [vmem:[%s14670_s3 + $0x88] sm:$0xff] }
  0x44   : > { %11936 = vmatprep.mubr.msk.f32.mxu0 %vm14537_vm1, %v20167_v2 }
  0x46   : > { %11988 = vmatmul.mubr.msk.f32.gmra.mrb[22].mxu1 %vm685_vm2, %v671_v27  ;;  %v15088_v27 = vld [vmem:[%s14670_s3 + $0xc2] sm:$0xff] }
  0x47   : > { %11990 = vmatprep.mubr.msk.f32.mxu1 %vm14537_vm1, %v20167_v2  ;;  %11937 = vmatmul.mubr.msk.f32.gmra.mrb[22].mxu0 %vm685_vm2, %v654_v28  ;;  %v619_v28 = vld [vmem:[%s14670_s3 + $0x90] sm:$0xff] }
  0x48   : > { %11939 = vmatprep.mubr.msk.f32.mxu0 %vm14537_vm1, %v20167_v2 }
  0x4a   : > { %11991 = vmatmul.mubr.msk.f32.gmra.mrb[24].mxu1 %vm685_vm2, %v672_v29  ;;  %v15099_v29 = vld [vmem:[%s14670_s3 + $0xca] sm:$0xff] }
  0x4b   : > { %11993 = vmatprep.mubr.msk.f32.mxu1 %vm14537_vm1, %v20167_v2  ;;  %11940 = vmatmul.mubr.msk.f32.gmra.mrb[24].mxu0 %vm685_vm2, %v655_v30  ;;  %v620_v30 = vld [vmem:[%s14670_s3 + $0x98] sm:$0xff] }
  0x4c   : > { %11942 = vmatprep.mubr.msk.f32.mxu0 %vm14537_vm1, %v20167_v2 }
  0x4e   : > { %11994 = vmatmul.mubr.msk.f32.gmra.mrb[26].mxu1 %vm685_vm2, %v673_v31  ;;  %v15110_v31 = vld [vmem:[%s14670_s3 + $0xd2] sm:$0xff] }
  0x4f   : > { %11996 = vmatprep.mubr.msk.f32.mxu1 %vm14537_vm1, %v20167_v2  ;;  %11943 = vmatmul.mubr.msk.f32.gmra.mrb[26].mxu0 %vm685_vm2, %v656_v32  ;;  %v621_v32 = vld [vmem:[%s14670_s3 + $0xa0] sm:$0xff] }
  0x50   : > { %11945 = vmatprep.mubr.msk.f32.mxu0 %vm14537_vm1, %v20167_v2 }
  0x52   : > { %11997 = vmatmul.mubr.msk.f32.gmra.mrb[28].mxu1 %vm685_vm2, %v674_v33  ;;  %v15121_v33 = vld [vmem:[%s14670_s3 + $0xda] sm:$0xff] }
  0x53   : > { %11999 = vmatprep.mubr.msk.f32.mxu1 %vm14537_vm1, %v20167_v2  ;;  %11946 = vmatmul.mubr.msk.f32.gmra.mrb[28].mxu0 %vm685_vm2, %v657_v34  ;;  %v622_v34 = vld [vmem:[%s14670_s3 + $0xa8] sm:$0xff] }
  0x54   : > { %11948 = vmatprep.mubr.msk.f32.mxu0 %vm14537_vm1, %v20167_v2 }
  0x56   : > { %12000 = vmatmul.mubr.msk.f32.gmra.mrb[30].mxu1 %vm685_vm2, %v675_v35  ;;  %v15132_v35 = vld [vmem:[%s14670_s3 + $0xe2] sm:$0xff] }
  0x57   : > { %12002 = vmatprep.mubr.msk.f32.mxu1 %vm14537_vm1, %v20167_v2  ;;  %11949 = vmatmul.mubr.msk.f32.gmra.mrb[30].mxu0 %vm685_vm2, %v658_v36  ;;  %v623_v36 = vld [vmem:[%s14670_s3 + $0xb0] sm:$0xff] }
  0x58   : > { %11951 = vmatprep.mubr.msk.f32.mxu0 %vm14537_vm1, %v20167_v2 }
  0x5a   : > { %12003 = vmatmul.mubr.msk.f32.gmra.mrb[32].mxu1 %vm685_vm2, %v676_v37  ;;  %v15143_v37 = vld [vmem:[%s14670_s3 + $0xea] sm:$0xff] }
  0x5b   : > { %12005 = vmatprep.mubr.msk.f32.mxu1 %vm14537_vm1, %v20167_v2  ;;  %11952 = vmatmul.mubr.msk.f32.gmra.mrb[32].mxu0 %vm685_vm2, %v659_v38  ;;  %v624_v38 = vld [vmem:[%s14670_s3 + $0xb8] sm:$0xff] }
  0x5c   : > { %12153 = vmatprep.mubr.msk.f32.mxu0 %vm14537_vm1, %v20167_v2 }
  0x5e   : > { %12006 = vmatmul.mubr.msk.f32.gmra.mrb[34].mxu1 %vm685_vm2, %v677_v39  ;;  %v15154_v39 = vld [vmem:[%s14670_s3 + $0xf2] sm:$0xff] }
  0x5f   : > { %12008 = vmatprep.mubr.msk.f32.mxu1 %vm14537_vm1, %v20167_v2  ;;  %12154 = vmatmul.mubr.msk.f32.vlgmr.msra.gmra.mrb[34].mxu0 %vm685_vm2, %v1479_v40  ;;  %v625_v40 = vld [vmem:[%s14670_s3 + $0xc0] sm:$0xff] }
  0x60   : > { %12156 = vmatprep.mubr.msk.f32.mxu0 %vm14537_vm1, %v20167_v2  ;;  %12402 = vmatpush3.msk.msra.mxu0 %vm809_vm0, %v2478_v44  ;;  %v627_v44 = vld [vmem:[%s14670_s3 + $0xd0] sm:$0xff] }
  0x61   : > { %12651 = vmatprep.subr.mxu0 %v20167_v2 }
  0x62   : > { %12009 = vmatmul.mubr.msk.f32.gmra.mrb[36].mxu1 %vm685_vm2, %v678_v41  ;;  %v15165_v41 = vld [vmem:[%s14670_s3 + $0xfa] sm:$0xff] }
  0x63   : > { %12011 = vmatprep.mubr.msk.f32.mxu1 %vm14537_vm1, %v20167_v2  ;;  %12157 = vmatmul.mubr.msk.f32.gmra.mrb[36].mxu0 %vm685_vm2, %v1480_v42  ;;  %v626_v42 = vld [vmem:[%s14670_s3 + $0xc8] sm:$0xff] }
  0x64   : > { %12159 = vmatprep.mubr.msk.f32.mxu0 %vm14537_vm1, %v20167_v2 }
  0x66   : > { %12012 = vmatmul.mubr.msk.f32.gmra.mrb[38].mxu1 %vm685_vm2, %v679_v43  ;;  %v15176_v43 = vld [vmem:[%s14670_s3 + $0x102] sm:$0xff] }
  0x67   : > { %12014 = vmatprep.mubr.msk.f32.mxu1 %vm14537_vm1, %v20167_v2  ;;  %12160 = vmatmul.mubr.msk.f32.gmra.mrb[38].mxu0 %vm685_vm2, %v14839_v45 }
  0x68   : > { %12162 = vmatprep.mubr.msk.f32.mxu0 %vm14537_vm1, %v20167_v2 }
  0x6a   : > { %12015 = vmatmul.mubr.msk.f32.gmra.mrb[40].mxu1 %vm685_vm2, %v680_v46  ;;  %v15187_v46 = vld [vmem:[%s14670_s3 + $0x10a] sm:$0xff] }
  0x6b   : > { %12017 = vmatprep.mubr.msk.f32.mxu1 %vm14537_vm1, %v20167_v2  ;;  %12163 = vmatmul.mubr.msk.f32.gmra.mrb[40].mxu0 %vm685_vm2, %v14852_v47 }
  0x6c   : > { %12165 = vmatprep.mubr.msk.f32.mxu0 %vm14537_vm1, %v20167_v2 }
  0x6e   : > { %12018 = vmatmul.mubr.msk.f32.gmra.mrb[42].mxu1 %vm685_vm2, %v681_v48  ;;  %v628_v48 = vld [vmem:[%s14670_s3 + $0xd8] sm:$0xff] }
  0x6f   : > { %12020 = vmatprep.mubr.msk.f32.mxu1 %vm14537_vm1, %v20167_v2  ;;  %12166 = vmatmul.mubr.msk.f32.gmra.mrb[42].mxu0 %vm685_vm2, %v14863_v49 }
  0x70   : > { %12168 = vmatprep.mubr.msk.f32.mxu0 %vm14537_vm1, %v20167_v2 }
  0x72   : > { %12021 = vmatmul.mubr.msk.f32.gmra.mrb[44].mxu1 %vm685_vm2, %v682_v50  ;;  %v15198_v50 = vld [vmem:[%s14670_s3 + $0x112] sm:$0xff] }
  0x73   : > { %12023 = vmatprep.mubr.msk.f32.mxu1 %vm14537_vm1, %v20167_v2  ;;  %12169 = vmatmul.mubr.msk.f32.gmra.mrb[44].mxu0 %vm685_vm2, %v14874_v51 }
  0x74   : > { %12171 = vmatprep.mubr.msk.f32.mxu0 %vm14537_vm1, %v20167_v2 }
  0x76   : > { %12024 = vmatmul.mubr.msk.f32.gmra.mrb[46].mxu1 %vm685_vm2, %v683_v52  ;;  %v629_v52 = vld [vmem:[%s14670_s3 + $0xe0] sm:$0xff] }
  0x77   : > { %12028 = vmatprep.mubr.msk.f32.mxu1 %vm14537_vm1, %v20167_v2  ;;  %12172 = vmatmul.mubr.msk.f32.gmra.mrb[46].mxu0 %vm685_vm2, %v14885_v53 }
  0x78   : > { %12174 = vmatprep.mubr.msk.f32.mxu0 %vm14537_vm1, %v20167_v2 }
  0x7a   : > { %12029 = vmatmul.mubr.msk.f32.vlgmr.msra.gmra.mrb[48].mxu1 %vm685_vm2, %v601_v54  ;;  %v15209_v54 = vld [vmem:[%s14670_s3 + $0x11a] sm:$0xff] }
  0x7b   : > { %12031 = vmatprep.mubr.msk.f32.mxu1 %vm14537_vm1, %v20167_v2  ;;  %12277 = vmatpush3.msk.msra.mxu1 %vm809_vm0, %v1999_v55  ;;  %v630_v55 = vld [vmem:[%s14670_s3 + $0xe8] sm:$0xff] }
  0x7c   : > { %12175 = vmatmul.mubr.msk.f32.gmra.mrb[48].mxu0 %vm685_vm2, %v14899_v56  ;;  %12526 = vmatprep.subr.mxu1 %v20167_v2 }
  0x7d   : > { %12177 = vmatprep.mubr.msk.f32.mxu0 %vm14537_vm1, %v20167_v2 }
  0x7e   : > { %12032 = vmatmul.mubr.msk.f32.gmra.mrb[50].mxu1 %vm685_vm2, %v602_v57 }
  0x7f   : > { %12034 = vmatprep.mubr.msk.f32.mxu1 %vm14537_vm1, %v20167_v2 }
  0x80   : > { %12178 = vmatmul.mubr.msk.f32.gmra.mrb[50].mxu0 %vm685_vm2, %v14912_v58 }
  0x81   : > { %12180 = vmatprep.mubr.msk.f32.mxu0 %vm14537_vm1, %v20167_v2 }
  0x82   : > { %12035 = vmatmul.mubr.msk.f32.gmra.mrb[52].mxu1 %vm685_vm2, %v603_v59  ;;  %v15222_v59 = vld [vmem:[%s14670_s3 + $0x122] sm:$0xff] }
  0x83   : > { %12037 = vmatprep.mubr.msk.f32.mxu1 %vm14537_vm1, %v20167_v2 }
  0x84   : > { %12181 = vmatmul.mubr.msk.f32.gmra.mrb[52].mxu0 %vm685_vm2, %v14923_v60 }
  0x85   : > { %12183 = vmatprep.mubr.msk.f32.mxu0 %vm14537_vm1, %v20167_v2 }
  0x86   : > { %12038 = vmatmul.mubr.msk.f32.gmra.mrb[54].mxu1 %vm685_vm2, %v604_v61 }
  0x87   : > { %12040 = vmatprep.mubr.msk.f32.mxu1 %vm14537_vm1, %v20167_v2 }
  0x88   : > { %12184 = vmatmul.mubr.msk.f32.gmra.mrb[54].mxu0 %vm685_vm2, %v14934_v62 }
  0x89   : > { %12186 = vmatprep.mubr.msk.f32.mxu0 %vm14537_vm1, %v20167_v2 }
  0x8a   : > { %12041 = vmatmul.mubr.msk.f32.gmra.mrb[56].mxu1 %vm685_vm2, %v605_v63  ;;  %v631_v63 = vld [vmem:[%s14670_s3 + $0xf0] sm:$0xff] }
  0x8b   : > { %12043 = vmatprep.mubr.msk.f32.mxu1 %vm14537_vm1, %v20167_v2 }
  0x8c   : > { %12187 = vmatmul.mubr.msk.f32.gmra.mrb[56].mxu0 %vm685_vm2, %v14945_v0 }
  0x8d   : > { %12189 = vmatprep.mubr.msk.f32.mxu0 %vm14537_vm1, %v20167_v2 }
  0x8e   : > { %12044 = vmatmul.mubr.msk.f32.gmra.mrb[58].mxu1 %vm685_vm2, %v606_v1 }
  0x8f   : > { %12046 = vmatprep.mubr.msk.f32.mxu1 %vm14537_vm1, %v20167_v2 }
  0x90   : > { %12190 = vmatmul.mubr.msk.f32.gmra.mrb[58].mxu0 %vm685_vm2, %v14956_v3 }
  0x91   : > { %12192 = vmatprep.mubr.msk.f32.mxu0 %vm14537_vm1, %v20167_v2 }
  0x92   : > { %12047 = vmatmul.mubr.msk.f32.gmra.mrb[60].mxu1 %vm685_vm2, %v607_v4 }
  0x93   : > { %12049 = vmatprep.mubr.msk.f32.mxu1 %vm14537_vm1, %v20167_v2 }
  0x94   : > { %12193 = vmatmul.mubr.msk.f32.gmra.mrb[60].mxu0 %vm685_vm2, %v14967_v5 }
  0x95   : > { %12195 = vmatprep.mubr.msk.f32.mxu0 %vm14537_vm1, %v20167_v2 }
  0x96   : > { %12050 = vmatmul.mubr.msk.f32.gmra.mrb[62].mxu1 %vm685_vm2, %v608_v6 }
  0x97   : > { %12052 = vmatprep.mubr.msk.f32.mxu1 %vm14537_vm1, %v20167_v2 }
  0x98   : > { %12196 = vmatmul.mubr.msk.f32.gmra.mrb[62].mxu0 %vm685_vm2, %v14978_v7 }
  0x99   : > { %12198 = vmatprep.mubr.msk.f32.mxu0 %vm14537_vm1, %v20167_v2 }
  0x9a   : > { %12053 = vmatmul.mubr.msk.f32.gmra.mrb[64].mxu1 %vm685_vm2, %v609_v8  ;;  %v15237_v8 = vld [vmem:[%s14670_s3 + $0x12a] sm:$0xff] }
  0x9b   : > { %12055 = vmatprep.mubr.msk.f32.mxu1 %vm14537_vm1, %v20167_v2 }
  0x9c   : > { %12199 = vmatmul.mubr.msk.f32.gmra.mrb[64].mxu0 %vm685_vm2, %v14989_v9 }
  0x9d   : > { %12201 = vmatprep.mubr.msk.f32.mxu0 %vm14537_vm1, %v20167_v2 }
  0x9e   : > { %12056 = vmatmul.mubr.msk.f32.gmra.mrb[66].mxu1 %vm685_vm2, %v610_v10 }
  0x9f   : > { %12058 = vmatprep.mubr.msk.f32.mxu1 %vm14537_vm1, %v20167_v2 }
  0xa0   : > { %12202 = vmatmul.mubr.msk.f32.gmra.mrb[66].mxu0 %vm685_vm2, %v15000_v11 }
  0xa1   : > { %12204 = vmatprep.mubr.msk.f32.mxu0 %vm14537_vm1, %v20167_v2 }
  0xa2   : > { %12059 = vmatmul.mubr.msk.f32.gmra.mrb[68].mxu1 %vm685_vm2, %v611_v12  ;;  %v632_v12 = vld [vmem:[%s14670_s3 + $0xf8] sm:$0xff] }
  0xa3   : > { %12061 = vmatprep.mubr.msk.f32.mxu1 %vm14537_vm1, %v20167_v2 }
  0xa4   : > { %12205 = vmatmul.mubr.msk.f32.gmra.mrb[68].mxu0 %vm685_vm2, %v15011_v13 }
  0xa5   : > { %12207 = vmatprep.mubr.msk.f32.mxu0 %vm14537_vm1, %v20167_v2 }
  0xa6   : > { %12062 = vmatmul.mubr.msk.f32.gmra.mrb[70].mxu1 %vm685_vm2, %v612_v14 }
  0xa7   : > { %12064 = vmatprep.mubr.msk.f32.mxu1 %vm14537_vm1, %v20167_v2 }
  0xa8   : > { %12208 = vmatmul.mubr.msk.f32.gmra.mrb[70].mxu0 %vm685_vm2, %v15022_v15 }
  0xa9   : > { %12210 = vmatprep.mubr.msk.f32.mxu0 %vm14537_vm1, %v20167_v2 }
  0xaa   : > { %12065 = vmatmul.mubr.msk.f32.gmra.mrb[72].mxu1 %vm685_vm2, %v613_v16 }
  0xab   : > { %12067 = vmatprep.mubr.msk.f32.mxu1 %vm14537_vm1, %v20167_v2 }
  0xac   : > { %12211 = vmatmul.mubr.msk.f32.gmra.mrb[72].mxu0 %vm685_vm2, %v15033_v17 }
  0xad   : > { %12213 = vmatprep.mubr.msk.f32.mxu0 %vm14537_vm1, %v20167_v2 }
  0xae   : > { %12068 = vmatmul.mubr.msk.f32.gmra.mrb[74].mxu1 %vm685_vm2, %v614_v18 }
  0xaf   : > { %12070 = vmatprep.mubr.msk.f32.mxu1 %vm14537_vm1, %v20167_v2 }
  0xb0   : > { %12214 = vmatmul.mubr.msk.f32.gmra.mrb[74].mxu0 %vm685_vm2, %v15044_v19 }
  0xb1   : > { %12216 = vmatprep.mubr.msk.f32.mxu0 %vm14537_vm1, %v20167_v2 }
  0xb2   : > { %12071 = vmatmul.mubr.msk.f32.gmra.mrb[76].mxu1 %vm685_vm2, %v615_v20  ;;  %v15252_v20 = vld [vmem:[%s14670_s3 + $0x132] sm:$0xff] }
  0xb3   : > { %12073 = vmatprep.mubr.msk.f32.mxu1 %vm14537_vm1, %v20167_v2  ;;  %20175 = vst [vmem:[#allocation10_spill] sm:$0xff] %v15252_v20 }
  0xb4   : > { %12217 = vmatmul.mubr.msk.f32.gmra.mrb[76].mxu0 %vm685_vm2, %v15055_v21 }
  0xb5   : > { %12219 = vmatprep.mubr.msk.f32.mxu0 %vm14537_vm1, %v20167_v2 }
  0xb6   : > { %12074 = vmatmul.mubr.msk.f32.gmra.mrb[78].mxu1 %vm685_vm2, %v616_v22 }
  0xb7   : > { %12076 = vmatprep.mubr.msk.f32.mxu1 %vm14537_vm1, %v20167_v2 }
  0xb8   : > { %12220 = vmatmul.mubr.msk.f32.gmra.mrb[78].mxu0 %vm685_vm2, %v15066_v23 }
  0xb9   : > { %12222 = vmatprep.mubr.msk.f32.mxu0 %vm14537_vm1, %v20167_v2 }
  0xba   : > { %12077 = vmatmul.mubr.msk.f32.gmra.mrb[80].mxu1 %vm685_vm2, %v617_v24  ;;  %v633_v24 = vld [vmem:[%s14670_s3 + $0x100] sm:$0xff] }
  0xbb   : > { %12079 = vmatprep.mubr.msk.f32.mxu1 %vm14537_vm1, %v20167_v2 }
  0xbc   : > { %12223 = vmatmul.mubr.msk.f32.gmra.mrb[80].mxu0 %vm685_vm2, %v15077_v25 }
  0xbd   : > { %12225 = vmatprep.mubr.msk.f32.mxu0 %vm14537_vm1, %v20167_v2 }
  0xbe   : > { %12080 = vmatmul.mubr.msk.f32.gmra.mrb[82].mxu1 %vm685_vm2, %v618_v26 }
  0xbf   : > { %12082 = vmatprep.mubr.msk.f32.mxu1 %vm14537_vm1, %v20167_v2 }
  0xc0   : > { %12226 = vmatmul.mubr.msk.f32.gmra.mrb[82].mxu0 %vm685_vm2, %v15088_v27 }
  0xc1   : > { %12228 = vmatprep.mubr.msk.f32.mxu0 %vm14537_vm1, %v20167_v2 }
  0xc2   : > { %12083 = vmatmul.mubr.msk.f32.gmra.mrb[84].mxu1 %vm685_vm2, %v619_v28 }
  0xc3   : > { %12085 = vmatprep.mubr.msk.f32.mxu1 %vm14537_vm1, %v20167_v2 }
  0xc4   : > { %12229 = vmatmul.mubr.msk.f32.gmra.mrb[84].mxu0 %vm685_vm2, %v15099_v29 }
  0xc5   : > { %12231 = vmatprep.mubr.msk.f32.mxu0 %vm14537_vm1, %v20167_v2 }
  0xc6   : > { %12086 = vmatmul.mubr.msk.f32.gmra.mrb[86].mxu1 %vm685_vm2, %v620_v30 }
  0xc7   : > { %12088 = vmatprep.mubr.msk.f32.mxu1 %vm14537_vm1, %v20167_v2 }
  0xc8   : > { %12232 = vmatmul.mubr.msk.f32.gmra.mrb[86].mxu0 %vm685_vm2, %v15110_v31 }
  0xc9   : > { %12234 = vmatprep.mubr.msk.f32.mxu0 %vm14537_vm1, %v20167_v2 }
  0xca   : > { %12089 = vmatmul.mubr.msk.f32.gmra.mrb[88].mxu1 %vm685_vm2, %v621_v32  ;;  %v15267_v32 = vld [vmem:[%s14670_s3 + $0x13a] sm:$0xff] }
  0xcb   : > { %12091 = vmatprep.mubr.msk.f32.mxu1 %vm14537_vm1, %v20167_v2  ;;  %20176 = vst [vmem:[#allocation11_spill] sm:$0xff] %v15267_v32 }
  0xcc   : > { %12235 = vmatmul.mubr.msk.f32.gmra.mrb[88].mxu0 %vm685_vm2, %v15121_v33 }
  0xcd   : > { %12237 = vmatprep.mubr.msk.f32.mxu0 %vm14537_vm1, %v20167_v2 }
  0xce   : > { %12092 = vmatmul.mubr.msk.f32.gmra.mrb[90].mxu1 %vm685_vm2, %v622_v34 }
  0xcf   : > { %12094 = vmatprep.mubr.msk.f32.mxu1 %vm14537_vm1, %v20167_v2 }
  0xd0   : > { %12238 = vmatmul.mubr.msk.f32.gmra.mrb[90].mxu0 %vm685_vm2, %v15132_v35 }
  0xd1   : > { %12240 = vmatprep.mubr.msk.f32.mxu0 %vm14537_vm1, %v20167_v2 }
  0xd2   : > { %12095 = vmatmul.mubr.msk.f32.gmra.mrb[92].mxu1 %vm685_vm2, %v623_v36  ;;  %v634_v36 = vld [vmem:[%s14670_s3 + $0x108] sm:$0xff] }
  0xd3   : > { %12097 = vmatprep.mubr.msk.f32.mxu1 %vm14537_vm1, %v20167_v2 }
  0xd4   : > { %12241 = vmatmul.mubr.msk.f32.gmra.mrb[92].mxu0 %vm685_vm2, %v15143_v37 }
  0xd5   : > { %12243 = vmatprep.mubr.msk.f32.mxu0 %vm14537_vm1, %v20167_v2 }
  0xd6   : > { %12098 = vmatmul.mubr.msk.f32.gmra.mrb[94].mxu1 %vm685_vm2, %v624_v38 }
  0xd7   : > { %12100 = vmatprep.mubr.msk.f32.mxu1 %vm14537_vm1, %v20167_v2 }
  0xd8   : > { %12244 = vmatmul.mubr.msk.f32.gmra.mrb[94].mxu0 %vm685_vm2, %v15154_v39 }
  0xd9   : > { %12246 = vmatprep.mubr.msk.f32.mxu0 %vm14537_vm1, %v20167_v2 }
  0xda   : > { %12101 = vmatmul.mubr.msk.f32.gmra.mrb[96].mxu1 %vm685_vm2, %v625_v40 }
  0xdb   : > { %12103 = vmatprep.mubr.msk.f32.mxu1 %vm14537_vm1, %v20167_v2 }
  0xdc   : > { %12247 = vmatmul.mubr.msk.f32.gmra.mrb[96].mxu0 %vm685_vm2, %v15165_v41 }
  0xdd   : > { %12249 = vmatprep.mubr.msk.f32.mxu0 %vm14537_vm1, %v20167_v2 }
  0xde   : > { %12104 = vmatmul.mubr.msk.f32.gmra.mrb[98].mxu1 %vm685_vm2, %v626_v42 }
  0xdf   : > { %12106 = vmatprep.mubr.msk.f32.mxu1 %vm14537_vm1, %v20167_v2 }
  0xe0   : > { %12250 = vmatmul.mubr.msk.f32.gmra.mrb[98].mxu0 %vm685_vm2, %v15176_v43 }
  0xe1   : > { %12252 = vmatprep.mubr.msk.f32.mxu0 %vm14537_vm1, %v20167_v2 }
  0xe2   : > { %12107 = vmatmul.mubr.msk.f32.gmra.mrb[100].mxu1 %vm685_vm2, %v627_v44  ;;  %v1519_v44 = vld [vmem:[%s14670_s3 + $0x142] sm:$0xf] }
  0xe3   : > { %12109 = vmatprep.mubr.msk.f32.mxu1 %vm14537_vm1, %v20167_v2 }
  0xe4   : > { %12253 = vmatmul.mubr.msk.f32.gmra.mrb[100].mxu0 %vm685_vm2, %v15187_v46 }
  0xe5   : > { %12255 = vmatprep.mubr.msk.f32.mxu0 %vm14537_vm1, %v20167_v2 }
  0xe6   : > { %12110 = vmatmul.mubr.msk.f32.gmra.mrb[102].mxu1 %vm685_vm2, %v628_v48 }
  0xe7   : > { %12112 = vmatprep.mubr.msk.f32.mxu1 %vm14537_vm1, %v20167_v2 }
  0xe8   : > { %12256 = vmatmul.mubr.msk.f32.gmra.mrb[102].mxu0 %vm685_vm2, %v15198_v50 }
  0xe9   : > { %12258 = vmatprep.mubr.msk.f32.mxu0 %vm14537_vm1, %v20167_v2 }
  0xea   : > { %12113 = vmatmul.mubr.msk.f32.gmra.mrb[104].mxu1 %vm685_vm2, %v629_v52  ;;  %v635_v52 = vld [vmem:[%s14670_s3 + $0x110] sm:$0xff] }
  0xeb   : > { %12115 = vmatprep.mubr.msk.f32.mxu1 %vm14537_vm1, %v20167_v2 }
  0xec   : > { %12259 = vmatmul.mubr.msk.f32.gmra.mrb[104].mxu0 %vm685_vm2, %v15209_v54 }
  0xed   : > { %v15217_v57 = vpop.f32.mrb[0].mxu1  ;;  %12261 = vmatprep.mubr.msk.f32.mxu0 %vm14537_vm1, %v20167_v2  ;;  %v15228_v1 = vpop.f32.mrb[0].mxu0 }
  0xee   : > { %v11956_v61 = vpop.f32.mrb[1].mxu1  ;;  %12116 = vmatmul.mubr.msk.f32.gmra.mrb[106].mxu1 %vm685_vm2, %v630_v55  ;;  %v11905_v4 = vpop.f32.mrb[1].mxu0 }
  0xef   : > { %12118 = vmatprep.mubr.msk.f32.mxu1 %vm14537_vm1, %v20167_v2  ;;  %v2437_v4 = vld [vmem:[%s14670_s3 + $0x13] sm:$0xff] }
  0xf0   : > { %12262 = vmatmul.mubr.msk.f32.gmra.mrb[106].mxu0 %vm685_vm2, %v15222_v59 }
  0xf1   : > { %v15232_v6 = vpop.f32.mrb[2].mxu1  ;;  %12264 = vmatprep.mubr.msk.f32.mxu0 %vm14537_vm1, %v20167_v2 }
  0xf2   : > { %v11959_v10 = vpop.f32.mrb[3].mxu1  ;;  %12119 = vmatmul.mubr.msk.f32.gmra.mrb[108].mxu1 %vm685_vm2, %v631_v63  ;;  %v15243_v14 = vpop.f32.mrb[2].mxu0 }
  0xf3   : > { %12121 = vmatprep.mubr.msk.f32.mxu1 %vm14537_vm1, %v20167_v2  ;;  %v11908_v16 = vpop.f32.mrb[3].mxu0 }
  0xf4   : > { %12265 = vmatmul.mubr.msk.f32.gmra.mrb[108].mxu0 %vm685_vm2, %v15237_v8 }
  0xf5   : > { %v15247_v18 = vpop.f32.mrb[4].mxu1  ;;  %12267 = vmatprep.mubr.msk.f32.mxu0 %vm14537_vm1, %v20167_v2 }
  0xf6   : > { %v11962_v22 = vpop.f32.mrb[5].mxu1  ;;  %12122 = vmatmul.mubr.msk.f32.gmra.mrb[110].mxu1 %vm685_vm2, %v632_v12  ;;  %v15258_v26 = vpop.f32.mrb[4].mxu0  ;;  %v636_v12 = vld [vmem:[%s14670_s3 + $0x118] sm:$0xff] }
  0xf7   : > { %12124 = vmatprep.mubr.msk.f32.mxu1 %vm14537_vm1, %v20167_v2  ;;  %v11911_v28 = vpop.f32.mrb[5].mxu0 }
  0xf8   : > { %12268 = vmatmul.mubr.msk.f32.gmra.mrb[110].mxu0 %vm685_vm2, %v15252_v20  ;;  %v2438_v28 = vld [vmem:[%s14670_s3 + $0x1b] sm:$0xff] }
  0xf9   : > { %v15262_v30 = vpop.f32.mrb[6].mxu1  ;;  %12270 = vmatprep.mubr.msk.f32.mxu0 %vm14537_vm1, %v20167_v2 }
  0xfa   : > { %v11965_v34 = vpop.f32.mrb[7].mxu1  ;;  %12125 = vmatmul.mubr.msk.f32.gmra.mrb[112].mxu1 %vm685_vm2, %v633_v24  ;;  %v15273_v38 = vpop.f32.mrb[6].mxu0 }
  0xfb   : > { %12127 = vmatprep.mubr.msk.f32.mxu1 %vm14537_vm1, %v20167_v2  ;;  %v11914_v40 = vpop.f32.mrb[7].mxu0 }
  0xfc   : > { %12271 = vmatmul.mubr.msk.f32.gmra.mrb[112].mxu0 %vm685_vm2, %v15267_v32 }
  0xfd   : > { %v15277_v42 = vpop.f32.mrb[8].mxu1  ;;  %12273 = vmatprep.mubr.msk.f32.mxu0 %vm14537_vm1, %v20167_v2 }
  0xfe   : > { %v11968_v48 = vpop.f32.mrb[9].mxu1  ;;  %12128 = vmatmul.mubr.msk.f32.gmra.mrb[114].mxu1 %vm685_vm2, %v634_v36  ;;  %v15286_v55 = vpop.f32.mrb[8].mxu0  ;;  %v637_v36 = vld [vmem:[%s14670_s3 + $0x120] sm:$0xff] }
  0xff   : > { %12130 = vmatprep.mubr.msk.f32.mxu1 %vm14537_vm1, %v20167_v2  ;;  %v11917_v61 = vpop.f32.mrb[9].mxu0 }
 0x100   : > { %12274 = vmatmul.mubr.msk.f32.gmra.mrb[114].mxu0 %vm685_vm2, %v1519_v44 }
 0x101   : > { %v15289_v63 = vpop.f32.mrb[10].mxu1  ;;  %12403 = vmatprep.mubr.msk.f32.mxu0 %vm14537_vm1, %v20167_v2 }
 0x102   : > { %v11971_v10 = vpop.f32.mrb[11].mxu1  ;;  %12131 = vmatmul.mubr.msk.f32.gmra.mrb[116].mxu1 %vm685_vm2, %v635_v52  ;;  %v15298_v16 = vpop.f32.mrb[10].mxu0  ;;  %v2439_v52 = vld [vmem:[%s14670_s3 + $0x23] sm:$0xff] }
 0x103   : > { %12133 = vmatprep.mubr.msk.f32.mxu1 %vm14537_vm1, %v20167_v2  ;;  %v11920_v22 = vpop.f32.mrb[11].mxu0  ;;  %v638_v10 = vld [vmem:[%s14670_s3 + $0x128] sm:$0xff] }
 0x104   : > { %12404 = vmatmul.mubr.msk.f32.vlgmr.msra.gmra.mrb[116].mxu0 %vm685_vm2, %v2437_v4  ;;  %v3436_v4 = vld [vmem:[%s20173_s2 + $0x12] sm:$0x7] }
 0x105   : > { %v15301_v24 = vpop.f32.mrb[12].mxu1  ;;  %12406 = vmatprep.mubr.msk.f32.mxu0 %vm14537_vm1, %v20167_v2  ;;  %12652 = vmatpush3.msk.msra.mxu0 %vm809_vm0, %v3436_v4 }
 0x106   : > { %v11974_v34 = vpop.f32.mrb[13].mxu1  ;;  %12134 = vmatmul.mubr.msk.f32.gmra.mrb[118].mxu1 %vm685_vm2, %v636_v12  ;;  %v15310_v40 = vpop.f32.mrb[12].mxu0  ;;  %12901 = vmatprep.subr.mxu0 %v20167_v2 }
 0x107   : > { %12136 = vmatprep.mubr.msk.f32.mxu1 %vm14537_vm1, %v20167_v2  ;;  %v11923_v44 = vpop.f32.mrb[13].mxu0  ;;  %v2440_v34 = vld [vmem:[%s14670_s3 + $0x2b] sm:$0xff] }
 0x108   : > { %12407 = vmatmul.mubr.msk.f32.gmra.mrb[118].mxu0 %vm685_vm2, %v2438_v28  ;;  %v639_v44 = vld [vmem:[%s14670_s3 + $0x130] sm:$0xff] }
 0x109   : > { %v15313_v48 = vpop.f32.mrb[14].mxu1  ;;  %12409 = vmatprep.mubr.msk.f32.mxu0 %vm14537_vm1, %v20167_v2 }
 0x10a   : > { %20177 = vst [vmem:[#allocation12_spill] sm:$0xff] %v15313_v48  ;;  %v11977_v61 = vpop.f32.mrb[15].mxu1  ;;  %12137 = vmatmul.mubr.msk.f32.gmra.mrb[120].mxu1 %vm685_vm2, %v637_v36  ;;  %v15325_v12 = vpop.f32.mrb[14].mxu0 }
 0x10b   : > { %12139 = vmatprep.mubr.msk.f32.mxu1 %vm14537_vm1, %v20167_v2  ;;  %v11926_v22 = vpop.f32.mrb[15].mxu0 }
 0x10c   : > { %12410 = vmatmul.mubr.msk.f32.gmra.mrb[120].mxu0 %vm685_vm2, %v2439_v52  ;;  %v2441_v22 = vld [vmem:[%s14670_s3 + $0x33] sm:$0xff] }
 0x10d   : > { %v15330_v28 = vpop.f32.mrb[16].mxu1  ;;  %12412 = vmatprep.mubr.msk.f32.mxu0 %vm14537_vm1, %v20167_v2 }
 0x10e   : > { %20178 = vst [vmem:[#allocation13_spill] sm:$0xff] %v15330_v28  ;;  %v11980_v36 = vpop.f32.mrb[17].mxu1  ;;  %12140 = vmatmul.mubr.msk.f32.gmra.mrb[122].mxu1 %vm685_vm2, %v638_v10  ;;  %v15339_v61 = vpop.f32.mrb[16].mxu0  ;;  %v640_v10 = vld [vmem:[%s14670_s3 + $0x138] sm:$0xff] }
 0x10f   : > { %12142 = vmatprep.mubr.msk.f32.mxu1 %vm14537_vm1, %v20167_v2  ;;  %v11929_v52 = vpop.f32.mrb[17].mxu0 }
 0x110   : > { %12413 = vmatmul.mubr.msk.f32.gmra.mrb[122].mxu0 %vm685_vm2, %v2440_v34 }
 0x111   : > { %v15342_v4 = vpop.f32.mrb[18].mxu1  ;;  %12415 = vmatprep.mubr.msk.f32.mxu0 %vm14537_vm1, %v20167_v2 }
 0x112   : > { %20179 = vst [vmem:[#allocation14_spill] sm:$0xff] %v15342_v4  ;;  %v11983_v36 = vpop.f32.mrb[19].mxu1  ;;  %12143 = vmatmul.mubr.msk.f32.gmra.mrb[124].mxu1 %vm685_vm2, %v639_v44  ;;  %v15351_v32 = vpop.f32.mrb[18].mxu0  ;;  %v2442_v4 = vld [vmem:[%s14670_s3 + $0x3b] sm:$0xff] }
 0x113   : > { %12145 = vmatprep.mubr.msk.f32.mxu1 %vm14537_vm1, %v20167_v2  ;;  %v11932_v52 = vpop.f32.mrb[19].mxu0  ;;  %v641_v44 = vld [vmem:[%s14670_s3 + $0x140] sm:$0xf] }
 0x114   : > { %12416 = vmatmul.mubr.msk.f32.gmra.mrb[124].mxu0 %vm685_vm2, %v2441_v22  ;;  %v2443_v52 = vld [vmem:[%s14670_s3 + $0x43] sm:$0xff] }
 0x115   : > { %v15354_v34 = vpop.f32.mrb[20].mxu1  ;;  %12418 = vmatprep.mubr.msk.f32.mxu0 %vm14537_vm1, %v20167_v2 }
 0x116   : > { %20180 = vst [vmem:[#allocation15_spill] sm:$0xff] %v15354_v34  ;;  %v11986_v28 = vpop.f32.mrb[21].mxu1  ;;  %12146 = vmatmul.mubr.msk.f32.gmra.mrb[126].mxu1 %vm685_vm2, %v640_v10  ;;  %v15363_v36 = vpop.f32.mrb[20].mxu0 }
 0x117   : > { %12148 = vmatprep.mubr.msk.f32.mxu1 %vm14537_vm1, %v20167_v2  ;;  %v11935_v20 = vpop.f32.mrb[21].mxu0 }
 0x118   : > { %12419 = vmatmul.mubr.msk.f32.gmra.mrb[126].mxu0 %vm685_vm2, %v2442_v4  ;;  %v2957_v20 = vld [vmem:[%s20173_s2 + $0xf] sm:$0x7] }
 0x119   : > { %v15366_v22 = vpop.f32.mrb[22].mxu1  ;;  %12421 = vmatprep.mubr.msk.f32.mxu0 %vm14537_vm1, %v20167_v2 }
 0x11a   : > { %20181 = vst [vmem:[#allocation16_spill] sm:$0xff] %v15366_v22  ;;  %v11989_v34 = vpop.f32.mrb[23].mxu1  ;;  %12149 = vmatmul.mubr.msk.f32.gmra.mrb[128].mxu1 %vm685_vm2, %v641_v44  ;;  %v15374_v28 = vpop.f32.mrb[22].mxu0 }
 0x11b   : > { %12278 = vmatprep.mubr.msk.f32.mxu1 %vm14537_vm1, %v20167_v2  ;;  %v11938_v10 = vpop.f32.mrb[23].mxu0  ;;  %v2444_v34 = vld [vmem:[%s14670_s3 + $0x4b] sm:$0xff] }
 0x11c   : > { %12422 = vmatmul.mubr.msk.f32.gmra.mrb[128].mxu0 %vm685_vm2, %v2443_v52 }
 0x11d   : > { %v15380_v4 = vpop.f32.mrb[24].mxu1  ;;  %12424 = vmatprep.mubr.msk.f32.mxu0 %vm14537_vm1, %v20167_v2 }
 0x11e   : > { %20182 = vst [vmem:[#allocation17_spill] sm:$0xff] %v15380_v4  ;;  %v11992_v44 = vpop.f32.mrb[25].mxu1  ;;  %12279 = vmatmul.mubr.msk.f32.vlgmr.msra.gmra.mrb[130].mxu1 %vm685_vm2, %v14839_v45  ;;  %v15389_v10 = vpop.f32.mrb[24].mxu0 }
 0x11f   : > { %12281 = vmatprep.mubr.msk.f32.mxu1 %vm14537_vm1, %v20167_v2  ;;  %12527 = vmatpush3.msk.msra.mxu1 %vm809_vm0, %v2957_v20  ;;  %v11941_v52 = vpop.f32.mrb[25].mxu0  ;;  %v2445_v44 = vld [vmem:[%s14670_s3 + $0x53] sm:$0xff] }
 0x120   : > { %12425 = vmatmul.mubr.msk.f32.gmra.mrb[130].mxu0 %vm685_vm2, %v2444_v34  ;;  %12776 = vmatprep.subr.mxu1 %v20167_v2 }
 0x121   : > { %v15394_v4 = vpop.f32.mrb[26].mxu1  ;;  %12427 = vmatprep.mubr.msk.f32.mxu0 %vm14537_vm1, %v20167_v2 }
 0x122   : > { %20183 = vst [vmem:[#allocation18_spill] sm:$0xff] %v15394_v4  ;;  %v11995_v45 = vpop.f32.mrb[27].mxu1  ;;  %12282 = vmatmul.mubr.msk.f32.gmra.mrb[132].mxu1 %vm685_vm2, %v14852_v47  ;;  %v15403_v20 = vpop.f32.mrb[26].mxu0  ;;  %v2446_v4 = vld [vmem:[%s14670_s3 + $0x5b] sm:$0xff] }
 0x123   : > { %12284 = vmatprep.mubr.msk.f32.mxu1 %vm14537_vm1, %v20167_v2  ;;  %v11944_v52 = vpop.f32.mrb[27].mxu0 }
 0x124   : > { %12428 = vmatmul.mubr.msk.f32.gmra.mrb[132].mxu0 %vm685_vm2, %v2445_v44  ;;  %v2447_v52 = vld [vmem:[%s14670_s3 + $0x63] sm:$0xff] }
 0x125   : > { %v15406_v34 = vpop.f32.mrb[28].mxu1  ;;  %12430 = vmatprep.mubr.msk.f32.mxu0 %vm14537_vm1, %v20167_v2 }
 0x126   : > { %20184 = vst [vmem:[#allocation19_spill] sm:$0xff] %v15406_v34  ;;  %v11998_v22 = vpop.f32.mrb[29].mxu1  ;;  %12285 = vmatmul.mubr.msk.f32.gmra.mrb[134].mxu1 %vm685_vm2, %v14863_v49  ;;  %v15415_v47 = vpop.f32.mrb[28].mxu0 }
 0x127   : > { %12287 = vmatprep.mubr.msk.f32.mxu1 %vm14537_vm1, %v20167_v2  ;;  %v11947_v45 = vpop.f32.mrb[29].mxu0 }
 0x128   : > { %12431 = vmatmul.mubr.msk.f32.gmra.mrb[134].mxu0 %vm685_vm2, %v2446_v4  ;;  %v2448_v45 = vld [vmem:[%s14670_s3 + $0x6b] sm:$0xff] }
 0x129   : > { %v15418_v44 = vpop.f32.mrb[30].mxu1  ;;  %12433 = vmatprep.mubr.msk.f32.mxu0 %vm14537_vm1, %v20167_v2 }
 0x12a   : > { %20185 = vst [vmem:[#allocation20_spill] sm:$0xff] %v15418_v44  ;;  %v12001_v34 = vpop.f32.mrb[31].mxu1  ;;  %12288 = vmatmul.mubr.msk.f32.gmra.mrb[136].mxu1 %vm685_vm2, %v14874_v51  ;;  %v15427_v49 = vpop.f32.mrb[30].mxu0 }
 0x12b   : > { %12290 = vmatprep.mubr.msk.f32.mxu1 %vm14537_vm1, %v20167_v2  ;;  %v11950_v22 = vpop.f32.mrb[31].mxu0 }
 0x12c   : > { %12434 = vmatmul.mubr.msk.f32.gmra.mrb[136].mxu0 %vm685_vm2, %v2447_v52  ;;  %v2449_v22 = vld [vmem:[%s14670_s3 + $0x73] sm:$0xff] }
 0x12d   : > { %v15430_v4 = vpop.f32.mrb[32].mxu1  ;;  %12436 = vmatprep.mubr.msk.f32.mxu0 %vm14537_vm1, %v20167_v2 }
 0x12e   : > { %20186 = vst [vmem:[#allocation21_spill] sm:$0xff] %v15430_v4  ;;  %v12004_v44 = vpop.f32.mrb[33].mxu1  ;;  %12291 = vmatmul.mubr.msk.f32.gmra.mrb[138].mxu1 %vm685_vm2, %v14885_v53  ;;  %v15439_v51 = vpop.f32.mrb[32].mxu0 }
 0x12f   : > { %12293 = vmatprep.mubr.msk.f32.mxu1 %vm14537_vm1, %v20167_v2  ;;  %v11953_v34 = vpop.f32.mrb[33].mxu0 }
 0x130   : > { %12437 = vmatmul.mubr.msk.f32.gmra.mrb[138].mxu0 %vm685_vm2, %v2448_v45  ;;  %v2450_v34 = vld [vmem:[%s14670_s3 + $0x7b] sm:$0xff] }
 0x131   : > { %v15442_v52 = vpop.f32.mrb[34].mxu1  ;;  %12439 = vmatprep.mubr.msk.f32.mxu0 %vm14537_vm1, %v20167_v2 }
 0x132   : > { %20187 = vst [vmem:[#allocation22_spill] sm:$0xff] %v15442_v52  ;;  %v12007_v4 = vpop.f32.mrb[35].mxu1  ;;  %12294 = vmatmul.mubr.msk.f32.gmra.mrb[140].mxu1 %vm685_vm2, %v14899_v56  ;;  %v15451_v53 = vpop.f32.mrb[34].mxu0 }
 0x133   : > { %12296 = vmatprep.mubr.msk.f32.mxu1 %vm14537_vm1, %v20167_v2  ;;  %v12155_v44 = vpop.f32.mrb[35].mxu0 }
 0x134   : > { %12440 = vmatmul.mubr.msk.f32.gmra.mrb[140].mxu0 %vm685_vm2, %v2449_v22  ;;  %v2451_v44 = vld [vmem:[%s14670_s3 + $0x83] sm:$0xff] }
 0x135   : > { %v15454_v45 = vpop.f32.mrb[36].mxu1  ;;  %12442 = vmatprep.mubr.msk.f32.mxu0 %vm14537_vm1, %v20167_v2 }
 0x136   : > { %20188 = vst [vmem:[#allocation23_spill] sm:$0xff] %v15454_v45  ;;  %v12010_v52 = vpop.f32.mrb[37].mxu1  ;;  %12297 = vmatmul.mubr.msk.f32.gmra.mrb[142].mxu1 %vm685_vm2, %v14912_v58  ;;  %v15463_v56 = vpop.f32.mrb[36].mxu0 }
 0x137   : > { %12299 = vmatprep.mubr.msk.f32.mxu1 %vm14537_vm1, %v20167_v2  ;;  %v12158_v4 = vpop.f32.mrb[37].mxu0 }
 0x138   : > { %12443 = vmatmul.mubr.msk.f32.gmra.mrb[142].mxu0 %vm685_vm2, %v2450_v34  ;;  %v2452_v4 = vld [vmem:[%s14670_s3 + $0x8b] sm:$0xff] }
 0x139   : > { %v15466_v22 = vpop.f32.mrb[38].mxu1  ;;  %12445 = vmatprep.mubr.msk.f32.mxu0 %vm14537_vm1, %v20167_v2 }
 0x13a   : > { %20189 = vst [vmem:[#allocation24_spill] sm:$0xff] %v15466_v22  ;;  %v12013_v45 = vpop.f32.mrb[39].mxu1  ;;  %12300 = vmatmul.mubr.msk.f32.gmra.mrb[144].mxu1 %vm685_vm2, %v14923_v60  ;;  %v15475_v58 = vpop.f32.mrb[38].mxu0 }
 0x13b   : > { %12302 = vmatprep.mubr.msk.f32.mxu1 %vm14537_vm1, %v20167_v2  ;;  %v12161_v52 = vpop.f32.mrb[39].mxu0 }
 0x13c   : > { %12446 = vmatmul.mubr.msk.f32.gmra.mrb[144].mxu0 %vm685_vm2, %v2451_v44  ;;  %v2453_v52 = vld [vmem:[%s14670_s3 + $0x93] sm:$0xff] }
 0x13d   : > { %v15478_v34 = vpop.f32.mrb[40].mxu1  ;;  %12448 = vmatprep.mubr.msk.f32.mxu0 %vm14537_vm1, %v20167_v2 }
 0x13e   : > { %20190 = vst [vmem:[#allocation25_spill] sm:$0xff] %v15478_v34  ;;  %v12016_v22 = vpop.f32.mrb[41].mxu1  ;;  %12303 = vmatmul.mubr.msk.f32.gmra.mrb[146].mxu1 %vm685_vm2, %v14934_v62  ;;  %v15487_v60 = vpop.f32.mrb[40].mxu0 }
 0x13f   : > { %12305 = vmatprep.mubr.msk.f32.mxu1 %vm14537_vm1, %v20167_v2  ;;  %v12164_v45 = vpop.f32.mrb[41].mxu0 }
 0x140   : > { %12449 = vmatmul.mubr.msk.f32.gmra.mrb[146].mxu0 %vm685_vm2, %v2452_v4  ;;  %v2454_v45 = vld [vmem:[%s14670_s3 + $0x9b] sm:$0xff] }
 0x141   : > { %v15490_v44 = vpop.f32.mrb[42].mxu1  ;;  %12451 = vmatprep.mubr.msk.f32.mxu0 %vm14537_vm1, %v20167_v2 }
 0x142   : > { %20191 = vst [vmem:[#allocation26_spill] sm:$0xff] %v15490_v44  ;;  %v12019_v34 = vpop.f32.mrb[43].mxu1  ;;  %12306 = vmatmul.mubr.msk.f32.gmra.mrb[148].mxu1 %vm685_vm2, %v14945_v0  ;;  %v15499_v62 = vpop.f32.mrb[42].mxu0 }
 0x143   : > { %12308 = vmatprep.mubr.msk.f32.mxu1 %vm14537_vm1, %v20167_v2  ;;  %v12167_v22 = vpop.f32.mrb[43].mxu0 }
 0x144   : > { %12452 = vmatmul.mubr.msk.f32.gmra.mrb[148].mxu0 %vm685_vm2, %v2453_v52  ;;  %v2455_v22 = vld [vmem:[%s14670_s3 + $0xa3] sm:$0xff] }
 0x145   : > { %v15502_v4 = vpop.f32.mrb[44].mxu1  ;;  %12454 = vmatprep.mubr.msk.f32.mxu0 %vm14537_vm1, %v20167_v2 }
 0x146   : > { %20192 = vst [vmem:[#allocation27_spill] sm:$0xff] %v15502_v4  ;;  %v12022_v44 = vpop.f32.mrb[45].mxu1  ;;  %12309 = vmatmul.mubr.msk.f32.gmra.mrb[150].mxu1 %vm685_vm2, %v14956_v3  ;;  %v15511_v0 = vpop.f32.mrb[44].mxu0 }
 0x147   : > { %12311 = vmatprep.mubr.msk.f32.mxu1 %vm14537_vm1, %v20167_v2  ;;  %v12170_v34 = vpop.f32.mrb[45].mxu0 }
 0x148   : > { %12455 = vmatmul.mubr.msk.f32.gmra.mrb[150].mxu0 %vm685_vm2, %v2454_v45  ;;  %v2456_v34 = vld [vmem:[%s14670_s3 + $0xab] sm:$0xff] }
 0x149   : > { %v15514_v52 = vpop.f32.mrb[46].mxu1  ;;  %12457 = vmatprep.mubr.msk.f32.mxu0 %vm14537_vm1, %v20167_v2 }
 0x14a   : > { %20193 = vst [vmem:[#allocation28_spill] sm:$0xff] %v15514_v52  ;;  %v12025_v4 = vpop.f32.mrb[47].mxu1  ;;  %12312 = vmatmul.mubr.msk.f32.gmra.mrb[152].mxu1 %vm685_vm2, %v14967_v5  ;;  %v15523_v3 = vpop.f32.mrb[46].mxu0 }
 0x14b   : > { %12314 = vmatprep.mubr.msk.f32.mxu1 %vm14537_vm1, %v20167_v2  ;;  %v12173_v44 = vpop.f32.mrb[47].mxu0 }
 0x14c   : > { %12458 = vmatmul.mubr.msk.f32.gmra.mrb[152].mxu0 %vm685_vm2, %v2455_v22 }
 0x14d   : > { %v1275_v45 = vpop.f32.mrb[48].mxu1  ;;  %12460 = vmatprep.mubr.msk.f32.mxu0 %vm14537_vm1, %v20167_v2 }
 0x14e   : > { %v1276_v52 = vadd.f32 %v1275_v45, %v15228_v1  ;;  %v12030_v4 = vpop.f32.mrb[49].mxu1  ;;  %12315 = vmatmul.mubr.msk.f32.gmra.mrb[154].mxu1 %vm685_vm2, %v14978_v7  ;;  %v2457_v1 = vld [vmem:[%s14670_s3 + $0xb3] sm:$0xff] }
 0x14f   : > { %12317 = vmatprep.mubr.msk.f32.mxu1 %vm14537_vm1, %v20167_v2  ;;  %v15534_v5 = vpop.f32.mrb[48].mxu0 }
 0x150   : > { %v15537_v44 = vadd.f32 %v15451_v53, %v1276_v52  ;;  %v12176_v22 = vpop.f32.mrb[49].mxu0  ;;  %12461 = vmatmul.mubr.msk.f32.gmra.mrb[154].mxu0 %vm685_vm2, %v2456_v34 }
 0x151   : > { %v1280_v48 = vpop.f32.mrb[50].mxu1  ;;  %12463 = vmatprep.mubr.msk.f32.mxu0 %vm14537_vm1, %v20167_v2 }
 0x152   : > { %v1281_v45 = vadd.f32 %v1280_v48, %v15243_v14  ;;  %v12033_v7 = vpop.f32.mrb[51].mxu1  ;;  %12318 = vmatmul.mubr.msk.f32.gmra.mrb[156].mxu1 %vm685_vm2, %v14989_v9  ;;  %v2458_v14 = vld [vmem:[%s14670_s3 + $0xbb] sm:$0xff] }
 0x153   : > { %12320 = vmatprep.mubr.msk.f32.mxu1 %vm14537_vm1, %v20167_v2  ;;  %v15548_v53 = vpop.f32.mrb[50].mxu0 }
 0x154   : > { %v15551_v52 = vadd.f32 %v15463_v56, %v1281_v45  ;;  %v12179_v34 = vpop.f32.mrb[51].mxu0  ;;  %12464 = vmatmul.mubr.msk.f32.gmra.mrb[156].mxu0 %vm685_vm2, %v2457_v1 }
 0x155   : > { %v1285_v4 = vpop.f32.mrb[52].mxu1  ;;  %12466 = vmatprep.mubr.msk.f32.mxu0 %vm14537_vm1, %v20167_v2 }
 0x156   : > { %v1286_v48 = vadd.f32 %v1285_v4, %v15258_v26  ;;  %v12036_v9 = vpop.f32.mrb[53].mxu1  ;;  %12321 = vmatmul.mubr.msk.f32.gmra.mrb[158].mxu1 %vm685_vm2, %v15000_v11  ;;  %v2459_v26 = vld [vmem:[%s14670_s3 + $0xc3] sm:$0xff] }
 0x157   : > { %12323 = vmatprep.mubr.msk.f32.mxu1 %vm14537_vm1, %v20167_v2  ;;  %v15562_v56 = vpop.f32.mrb[52].mxu0 }
 0x158   : > { %v15565_v22 = vadd.f32 %v15475_v58, %v1286_v48  ;;  %v12182_v1 = vpop.f32.mrb[53].mxu0  ;;  %12467 = vmatmul.mubr.msk.f32.gmra.mrb[158].mxu0 %vm685_vm2, %v2458_v14 }
 0x159   : > { %v1290_v45 = vpop.f32.mrb[54].mxu1  ;;  %12469 = vmatprep.mubr.msk.f32.mxu0 %vm14537_vm1, %v20167_v2 }
 0x15a   : > { %v1291_v7 = vadd.f32 %v1290_v45, %v15273_v38  ;;  %v12039_v11 = vpop.f32.mrb[55].mxu1  ;;  %12324 = vmatmul.mubr.msk.f32.gmra.mrb[160].mxu1 %vm685_vm2, %v15011_v13  ;;  %v2460_v38 = vld [vmem:[%s14670_s3 + $0xcb] sm:$0xff] }
 0x15b   : > { %12326 = vmatprep.mubr.msk.f32.mxu1 %vm14537_vm1, %v20167_v2  ;;  %v15576_v58 = vpop.f32.mrb[54].mxu0 }
 0x15c   : > { %v15579_v34 = vadd.f32 %v15487_v60, %v1291_v7  ;;  %v12185_v4 = vpop.f32.mrb[55].mxu0  ;;  %12470 = vmatmul.mubr.msk.f32.gmra.mrb[160].mxu0 %vm685_vm2, %v2459_v26 }
 0x15d   : > { %v1295_v14 = vpop.f32.mrb[56].mxu1  ;;  %12472 = vmatprep.mubr.msk.f32.mxu0 %vm14537_vm1, %v20167_v2 }
 0x15e   : > { %v1296_v48 = vadd.f32 %v1295_v14, %v15286_v55  ;;  %v12042_v13 = vpop.f32.mrb[57].mxu1  ;;  %12327 = vmatmul.mubr.msk.f32.gmra.mrb[162].mxu1 %vm685_vm2, %v15022_v15  ;;  %v2461_v55 = vld [vmem:[%s14670_s3 + $0xd3] sm:$0xff] }
 0x15f   : > { %12329 = vmatprep.mubr.msk.f32.mxu1 %vm14537_vm1, %v20167_v2  ;;  %v15590_v60 = vpop.f32.mrb[56].mxu0 }
 0x160   : > { %v15593_v9 = vadd.f32 %v15499_v62, %v1296_v48  ;;  %v12188_v1 = vpop.f32.mrb[57].mxu0  ;;  %12473 = vmatmul.mubr.msk.f32.gmra.mrb[162].mxu0 %vm685_vm2, %v2460_v38 }
 0x161   : > { %v1300_v45 = vpop.f32.mrb[58].mxu1  ;;  %12475 = vmatprep.mubr.msk.f32.mxu0 %vm14537_vm1, %v20167_v2 }
 0x162   : > { %v1301_v26 = vadd.f32 %v1300_v45, %v15298_v16  ;;  %v12045_v15 = vpop.f32.mrb[59].mxu1  ;;  %12330 = vmatmul.mubr.msk.f32.gmra.mrb[164].mxu1 %vm685_vm2, %v15033_v17  ;;  %v2462_v16 = vld [vmem:[%s14670_s3 + $0xdb] sm:$0xff] }
 0x163   : > { %12332 = vmatprep.mubr.msk.f32.mxu1 %vm14537_vm1, %v20167_v2  ;;  %v15604_v62 = vpop.f32.mrb[58].mxu0 }
 0x164   : > { %v15607_v7 = vadd.f32 %v15511_v0, %v1301_v26  ;;  %v12191_v11 = vpop.f32.mrb[59].mxu0  ;;  %12476 = vmatmul.mubr.msk.f32.gmra.mrb[164].mxu0 %vm685_vm2, %v2461_v55 }
 0x165   : > { %v1305_v4 = vpop.f32.mrb[60].mxu1  ;;  %12478 = vmatprep.mubr.msk.f32.mxu0 %vm14537_vm1, %v20167_v2 }
 0x166   : > { %v1306_v14 = vadd.f32 %v1305_v4, %v15310_v40  ;;  %v12048_v17 = vpop.f32.mrb[61].mxu1  ;;  %12333 = vmatmul.mubr.msk.f32.gmra.mrb[166].mxu1 %vm685_vm2, %v15044_v19  ;;  %v2463_v40 = vld [vmem:[%s14670_s3 + $0xe3] sm:$0xff] }
 0x167   : > { %12335 = vmatprep.mubr.msk.f32.mxu1 %vm14537_vm1, %v20167_v2  ;;  %v15618_v0 = vpop.f32.mrb[60].mxu0 }
 0x168   : > { %v15621_v38 = vadd.f32 %v15523_v3, %v1306_v14  ;;  %v12194_v48 = vpop.f32.mrb[61].mxu0  ;;  %12479 = vmatmul.mubr.msk.f32.gmra.mrb[166].mxu0 %vm685_vm2, %v2462_v16 }
 0x169   : > { %v1310_v13 = vpop.f32.mrb[62].mxu1  ;;  %12481 = vmatprep.mubr.msk.f32.mxu0 %vm14537_vm1, %v20167_v2 }
 0x16a   : > { %v1311_v1 = vadd.f32 %v1310_v13, %v15325_v12  ;;  %v12051_v19 = vpop.f32.mrb[63].mxu1  ;;  %12336 = vmatmul.mubr.msk.f32.gmra.mrb[168].mxu1 %vm685_vm2, %v15055_v21  ;;  %v2464_v12 = vld [vmem:[%s14670_s3 + $0xeb] sm:$0xff] }
 0x16b   : > { %12338 = vmatprep.mubr.msk.f32.mxu1 %vm14537_vm1, %v20167_v2  ;;  %v15632_v3 = vpop.f32.mrb[62].mxu0 }
 0x16c   : > { %v15635_v45 = vadd.f32 %v15534_v5, %v1311_v1  ;;  %v12197_v55 = vpop.f32.mrb[63].mxu0  ;;  %12482 = vmatmul.mubr.msk.f32.gmra.mrb[168].mxu0 %vm685_vm2, %v2463_v40 }
 0x16d   : > { %v1315_v26 = vpop.f32.mrb[64].mxu1  ;;  %12484 = vmatprep.mubr.msk.f32.mxu0 %vm14537_vm1, %v20167_v2 }
 0x16e   : > { %v1316_v15 = vadd.f32 %v1315_v26, %v15339_v61  ;;  %v12054_v21 = vpop.f32.mrb[65].mxu1  ;;  %12339 = vmatmul.mubr.msk.f32.gmra.mrb[170].mxu1 %vm685_vm2, %v15066_v23  ;;  %v2465_v61 = vld [vmem:[%s14670_s3 + $0xf3] sm:$0xff] }
 0x16f   : > { %12341 = vmatprep.mubr.msk.f32.mxu1 %vm14537_vm1, %v20167_v2  ;;  %v15646_v5 = vpop.f32.mrb[64].mxu0 }
 0x170   : > { %v15649_v11 = vadd.f32 %v15548_v53, %v1316_v15  ;;  %v12200_v4 = vpop.f32.mrb[65].mxu0  ;;  %12485 = vmatmul.mubr.msk.f32.gmra.mrb[170].mxu0 %vm685_vm2, %v2464_v12 }
 0x171   : > { %v1320_v16 = vpop.f32.mrb[66].mxu1  ;;  %12487 = vmatprep.mubr.msk.f32.mxu0 %vm14537_vm1, %v20167_v2 }
 0x172   : > { %v1321_v14 = vadd.f32 %v1320_v16, %v15351_v32  ;;  %v12057_v23 = vpop.f32.mrb[67].mxu1  ;;  %12342 = vmatmul.mubr.msk.f32.gmra.mrb[172].mxu1 %vm685_vm2, %v15077_v25  ;;  %v2466_v32 = vld [vmem:[%s14670_s3 + $0xfb] sm:$0xff] }
 0x173   : > { %12344 = vmatprep.mubr.msk.f32.mxu1 %vm14537_vm1, %v20167_v2  ;;  %v15660_v53 = vpop.f32.mrb[66].mxu0 }
 0x174   : > { %v15663_v17 = vadd.f32 %v15562_v56, %v1321_v14  ;;  %v12203_v48 = vpop.f32.mrb[67].mxu0  ;;  %12488 = vmatmul.mubr.msk.f32.gmra.mrb[172].mxu0 %vm685_vm2, %v2465_v61 }
 0x175   : > { %v1325_v13 = vpop.f32.mrb[68].mxu1  ;;  %12490 = vmatprep.mubr.msk.f32.mxu0 %vm14537_vm1, %v20167_v2 }
 0x176   : > { %v1326_v40 = vadd.f32 %v1325_v13, %v15363_v36  ;;  %v12060_v25 = vpop.f32.mrb[69].mxu1  ;;  %12345 = vmatmul.mubr.msk.f32.gmra.mrb[174].mxu1 %vm685_vm2, %v15088_v27  ;;  %v2467_v36 = vld [vmem:[%s14670_s3 + $0x103] sm:$0xff] }
 0x177   : > { %12347 = vmatprep.mubr.msk.f32.mxu1 %vm14537_vm1, %v20167_v2  ;;  %v15674_v56 = vpop.f32.mrb[68].mxu0 }
 0x178   : > { %v15677_v1 = vadd.f32 %v15576_v58, %v1326_v40  ;;  %v12206_v19 = vpop.f32.mrb[69].mxu0  ;;  %12491 = vmatmul.mubr.msk.f32.gmra.mrb[174].mxu0 %vm685_vm2, %v2466_v32 }
 0x179   : > { %v1330_v55 = vpop.f32.mrb[70].mxu1  ;;  %12493 = vmatprep.mubr.msk.f32.mxu0 %vm14537_vm1, %v20167_v2 }
 0x17a   : > { %v1331_v26 = vadd.f32 %v1330_v55, %v15374_v28  ;;  %v12063_v27 = vpop.f32.mrb[71].mxu1  ;;  %12348 = vmatmul.mubr.msk.f32.gmra.mrb[176].mxu1 %vm685_vm2, %v15099_v29  ;;  %v2468_v28 = vld [vmem:[%s14670_s3 + $0x10b] sm:$0xff] }
 0x17b   : > { %12350 = vmatprep.mubr.msk.f32.mxu1 %vm14537_vm1, %v20167_v2  ;;  %v15688_v58 = vpop.f32.mrb[70].mxu0 }
 0x17c   : > { %v15691_v12 = vadd.f32 %v15590_v60, %v1331_v26  ;;  %v12209_v15 = vpop.f32.mrb[71].mxu0  ;;  %12494 = vmatmul.mubr.msk.f32.gmra.mrb[176].mxu0 %vm685_vm2, %v2467_v36 }
 0x17d   : > { %v1335_v21 = vpop.f32.mrb[72].mxu1  ;;  %12496 = vmatprep.mubr.msk.f32.mxu0 %vm14537_vm1, %v20167_v2 }
 0x17e   : > { %v1336_v4 = vadd.f32 %v1335_v21, %v15389_v10  ;;  %v12066_v29 = vpop.f32.mrb[73].mxu1  ;;  %12351 = vmatmul.mubr.msk.f32.gmra.mrb[178].mxu1 %vm685_vm2, %v15110_v31  ;;  %v2469_v10 = vld [vmem:[%s14670_s3 + $0x113] sm:$0xff] }
 0x17f   : > { %12353 = vmatprep.mubr.msk.f32.mxu1 %vm14537_vm1, %v20167_v2  ;;  %v15702_v60 = vpop.f32.mrb[72].mxu0 }
 0x180   : > { %v15705_v16 = vadd.f32 %v15604_v62, %v1336_v4  ;;  %v12212_v61 = vpop.f32.mrb[73].mxu0  ;;  %12497 = vmatmul.mubr.msk.f32.gmra.mrb[178].mxu0 %vm685_vm2, %v2468_v28 }
 0x181   : > { %v1340_v14 = vpop.f32.mrb[74].mxu1  ;;  %12499 = vmatprep.mubr.msk.f32.mxu0 %vm14537_vm1, %v20167_v2 }
 0x182   : > { %v1341_v23 = vadd.f32 %v1340_v14, %v15403_v20  ;;  %v12069_v31 = vpop.f32.mrb[75].mxu1  ;;  %12354 = vmatmul.mubr.msk.f32.gmra.mrb[180].mxu1 %vm685_vm2, %v15121_v33  ;;  %v2470_v20 = vld [vmem:[%s14670_s3 + $0x11b] sm:$0xff] }
 0x183   : > { %12356 = vmatprep.mubr.msk.f32.mxu1 %vm14537_vm1, %v20167_v2  ;;  %v15716_v62 = vpop.f32.mrb[74].mxu0 }
 0x184   : > { %v15719_v48 = vadd.f32 %v15618_v0, %v1341_v23  ;;  %v12215_v13 = vpop.f32.mrb[75].mxu0  ;;  %12500 = vmatmul.mubr.msk.f32.gmra.mrb[180].mxu0 %vm685_vm2, %v2469_v10 }
 0x185   : > { %v1345_v32 = vpop.f32.mrb[76].mxu1  ;;  %12502 = vmatprep.mubr.msk.f32.mxu0 %vm14537_vm1, %v20167_v2 }
 0x186   : > { %v1346_v40 = vadd.f32 %v1345_v32, %v15415_v47  ;;  %v12072_v33 = vpop.f32.mrb[77].mxu1  ;;  %12357 = vmatmul.mubr.msk.f32.gmra.mrb[182].mxu1 %vm685_vm2, %v15132_v35  ;;  %v2471_v47 = vld [vmem:[%s14670_s3 + $0x123] sm:$0xff] }
 0x187   : > { %12359 = vmatprep.mubr.msk.f32.mxu1 %vm14537_vm1, %v20167_v2  ;;  %v15730_v0 = vpop.f32.mrb[76].mxu0 }
 0x188   : > { %v15733_v25 = vadd.f32 %v15632_v3, %v1346_v40  ;;  %v12218_v19 = vpop.f32.mrb[77].mxu0  ;;  %12503 = vmatmul.mubr.msk.f32.gmra.mrb[182].mxu0 %vm685_vm2, %v2470_v20 }
 0x189   : > { %v1350_v55 = vpop.f32.mrb[78].mxu1  ;;  %12505 = vmatprep.mubr.msk.f32.mxu0 %vm14537_vm1, %v20167_v2 }
 0x18a   : > { %v1351_v36 = vadd.f32 %v1350_v55, %v15427_v49  ;;  %v12075_v35 = vpop.f32.mrb[79].mxu1  ;;  %12360 = vmatmul.mubr.msk.f32.gmra.mrb[184].mxu1 %vm685_vm2, %v15143_v37  ;;  %v2472_v49 = vld [vmem:[%s14670_s3 + $0x12b] sm:$0xff] }
 0x18b   : > { %12362 = vmatprep.mubr.msk.f32.mxu1 %vm14537_vm1, %v20167_v2  ;;  %v15744_v3 = vpop.f32.mrb[78].mxu0 }
 0x18c   : > { %v15747_v26 = vadd.f32 %v15646_v5, %v1351_v36  ;;  %v12221_v27 = vpop.f32.mrb[79].mxu0  ;;  %12506 = vmatmul.mubr.msk.f32.gmra.mrb[184].mxu0 %vm685_vm2, %v2471_v47 }
 0x18d   : > { %v1355_v15 = vpop.f32.mrb[80].mxu1  ;;  %12508 = vmatprep.mubr.msk.f32.mxu0 %vm14537_vm1, %v20167_v2 }
 0x18e   : > { %v1356_v21 = vadd.f32 %v1355_v15, %v15439_v51  ;;  %v12078_v37 = vpop.f32.mrb[81].mxu1  ;;  %12363 = vmatmul.mubr.msk.f32.gmra.mrb[186].mxu1 %vm685_vm2, %v15154_v39  ;;  %v2473_v51 = vld [vmem:[%s14670_s3 + $0x133] sm:$0xff] }
 0x18f   : > { %12365 = vmatprep.mubr.msk.f32.mxu1 %vm14537_vm1, %v20167_v2  ;;  %v15758_v5 = vpop.f32.mrb[80].mxu0 }
 0x190   : > { %v15761_v28 = vadd.f32 %v15660_v53, %v1356_v21  ;;  %v12224_v4 = vpop.f32.mrb[81].mxu0  ;;  %12509 = vmatmul.mubr.msk.f32.gmra.mrb[186].mxu0 %vm685_vm2, %v2472_v49 }
 0x191   : > { %v1360_v29 = vpop.f32.mrb[82].mxu1  ;;  %12511 = vmatprep.mubr.msk.f32.mxu0 %vm14537_vm1, %v20167_v2 }
 0x192   : > { %v1361_v61 = vadd.f32 %v1360_v29, %v15217_v57  ;;  %v12081_v39 = vpop.f32.mrb[83].mxu1  ;;  %12366 = vmatmul.mubr.msk.f32.gmra.mrb[188].mxu1 %vm685_vm2, %v15165_v41  ;;  %v2474_v57 = vld [vmem:[%s14670_s3 + $0x13b] sm:$0xff] }
 0x193   : > { %12368 = vmatprep.mubr.msk.f32.mxu1 %vm14537_vm1, %v20167_v2  ;;  %v15772_v53 = vpop.f32.mrb[82].mxu0 }
 0x194   : > { %v15775_v14 = vadd.f32 %v15674_v56, %v1361_v61  ;;  %v12227_v10 = vpop.f32.mrb[83].mxu0  ;;  %12512 = vmatmul.mubr.msk.f32.gmra.mrb[188].mxu0 %vm685_vm2, %v2473_v51 }
 0x195   : > { %v1365_v23 = vpop.f32.mrb[84].mxu1  ;;  %12514 = vmatprep.mubr.msk.f32.mxu0 %vm14537_vm1, %v20167_v2 }
 0x196   : > { %v1366_v31 = vadd.f32 %v1365_v23, %v15232_v6  ;;  %v12084_v41 = vpop.f32.mrb[85].mxu1  ;;  %12369 = vmatmul.mubr.msk.f32.gmra.mrb[190].mxu1 %vm685_vm2, %v15176_v43  ;;  %v2475_v6 = vld [vmem:[%s14670_s3 + $0x143] sm:$0xff] }
 0x197   : > { %12371 = vmatprep.mubr.msk.f32.mxu1 %vm14537_vm1, %v20167_v2  ;;  %v15786_v56 = vpop.f32.mrb[84].mxu0 }
 0x198   : > { %v15789_v13 = vadd.f32 %v15688_v58, %v1366_v31  ;;  %v12230_v32 = vpop.f32.mrb[85].mxu0  ;;  %12515 = vmatmul.mubr.msk.f32.gmra.mrb[190].mxu0 %vm685_vm2, %v2474_v57 }
 0x199   : > { %v1370_v20 = vpop.f32.mrb[86].mxu1  ;;  %12517 = vmatprep.mubr.msk.f32.mxu0 %vm14537_vm1, %v20167_v2  ;;  %v20195_v32 = vld [vmem:[#allocation10_spill] sm:$0xff] }
 0x19a   : > { %v1371_v40 = vadd.f32 %v1370_v20, %v15247_v18  ;;  %v12087_v43 = vpop.f32.mrb[87].mxu1  ;;  %12372 = vmatmul.mubr.msk.f32.gmra.mrb[192].mxu1 %vm685_vm2, %v15187_v46  ;;  %v2476_v18 = vld [vmem:[%s14670_s3 + $0x14b] sm:$0xff] }
 0x19b   : > { %12374 = vmatprep.mubr.msk.f32.mxu1 %vm14537_vm1, %v20167_v2  ;;  %v15800_v58 = vpop.f32.mrb[86].mxu0 }
 0x19c   : > { %v15803_v33 = vadd.f32 %v15702_v60, %v1371_v40  ;;  %v12233_v19 = vpop.f32.mrb[87].mxu0  ;;  %12518 = vmatmul.mubr.msk.f32.gmra.mrb[192].mxu0 %vm685_vm2, %v2475_v6 }
 0x19d   : > { %v1375_v55 = vpop.f32.mrb[88].mxu1  ;;  %12520 = vmatprep.mubr.msk.f32.mxu0 %vm14537_vm1, %v20167_v2  ;;  %v15892_v19 = vld [vmem:[%s14670_s3 + $0x3c] sm:$0xff] }
 0x19e   : > { %v1376_v47 = vadd.f32 %v1375_v55, %v15262_v30  ;;  %v12090_v46 = vpop.f32.mrb[89].mxu1  ;;  %12375 = vmatmul.mubr.msk.f32.gmra.mrb[194].mxu1 %vm685_vm2, %v15198_v50  ;;  %v2477_v30 = vld [vmem:[%s14670_s3 + $0x153] sm:$0xf]  ;;  %v20196_v55 = vld [vmem:[#allocation13_spill] sm:$0xff] }
 0x19f   : > { %12377 = vmatprep.mubr.msk.f32.mxu1 %vm14537_vm1, %v20167_v2  ;;  %v15814_v60 = vpop.f32.mrb[88].mxu0  ;;  %v20197_v46 = vld [vmem:[#allocation11_spill] sm:$0xff] }
 0x1a0   : > { %v15817_v36 = vadd.f32 %v15716_v62, %v1376_v47  ;;  %v12236_v35 = vpop.f32.mrb[89].mxu0  ;;  %12521 = vmatmul.mubr.msk.f32.gmra.mrb[194].mxu0 %vm685_vm2, %v2476_v18 }
 0x1a1   : > { %v1380_v27 = vpop.f32.mrb[90].mxu1  ;;  %12523 = vmatprep.mubr.msk.f32.mxu0 %vm14537_vm1, %v20167_v2 }
 0x1a2   : > { %v1381_v15 = vadd.f32 %v1380_v27, %v15277_v42  ;;  %v12093_v50 = vpop.f32.mrb[91].mxu1  ;;  %12378 = vmatmul.mubr.msk.f32.gmra.mrb[196].mxu1 %vm685_vm2, %v15209_v54  ;;  %v15837_v42 = vld [vmem:[%s14670_s3 + $0x24] sm:$0xff] }
 0x1a3   : > { %12380 = vmatprep.mubr.msk.f32.mxu1 %vm14537_vm1, %v20167_v2  ;;  %v15828_v62 = vpop.f32.mrb[90].mxu0  ;;  %v15910_v50 = vld [vmem:[%s14670_s3 + $0x44] sm:$0xff] }
 0x1a4   : > { %v15831_v49 = vadd.f32 %v15730_v0, %v1381_v15  ;;  %v12239_v21 = vpop.f32.mrb[91].mxu0  ;;  %12524 = vmatmul.mubr.msk.f32.gmra.mrb[196].mxu0 %vm685_vm2, %v2477_v30 }
 0x1a5   : > { %v1385_v37 = vpop.f32.mrb[92].mxu1  ;;  %12653 = vmatprep.mubr.msk.f32.mxu0 %vm14537_vm1, %v20167_v2  ;;  %v20198_v21 = vld [vmem:[#allocation14_spill] sm:$0xff] }
 0x1a6   : > { %v1386_v54 = vadd.f32 %v1385_v37, %v15289_v63  ;;  %v12096_v4 = vpop.f32.mrb[93].mxu1  ;;  %12381 = vmatmul.mubr.msk.f32.gmra.mrb[198].mxu1 %vm685_vm2, %v15222_v59  ;;  %v15854_v63 = vld [vmem:[%s14670_s3 + $0x2c] sm:$0xff] }
 0x1a7   : > { %12383 = vmatprep.mubr.msk.f32.mxu1 %vm14537_vm1, %v20167_v2  ;;  %v15844_v0 = vpop.f32.mrb[92].mxu0 }
 0x1a8   : > { %v15847_v29 = vadd.f32 %v15744_v3, %v1386_v54  ;;  %v12242_v51 = vpop.f32.mrb[93].mxu0  ;;  %12654 = vmatmul.mubr.msk.f32.vlgmr.msra.gmra.mrb[198].mxu0 %vm685_vm2, %v15837_v42 }
 0x1a9   : > { %v1390_v61 = vpop.f32.mrb[94].mxu1  ;;  %12656 = vmatprep.mubr.msk.f32.mxu0 %vm14537_vm1, %v20167_v2 }
 0x1aa   : > { %v1391_v59 = vadd.f32 %v1390_v61, %v15301_v24  ;;  %v12099_v39 = vpop.f32.mrb[95].mxu1  ;;  %12384 = vmatmul.mubr.msk.f32.gmra.mrb[200].mxu1 %vm685_vm2, %v15237_v8  ;;  %v15871_v24 = vld [vmem:[%s14670_s3 + $0x34] sm:$0xff]  ;;  %v20194_v8 = vld [vmem:[#allocation12_spill] sm:$0xff] }
 0x1ab   : > { %12386 = vmatprep.mubr.msk.f32.mxu1 %vm14537_vm1, %v20167_v2  ;;  %v15861_v3 = vpop.f32.mrb[94].mxu0  ;;  %v15927_v39 = vld [vmem:[%s14670_s3 + $0x4c] sm:$0xff] }
 0x1ac   : > { %v15864_v10 = vadd.f32 %v15758_v5, %v1391_v59  ;;  %v12245_v23 = vpop.f32.mrb[95].mxu0  ;;  %12657 = vmatmul.mubr.msk.f32.gmra.mrb[200].mxu0 %vm685_vm2, %v15854_v63  ;;  %v4394_v5 = vld [vmem:[%s20173_s2 + $0x18] sm:$0x7] }
 0x1ad   : > { %v1395_v57 = vpop.f32.mrb[96].mxu1  ;;  %12659 = vmatprep.mubr.msk.f32.mxu0 %vm14537_vm1, %v20167_v2  ;;  %12902 = vmatpush3.msk.msra.mxu0 %vm809_vm0, %v4394_v5  ;;  %v20199_v23 = vld [vmem:[#allocation15_spill] sm:$0xff] }
 0x1ae   : > { %v1396_v31 = vadd.f32 %v1395_v57, %v20194_v8  ;;  %v12102_v41 = vpop.f32.mrb[97].mxu1  ;;  %12387 = vmatmul.mubr.msk.f32.gmra.mrb[202].mxu1 %vm685_vm2, %v20195_v32 }
 0x1af   : > { %12389 = vmatprep.mubr.msk.f32.mxu1 %vm14537_vm1, %v20167_v2  ;;  %v15881_v20 = vpop.f32.mrb[96].mxu0 }
 0x1b0   : > { %v15885_v6 = vadd.f32 %v15772_v53, %v1396_v31  ;;  %v12248_v40 = vpop.f32.mrb[97].mxu0  ;;  %12660 = vmatmul.mubr.msk.f32.gmra.mrb[202].mxu0 %vm685_vm2, %v15871_v24  ;;  %v1996_v53 = vld [vmem:[%s14670_s3 + $0x142] sm:$0xff] }
 0x1b1   : > { %v1400_v43 = vpop.f32.mrb[98].mxu1  ;;  %12662 = vmatprep.mubr.msk.f32.mxu0 %vm14537_vm1, %v20167_v2  ;;  %v15944_v40 = vld [vmem:[%s14670_s3 + $0x54] sm:$0xff] }
 0x1b2   : > { %v1401_v18 = vadd.f32 %v1400_v43, %v20196_v55  ;;  %v12105_v47 = vpop.f32.mrb[99].mxu1  ;;  %12390 = vmatmul.mubr.msk.f32.gmra.mrb[204].mxu1 %vm685_vm2, %v20197_v46  ;;  %v20200_v43 = vld [vmem:[#allocation16_spill] sm:$0xff] }
 0x1b3   : > { %12392 = vmatprep.mubr.msk.f32.mxu1 %vm14537_vm1, %v20167_v2  ;;  %v15900_v35 = vpop.f32.mrb[98].mxu0 }
 0x1b4   : > { %v15903_v27 = vadd.f32 %v15786_v56, %v1401_v18  ;;  %v12251_v30 = vpop.f32.mrb[99].mxu0  ;;  %12663 = vmatmul.mubr.msk.f32.gmra.mrb[204].mxu0 %vm685_vm2, %v15892_v19  ;;  %v1997_v56 = vld [vmem:[%s14670_s3 + $0x14a] sm:$0xff] }
 0x1b5   : > { %v1405_v15 = vpop.f32.mrb[100].mxu1  ;;  %12665 = vmatprep.mubr.msk.f32.mxu0 %vm14537_vm1, %v20167_v2  ;;  %v3915_v30 = vld [vmem:[%s20173_s2 + $0x15] sm:$0x7] }
 0x1b6   : > { %v1406_v37 = vadd.f32 %v1405_v15, %v20198_v21  ;;  %v12108_v54 = vpop.f32.mrb[101].mxu1  ;;  %12393 = vmatmul.mubr.msk.f32.gmra.mrb[206].mxu1 %vm685_vm2, %v1996_v53  ;;  %v15964_v21 = vld [vmem:[%s14670_s3 + $0x5c] sm:$0xff] }
 0x1b7   : > { %12395 = vmatprep.mubr.msk.f32.mxu1 %vm14537_vm1, %v20167_v2  ;;  %v15917_v4 = vpop.f32.mrb[100].mxu0 }
 0x1b8   : > { %v15920_v51 = vadd.f32 %v15800_v58, %v1406_v37  ;;  %v12254_v61 = vpop.f32.mrb[101].mxu0  ;;  %12666 = vmatmul.mubr.msk.f32.gmra.mrb[206].mxu0 %vm685_vm2, %v15910_v50  ;;  %v1998_v58 = vld [vmem:[%s14670_s3 + $0x152] sm:$0xf]  ;;  %v20201_v37 = vld [vmem:[#allocation17_spill] sm:$0xff] }
 0x1b9   : > { %v1410_v59 = vpop.f32.mrb[102].mxu1  ;;  %12668 = vmatprep.mubr.msk.f32.mxu0 %vm14537_vm1, %v20167_v2 }
 0x1ba   : > { %v1411_v57 = vadd.f32 %v1410_v59, %v20199_v23  ;;  %v12111_v8 = vpop.f32.mrb[103].mxu1  ;;  %12396 = vmatmul.mubr.msk.f32.gmra.mrb[208].mxu1 %vm685_vm2, %v1997_v56 }
 0x1bb   : > { %12398 = vmatprep.mubr.msk.f32.mxu1 %vm14537_vm1, %v20167_v2  ;;  %v15934_v31 = vpop.f32.mrb[102].mxu0  ;;  %v15982_v8 = vld [vmem:[%s14670_s3 + $0x64] sm:$0xff] }
 0x1bc   : > { %v15937_v41 = vadd.f32 %v15814_v60, %v1411_v57  ;;  %v12257_v32 = vpop.f32.mrb[103].mxu0  ;;  %12669 = vmatmul.mubr.msk.f32.gmra.mrb[208].mxu0 %vm685_vm2, %v15927_v39  ;;  %v2916_v60 = vld [vmem:[%s14670_s3 + $0x14] sm:$0xff] }
 0x1bd   : > { %v1415_v5 = vpop.f32.mrb[104].mxu1  ;;  %12671 = vmatprep.mubr.msk.f32.mxu0 %vm14537_vm1, %v20167_v2 }
 0x1be   : > { %v1416_v55 = vadd.f32 %v1415_v5, %v20200_v43  ;;  %v12114_v18 = vpop.f32.mrb[105].mxu1  ;;  %12399 = vmatmul.mubr.msk.f32.gmra.mrb[210].mxu1 %vm685_vm2, %v1998_v58  ;;  %v20202_v58 = vld [vmem:[#allocation18_spill] sm:$0xff] }
 0x1bf   : > { %12528 = vmatprep.mubr.msk.f32.mxu1 %vm14537_vm1, %v20167_v2  ;;  %v15951_v47 = vpop.f32.mrb[104].mxu0 }
 0x1c0   : > { %v15954_v46 = vadd.f32 %v15828_v62, %v1416_v55  ;;  %v12260_v53 = vpop.f32.mrb[105].mxu0  ;;  %12672 = vmatmul.mubr.msk.f32.gmra.mrb[210].mxu0 %vm685_vm2, %v15944_v40  ;;  %v2917_v62 = vld [vmem:[%s14670_s3 + $0x1c] sm:$0xff] }
 0x1c1   : > { %v1420_v15 = vpop.f32.mrb[106].mxu1  ;;  %12674 = vmatprep.mubr.msk.f32.mxu0 %vm14537_vm1, %v20167_v2  ;;  %v20203_v53 = vld [vmem:[#allocation19_spill] sm:$0xff] }
 0x1c2   : > { %v1421_v54 = vadd.f32 %v1420_v15, %v20201_v37  ;;  %v12117_v56 = vpop.f32.mrb[107].mxu1  ;;  %12529 = vmatmul.mubr.msk.f32.vlgmr.msra.gmra.mrb[212].mxu1 %vm685_vm2, %v2916_v60  ;;  %v15998_v60 = vld [vmem:[%s14670_s3 + $0x6c] sm:$0xff] }
 0x1c3   : > { %12531 = vmatprep.mubr.msk.f32.mxu1 %vm14537_vm1, %v20167_v2  ;;  %v15971_v61 = vpop.f32.mrb[106].mxu0  ;;  %12777 = vmatpush3.msk.msra.mxu1 %vm809_vm0, %v3915_v30 }
 0x1c4   : > { %v15975_v59 = vadd.f32 %v15844_v0, %v1421_v54  ;;  %v12263_v23 = vpop.f32.mrb[107].mxu0  ;;  %12675 = vmatmul.mubr.msk.f32.gmra.mrb[212].mxu0 %vm685_vm2, %v15964_v21 }
 0x1c5   : > { %v1425_v57 = vpop.f32.mrb[108].mxu1  ;;  %12677 = vmatprep.mubr.msk.f32.mxu0 %vm14537_vm1, %v20167_v2 }
 0x1c6   : > { %v1426_v32 = vadd.f32 %v1425_v57, %v20202_v58  ;;  %v12120_v5 = vpop.f32.mrb[109].mxu1  ;;  %12532 = vmatmul.mubr.msk.f32.gmra.mrb[214].mxu1 %vm685_vm2, %v2917_v62  ;;  %v16015_v62 = vld [vmem:[%s14670_s3 + $0x74] sm:$0xff] }
 0x1c7   : > { %12534 = vmatprep.mubr.msk.f32.mxu1 %vm14537_vm1, %v20167_v2  ;;  %v15988_v0 = vpop.f32.mrb[108].mxu0 }
 0x1c8   : > { %v15991_v43 = vadd.f32 %v15861_v3, %v1426_v32  ;;  %v12266_v55 = vpop.f32.mrb[109].mxu0  ;;  %12678 = vmatmul.mubr.msk.f32.gmra.mrb[214].mxu0 %vm685_vm2, %v15982_v8 }
 0x1c9   : > { %v1430_v18 = vpop.f32.mrb[110].mxu1  ;;  %12680 = vmatprep.mubr.msk.f32.mxu0 %vm14537_vm1, %v20167_v2  ;;  %v16032_v55 = vld [vmem:[%s14670_s3 + $0x7c] sm:$0xff] }
 0x1ca   : > { %v1431_v30 = vadd.f32 %v1430_v18, %v20203_v53  ;;  %v12123_v15 = vpop.f32.mrb[111].mxu1  ;;  %12535 = vmatmul.mubr.msk.f32.gmra.mrb[216].mxu1 %vm685_vm2, %v15837_v42  ;;  %v20204_v42 = vld [vmem:[#allocation20_spill] sm:$0xff] }
 0x1cb   : > { %12537 = vmatprep.mubr.msk.f32.mxu1 %vm14537_vm1, %v20167_v2  ;;  %v16005_v3 = vpop.f32.mrb[110].mxu0 }
 0x1cc   : > { %v16008_v37 = vadd.f32 %v15881_v20, %v1431_v30  ;;  %v12269_v54 = vpop.f32.mrb[111].mxu0  ;;  %12681 = vmatmul.mubr.msk.f32.gmra.mrb[216].mxu0 %vm685_vm2, %v15998_v60 }
 0x1cd   : > { %v1435_v56 = vpop.f32.mrb[112].mxu1  ;;  %12683 = vmatprep.mubr.msk.f32.mxu0 %vm14537_vm1, %v20167_v2 }
 0x1ce   : > { %v1436_v23 = vadd.f32 %v1435_v56, %v20204_v42  ;;  %v12126_v57 = vpop.f32.mrb[113].mxu1  ;;  %12538 = vmatmul.mubr.msk.f32.gmra.mrb[218].mxu1 %vm685_vm2, %v15854_v63  ;;  %v20205_v63 = vld [vmem:[#allocation21_spill] sm:$0xff] }
 0x1cf   : > { %12540 = vmatprep.mubr.msk.f32.mxu1 %vm14537_vm1, %v20167_v2  ;;  %v16022_v20 = vpop.f32.mrb[112].mxu0  ;;  %v16049_v56 = vld [vmem:[%s14670_s3 + $0x84] sm:$0xff] }
 0x1d0   : > { %v16025_v58 = vadd.f32 %v15900_v35, %v1436_v23  ;;  %v12272_v32 = vpop.f32.mrb[113].mxu0  ;;  %12684 = vmatmul.mubr.msk.f32.gmra.mrb[218].mxu0 %vm685_vm2, %v16015_v62 }
 0x1d1   : > { %v1440_v5 = vpop.f32.mrb[114].mxu1  ;;  %12686 = vmatprep.mubr.msk.f32.mxu0 %vm14537_vm1, %v20167_v2 }
 0x1d2   : > { %v1441_v18 = vadd.f32 %v1440_v5, %v20205_v63  ;;  %v12129_v53 = vpop.f32.mrb[115].mxu1  ;;  %12541 = vmatmul.mubr.msk.f32.gmra.mrb[220].mxu1 %vm685_vm2, %v15871_v24  ;;  %v20206_v24 = vld [vmem:[#allocation22_spill] sm:$0xff] }
 0x1d3   : > { %12543 = vmatprep.mubr.msk.f32.mxu1 %vm14537_vm1, %v20167_v2  ;;  %v16039_v35 = vpop.f32.mrb[114].mxu0  ;;  %v16066_v63 = vld [vmem:[%s14670_s3 + $0x8c] sm:$0xff] }
 0x1d4   : > { %v16042_v30 = vadd.f32 %v15917_v4, %v1441_v18  ;;  %v12275_v15 = vpop.f32.mrb[115].mxu0  ;;  %12687 = vmatmul.mubr.msk.f32.gmra.mrb[220].mxu0 %vm685_vm2, %v16032_v55 }
 0x1d5   : > { %v1445_v54 = vpop.f32.mrb[116].mxu1  ;;  %12689 = vmatprep.mubr.msk.f32.mxu0 %vm14537_vm1, %v20167_v2 }
 0x1d6   : > { %v1446_v42 = vadd.f32 %v1445_v54, %v20206_v24  ;;  %v12132_v23 = vpop.f32.mrb[117].mxu1  ;;  %12544 = vmatmul.mubr.msk.f32.gmra.mrb[222].mxu1 %vm685_vm2, %v15892_v19  ;;  %v20207_v19 = vld [vmem:[#allocation23_spill] sm:$0xff] }
 0x1d7   : > { %12546 = vmatprep.mubr.msk.f32.mxu1 %vm14537_vm1, %v20167_v2  ;;  %v16056_v4 = vpop.f32.mrb[116].mxu0 }
 0x1d8   : > { %v16059_v57 = vadd.f32 %v15934_v31, %v1446_v42  ;;  %v12405_v32 = vpop.f32.mrb[117].mxu0  ;;  %12690 = vmatmul.mubr.msk.f32.gmra.mrb[222].mxu0 %vm685_vm2, %v16049_v56  ;;  %v16083_v42 = vld [vmem:[%s14670_s3 + $0x94] sm:$0xff] }
 0x1d9   : > { %v1450_v5 = vpop.f32.mrb[118].mxu1  ;;  %12692 = vmatprep.mubr.msk.f32.mxu0 %vm14537_vm1, %v20167_v2 }
 0x1da   : > { %v1451_v18 = vadd.f32 %v1450_v5, %v20207_v19  ;;  %v12135_v53 = vpop.f32.mrb[119].mxu1  ;;  %12547 = vmatmul.mubr.msk.f32.gmra.mrb[224].mxu1 %vm685_vm2, %v15910_v50  ;;  %v20208_v50 = vld [vmem:[#allocation24_spill] sm:$0xff] }
 0x1db   : > { %12549 = vmatprep.mubr.msk.f32.mxu1 %vm14537_vm1, %v20167_v2  ;;  %v16073_v31 = vpop.f32.mrb[118].mxu0  ;;  %v16100_v53 = vld [vmem:[%s14670_s3 + $0x9c] sm:$0xff] }
 0x1dc   : > { %v16076_v15 = vadd.f32 %v15951_v47, %v1451_v18  ;;  %v12408_v54 = vpop.f32.mrb[119].mxu0  ;;  %12693 = vmatmul.mubr.msk.f32.gmra.mrb[224].mxu0 %vm685_vm2, %v16066_v63 }
 0x1dd   : > { %v1455_v24 = vpop.f32.mrb[120].mxu1  ;;  %12695 = vmatprep.mubr.msk.f32.mxu0 %vm14537_vm1, %v20167_v2 }
 0x1de   : > { %v1456_v23 = vadd.f32 %v1455_v24, %v20208_v50  ;;  %v12138_v32 = vpop.f32.mrb[121].mxu1  ;;  %12550 = vmatmul.mubr.msk.f32.gmra.mrb[226].mxu1 %vm685_vm2, %v15927_v39  ;;  %v20209_v39 = vld [vmem:[#allocation25_spill] sm:$0xff] }
 0x1df   : > { %12552 = vmatprep.mubr.msk.f32.mxu1 %vm14537_vm1, %v20167_v2  ;;  %v16090_v47 = vpop.f32.mrb[120].mxu0 }
 0x1e0   : > { %v16093_v5 = vadd.f32 %v15971_v61, %v1456_v23  ;;  %v12411_v19 = vpop.f32.mrb[121].mxu0  ;;  %12696 = vmatmul.mubr.msk.f32.gmra.mrb[226].mxu0 %vm685_vm2, %v16083_v42 }
 0x1e1   : > { %v1460_v18 = vpop.f32.mrb[122].mxu1  ;;  %12698 = vmatprep.mubr.msk.f32.mxu0 %vm14537_vm1, %v20167_v2  ;;  %v16117_v19 = vld [vmem:[%s14670_s3 + $0xa4] sm:$0xff] }
 0x1e2   : > { %v1461_v54 = vadd.f32 %v1460_v18, %v20209_v39  ;;  %v12141_v24 = vpop.f32.mrb[123].mxu1  ;;  %12553 = vmatmul.mubr.msk.f32.gmra.mrb[228].mxu1 %vm685_vm2, %v15944_v40  ;;  %v20210_v40 = vld [vmem:[#allocation26_spill] sm:$0xff] }
 0x1e3   : > { %12555 = vmatprep.mubr.msk.f32.mxu1 %vm14537_vm1, %v20167_v2  ;;  %v16107_v61 = vpop.f32.mrb[122].mxu0 }
 0x1e4   : > { %v16110_v50 = vadd.f32 %v15988_v0, %v1461_v54  ;;  %v12414_v23 = vpop.f32.mrb[123].mxu0  ;;  %12699 = vmatmul.mubr.msk.f32.gmra.mrb[228].mxu0 %vm685_vm2, %v16100_v53 }
 0x1e5   : > { %v1465_v32 = vpop.f32.mrb[124].mxu1  ;;  %12701 = vmatprep.mubr.msk.f32.mxu0 %vm14537_vm1, %v20167_v2 }
 0x1e6   : > { %v1466_v18 = vadd.f32 %v1465_v32, %v20210_v40  ;;  %v12144_v39 = vpop.f32.mrb[125].mxu1  ;;  %12556 = vmatmul.mubr.msk.f32.gmra.mrb[230].mxu1 %vm685_vm2, %v15964_v21  ;;  %v16134_v32 = vld [vmem:[%s14670_s3 + $0xac] sm:$0xff]  ;;  %v20212_v21 = vld [vmem:[#allocation27_spill] sm:$0xff] }
 0x1e7   : > { %12558 = vmatprep.mubr.msk.f32.mxu1 %vm14537_vm1, %v20167_v2  ;;  %v16124_v0 = vpop.f32.mrb[124].mxu0 }
 0x1e8   : > { %v16127_v54 = vadd.f32 %v16005_v3, %v1466_v18  ;;  %v12417_v24 = vpop.f32.mrb[125].mxu0  ;;  %12702 = vmatmul.mubr.msk.f32.gmra.mrb[230].mxu0 %vm685_vm2, %v16117_v19 }
 0x1e9   : > { %v1470_v23 = vpop.f32.mrb[126].mxu1  ;;  %12704 = vmatprep.mubr.msk.f32.mxu0 %vm14537_vm1, %v20167_v2 }
 0x1ea   : > { %20211 = vst [vmem:[#allocation12_spill] sm:$0xff] %v16127_v54  ;;  %v1471_v40 = vadd.f32 %v1470_v23, %v20212_v21  ;;  %v12147_v39 = vpop.f32.mrb[127].mxu1  ;;  %12559 = vmatmul.mubr.msk.f32.gmra.mrb[232].mxu1 %vm685_vm2, %v15982_v8  ;;  %v16151_v23 = vld [vmem:[%s14670_s3 + $0xb4] sm:$0xff]  ;;  %v20214_v8 = vld [vmem:[#allocation28_spill] sm:$0xff] }
 0x1eb   : > { %12561 = vmatprep.mubr.msk.f32.mxu1 %vm14537_vm1, %v20167_v2  ;;  %v16141_v3 = vpop.f32.mrb[126].mxu0 }
 0x1ec   : > { %v16144_v18 = vadd.f32 %v16022_v20, %v1471_v40  ;;  %v12420_v24 = vpop.f32.mrb[127].mxu0  ;;  %12705 = vmatmul.mubr.msk.f32.gmra.mrb[232].mxu0 %vm685_vm2, %v16134_v32 }
 0x1ed   : > { %v1475_v54 = vpop.f32.mrb[128].mxu1  ;;  %12707 = vmatprep.mubr.msk.f32.mxu0 %vm14537_vm1, %v20167_v2 }
 0x1ee   : > { %20213 = vst [vmem:[#allocation10_spill] sm:$0xff] %v16144_v18  ;;  %v1476_v21 = vadd.f32 %v1475_v54, %v20214_v8  ;;  %v12150_v39 = vpop.f32.mrb[129].mxu1  ;;  %12562 = vmatmul.mubr.msk.f32.gmra.mrb[234].mxu1 %vm685_vm2, %v15998_v60  ;;  %v16168_v54 = vld [vmem:[%s14670_s3 + $0xbc] sm:$0xff] }
 0x1ef   : > { %12564 = vmatprep.mubr.msk.f32.mxu1 %vm14537_vm1, %v20167_v2  ;;  %v16158_v20 = vpop.f32.mrb[128].mxu0 }
 0x1f0   : > { %v16161_v40 = vadd.f32 %v16039_v35, %v1476_v21  ;;  %v12423_v24 = vpop.f32.mrb[129].mxu0  ;;  %12708 = vmatmul.mubr.msk.f32.gmra.mrb[234].mxu0 %vm685_vm2, %v16151_v23 }
 0x1f1   : > { %v2192_v18 = vpop.f32.mrb[130].mxu1  ;;  %12710 = vmatprep.mubr.msk.f32.mxu0 %vm14537_vm1, %v20167_v2 }
 0x1f2   : > { %v2396_v60 = vadd.f32 %v2192_v18, %v15537_v44  ;;  %v12280_v8 = vpop.f32.mrb[131].mxu1  ;;  %12565 = vmatmul.mubr.msk.f32.gmra.mrb[236].mxu1 %vm685_vm2, %v16015_v62  ;;  %v16185_v44 = vld [vmem:[%s14670_s3 + $0xc4] sm:$0xff] }
 0x1f3   : > { %12567 = vmatprep.mubr.msk.f32.mxu1 %vm14537_vm1, %v20167_v2  ;;  %v16175_v35 = vpop.f32.mrb[130].mxu0 }
 0x1f4   : > { %v16178_v21 = vadd.f32 %v16056_v4, %v2396_v60  ;;  %v12426_v39 = vpop.f32.mrb[131].mxu0  ;;  %12711 = vmatmul.mubr.msk.f32.gmra.mrb[236].mxu0 %vm685_vm2, %v16168_v54 }
 0x1f5   : > { %v2197_v24 = vpop.f32.mrb[132].mxu1  ;;  %12713 = vmatprep.mubr.msk.f32.mxu0 %vm14537_vm1, %v20167_v2 }
 0x1f6   : > { %v2397_v62 = vadd.f32 %v2197_v24, %v15551_v52  ;;  %v12283_v18 = vpop.f32.mrb[133].mxu1  ;;  %12568 = vmatmul.mubr.msk.f32.gmra.mrb[238].mxu1 %vm685_vm2, %v16032_v55  ;;  %v16202_v52 = vld [vmem:[%s14670_s3 + $0xcc] sm:$0xff] }
 0x1f7   : > { %12570 = vmatprep.mubr.msk.f32.mxu1 %vm14537_vm1, %v20167_v2  ;;  %v16192_v4 = vpop.f32.mrb[132].mxu0 }
 0x1f8   : > { %v16195_v60 = vadd.f32 %v16073_v31, %v2397_v62  ;;  %v12429_v8 = vpop.f32.mrb[133].mxu0  ;;  %12714 = vmatmul.mubr.msk.f32.gmra.mrb[238].mxu0 %vm685_vm2, %v16185_v44 }
 0x1f9   : > { %v2202_v39 = vpop.f32.mrb[134].mxu1  ;;  %12716 = vmatprep.mubr.msk.f32.mxu0 %vm14537_vm1, %v20167_v2 }
 0x1fa   : > { %v2398_v55 = vadd.f32 %v2202_v39, %v15565_v22  ;;  %v12286_v24 = vpop.f32.mrb[135].mxu1  ;;  %12571 = vmatmul.mubr.msk.f32.gmra.mrb[240].mxu1 %vm685_vm2, %v16049_v56  ;;  %v16219_v22 = vld [vmem:[%s14670_s3 + $0xd4] sm:$0xff] }
 0x1fb   : > { %12573 = vmatprep.mubr.msk.f32.mxu1 %vm14537_vm1, %v20167_v2  ;;  %v16209_v31 = vpop.f32.mrb[134].mxu0 }
 0x1fc   : > { %v16212_v62 = vadd.f32 %v16090_v47, %v2398_v55  ;;  %v12432_v18 = vpop.f32.mrb[135].mxu0  ;;  %12717 = vmatmul.mubr.msk.f32.gmra.mrb[240].mxu0 %vm685_vm2, %v16202_v52 }
 0x1fd   : > { %v2207_v8 = vpop.f32.mrb[136].mxu1  ;;  %12719 = vmatprep.mubr.msk.f32.mxu0 %vm14537_vm1, %v20167_v2 }
 0x1fe   : > { %v2399_v56 = vadd.f32 %v2207_v8, %v15579_v34  ;;  %v12289_v39 = vpop.f32.mrb[137].mxu1  ;;  %12574 = vmatmul.mubr.msk.f32.gmra.mrb[242].mxu1 %vm685_vm2, %v16066_v63  ;;  %v16236_v34 = vld [vmem:[%s14670_s3 + $0xdc] sm:$0xff] }
 0x1ff   : > { %12576 = vmatprep.mubr.msk.f32.mxu1 %vm14537_vm1, %v20167_v2  ;;  %v16226_v47 = vpop.f32.mrb[136].mxu0 }
 0x200   : > { %v16229_v55 = vadd.f32 %v16107_v61, %v2399_v56  ;;  %v12435_v24 = vpop.f32.mrb[137].mxu0  ;;  %12720 = vmatmul.mubr.msk.f32.gmra.mrb[242].mxu0 %vm685_vm2, %v16219_v22 }
 0x201   : > { %v2212_v18 = vpop.f32.mrb[138].mxu1  ;;  %12722 = vmatprep.mubr.msk.f32.mxu0 %vm14537_vm1, %v20167_v2 }
 0x202   : > { %v2400_v63 = vadd.f32 %v2212_v18, %v15593_v9  ;;  %v12292_v8 = vpop.f32.mrb[139].mxu1  ;;  %12577 = vmatmul.mubr.msk.f32.gmra.mrb[244].mxu1 %vm685_vm2, %v16083_v42  ;;  %v16253_v9 = vld [vmem:[%s14670_s3 + $0xe4] sm:$0xff] }
 0x203   : > { %12579 = vmatprep.mubr.msk.f32.mxu1 %vm14537_vm1, %v20167_v2  ;;  %v16243_v61 = vpop.f32.mrb[138].mxu0 }
 0x204   : > { %v16246_v56 = vadd.f32 %v16124_v0, %v2400_v63  ;;  %v12438_v39 = vpop.f32.mrb[139].mxu0  ;;  %12723 = vmatmul.mubr.msk.f32.gmra.mrb[244].mxu0 %vm685_vm2, %v16236_v34 }
 0x205   : > { %v2217_v24 = vpop.f32.mrb[140].mxu1  ;;  %12725 = vmatprep.mubr.msk.f32.mxu0 %vm14537_vm1, %v20167_v2 }
 0x206   : > { %v2401_v42 = vadd.f32 %v2217_v24, %v15607_v7  ;;  %v12295_v18 = vpop.f32.mrb[141].mxu1  ;;  %12580 = vmatmul.mubr.msk.f32.gmra.mrb[246].mxu1 %vm685_vm2, %v16100_v53  ;;  %v16270_v7 = vld [vmem:[%s14670_s3 + $0xec] sm:$0xff] }
 0x207   : > { %12582 = vmatprep.mubr.msk.f32.mxu1 %vm14537_vm1, %v20167_v2  ;;  %v16260_v0 = vpop.f32.mrb[140].mxu0 }
 0x208   : > { %v16263_v63 = vadd.f32 %v16141_v3, %v2401_v42  ;;  %v12441_v8 = vpop.f32.mrb[141].mxu0  ;;  %12726 = vmatmul.mubr.msk.f32.gmra.mrb[246].mxu0 %vm685_vm2, %v16253_v9 }
 0x209   : > { %v2222_v39 = vpop.f32.mrb[142].mxu1  ;;  %12728 = vmatprep.mubr.msk.f32.mxu0 %vm14537_vm1, %v20167_v2 }
 0x20a   : > { %v2402_v53 = vadd.f32 %v2222_v39, %v15621_v38  ;;  %v12298_v24 = vpop.f32.mrb[143].mxu1  ;;  %12583 = vmatmul.mubr.msk.f32.gmra.mrb[248].mxu1 %vm685_vm2, %v16117_v19  ;;  %v16287_v38 = vld [vmem:[%s14670_s3 + $0xf4] sm:$0xff] }
 0x20b   : > { %12585 = vmatprep.mubr.msk.f32.mxu1 %vm14537_vm1, %v20167_v2  ;;  %v16277_v3 = vpop.f32.mrb[142].mxu0 }
 0x20c   : > { %v16280_v42 = vadd.f32 %v16158_v20, %v2402_v53  ;;  %v12444_v18 = vpop.f32.mrb[143].mxu0  ;;  %12729 = vmatmul.mubr.msk.f32.gmra.mrb[248].mxu0 %vm685_vm2, %v16270_v7 }
 0x20d   : > { %v2227_v8 = vpop.f32.mrb[144].mxu1  ;;  %12731 = vmatprep.mubr.msk.f32.mxu0 %vm14537_vm1, %v20167_v2 }
 0x20e   : > { %v2403_v19 = vadd.f32 %v2227_v8, %v15635_v45  ;;  %v12301_v39 = vpop.f32.mrb[145].mxu1  ;;  %12586 = vmatmul.mubr.msk.f32.gmra.mrb[250].mxu1 %vm685_vm2, %v16134_v32  ;;  %v16304_v45 = vld [vmem:[%s14670_s3 + $0xfc] sm:$0xff] }
 0x20f   : > { %12588 = vmatprep.mubr.msk.f32.mxu1 %vm14537_vm1, %v20167_v2  ;;  %v16294_v20 = vpop.f32.mrb[144].mxu0 }
 0x210   : > { %v16297_v53 = vadd.f32 %v16175_v35, %v2403_v19  ;;  %v12447_v24 = vpop.f32.mrb[145].mxu0  ;;  %12732 = vmatmul.mubr.msk.f32.gmra.mrb[250].mxu0 %vm685_vm2, %v16287_v38 }
 0x211   : > { %v2232_v18 = vpop.f32.mrb[146].mxu1  ;;  %12734 = vmatprep.mubr.msk.f32.mxu0 %vm14537_vm1, %v20167_v2 }
 0x212   : > { %v2404_v32 = vadd.f32 %v2232_v18, %v15649_v11  ;;  %v12304_v8 = vpop.f32.mrb[147].mxu1  ;;  %12589 = vmatmul.mubr.msk.f32.gmra.mrb[252].mxu1 %vm685_vm2, %v16151_v23  ;;  %v16321_v11 = vld [vmem:[%s14670_s3 + $0x104] sm:$0xff] }
 0x213   : > { %12591 = vmatprep.mubr.msk.f32.mxu1 %vm14537_vm1, %v20167_v2  ;;  %v16311_v35 = vpop.f32.mrb[146].mxu0 }
 0x214   : > { %v16314_v19 = vadd.f32 %v16192_v4, %v2404_v32  ;;  %v12450_v39 = vpop.f32.mrb[147].mxu0  ;;  %12735 = vmatmul.mubr.msk.f32.gmra.mrb[252].mxu0 %vm685_vm2, %v16304_v45 }
 0x215   : > { %v2237_v24 = vpop.f32.mrb[148].mxu1  ;;  %12737 = vmatprep.mubr.msk.f32.mxu0 %vm14537_vm1, %v20167_v2 }
 0x216   : > { %v2405_v23 = vadd.f32 %v2237_v24, %v15663_v17  ;;  %v12307_v18 = vpop.f32.mrb[149].mxu1  ;;  %12592 = vmatmul.mubr.msk.f32.gmra.mrb[254].mxu1 %vm685_vm2, %v16168_v54  ;;  %v16338_v17 = vld [vmem:[%s14670_s3 + $0x10c] sm:$0xff] }
 0x217   : > { %12594 = vmatprep.mubr.msk.f32.mxu1 %vm14537_vm1, %v20167_v2  ;;  %v16328_v4 = vpop.f32.mrb[148].mxu0 }
 0x218   : > { %v16331_v32 = vadd.f32 %v16209_v31, %v2405_v23  ;;  %v12453_v8 = vpop.f32.mrb[149].mxu0  ;;  %12738 = vmatmul.mubr.msk.f32.gmra.mrb[254].mxu0 %vm685_vm2, %v16321_v11 }
 0x219   : > { %v2242_v39 = vpop.f32.mrb[150].mxu1  ;;  %12740 = vmatprep.mubr.msk.f32.mxu0 %vm14537_vm1, %v20167_v2 }
 0x21a   : > { %v2406_v54 = vadd.f32 %v2242_v39, %v15677_v1  ;;  %v12310_v24 = vpop.f32.mrb[151].mxu1  ;;  %12595 = vmatmul.mubr.msk.f32.gmra.mrb[0].mxu1 %vm685_vm2, %v16185_v44  ;;  %v16355_v1 = vld [vmem:[%s14670_s3 + $0x114] sm:$0xff] }
 0x21b   : > { %12597 = vmatprep.mubr.msk.f32.mxu1 %vm14537_vm1, %v20167_v2  ;;  %v16345_v31 = vpop.f32.mrb[150].mxu0 }
 0x21c   : > { %v16348_v23 = vadd.f32 %v16226_v47, %v2406_v54  ;;  %v12456_v18 = vpop.f32.mrb[151].mxu0  ;;  %12741 = vmatmul.mubr.msk.f32.gmra.mrb[0].mxu0 %vm685_vm2, %v16338_v17 }
 0x21d   : > { %v2247_v8 = vpop.f32.mrb[152].mxu1  ;;  %12743 = vmatprep.mubr.msk.f32.mxu0 %vm14537_vm1, %v20167_v2 }
 0x21e   : > { %v2407_v44 = vadd.f32 %v2247_v8, %v15691_v12  ;;  %v12313_v39 = vpop.f32.mrb[153].mxu1  ;;  %12598 = vmatmul.mubr.msk.f32.gmra.mrb[2].mxu1 %vm685_vm2, %v16202_v52  ;;  %v16372_v12 = vld [vmem:[%s14670_s3 + $0x11c] sm:$0xff] }
 0x21f   : > { %12600 = vmatprep.mubr.msk.f32.mxu1 %vm14537_vm1, %v20167_v2  ;;  %v16362_v47 = vpop.f32.mrb[152].mxu0 }
 0x220   : > { %v16365_v54 = vadd.f32 %v16243_v61, %v2407_v44  ;;  %v12459_v24 = vpop.f32.mrb[153].mxu0  ;;  %12744 = vmatmul.mubr.msk.f32.gmra.mrb[2].mxu0 %vm685_vm2, %v16355_v1 }
 0x221   : > { %v2252_v18 = vpop.f32.mrb[154].mxu1  ;;  %12746 = vmatprep.mubr.msk.f32.mxu0 %vm14537_vm1, %v20167_v2 }
 0x222   : > { %v2408_v52 = vadd.f32 %v2252_v18, %v15705_v16  ;;  %v12316_v8 = vpop.f32.mrb[155].mxu1  ;;  %12601 = vmatmul.mubr.msk.f32.gmra.mrb[4].mxu1 %vm685_vm2, %v16219_v22  ;;  %v16389_v16 = vld [vmem:[%s14670_s3 + $0x124] sm:$0xff] }
 0x223   : > { %12603 = vmatprep.mubr.msk.f32.mxu1 %vm14537_vm1, %v20167_v2  ;;  %v16379_v61 = vpop.f32.mrb[154].mxu0 }
 0x224   : > { %v16382_v44 = vadd.f32 %v16260_v0, %v2408_v52  ;;  %v12462_v39 = vpop.f32.mrb[155].mxu0  ;;  %12747 = vmatmul.mubr.msk.f32.gmra.mrb[4].mxu0 %vm685_vm2, %v16372_v12 }
 0x225   : > { %v2257_v24 = vpop.f32.mrb[156].mxu1  ;;  %12749 = vmatprep.mubr.msk.f32.mxu0 %vm14537_vm1, %v20167_v2 }
 0x226   : > { %v2409_v22 = vadd.f32 %v2257_v24, %v15719_v48  ;;  %v12319_v18 = vpop.f32.mrb[157].mxu1  ;;  %12604 = vmatmul.mubr.msk.f32.gmra.mrb[6].mxu1 %vm685_vm2, %v16236_v34  ;;  %v16406_v48 = vld [vmem:[%s14670_s3 + $0x12c] sm:$0xff] }
 0x227   : > { %12606 = vmatprep.mubr.msk.f32.mxu1 %vm14537_vm1, %v20167_v2  ;;  %v16396_v0 = vpop.f32.mrb[156].mxu0 }
 0x228   : > { %v16399_v52 = vadd.f32 %v16277_v3, %v2409_v22  ;;  %v12465_v8 = vpop.f32.mrb[157].mxu0  ;;  %12750 = vmatmul.mubr.msk.f32.gmra.mrb[6].mxu0 %vm685_vm2, %v16389_v16 }
 0x229   : > { %v2262_v39 = vpop.f32.mrb[158].mxu1  ;;  %12752 = vmatprep.mubr.msk.f32.mxu0 %vm14537_vm1, %v20167_v2 }
 0x22a   : > { %v2410_v34 = vadd.f32 %v2262_v39, %v15733_v25  ;;  %v12322_v24 = vpop.f32.mrb[159].mxu1  ;;  %12607 = vmatmul.mubr.msk.f32.gmra.mrb[8].mxu1 %vm685_vm2, %v16253_v9  ;;  %v16423_v25 = vld [vmem:[%s14670_s3 + $0x134] sm:$0xff] }
 0x22b   : > { %12609 = vmatprep.mubr.msk.f32.mxu1 %vm14537_vm1, %v20167_v2  ;;  %v16413_v3 = vpop.f32.mrb[158].mxu0 }
 0x22c   : > { %v16416_v22 = vadd.f32 %v16294_v20, %v2410_v34  ;;  %v12468_v18 = vpop.f32.mrb[159].mxu0  ;;  %12753 = vmatmul.mubr.msk.f32.gmra.mrb[8].mxu0 %vm685_vm2, %v16406_v48 }
 0x22d   : > { %v2267_v8 = vpop.f32.mrb[160].mxu1  ;;  %12755 = vmatprep.mubr.msk.f32.mxu0 %vm14537_vm1, %v20167_v2 }
 0x22e   : > { %v2411_v9 = vadd.f32 %v2267_v8, %v15747_v26  ;;  %v12325_v39 = vpop.f32.mrb[161].mxu1  ;;  %12610 = vmatmul.mubr.msk.f32.gmra.mrb[10].mxu1 %vm685_vm2, %v16270_v7  ;;  %v16440_v26 = vld [vmem:[%s14670_s3 + $0x13c] sm:$0xff] }
 0x22f   : > { %12612 = vmatprep.mubr.msk.f32.mxu1 %vm14537_vm1, %v20167_v2  ;;  %v16430_v20 = vpop.f32.mrb[160].mxu0 }
 0x230   : > { %v16433_v34 = vadd.f32 %v16311_v35, %v2411_v9  ;;  %v12471_v24 = vpop.f32.mrb[161].mxu0  ;;  %12756 = vmatmul.mubr.msk.f32.gmra.mrb[10].mxu0 %vm685_vm2, %v16423_v25 }
 0x231   : > { %v2272_v18 = vpop.f32.mrb[162].mxu1  ;;  %12758 = vmatprep.mubr.msk.f32.mxu0 %vm14537_vm1, %v20167_v2 }
 0x232   : > { %v2412_v7 = vadd.f32 %v2272_v18, %v15761_v28  ;;  %v12328_v8 = vpop.f32.mrb[163].mxu1  ;;  %12613 = vmatmul.mubr.msk.f32.gmra.mrb[12].mxu1 %vm685_vm2, %v16287_v38  ;;  %v16457_v28 = vld [vmem:[%s14670_s3 + $0x144] sm:$0xff] }
 0x233   : > { %12615 = vmatprep.mubr.msk.f32.mxu1 %vm14537_vm1, %v20167_v2  ;;  %v16447_v35 = vpop.f32.mrb[162].mxu0 }
 0x234   : > { %v16450_v9 = vadd.f32 %v16328_v4, %v2412_v7  ;;  %v12474_v39 = vpop.f32.mrb[163].mxu0  ;;  %12759 = vmatmul.mubr.msk.f32.gmra.mrb[12].mxu0 %vm685_vm2, %v16440_v26 }
 0x235   : > { %v2277_v24 = vpop.f32.mrb[164].mxu1  ;;  %12761 = vmatprep.mubr.msk.f32.mxu0 %vm14537_vm1, %v20167_v2 }
 0x236   : > { %v2413_v38 = vadd.f32 %v2277_v24, %v15775_v14  ;;  %v12331_v18 = vpop.f32.mrb[165].mxu1  ;;  %12616 = vmatmul.mubr.msk.f32.gmra.mrb[14].mxu1 %vm685_vm2, %v16304_v45  ;;  %v16474_v14 = vld [vmem:[%s14670_s3 + $0x14c] sm:$0xff] }
 0x237   : > { %12618 = vmatprep.mubr.msk.f32.mxu1 %vm14537_vm1, %v20167_v2  ;;  %v16464_v4 = vpop.f32.mrb[164].mxu0 }
 0x238   : > { %v16467_v7 = vadd.f32 %v16345_v31, %v2413_v38  ;;  %v12477_v8 = vpop.f32.mrb[165].mxu0  ;;  %12762 = vmatmul.mubr.msk.f32.gmra.mrb[14].mxu0 %vm685_vm2, %v16457_v28 }
 0x239   : > { %v2282_v39 = vpop.f32.mrb[166].mxu1  ;;  %12764 = vmatprep.mubr.msk.f32.mxu0 %vm14537_vm1, %v20167_v2 }
 0x23a   : > { %v2414_v45 = vadd.f32 %v2282_v39, %v15789_v13  ;;  %v12334_v24 = vpop.f32.mrb[167].mxu1  ;;  %12619 = vmatmul.mubr.msk.f32.gmra.mrb[16].mxu1 %vm685_vm2, %v16321_v11  ;;  %v3433_v13 = vld [vmem:[%s14670_s3 + $0x154] sm:$0xff] }
 0x23b   : > { %12621 = vmatprep.mubr.msk.f32.mxu1 %vm14537_vm1, %v20167_v2  ;;  %v16481_v31 = vpop.f32.mrb[166].mxu0 }
 0x23c   : > { %v16484_v38 = vadd.f32 %v16362_v47, %v2414_v45  ;;  %v12480_v18 = vpop.f32.mrb[167].mxu0  ;;  %12765 = vmatmul.mubr.msk.f32.gmra.mrb[16].mxu0 %vm685_vm2, %v16474_v14 }
 0x23d   : > { %v2287_v8 = vpop.f32.mrb[168].mxu1  ;;  %12767 = vmatprep.mubr.msk.f32.mxu0 %vm14537_vm1, %v20167_v2 }
 0x23e   : > { %v2415_v11 = vadd.f32 %v2287_v8, %v15803_v33  ;;  %v12337_v39 = vpop.f32.mrb[169].mxu1  ;;  %12622 = vmatmul.mubr.msk.f32.gmra.mrb[18].mxu1 %vm685_vm2, %v16338_v17  ;;  %v3434_v33 = vld [vmem:[%s14670_s3 + $0x15c] sm:$0xff] }
 0x23f   : > { %12624 = vmatprep.mubr.msk.f32.mxu1 %vm14537_vm1, %v20167_v2  ;;  %v16496_v47 = vpop.f32.mrb[168].mxu0 }
 0x240   : > { %v16499_v45 = vadd.f32 %v16379_v61, %v2415_v11  ;;  %v12483_v24 = vpop.f32.mrb[169].mxu0  ;;  %12768 = vmatmul.mubr.msk.f32.gmra.mrb[18].mxu0 %vm685_vm2, %v3433_v13 }
 0x241   : > { %v2292_v18 = vpop.f32.mrb[170].mxu1  ;;  %12770 = vmatprep.mubr.msk.f32.mxu0 %vm14537_vm1, %v20167_v2 }
 0x242   : > { %v2416_v8 = vadd.f32 %v2292_v18, %v15817_v36  ;;  %v12340_v17 = vpop.f32.mrb[171].mxu1  ;;  %12625 = vmatmul.mubr.msk.f32.gmra.mrb[20].mxu1 %vm685_vm2, %v16355_v1  ;;  %v3435_v36 = vld [vmem:[%s14670_s3 + $0x164] sm:$0xf] }
 0x243   : > { %12627 = vmatprep.mubr.msk.f32.mxu1 %vm14537_vm1, %v20167_v2  ;;  %v16510_v61 = vpop.f32.mrb[170].mxu0 }
 0x244   : > { %v16513_v11 = vadd.f32 %v16396_v0, %v2416_v8  ;;  %v12486_v13 = vpop.f32.mrb[171].mxu0  ;;  %12771 = vmatmul.mubr.msk.f32.gmra.mrb[20].mxu0 %vm685_vm2, %v3434_v33 }
 0x245   : > { %v2297_v39 = vpop.f32.mrb[172].mxu1  ;;  %12773 = vmatprep.mubr.msk.f32.mxu0 %vm14537_vm1, %v20167_v2 }
 0x246   : > { %v2417_v24 = vadd.f32 %v2297_v39, %v15831_v49  ;;  %v12343_v1 = vpop.f32.mrb[173].mxu1  ;;  %12628 = vmatmul.mubr.msk.f32.gmra.mrb[22].mxu1 %vm685_vm2, %v16372_v12  ;;  %v4353_v49 = vld [vmem:[%s14670_s3 + $0x26] sm:$0xff] }
 0x247   : > { %12630 = vmatprep.mubr.msk.f32.mxu1 %vm14537_vm1, %v20167_v2  ;;  %v16524_v0 = vpop.f32.mrb[172].mxu0 }
 0x248   : > { %v16527_v18 = vadd.f32 %v16413_v3, %v2417_v24  ;;  %v12489_v33 = vpop.f32.mrb[173].mxu0  ;;  %12774 = vmatmul.mubr.msk.f32.gmra.mrb[22].mxu0 %vm685_vm2, %v3435_v36 }
 0x249   : > { %v2302_v8 = vpop.f32.mrb[174].mxu1  ;;  %12903 = vmatprep.mubr.msk.f32.mxu0 %vm14537_vm1, %v20167_v2 }
 0x24a   : > { %v2418_v17 = vadd.f32 %v2302_v8, %v15847_v29  ;;  %v12346_v12 = vpop.f32.mrb[175].mxu1  ;;  %12631 = vmatmul.mubr.msk.f32.gmra.mrb[24].mxu1 %vm685_vm2, %v16389_v16  ;;  %v4354_v29 = vld [vmem:[%s14670_s3 + $0x2e] sm:$0xff] }
 0x24b   : > { %12633 = vmatprep.mubr.msk.f32.mxu1 %vm14537_vm1, %v20167_v2  ;;  %v16538_v3 = vpop.f32.mrb[174].mxu0 }
 0x24c   : > { %v16541_v13 = vadd.f32 %v16430_v20, %v2418_v17  ;;  %v12492_v39 = vpop.f32.mrb[175].mxu0  ;;  %12904 = vmatmul.mubr.msk.f32.vlgmr.msra.gmra.mrb[24].mxu0 %vm685_vm2, %v4353_v49 }
 0x24d   : > { %v2307_v36 = vpop.f32.mrb[176].mxu1  ;;  %12906 = vmatprep.mubr.msk.f32.mxu0 %vm14537_vm1, %v20167_v2 }
 0x24e   : > { %v2419_v24 = vadd.f32 %v2307_v36, %v15864_v10  ;;  %v12349_v16 = vpop.f32.mrb[177].mxu1  ;;  %12634 = vmatmul.mubr.msk.f32.gmra.mrb[26].mxu1 %vm685_vm2, %v16406_v48  ;;  %v4355_v10 = vld [vmem:[%s14670_s3 + $0x36] sm:$0xff] }
 0x24f   : > { %12636 = vmatprep.mubr.msk.f32.mxu1 %vm14537_vm1, %v20167_v2  ;;  %v16552_v20 = vpop.f32.mrb[176].mxu0 }
 0x250   : > { %v16555_v1 = vadd.f32 %v16447_v35, %v2419_v24  ;;  %v12495_v33 = vpop.f32.mrb[177].mxu0  ;;  %12907 = vmatmul.mubr.msk.f32.gmra.mrb[26].mxu0 %vm685_vm2, %v4354_v29 }
 0x251   : > { %v2312_v8 = vpop.f32.mrb[178].mxu1  ;;  %12909 = vmatprep.mubr.msk.f32.mxu0 %vm14537_vm1, %v20167_v2 }
 0x252   : > { %v2420_v49 = vadd.f32 %v2312_v8, %v15885_v6  ;;  %v12352_v48 = vpop.f32.mrb[179].mxu1  ;;  %12637 = vmatmul.mubr.msk.f32.gmra.mrb[28].mxu1 %vm685_vm2, %v16423_v25  ;;  %v4356_v6 = vld [vmem:[%s14670_s3 + $0x3e] sm:$0xff] }
 0x253   : > { %12639 = vmatprep.mubr.msk.f32.mxu1 %vm14537_vm1, %v20167_v2  ;;  %v16566_v35 = vpop.f32.mrb[178].mxu0 }
 0x254   : > { %v16569_v17 = vadd.f32 %v16464_v4, %v2420_v49  ;;  %v12498_v12 = vpop.f32.mrb[179].mxu0  ;;  %12910 = vmatmul.mubr.msk.f32.gmra.mrb[28].mxu0 %vm685_vm2, %v4355_v10 }
 0x255   : > { %v2317_v39 = vpop.f32.mrb[180].mxu1  ;;  %12912 = vmatprep.mubr.msk.f32.mxu0 %vm14537_vm1, %v20167_v2 }
 0x256   : > { %v2421_v36 = vadd.f32 %v2317_v39, %v15903_v27  ;;  %v12355_v25 = vpop.f32.mrb[181].mxu1  ;;  %12640 = vmatmul.mubr.msk.f32.gmra.mrb[30].mxu1 %vm685_vm2, %v16440_v26  ;;  %v4357_v27 = vld [vmem:[%s14670_s3 + $0x46] sm:$0xff] }
 0x257   : > { %12642 = vmatprep.mubr.msk.f32.mxu1 %vm14537_vm1, %v20167_v2  ;;  %v16580_v4 = vpop.f32.mrb[180].mxu0 }
 0x258   : > { %v16583_v29 = vadd.f32 %v16481_v31, %v2421_v36  ;;  %v12501_v24 = vpop.f32.mrb[181].mxu0  ;;  %12913 = vmatmul.mubr.msk.f32.gmra.mrb[30].mxu0 %vm685_vm2, %v4356_v6 }
 0x259   : > { %v2322_v16 = vpop.f32.mrb[182].mxu1  ;;  %12915 = vmatprep.mubr.msk.f32.mxu0 %vm14537_vm1, %v20167_v2 }
 0x25a   : > { %v2422_v26 = vadd.f32 %v2322_v16, %v15920_v51  ;;  %v12358_v33 = vpop.f32.mrb[183].mxu1  ;;  %12643 = vmatmul.mubr.msk.f32.gmra.mrb[32].mxu1 %vm685_vm2, %v16457_v28  ;;  %v4358_v51 = vld [vmem:[%s14670_s3 + $0x4e] sm:$0xff] }
 0x25b   : > { %12645 = vmatprep.mubr.msk.f32.mxu1 %vm14537_vm1, %v20167_v2  ;;  %v16594_v31 = vpop.f32.mrb[182].mxu0 }
 0x25c   : > { %v16597_v8 = vadd.f32 %v16496_v47, %v2422_v26  ;;  %v12504_v10 = vpop.f32.mrb[183].mxu0  ;;  %12916 = vmatmul.mubr.msk.f32.gmra.mrb[32].mxu0 %vm685_vm2, %v4357_v27  ;;  %v2956_v47 = vld [vmem:[%s14670_s3 + $0x154] sm:$0xf] }
 0x25d   : > { %v2327_v49 = vpop.f32.mrb[184].mxu1  ;;  %12918 = vmatprep.mubr.msk.f32.mxu0 %vm14537_vm1, %v20167_v2 }
 0x25e   : > { %v2423_v48 = vadd.f32 %v2327_v49, %v15937_v41  ;;  %v12361_v28 = vpop.f32.mrb[185].mxu1  ;;  %12646 = vmatmul.mubr.msk.f32.gmra.mrb[34].mxu1 %vm685_vm2, %v16474_v14  ;;  %v4359_v41 = vld [vmem:[%s14670_s3 + $0x56] sm:$0xff] }
 0x25f   : > { %12648 = vmatprep.mubr.msk.f32.mxu1 %vm14537_vm1, %v20167_v2  ;;  %v16609_v12 = vpop.f32.mrb[184].mxu0 }
 0x260   : > { %v16612_v39 = vadd.f32 %v16510_v61, %v2423_v48  ;;  %v12507_v6 = vpop.f32.mrb[185].mxu0  ;;  %12919 = vmatmul.mubr.msk.f32.gmra.mrb[34].mxu0 %vm685_vm2, %v4358_v51  ;;  %v3874_v61 = vld [vmem:[%s14670_s3 + $0x25] sm:$0xff] }
 0x261   : > { %v2332_v36 = vpop.f32.mrb[186].mxu1  ;;  %12921 = vmatprep.mubr.msk.f32.mxu0 %vm14537_vm1, %v20167_v2 }
 0x262   : > { %v2424_v14 = vadd.f32 %v2332_v36, %v15954_v46  ;;  %v12364_v25 = vpop.f32.mrb[187].mxu1  ;;  %12649 = vmatmul.mubr.msk.f32.gmra.mrb[36].mxu1 %vm685_vm2, %v2956_v47  ;;  %v4360_v46 = vld [vmem:[%s14670_s3 + $0x5e] sm:$0xff] }
 0x263   : > { %12778 = vmatprep.mubr.msk.f32.mxu1 %vm14537_vm1, %v20167_v2  ;;  %v16623_v24 = vpop.f32.mrb[186].mxu0 }
 0x264   : > { %v16626_v16 = vadd.f32 %v16524_v0, %v2424_v14  ;;  %v12510_v27 = vpop.f32.mrb[187].mxu0  ;;  %12922 = vmatmul.mubr.msk.f32.gmra.mrb[36].mxu0 %vm685_vm2, %v4359_v41  ;;  %v3875_v0 = vld [vmem:[%s14670_s3 + $0x2d] sm:$0xff] }
 0x265   : > { %v2337_v26 = vpop.f32.mrb[188].mxu1  ;;  %12924 = vmatprep.mubr.msk.f32.mxu0 %vm14537_vm1, %v20167_v2 }
 0x266   : > { %v2425_v33 = vadd.f32 %v2337_v26, %v15975_v59  ;;  %v12367_v10 = vpop.f32.mrb[189].mxu1  ;;  %12779 = vmatmul.mubr.msk.f32.vlgmr.msra.gmra.mrb[38].mxu1 %vm685_vm2, %v3874_v61  ;;  %v4361_v59 = vld [vmem:[%s14670_s3 + $0x66] sm:$0xff] }
 0x267   : > { %12781 = vmatprep.mubr.msk.f32.mxu1 %vm14537_vm1, %v20167_v2  ;;  %v16637_v49 = vpop.f32.mrb[188].mxu0 }
 0x268   : > { %v16640_v51 = vadd.f32 %v16538_v3, %v2425_v33  ;;  %v12513_v48 = vpop.f32.mrb[189].mxu0  ;;  %12925 = vmatmul.mubr.msk.f32.gmra.mrb[38].mxu0 %vm685_vm2, %v4360_v46  ;;  %v3876_v3 = vld [vmem:[%s14670_s3 + $0x35] sm:$0xff] }
 0x269   : > { %v2342_v28 = vpop.f32.mrb[190].mxu1  ;;  %12927 = vmatprep.mubr.msk.f32.mxu0 %vm14537_vm1, %v20167_v2 }
 0x26a   : > { %v2426_v47 = vadd.f32 %v2342_v28, %v15991_v43  ;;  %v12370_v6 = vpop.f32.mrb[191].mxu1  ;;  %12782 = vmatmul.mubr.msk.f32.gmra.mrb[40].mxu1 %vm685_vm2, %v3875_v0  ;;  %v4362_v43 = vld [vmem:[%s14670_s3 + $0x6e] sm:$0xff] }
 0x26b   : > { %12784 = vmatprep.mubr.msk.f32.mxu1 %vm14537_vm1, %v20167_v2  ;;  %v16651_v36 = vpop.f32.mrb[190].mxu0 }
 0x26c   : > { %v16654_v41 = vadd.f32 %v16552_v20, %v2426_v47  ;;  %v12516_v14 = vpop.f32.mrb[191].mxu0  ;;  %12928 = vmatmul.mubr.msk.f32.gmra.mrb[40].mxu0 %vm685_vm2, %v4361_v59  ;;  %v3877_v20 = vld [vmem:[%s14670_s3 + $0x3d] sm:$0xff] }
 0x26d   : > { %v2347_v25 = vpop.f32.mrb[192].mxu1  ;;  %12930 = vmatprep.mubr.msk.f32.mxu0 %vm14537_vm1, %v20167_v2 }
 0x26e   : > { %v2427_v61 = vadd.f32 %v2347_v25, %v16008_v37  ;;  %v12373_v27 = vpop.f32.mrb[193].mxu1  ;;  %12785 = vmatmul.mubr.msk.f32.gmra.mrb[42].mxu1 %vm685_vm2, %v3876_v3  ;;  %v4363_v37 = vld [vmem:[%s14670_s3 + $0x76] sm:$0xff] }
 0x26f   : > { %12787 = vmatprep.mubr.msk.f32.mxu1 %vm14537_vm1, %v20167_v2  ;;  %v16665_v26 = vpop.f32.mrb[192].mxu0 }
 0x270   : > { %v16668_v46 = vadd.f32 %v16566_v35, %v2427_v61  ;;  %v12519_v33 = vpop.f32.mrb[193].mxu0  ;;  %12931 = vmatmul.mubr.msk.f32.gmra.mrb[42].mxu0 %vm685_vm2, %v4362_v43  ;;  %v3878_v35 = vld [vmem:[%s14670_s3 + $0x45] sm:$0xff] }
 0x271   : > { %v2352_v10 = vpop.f32.mrb[194].mxu1  ;;  %12933 = vmatprep.mubr.msk.f32.mxu0 %vm14537_vm1, %v20167_v2 }
 0x272   : > { %v2428_v0 = vadd.f32 %v2352_v10, %v16025_v58  ;;  %v12376_v48 = vpop.f32.mrb[195].mxu1  ;;  %12788 = vmatmul.mubr.msk.f32.gmra.mrb[44].mxu1 %vm685_vm2, %v3877_v20  ;;  %v4364_v58 = vld [vmem:[%s14670_s3 + $0x7e] sm:$0xff] }
 0x273   : > { %12790 = vmatprep.mubr.msk.f32.mxu1 %vm14537_vm1, %v20167_v2  ;;  %v16679_v28 = vpop.f32.mrb[194].mxu0 }
 0x274   : > { %v16682_v59 = vadd.f32 %v16580_v4, %v2428_v0  ;;  %v12522_v47 = vpop.f32.mrb[195].mxu0  ;;  %12934 = vmatmul.mubr.msk.f32.gmra.mrb[44].mxu0 %vm685_vm2, %v4363_v37  ;;  %v3879_v4 = vld [vmem:[%s14670_s3 + $0x4d] sm:$0xff] }
 0x275   : > { %v2357_v6 = vpop.f32.mrb[196].mxu1  ;;  %12936 = vmatprep.mubr.msk.f32.mxu0 %vm14537_vm1, %v20167_v2 }
 0x276   : > { %v2429_v3 = vadd.f32 %v2357_v6, %v16042_v30  ;;  %v12379_v14 = vpop.f32.mrb[197].mxu1  ;;  %12791 = vmatmul.mubr.msk.f32.gmra.mrb[46].mxu1 %vm685_vm2, %v3878_v35  ;;  %v4365_v30 = vld [vmem:[%s14670_s3 + $0x86] sm:$0xff] }
 0x277   : > { %12793 = vmatprep.mubr.msk.f32.mxu1 %vm14537_vm1, %v20167_v2  ;;  %v16693_v25 = vpop.f32.mrb[196].mxu0 }
 0x278   : > { %v16696_v43 = vadd.f32 %v16594_v31, %v2429_v3  ;;  %v12525_v61 = vpop.f32.mrb[197].mxu0  ;;  %12937 = vmatmul.mubr.msk.f32.gmra.mrb[46].mxu0 %vm685_vm2, %v4364_v58  ;;  %v3880_v31 = vld [vmem:[%s14670_s3 + $0x55] sm:$0xff] }
 0x279   : > { %v2362_v27 = vpop.f32.mrb[198].mxu1  ;;  %12939 = vmatprep.mubr.msk.f32.mxu0 %vm14537_vm1, %v20167_v2 }
 0x27a   : > { %v2430_v20 = vadd.f32 %v2362_v27, %v16059_v57  ;;  %v12382_v33 = vpop.f32.mrb[199].mxu1  ;;  %12794 = vmatmul.mubr.msk.f32.gmra.mrb[48].mxu1 %vm685_vm2, %v3879_v4  ;;  %v4366_v57 = vld [vmem:[%s14670_s3 + $0x8e] sm:$0xff] }
 0x27b   : > { %12796 = vmatprep.mubr.msk.f32.mxu1 %vm14537_vm1, %v20167_v2  ;;  %v16707_v10 = vpop.f32.mrb[198].mxu0 }
 0x27c   : > { %v16710_v37 = vadd.f32 %v16609_v12, %v2430_v20  ;;  %v12655_v0 = vpop.f32.mrb[199].mxu0  ;;  %12940 = vmatmul.mubr.msk.f32.gmra.mrb[48].mxu0 %vm685_vm2, %v4365_v30  ;;  %v3881_v12 = vld [vmem:[%s14670_s3 + $0x5d] sm:$0xff] }
 0x27d   : > { %v2367_v48 = vpop.f32.mrb[200].mxu1  ;;  %12942 = vmatprep.mubr.msk.f32.mxu0 %vm14537_vm1, %v20167_v2 }
 0x27e   : > { %v2431_v35 = vadd.f32 %v2367_v48, %v16076_v15  ;;  %v12385_v47 = vpop.f32.mrb[201].mxu1  ;;  %12797 = vmatmul.mubr.msk.f32.gmra.mrb[50].mxu1 %vm685_vm2, %v3880_v31  ;;  %v4367_v15 = vld [vmem:[%s14670_s3 + $0x96] sm:$0xff] }
 0x27f   : > { %12799 = vmatprep.mubr.msk.f32.mxu1 %vm14537_vm1, %v20167_v2  ;;  %v16721_v6 = vpop.f32.mrb[200].mxu0 }
 0x280   : > { %v16724_v58 = vadd.f32 %v16623_v24, %v2431_v35  ;;  %v12658_v3 = vpop.f32.mrb[201].mxu0  ;;  %12943 = vmatmul.mubr.msk.f32.gmra.mrb[50].mxu0 %vm685_vm2, %v4366_v57  ;;  %v3882_v24 = vld [vmem:[%s14670_s3 + $0x65] sm:$0xff] }
 0x281   : > { %v2372_v14 = vpop.f32.mrb[202].mxu1  ;;  %12945 = vmatprep.mubr.msk.f32.mxu0 %vm14537_vm1, %v20167_v2 }
 0x282   : > { %v2432_v4 = vadd.f32 %v2372_v14, %v16093_v5  ;;  %v12388_v61 = vpop.f32.mrb[203].mxu1  ;;  %12800 = vmatmul.mubr.msk.f32.gmra.mrb[52].mxu1 %vm685_vm2, %v3881_v12  ;;  %v4368_v5 = vld [vmem:[%s14670_s3 + $0x9e] sm:$0xff] }
 0x283   : > { %12802 = vmatprep.mubr.msk.f32.mxu1 %vm14537_vm1, %v20167_v2  ;;  %v16735_v27 = vpop.f32.mrb[202].mxu0  ;;  %v20215_v12 = vld [vmem:[#allocation12_spill] sm:$0xff] }
 0x284   : > { %v16738_v30 = vadd.f32 %v16637_v49, %v2432_v4  ;;  %v12661_v20 = vpop.f32.mrb[203].mxu0  ;;  %12946 = vmatmul.mubr.msk.f32.gmra.mrb[52].mxu0 %vm685_vm2, %v4367_v15  ;;  %v3883_v49 = vld [vmem:[%s14670_s3 + $0x6d] sm:$0xff] }
 0x285   : > { %v2377_v33 = vpop.f32.mrb[204].mxu1  ;;  %12948 = vmatprep.mubr.msk.f32.mxu0 %vm14537_vm1, %v20167_v2  ;;  %v4370_v20 = vld [vmem:[%s14670_s3 + $0xae] sm:$0xff] }
 0x286   : > { %v2433_v31 = vadd.f32 %v2377_v33, %v16110_v50  ;;  %v12391_v0 = vpop.f32.mrb[205].mxu1  ;;  %12803 = vmatmul.mubr.msk.f32.gmra.mrb[54].mxu1 %vm685_vm2, %v3882_v24  ;;  %v4369_v50 = vld [vmem:[%s14670_s3 + $0xa6] sm:$0xff]  ;;  %v20216_v33 = vld [vmem:[#allocation10_spill] sm:$0xff] }
 0x287   : > { %12805 = vmatprep.mubr.msk.f32.mxu1 %vm14537_vm1, %v20167_v2  ;;  %v16749_v48 = vpop.f32.mrb[204].mxu0 }
 0x288   : > { %v16752_v57 = vadd.f32 %v16651_v36, %v2433_v31  ;;  %v12664_v35 = vpop.f32.mrb[205].mxu0  ;;  %12949 = vmatmul.mubr.msk.f32.gmra.mrb[54].mxu0 %vm685_vm2, %v4368_v5  ;;  %v3884_v36 = vld [vmem:[%s14670_s3 + $0x75] sm:$0xff] }
 0x289   : > { %v2382_v47 = vpop.f32.mrb[206].mxu1  ;;  %12951 = vmatprep.mubr.msk.f32.mxu0 %vm14537_vm1, %v20167_v2 }
 0x28a   : > { %v2434_v3 = vadd.f32 %v2382_v47, %v20215_v12  ;;  %v12394_v14 = vpop.f32.mrb[207].mxu1  ;;  %12806 = vmatmul.mubr.msk.f32.gmra.mrb[56].mxu1 %vm685_vm2, %v3883_v49 }
 0x28b   : > { %12808 = vmatprep.mubr.msk.f32.mxu1 %vm14537_vm1, %v20167_v2  ;;  %v16763_v15 = vpop.f32.mrb[206].mxu0 }
 0x28c   : > { %v16766_v4 = vadd.f32 %v16665_v26, %v2434_v3  ;;  %v12667_v61 = vpop.f32.mrb[207].mxu0  ;;  %12952 = vmatmul.mubr.msk.f32.gmra.mrb[56].mxu0 %vm685_vm2, %v4369_v50  ;;  %v3885_v26 = vld [vmem:[%s14670_s3 + $0x7d] sm:$0xff] }
 0x28d   : > { %v2387_v24 = vpop.f32.mrb[208].mxu1  ;;  %12954 = vmatprep.mubr.msk.f32.mxu0 %vm14537_vm1, %v20167_v2  ;;  %v4371_v50 = vld [vmem:[%s14670_s3 + $0xb6] sm:$0xff] }
 0x28e   : > { %v2435_v5 = vadd.f32 %v2387_v24, %v20216_v33  ;;  %v12397_v31 = vpop.f32.mrb[209].mxu1  ;;  %12809 = vmatmul.mubr.msk.f32.gmra.mrb[58].mxu1 %vm685_vm2, %v3884_v36 }
 0x28f   : > { %12811 = vmatprep.mubr.msk.f32.mxu1 %vm14537_vm1, %v20167_v2  ;;  %v16777_v0 = vpop.f32.mrb[208].mxu0 }
 0x290   : > { %v16780_v49 = vadd.f32 %v16679_v28, %v2435_v5  ;;  %v12670_v35 = vpop.f32.mrb[209].mxu0  ;;  %12955 = vmatmul.mubr.msk.f32.gmra.mrb[58].mxu0 %vm685_vm2, %v4370_v20  ;;  %v3886_v28 = vld [vmem:[%s14670_s3 + $0x85] sm:$0xff] }
 0x291   : > { %v2392_v47 = vpop.f32.mrb[210].mxu1  ;;  %12957 = vmatprep.mubr.msk.f32.mxu0 %vm14537_vm1, %v20167_v2 }
 0x292   : > { %v2436_v12 = vadd.f32 %v2392_v47, %v16161_v40  ;;  %v12400_v3 = vpop.f32.mrb[211].mxu1  ;;  %12812 = vmatmul.mubr.msk.f32.gmra.mrb[60].mxu1 %vm685_vm2, %v3885_v26  ;;  %v4372_v40 = vld [vmem:[%s14670_s3 + $0xbe] sm:$0xff] }
 0x293   : > { %12814 = vmatprep.mubr.msk.f32.mxu1 %vm14537_vm1, %v20167_v2  ;;  %v16791_v14 = vpop.f32.mrb[210].mxu0 }
 0x294   : > { %v16794_v36 = vadd.f32 %v16693_v25, %v2436_v12  ;;  %v12673_v61 = vpop.f32.mrb[211].mxu0  ;;  %12958 = vmatmul.mubr.msk.f32.gmra.mrb[60].mxu0 %vm685_vm2, %v4371_v50  ;;  %v3887_v25 = vld [vmem:[%s14670_s3 + $0x8d] sm:$0xff] }
 0x295   : > { %v3150_v24 = vpop.f32.mrb[212].mxu1  ;;  %12960 = vmatprep.mubr.msk.f32.mxu0 %vm14537_vm1, %v20167_v2 }
 0x296   : > { %v3354_v20 = vadd.f32 %v3150_v24, %v16178_v21  ;;  %v12530_v33 = vpop.f32.mrb[213].mxu1  ;;  %12815 = vmatmul.mubr.msk.f32.gmra.mrb[62].mxu1 %vm685_vm2, %v3886_v28  ;;  %v4373_v21 = vld [vmem:[%s14670_s3 + $0xc6] sm:$0xff] }
 0x297   : > { %12817 = vmatprep.mubr.msk.f32.mxu1 %vm14537_vm1, %v20167_v2  ;;  %v16805_v5 = vpop.f32.mrb[212].mxu0 }
 0x298   : > { %v16808_v31 = vadd.f32 %v16707_v10, %v3354_v20  ;;  %v12676_v26 = vpop.f32.mrb[213].mxu0  ;;  %12961 = vmatmul.mubr.msk.f32.gmra.mrb[62].mxu0 %vm685_vm2, %v4372_v40  ;;  %v3888_v10 = vld [vmem:[%s14670_s3 + $0x95] sm:$0xff] }
 0x299   : > { %v3155_v35 = vpop.f32.mrb[214].mxu1  ;;  %12963 = vmatprep.mubr.msk.f32.mxu0 %vm14537_vm1, %v20167_v2 }
 0x29a   : > { %v3355_v47 = vadd.f32 %v3155_v35, %v16195_v60  ;;  %v12533_v50 = vpop.f32.mrb[215].mxu1  ;;  %12818 = vmatmul.mubr.msk.f32.gmra.mrb[64].mxu1 %vm685_vm2, %v3887_v25  ;;  %v4374_v60 = vld [vmem:[%s14670_s3 + $0xce] sm:$0xff] }
 0x29b   : > { %12820 = vmatprep.mubr.msk.f32.mxu1 %vm14537_vm1, %v20167_v2  ;;  %v16819_v12 = vpop.f32.mrb[214].mxu0 }
 0x29c   : > { %v16822_v3 = vadd.f32 %v16721_v6, %v3355_v47  ;;  %v12679_v28 = vpop.f32.mrb[215].mxu0  ;;  %12964 = vmatmul.mubr.msk.f32.gmra.mrb[64].mxu0 %vm685_vm2, %v4373_v21  ;;  %v3889_v6 = vld [vmem:[%s14670_s3 + $0x9d] sm:$0xff] }
 0x29d   : > { %v3160_v61 = vpop.f32.mrb[216].mxu1  ;;  %12966 = vmatprep.mubr.msk.f32.mxu0 %vm14537_vm1, %v20167_v2 }
 0x29e   : > { %v3356_v24 = vadd.f32 %v3160_v61, %v16212_v62  ;;  %v12536_v40 = vpop.f32.mrb[217].mxu1  ;;  %12821 = vmatmul.mubr.msk.f32.gmra.mrb[66].mxu1 %vm685_vm2, %v3888_v10  ;;  %v4375_v62 = vld [vmem:[%s14670_s3 + $0xd6] sm:$0xff] }
 0x29f   : > { %12823 = vmatprep.mubr.msk.f32.mxu1 %vm14537_vm1, %v20167_v2  ;;  %v16833_v20 = vpop.f32.mrb[216].mxu0 }
 0x2a0   : > { %v16836_v33 = vadd.f32 %v16735_v27, %v3356_v24  ;;  %v12682_v25 = vpop.f32.mrb[217].mxu0  ;;  %12967 = vmatmul.mubr.msk.f32.gmra.mrb[66].mxu0 %vm685_vm2, %v4374_v60  ;;  %v3890_v27 = vld [vmem:[%s14670_s3 + $0xa5] sm:$0xff] }
 0x2a1   : > { %v3165_v26 = vpop.f32.mrb[218].mxu1  ;;  %12969 = vmatprep.mubr.msk.f32.mxu0 %vm14537_vm1, %v20167_v2 }
 0x2a2   : > { %v3357_v35 = vadd.f32 %v3165_v26, %v16229_v55  ;;  %v12539_v21 = vpop.f32.mrb[219].mxu1  ;;  %12824 = vmatmul.mubr.msk.f32.gmra.mrb[68].mxu1 %vm685_vm2, %v3889_v6  ;;  %v4376_v55 = vld [vmem:[%s14670_s3 + $0xde] sm:$0xff] }
 0x2a3   : > { %12826 = vmatprep.mubr.msk.f32.mxu1 %vm14537_vm1, %v20167_v2  ;;  %v16847_v47 = vpop.f32.mrb[218].mxu0 }
 0x2a4   : > { %v16850_v50 = vadd.f32 %v16749_v48, %v3357_v35  ;;  %v12685_v10 = vpop.f32.mrb[219].mxu0  ;;  %12970 = vmatmul.mubr.msk.f32.gmra.mrb[68].mxu0 %vm685_vm2, %v4375_v62  ;;  %v3891_v48 = vld [vmem:[%s14670_s3 + $0xad] sm:$0xff] }
 0x2a5   : > { %v3170_v28 = vpop.f32.mrb[220].mxu1  ;;  %12972 = vmatprep.mubr.msk.f32.mxu0 %vm14537_vm1, %v20167_v2 }
 0x2a6   : > { %v3358_v61 = vadd.f32 %v3170_v28, %v16246_v56  ;;  %v12542_v60 = vpop.f32.mrb[221].mxu1  ;;  %12827 = vmatmul.mubr.msk.f32.gmra.mrb[70].mxu1 %vm685_vm2, %v3890_v27  ;;  %v4377_v56 = vld [vmem:[%s14670_s3 + $0xe6] sm:$0xff] }
 0x2a7   : > { %12829 = vmatprep.mubr.msk.f32.mxu1 %vm14537_vm1, %v20167_v2  ;;  %v16861_v24 = vpop.f32.mrb[220].mxu0 }
 0x2a8   : > { %v16864_v40 = vadd.f32 %v16763_v15, %v3358_v61  ;;  %v12688_v6 = vpop.f32.mrb[221].mxu0  ;;  %12973 = vmatmul.mubr.msk.f32.gmra.mrb[70].mxu0 %vm685_vm2, %v4376_v55  ;;  %v3892_v15 = vld [vmem:[%s14670_s3 + $0xb5] sm:$0xff] }
 0x2a9   : > { %v3175_v25 = vpop.f32.mrb[222].mxu1  ;;  %12975 = vmatprep.mubr.msk.f32.mxu0 %vm14537_vm1, %v20167_v2 }
 0x2aa   : > { %v3359_v26 = vadd.f32 %v3175_v25, %v16263_v63  ;;  %v12545_v62 = vpop.f32.mrb[223].mxu1  ;;  %12830 = vmatmul.mubr.msk.f32.gmra.mrb[72].mxu1 %vm685_vm2, %v3891_v48  ;;  %v4378_v63 = vld [vmem:[%s14670_s3 + $0xee] sm:$0xff] }
 0x2ab   : > { %12832 = vmatprep.mubr.msk.f32.mxu1 %vm14537_vm1, %v20167_v2  ;;  %v16875_v35 = vpop.f32.mrb[222].mxu0 }
 0x2ac   : > { %v16878_v21 = vadd.f32 %v16777_v0, %v3359_v26  ;;  %v12691_v27 = vpop.f32.mrb[223].mxu0  ;;  %12976 = vmatmul.mubr.msk.f32.gmra.mrb[72].mxu0 %vm685_vm2, %v4377_v56  ;;  %v3893_v0 = vld [vmem:[%s14670_s3 + $0xbd] sm:$0xff] }
 0x2ad   : > { %v3180_v10 = vpop.f32.mrb[224].mxu1  ;;  %12978 = vmatprep.mubr.msk.f32.mxu0 %vm14537_vm1, %v20167_v2 }
 0x2ae   : > { %v3360_v28 = vadd.f32 %v3180_v10, %v16280_v42  ;;  %v12548_v55 = vpop.f32.mrb[225].mxu1  ;;  %12833 = vmatmul.mubr.msk.f32.gmra.mrb[74].mxu1 %vm685_vm2, %v3892_v15  ;;  %v4379_v42 = vld [vmem:[%s14670_s3 + $0xf6] sm:$0xff] }
 0x2af   : > { %12835 = vmatprep.mubr.msk.f32.mxu1 %vm14537_vm1, %v20167_v2  ;;  %v16889_v61 = vpop.f32.mrb[224].mxu0 }
 0x2b0   : > { %v16892_v60 = vadd.f32 %v16791_v14, %v3360_v28  ;;  %v12694_v48 = vpop.f32.mrb[225].mxu0  ;;  %12979 = vmatmul.mubr.msk.f32.gmra.mrb[74].mxu0 %vm685_vm2, %v4378_v63  ;;  %v3894_v14 = vld [vmem:[%s14670_s3 + $0xc5] sm:$0xff] }
 0x2b1   : > { %v3185_v6 = vpop.f32.mrb[226].mxu1  ;;  %12981 = vmatprep.mubr.msk.f32.mxu0 %vm14537_vm1, %v20167_v2 }
 0x2b2   : > { %v3361_v25 = vadd.f32 %v3185_v6, %v16297_v53  ;;  %v12551_v56 = vpop.f32.mrb[227].mxu1  ;;  %12836 = vmatmul.mubr.msk.f32.gmra.mrb[76].mxu1 %vm685_vm2, %v3893_v0  ;;  %v4380_v53 = vld [vmem:[%s14670_s3 + $0xfe] sm:$0xff] }
 0x2b3   : > { %12838 = vmatprep.mubr.msk.f32.mxu1 %vm14537_vm1, %v20167_v2  ;;  %v16903_v26 = vpop.f32.mrb[226].mxu0 }
 0x2b4   : > { %v16906_v62 = vadd.f32 %v16805_v5, %v3361_v25  ;;  %v12697_v15 = vpop.f32.mrb[227].mxu0  ;;  %12982 = vmatmul.mubr.msk.f32.gmra.mrb[76].mxu0 %vm685_vm2, %v4379_v42  ;;  %v3895_v5 = vld [vmem:[%s14670_s3 + $0xcd] sm:$0xff] }
 0x2b5   : > { %v3190_v27 = vpop.f32.mrb[228].mxu1  ;;  %12984 = vmatprep.mubr.msk.f32.mxu0 %vm14537_vm1, %v20167_v2 }
 0x2b6   : > { %v3362_v10 = vadd.f32 %v3190_v27, %v16314_v19  ;;  %v12554_v63 = vpop.f32.mrb[229].mxu1  ;;  %12839 = vmatmul.mubr.msk.f32.gmra.mrb[78].mxu1 %vm685_vm2, %v3894_v14  ;;  %v4381_v19 = vld [vmem:[%s14670_s3 + $0x106] sm:$0xff] }
 0x2b7   : > { %12841 = vmatprep.mubr.msk.f32.mxu1 %vm14537_vm1, %v20167_v2  ;;  %v16917_v28 = vpop.f32.mrb[228].mxu0 }
 0x2b8   : > { %v16920_v55 = vadd.f32 %v16819_v12, %v3362_v10  ;;  %v12700_v0 = vpop.f32.mrb[229].mxu0  ;;  %12985 = vmatmul.mubr.msk.f32.gmra.mrb[78].mxu0 %vm685_vm2, %v4380_v53  ;;  %v3896_v12 = vld [vmem:[%s14670_s3 + $0xd5] sm:$0xff] }
 0x2b9   : > { %v3195_v48 = vpop.f32.mrb[230].mxu1  ;;  %12987 = vmatprep.mubr.msk.f32.mxu0 %vm14537_vm1, %v20167_v2 }
 0x2ba   : > { %v3363_v6 = vadd.f32 %v3195_v48, %v16331_v32  ;;  %v12557_v42 = vpop.f32.mrb[231].mxu1  ;;  %12842 = vmatmul.mubr.msk.f32.gmra.mrb[80].mxu1 %vm685_vm2, %v3895_v5  ;;  %v4382_v32 = vld [vmem:[%s14670_s3 + $0x10e] sm:$0xff] }
 0x2bb   : > { %12844 = vmatprep.mubr.msk.f32.mxu1 %vm14537_vm1, %v20167_v2  ;;  %v16931_v25 = vpop.f32.mrb[230].mxu0 }
 0x2bc   : > { %v16934_v56 = vadd.f32 %v16833_v20, %v3363_v6  ;;  %v12703_v14 = vpop.f32.mrb[231].mxu0  ;;  %12988 = vmatmul.mubr.msk.f32.gmra.mrb[80].mxu0 %vm685_vm2, %v4381_v19  ;;  %v3897_v20 = vld [vmem:[%s14670_s3 + $0xdd] sm:$0xff] }
 0x2bd   : > { %v3200_v15 = vpop.f32.mrb[232].mxu1  ;;  %12990 = vmatprep.mubr.msk.f32.mxu0 %vm14537_vm1, %v20167_v2 }
 0x2be   : > { %v3364_v27 = vadd.f32 %v3200_v15, %v16348_v23  ;;  %v12560_v53 = vpop.f32.mrb[233].mxu1  ;;  %12845 = vmatmul.mubr.msk.f32.gmra.mrb[82].mxu1 %vm685_vm2, %v3896_v12  ;;  %v4383_v23 = vld [vmem:[%s14670_s3 + $0x116] sm:$0xff] }
 0x2bf   : > { %12847 = vmatprep.mubr.msk.f32.mxu1 %vm14537_vm1, %v20167_v2  ;;  %v16945_v10 = vpop.f32.mrb[232].mxu0 }
 0x2c0   : > { %v16948_v63 = vadd.f32 %v16847_v47, %v3364_v27  ;;  %v12706_v5 = vpop.f32.mrb[233].mxu0  ;;  %12991 = vmatmul.mubr.msk.f32.gmra.mrb[82].mxu0 %vm685_vm2, %v4382_v32  ;;  %v3898_v47 = vld [vmem:[%s14670_s3 + $0xe5] sm:$0xff] }
 0x2c1   : > { %v3205_v0 = vpop.f32.mrb[234].mxu1  ;;  %12993 = vmatprep.mubr.msk.f32.mxu0 %vm14537_vm1, %v20167_v2 }
 0x2c2   : > { %v3365_v48 = vadd.f32 %v3205_v0, %v16365_v54  ;;  %v12563_v19 = vpop.f32.mrb[235].mxu1  ;;  %12848 = vmatmul.mubr.msk.f32.gmra.mrb[84].mxu1 %vm685_vm2, %v3897_v20  ;;  %v4384_v54 = vld [vmem:[%s14670_s3 + $0x11e] sm:$0xff] }
 0x2c3   : > { %12850 = vmatprep.mubr.msk.f32.mxu1 %vm14537_vm1, %v20167_v2  ;;  %v16959_v6 = vpop.f32.mrb[234].mxu0 }
 0x2c4   : > { %v16962_v42 = vadd.f32 %v16861_v24, %v3365_v48  ;;  %v12709_v12 = vpop.f32.mrb[235].mxu0  ;;  %12994 = vmatmul.mubr.msk.f32.gmra.mrb[84].mxu0 %vm685_vm2, %v4383_v23  ;;  %v3899_v24 = vld [vmem:[%s14670_s3 + $0xed] sm:$0xff] }
 0x2c5   : > { %v3210_v14 = vpop.f32.mrb[236].mxu1  ;;  %12996 = vmatprep.mubr.msk.f32.mxu0 %vm14537_vm1, %v20167_v2 }
 0x2c6   : > { %v3366_v15 = vadd.f32 %v3210_v14, %v16382_v44  ;;  %v12566_v32 = vpop.f32.mrb[237].mxu1  ;;  %12851 = vmatmul.mubr.msk.f32.gmra.mrb[86].mxu1 %vm685_vm2, %v3898_v47  ;;  %v4385_v44 = vld [vmem:[%s14670_s3 + $0x126] sm:$0xff] }
 0x2c7   : > { %12853 = vmatprep.mubr.msk.f32.mxu1 %vm14537_vm1, %v20167_v2  ;;  %v16973_v27 = vpop.f32.mrb[236].mxu0 }
 0x2c8   : > { %v16976_v53 = vadd.f32 %v16875_v35, %v3366_v15  ;;  %v12712_v20 = vpop.f32.mrb[237].mxu0  ;;  %12997 = vmatmul.mubr.msk.f32.gmra.mrb[86].mxu0 %vm685_vm2, %v4384_v54  ;;  %v3900_v35 = vld [vmem:[%s14670_s3 + $0xf5] sm:$0xff] }
 0x2c9   : > { %v3215_v5 = vpop.f32.mrb[238].mxu1  ;;  %12999 = vmatprep.mubr.msk.f32.mxu0 %vm14537_vm1, %v20167_v2 }
 0x2ca   : > { %v3367_v0 = vadd.f32 %v3215_v5, %v16399_v52  ;;  %v12569_v23 = vpop.f32.mrb[239].mxu1  ;;  %12854 = vmatmul.mubr.msk.f32.gmra.mrb[88].mxu1 %vm685_vm2, %v3899_v24  ;;  %v4386_v52 = vld [vmem:[%s14670_s3 + $0x12e] sm:$0xff] }
 0x2cb   : > { %12856 = vmatprep.mubr.msk.f32.mxu1 %vm14537_vm1, %v20167_v2  ;;  %v16987_v48 = vpop.f32.mrb[238].mxu0 }
 0x2cc   : > { %v16990_v19 = vadd.f32 %v16889_v61, %v3367_v0  ;;  %v12715_v47 = vpop.f32.mrb[239].mxu0  ;;  %13000 = vmatmul.mubr.msk.f32.gmra.mrb[88].mxu0 %vm685_vm2, %v4385_v44  ;;  %v3901_v61 = vld [vmem:[%s14670_s3 + $0xfd] sm:$0xff] }
 0x2cd   : > { %v3220_v12 = vpop.f32.mrb[240].mxu1  ;;  %13002 = vmatprep.mubr.msk.f32.mxu0 %vm14537_vm1, %v20167_v2 }
 0x2ce   : > { %v3368_v14 = vadd.f32 %v3220_v12, %v16416_v22  ;;  %v12572_v54 = vpop.f32.mrb[241].mxu1  ;;  %12857 = vmatmul.mubr.msk.f32.gmra.mrb[90].mxu1 %vm685_vm2, %v3900_v35  ;;  %v4387_v22 = vld [vmem:[%s14670_s3 + $0x136] sm:$0xff] }
 0x2cf   : > { %12859 = vmatprep.mubr.msk.f32.mxu1 %vm14537_vm1, %v20167_v2  ;;  %v17001_v15 = vpop.f32.mrb[240].mxu0 }
 0x2d0   : > { %v17004_v32 = vadd.f32 %v16903_v26, %v3368_v14  ;;  %v12718_v24 = vpop.f32.mrb[241].mxu0  ;;  %13003 = vmatmul.mubr.msk.f32.gmra.mrb[90].mxu0 %vm685_vm2, %v4386_v52  ;;  %v3902_v26 = vld [vmem:[%s14670_s3 + $0x105] sm:$0xff] }
 0x2d1   : > { %v3225_v20 = vpop.f32.mrb[242].mxu1  ;;  %13005 = vmatprep.mubr.msk.f32.mxu0 %vm14537_vm1, %v20167_v2 }
 0x2d2   : > { %v3369_v5 = vadd.f32 %v3225_v20, %v16433_v34  ;;  %v12575_v44 = vpop.f32.mrb[243].mxu1  ;;  %12860 = vmatmul.mubr.msk.f32.gmra.mrb[92].mxu1 %vm685_vm2, %v3901_v61  ;;  %v4388_v34 = vld [vmem:[%s14670_s3 + $0x13e] sm:$0xff] }
 0x2d3   : > { %12862 = vmatprep.mubr.msk.f32.mxu1 %vm14537_vm1, %v20167_v2  ;;  %v17015_v0 = vpop.f32.mrb[242].mxu0 }
 0x2d4   : > { %v17018_v23 = vadd.f32 %v16917_v28, %v3369_v5  ;;  %v12721_v35 = vpop.f32.mrb[243].mxu0  ;;  %13006 = vmatmul.mubr.msk.f32.gmra.mrb[92].mxu0 %vm685_vm2, %v4387_v22  ;;  %v3903_v28 = vld [vmem:[%s14670_s3 + $0x10d] sm:$0xff] }
 0x2d5   : > { %v3230_v47 = vpop.f32.mrb[244].mxu1  ;;  %13008 = vmatprep.mubr.msk.f32.mxu0 %vm14537_vm1, %v20167_v2 }
 0x2d6   : > { %v3370_v12 = vadd.f32 %v3230_v47, %v16450_v9  ;;  %v12578_v52 = vpop.f32.mrb[245].mxu1  ;;  %12863 = vmatmul.mubr.msk.f32.gmra.mrb[94].mxu1 %vm685_vm2, %v3902_v26  ;;  %v4389_v9 = vld [vmem:[%s14670_s3 + $0x146] sm:$0xff] }
 0x2d7   : > { %12865 = vmatprep.mubr.msk.f32.mxu1 %vm14537_vm1, %v20167_v2  ;;  %v17029_v14 = vpop.f32.mrb[244].mxu0 }
 0x2d8   : > { %v17032_v54 = vadd.f32 %v16931_v25, %v3370_v12  ;;  %v12724_v61 = vpop.f32.mrb[245].mxu0  ;;  %13009 = vmatmul.mubr.msk.f32.gmra.mrb[94].mxu0 %vm685_vm2, %v4388_v34  ;;  %v3904_v25 = vld [vmem:[%s14670_s3 + $0x115] sm:$0xff] }
 0x2d9   : > { %v3235_v24 = vpop.f32.mrb[246].mxu1  ;;  %13011 = vmatprep.mubr.msk.f32.mxu0 %vm14537_vm1, %v20167_v2 }
 0x2da   : > { %v3371_v20 = vadd.f32 %v3235_v24, %v16467_v7  ;;  %v12581_v22 = vpop.f32.mrb[247].mxu1  ;;  %12866 = vmatmul.mubr.msk.f32.gmra.mrb[96].mxu1 %vm685_vm2, %v3903_v28  ;;  %v4390_v7 = vld [vmem:[%s14670_s3 + $0x14e] sm:$0xff] }
 0x2db   : > { %12868 = vmatprep.mubr.msk.f32.mxu1 %vm14537_vm1, %v20167_v2  ;;  %v17043_v5 = vpop.f32.mrb[246].mxu0 }
 0x2dc   : > { %v17046_v44 = vadd.f32 %v16945_v10, %v3371_v20  ;;  %v12727_v26 = vpop.f32.mrb[247].mxu0  ;;  %13012 = vmatmul.mubr.msk.f32.gmra.mrb[96].mxu0 %vm685_vm2, %v4389_v9  ;;  %v3905_v10 = vld [vmem:[%s14670_s3 + $0x11d] sm:$0xff] }
 0x2dd   : > { %v3240_v35 = vpop.f32.mrb[248].mxu1  ;;  %13014 = vmatprep.mubr.msk.f32.mxu0 %vm14537_vm1, %v20167_v2 }
 0x2de   : > { %v3372_v47 = vadd.f32 %v3240_v35, %v16484_v38  ;;  %v12584_v34 = vpop.f32.mrb[249].mxu1  ;;  %12869 = vmatmul.mubr.msk.f32.gmra.mrb[98].mxu1 %vm685_vm2, %v3904_v25  ;;  %v4391_v38 = vld [vmem:[%s14670_s3 + $0x156] sm:$0xff] }
 0x2df   : > { %12871 = vmatprep.mubr.msk.f32.mxu1 %vm14537_vm1, %v20167_v2  ;;  %v17057_v12 = vpop.f32.mrb[248].mxu0 }
 0x2e0   : > { %v17060_v52 = vadd.f32 %v16959_v6, %v3372_v47  ;;  %v12730_v28 = vpop.f32.mrb[249].mxu0  ;;  %13015 = vmatmul.mubr.msk.f32.gmra.mrb[98].mxu0 %vm685_vm2, %v4390_v7  ;;  %v3906_v6 = vld [vmem:[%s14670_s3 + $0x125] sm:$0xff] }
 0x2e1   : > { %v3245_v61 = vpop.f32.mrb[250].mxu1  ;;  %13017 = vmatprep.mubr.msk.f32.mxu0 %vm14537_vm1, %v20167_v2 }
 0x2e2   : > { %v3373_v24 = vadd.f32 %v3245_v61, %v16499_v45  ;;  %v12587_v9 = vpop.f32.mrb[251].mxu1  ;;  %12872 = vmatmul.mubr.msk.f32.gmra.mrb[100].mxu1 %vm685_vm2, %v3905_v10  ;;  %v4392_v45 = vld [vmem:[%s14670_s3 + $0x15e] sm:$0xff] }
 0x2e3   : > { %12874 = vmatprep.mubr.msk.f32.mxu1 %vm14537_vm1, %v20167_v2  ;;  %v17071_v20 = vpop.f32.mrb[250].mxu0 }
 0x2e4   : > { %v17074_v22 = vadd.f32 %v16973_v27, %v3373_v24  ;;  %v12733_v25 = vpop.f32.mrb[251].mxu0  ;;  %13018 = vmatmul.mubr.msk.f32.gmra.mrb[100].mxu0 %vm685_vm2, %v4391_v38  ;;  %v3907_v27 = vld [vmem:[%s14670_s3 + $0x12d] sm:$0xff]  ;;  %v3908_v24 = vld [vmem:[%s14670_s3 + $0x135] sm:$0xff] }
 0x2e5   : > { %v3250_v26 = vpop.f32.mrb[252].mxu1  ;;  %13020 = vmatprep.mubr.msk.f32.mxu0 %vm14537_vm1, %v20167_v2 }
 0x2e6   : > { %v3374_v35 = vadd.f32 %v3250_v26, %v16513_v11  ;;  %v12590_v7 = vpop.f32.mrb[253].mxu1  ;;  %12875 = vmatmul.mubr.msk.f32.gmra.mrb[102].mxu1 %vm685_vm2, %v3906_v6  ;;  %v4393_v11 = vld [vmem:[%s14670_s3 + $0x166] sm:$0xf] }
 0x2e7   : > { %12877 = vmatprep.mubr.msk.f32.mxu1 %vm14537_vm1, %v20167_v2  ;;  %v17085_v47 = vpop.f32.mrb[252].mxu0 }
 0x2e8   : > { %v17088_v34 = vadd.f32 %v16987_v48, %v3374_v35  ;;  %v12736_v10 = vpop.f32.mrb[253].mxu0  ;;  %13021 = vmatmul.mubr.msk.f32.gmra.mrb[102].mxu0 %vm685_vm2, %v4392_v45  ;;  %v3909_v45 = vld [vmem:[%s14670_s3 + $0x13d] sm:$0xff] }
 0x2e9   : > { %v3255_v28 = vpop.f32.mrb[254].mxu1  ;;  %13023 = vmatprep.mubr.msk.f32.mxu0 %vm14537_vm1, %v20167_v2 }
 0x2ea   : > { %v3375_v61 = vadd.f32 %v3255_v28, %v16527_v18  ;;  %v12593_v38 = vpop.f32.mrb[255].mxu1  ;;  %12878 = vmatmul.mubr.msk.f32.gmra.mrb[104].mxu1 %vm685_vm2, %v3907_v27 }
 0x2eb   : > { %12880 = vmatprep.mubr.msk.f32.mxu1 %vm14537_vm1, %v20167_v2  ;;  %v17099_v48 = vpop.f32.mrb[254].mxu0 }
 0x2ec   : > { %v17102_v9 = vadd.f32 %v17001_v15, %v3375_v61  ;;  %v12739_v6 = vpop.f32.mrb[255].mxu0  ;;  %13024 = vmatmul.mubr.msk.f32.gmra.mrb[104].mxu0 %vm685_vm2, %v4393_v11 }
 0x2ed   : > { %v3260_v25 = vpop.f32.mrb[0].mxu1  ;;  %13166 = vmatprep.mubr.msk.f32.mxu0 %vm14537_vm1, %v20167_v2 }
 0x2ee   : > { %v3376_v18 = vadd.f32 %v3260_v25, %v16541_v13  ;;  %v12596_v26 = vpop.f32.mrb[1].mxu1  ;;  %12881 = vmatmul.mubr.msk.f32.gmra.mrb[106].mxu1 %vm685_vm2, %v3908_v24  ;;  %v3910_v13 = vld [vmem:[%s14670_s3 + $0x145] sm:$0xff] }
 0x2ef   : > { %12883 = vmatprep.mubr.msk.f32.mxu1 %vm14537_vm1, %v20167_v2  ;;  %v3774_v35 = vpop.f32.mrb[0].mxu0 }
 0x2f0   : > { %v17113_v15 = vadd.f32 %v17015_v0, %v3376_v18  ;;  %v12742_v7 = vpop.f32.mrb[1].mxu0 }
 0x2f1   : > { %v3265_v27 = vpop.f32.mrb[2].mxu1 }
 0x2f2   : > { %v3377_v10 = vadd.f32 %v3265_v27, %v16555_v1  ;;  %v12599_v28 = vpop.f32.mrb[3].mxu1  ;;  %12884 = vmatmul.mubr.msk.f32.gmra.mrb[108].mxu1 %vm685_vm2, %v3909_v45  ;;  %v3911_v1 = vld [vmem:[%s14670_s3 + $0x14d] sm:$0xff] }
 0x2f3   : > { %12886 = vmatprep.mubr.msk.f32.mxu1 %vm14537_vm1, %v20167_v2  ;;  %v3779_v11 = vpop.f32.mrb[2].mxu0 }
 0x2f4   : > { %v17121_v61 = vadd.f32 %v17029_v14, %v3377_v10  ;;  %v12745_v38 = vpop.f32.mrb[3].mxu0 }
 0x2f5   : > { %v3270_v0 = vpop.f32.mrb[4].mxu1 }
 0x2f6   : > { %v3378_v24 = vadd.f32 %v3270_v0, %v16569_v17  ;;  %v12602_v6 = vpop.f32.mrb[5].mxu1  ;;  %12887 = vmatmul.mubr.msk.f32.gmra.mrb[110].mxu1 %vm685_vm2, %v3910_v13  ;;  %v3912_v17 = vld [vmem:[%s14670_s3 + $0x155] sm:$0xff] }
 0x2f7   : > { %12889 = vmatprep.mubr.msk.f32.mxu1 %vm14537_vm1, %v20167_v2  ;;  %v3784_v25 = vpop.f32.mrb[4].mxu0 }
 0x2f8   : > { %v17129_v18 = vadd.f32 %v17043_v5, %v3378_v24  ;;  %v12748_v26 = vpop.f32.mrb[5].mxu0 }
 0x2f9   : > { %v3275_v14 = vpop.f32.mrb[6].mxu1 }
 0x2fa   : > { %v3379_v45 = vadd.f32 %v3275_v14, %v16583_v29  ;;  %v12605_v7 = vpop.f32.mrb[7].mxu1  ;;  %12890 = vmatmul.mubr.msk.f32.gmra.mrb[112].mxu1 %vm685_vm2, %v3911_v1  ;;  %v3913_v29 = vld [vmem:[%s14670_s3 + $0x15d] sm:$0xff] }
 0x2fb   : > { %12892 = vmatprep.mubr.msk.f32.mxu1 %vm14537_vm1, %v20167_v2  ;;  %v3789_v27 = vpop.f32.mrb[6].mxu0 }
 0x2fc   : > { %v17137_v10 = vadd.f32 %v17057_v12, %v3379_v45  ;;  %v12751_v28 = vpop.f32.mrb[7].mxu0 }
 0x2fd   : > { %v3280_v5 = vpop.f32.mrb[8].mxu1 }
 0x2fe   : > { %v3380_v13 = vadd.f32 %v3280_v5, %v16597_v8  ;;  %v12608_v38 = vpop.f32.mrb[9].mxu1  ;;  %12893 = vmatmul.mubr.msk.f32.gmra.mrb[114].mxu1 %vm685_vm2, %v3912_v17  ;;  %v3914_v8 = vld [vmem:[%s14670_s3 + $0x165] sm:$0xf] }
 0x2ff   : > { %12895 = vmatprep.mubr.msk.f32.mxu1 %vm14537_vm1, %v20167_v2  ;;  %v3794_v0 = vpop.f32.mrb[8].mxu0 }
 0x300   : > { %v17145_v24 = vadd.f32 %v17071_v20, %v3380_v13  ;;  %v12754_v6 = vpop.f32.mrb[9].mxu0 }
 0x301   : > { %v3285_v1 = vpop.f32.mrb[10].mxu1 }
 0x302   : > { %v3381_v12 = vadd.f32 %v3285_v1, %v16612_v39  ;;  %v12611_v26 = vpop.f32.mrb[11].mxu1  ;;  %12896 = vmatmul.mubr.msk.f32.gmra.mrb[116].mxu1 %vm685_vm2, %v3913_v29 }
 0x303   : > { %12898 = vmatprep.mubr.msk.f32.mxu1 %vm14537_vm1, %v20167_v2  ;;  %v3799_v14 = vpop.f32.mrb[10].mxu0 }
 0x304   : > { %v17153_v45 = vadd.f32 %v17085_v47, %v3381_v12  ;;  %v12757_v7 = vpop.f32.mrb[11].mxu0 }
 0x305   : > { %v3290_v17 = vpop.f32.mrb[12].mxu1 }
 0x306   : > { %v3382_v20 = vadd.f32 %v3290_v17, %v16626_v16  ;;  %v12614_v28 = vpop.f32.mrb[13].mxu1  ;;  %12899 = vmatmul.mubr.msk.f32.gmra.mrb[118].mxu1 %vm685_vm2, %v3914_v8  ;;  %vm14109_vm2 = vmpackc.low %vm8846_vm15, %vm14539_vm10 }
 0x307   : > { %v3804_v5 = vpop.f32.mrb[12].mxu0 }
 0x308   : > { %v17158_v39 = vadd.f32 %v17099_v48, %v3382_v20  ;;  %v12760_v13 = vpop.f32.mrb[13].mxu0 }
 0x309   : > { %v3295_v38 = vpop.f32.mrb[14].mxu1 }
 0x30a   : > { %20217 = vst [vmem:[#allocation13_spill] sm:$0xff] %v17158_v39  ;;  %v3383_v29 = vadd.f32 %v3295_v38, %v16640_v51  ;;  %v12617_v6 = vpop.f32.mrb[15].mxu1 }
 0x30b   : > { %v3809_v1 = vpop.f32.mrb[14].mxu0 }
 0x30c   : > { %v17161_v26 = vadd.f32 %v3774_v35, %v3383_v29  ;;  %v12763_v47 = vpop.f32.mrb[15].mxu0 }
 0x30d   : > { %v3300_v12 = vpop.f32.mrb[16].mxu1 }
 0x30e   : > { %v3384_v7 = vadd.f32 %v3300_v12, %v16654_v41  ;;  %v12620_v16 = vpop.f32.mrb[17].mxu1 }
 0x30f   : > { %v3814_v17 = vpop.f32.mrb[16].mxu0 }
 0x310   : > { %v17164_v28 = vadd.f32 %v3779_v11, %v3384_v7  ;;  %v12766_v8 = vpop.f32.mrb[17].mxu0 }
 0x311   : > { %v3305_v2 = vpop.f32.mrb[18].mxu1 }
 0x312   : > { %v3385_v48 = vadd.f32 %v3305_v2, %v16668_v46  ;;  %v12623_v20 = vpop.f32.mrb[19].mxu1 }
 0x313   : > { %v3819_v13 = vpop.f32.mrb[18].mxu0 }
 0x314   : > { %v12769_v39 = vpop.f32.mrb[19].mxu0  ;;  %v17167_v51 = vadd.f32 %v3784_v25, %v3385_v48 }
 0x315   : > { %v3310_v38 = vpop.f32.mrb[20].mxu1 }
 0x316   : > { %v3386_v35 = vadd.f32 %v3310_v38, %v16682_v59  ;;  %v12626_v29 = vpop.f32.mrb[21].mxu1 }
 0x317   : > { %v3824_v6 = vpop.f32.mrb[20].mxu0 }
 0x318   : > { %v12772_v47 = vpop.f32.mrb[21].mxu0  ;;  %v17170_v41 = vadd.f32 %v3789_v27, %v3386_v35 }
 0x319   : > { %v3315_v12 = vpop.f32.mrb[22].mxu1 }
 0x31a   : > { %v12629_v11 = vpop.f32.mrb[23].mxu1  ;;  %v3387_v7 = vadd.f32 %v3315_v12, %v16696_v43 }
 0x31b   : > { %v3829_v16 = vpop.f32.mrb[22].mxu0 }
 0x31c   : > { %v17173_v8 = vadd.f32 %v3794_v0, %v3387_v7  ;;  %v12775_v2 = vpop.f32.mrb[23].mxu0 }
 0x31d   : > { %v3320_v46 = vpop.f32.mrb[24].mxu1 }
 0x31e   : > { %v12632_v39 = vpop.f32.mrb[25].mxu1  ;;  %v3388_v25 = vadd.f32 %v3320_v46, %v16710_v37 }
 0x31f   : > { %v4587_v48 = vpop.f32.mrb[24].mxu0 }
 0x320   : > { %v17176_v20 = vadd.f32 %v3799_v14, %v3388_v25  ;;  %v12905_v59 = vpop.f32.mrb[25].mxu0 }
 0x321   : > { %v3325_v38 = vpop.f32.mrb[26].mxu1 }
 0x322   : > { %v12635_v29 = vpop.f32.mrb[27].mxu1  ;;  %v3389_v27 = vadd.f32 %v3325_v38, %v16724_v58 }
 0x323   : > { %v4592_v35 = vpop.f32.mrb[26].mxu0 }
 0x324   : > { %v17179_v47 = vadd.f32 %v3804_v5, %v3389_v27  ;;  %v12908_v43 = vpop.f32.mrb[27].mxu0 }
 0x325   : > { %v3330_v12 = vpop.f32.mrb[28].mxu1 }
 0x326   : > { %v12638_v0 = vpop.f32.mrb[29].mxu1  ;;  %v3390_v11 = vadd.f32 %v3330_v12, %v16738_v30 }
 0x327   : > { %v4597_v7 = vpop.f32.mrb[28].mxu0 }
 0x328   : > { %v17182_v2 = vadd.f32 %v3809_v1, %v3390_v11  ;;  %v12911_v37 = vpop.f32.mrb[29].mxu0 }
 0x329   : > { %v3335_v46 = vpop.f32.mrb[30].mxu1 }
 0x32a   : > { %v12641_v14 = vpop.f32.mrb[31].mxu1  ;;  %v3391_v39 = vadd.f32 %v3335_v46, %v16752_v57 }
 0x32b   : > { %v4602_v25 = vpop.f32.mrb[30].mxu0 }
 0x32c   : > { %v17185_v59 = vadd.f32 %v3814_v17, %v3391_v39  ;;  %v12914_v58 = vpop.f32.mrb[31].mxu0 }
 0x32d   : > { %v3340_v38 = vpop.f32.mrb[32].mxu1 }
 0x32e   : > { %v12644_v5 = vpop.f32.mrb[33].mxu1  ;;  %v3392_v29 = vadd.f32 %v3340_v38, %v16766_v4 }
 0x32f   : > { %v4607_v27 = vpop.f32.mrb[32].mxu0 }
 0x330   : > { %v17188_v43 = vadd.f32 %v3819_v13, %v3392_v29  ;;  %v12917_v30 = vpop.f32.mrb[33].mxu0 }
 0x331   : > { %v3345_v12 = vpop.f32.mrb[34].mxu1 }
 0x332   : > { %v12647_v1 = vpop.f32.mrb[35].mxu1  ;;  %v3393_v0 = vadd.f32 %v3345_v12, %v16780_v49  ;;  %v17200_v49 = vld [vmem:[%s20218_s30] ss:$0 sm:$0xff] }
 0x333   : > { %v4612_v11 = vpop.f32.mrb[34].mxu0 }
 0x334   : > { %v17191_v37 = vadd.f32 %v3824_v6, %v3393_v0  ;;  %v12920_v57 = vpop.f32.mrb[35].mxu0 }
 0x335   : > { %v3350_v46 = vpop.f32.mrb[36].mxu1 }
 0x336   : > { %v12650_v17 = vpop.f32.mrb[37].mxu1  ;;  %v3394_v14 = vadd.f32 %v3350_v46, %v16794_v36 }
 0x337   : > { %v4617_v39 = vpop.f32.mrb[36].mxu0 }
 0x338   : > { %v17194_v58 = vadd.f32 %v3829_v16, %v3394_v14  ;;  %v12923_v4 = vpop.f32.mrb[37].mxu0 }
 0x339   : > { %v4108_v38 = vpop.f32.mrb[38].mxu1 }
 0x33a   : > { %v12780_v13 = vpop.f32.mrb[39].mxu1  ;;  %v4312_v5 = vadd.f32 %v4108_v38, %v16808_v31 }
 0x33b   : > { %v17202_v6 = vpop.f32.mrb[38].mxu0 }
 0x33c   : > { %v4791_v29 = vadd.f32 %v4587_v48, %v4312_v5  ;;  %v12926_v30 = vpop.f32.mrb[39].mxu0 }
 0x33d   : > { %v4113_v12 = vpop.f32.mrb[40].mxu1 }
 0x33e   : > { %v4839_v36 = vadd.f32 %v17200_v49, %v4791_v29  ;;  %v12783_v1 = vpop.f32.mrb[41].mxu1  ;;  %v4313_v16 = vadd.f32 %v4113_v12, %v16822_v3 }
 0x33f   : > { %v17206_v0 = vpop.f32.mrb[40].mxu0 }
 0x340   : > { %v4880_v57 = vmax.f32 %v4839_v36, 0.0  ;;  %v4792_v31 = vadd.f32 %v4592_v35, %v4313_v16  ;;  %v12929_v46 = vpop.f32.mrb[41].mxu0 }
 0x341   : > { %v4118_v17 = vpop.f32.mrb[42].mxu1 }
 0x342   : > { %4922 = vst.msk [vmem:[#allocation2] sm:$0xff] %vm4921_vm3, %v4880_v57  ;;  %v4840_v14 = vadd.f32 %v17200_v49, %v4792_v31  ;;  %v12786_v4 = vpop.f32.mrb[43].mxu1  ;;  %v4314_v48 = vadd.f32 %v4118_v17, %v16836_v33 }
 0x343   : > { %v17211_v38 = vpop.f32.mrb[42].mxu0 }
 0x344   : > { %v4881_v13 = vmax.f32 %v4840_v14, 0.0  ;;  %v4793_v5 = vadd.f32 %v4597_v7, %v4314_v48  ;;  %v12932_v29 = vpop.f32.mrb[43].mxu0 }
 0x345   : > { %v4123_v3 = vpop.f32.mrb[44].mxu1 }
 0x346   : > { %4923 = vst.msk [vmem:[#allocation2 + $0x8] sm:$0xff] %vm4921_vm3, %v4881_v13  ;;  %v4841_v30 = vadd.f32 %v17200_v49, %v4793_v5  ;;  %v12789_v35 = vpop.f32.mrb[45].mxu1  ;;  %v4315_v12 = vadd.f32 %v4123_v3, %v16850_v50 }
 0x347   : > { %v17216_v36 = vpop.f32.mrb[44].mxu0 }
 0x348   : > { %v4882_v1 = vmax.f32 %v4841_v30, 0.0  ;;  %v4794_v16 = vadd.f32 %v4602_v25, %v4315_v12  ;;  %v12935_v57 = vpop.f32.mrb[45].mxu0 }
 0x349   : > { %v4128_v31 = vpop.f32.mrb[46].mxu1 }
 0x34a   : > { %4924 = vst.msk [vmem:[#allocation2 + $0x10] sm:$0xff] %vm4921_vm3, %v4882_v1  ;;  %v4842_v33 = vadd.f32 %v17200_v49, %v4794_v16  ;;  %v12792_v7 = vpop.f32.mrb[47].mxu1  ;;  %v4316_v46 = vadd.f32 %v4128_v31, %v16864_v40 }
 0x34b   : > { %v17221_v17 = vpop.f32.mrb[46].mxu0 }
 0x34c   : > { %v4883_v14 = vmax.f32 %v4842_v33, 0.0  ;;  %v4795_v4 = vadd.f32 %v4607_v27, %v4316_v46  ;;  %v12938_v48 = vpop.f32.mrb[47].mxu0 }
 0x34d   : > { %v4133_v13 = vpop.f32.mrb[48].mxu1 }
 0x34e   : > { %4925 = vst.msk [vmem:[#allocation2 + $0x18] sm:$0xff] %vm4921_vm3, %v4883_v14  ;;  %v4843_v50 = vadd.f32 %v17200_v49, %v4795_v4  ;;  %v12795_v25 = vpop.f32.mrb[49].mxu1  ;;  %v4317_v5 = vadd.f32 %v4133_v13, %v16878_v21 }
 0x34f   : > { %v17226_v29 = vpop.f32.mrb[48].mxu0 }
 0x350   : > { %v4884_v3 = vmax.f32 %v4843_v50, 0.0  ;;  %v4796_v30 = vadd.f32 %v4612_v11, %v4317_v5  ;;  %v12941_v35 = vpop.f32.mrb[49].mxu0 }
 0x351   : > { %v4138_v12 = vpop.f32.mrb[50].mxu1 }
 0x352   : > { %4926 = vst.msk [vmem:[#allocation2 + $0x20] sm:$0xff] %vm4921_vm3, %v4884_v3  ;;  %v4844_v40 = vadd.f32 %v17200_v49, %v4796_v30  ;;  %v12798_v27 = vpop.f32.mrb[51].mxu1  ;;  %v4318_v1 = vadd.f32 %v4138_v12, %v16892_v60 }
 0x353   : > { %v17231_v16 = vpop.f32.mrb[50].mxu0 }
 0x354   : > { %v4885_v57 = vmax.f32 %v4844_v40, 0.0  ;;  %v4797_v31 = vadd.f32 %v4617_v39, %v4318_v1  ;;  %v12944_v33 = vpop.f32.mrb[51].mxu0 }
 0x355   : > { %v4143_v7 = vpop.f32.mrb[52].mxu1 }
 0x356   : > { %4927 = vst.msk [vmem:[#allocation2 + $0x28] sm:$0xff] %vm4921_vm3, %v4885_v57  ;;  %v4845_v21 = vadd.f32 %v17200_v49, %v4797_v31  ;;  %v12801_v11 = vpop.f32.mrb[53].mxu1  ;;  %v4319_v46 = vadd.f32 %v4143_v7, %v16906_v62  ;;  %v5238_v62 = vld [vmem:[%s20219_s18 + $0x8] sm:$0xff] }
 0x357   : > { %v17236_v14 = vpop.f32.mrb[52].mxu0  ;;  %5402 = vmatprep.mubr.f32.mxu1 %v5238_v62 }
 0x358   : > { %v4886_v4 = vmax.f32 %v4845_v21, 0.0  ;;  %v4798_v48 = vadd.f32 %v17202_v6, %v4319_v46  ;;  %v12947_v13 = vpop.f32.mrb[53].mxu0 }
 0x359   : > { %v4148_v60 = vpop.f32.mrb[54].mxu1 }
 0x35a   : > { %4928 = vst.msk [vmem:[#allocation2 + $0x30] sm:$0xff] %vm4921_vm3, %v4886_v4  ;;  %v4846_v39 = vadd.f32 %v17200_v49, %v4798_v48  ;;  %v12804_v50 = vpop.f32.mrb[55].mxu1  ;;  %v4320_v25 = vadd.f32 %v4148_v60, %v16920_v55 }
 0x35b   : > { %v17242_v5 = vpop.f32.mrb[54].mxu0 }
 0x35c   : > { %v4887_v3 = vmax.f32 %v4846_v39, 0.0  ;;  %v4799_v30 = vadd.f32 %v17206_v0, %v4320_v25  ;;  %v12950_v35 = vpop.f32.mrb[55].mxu0 }
 0x35d   : > { %v4153_v6 = vpop.f32.mrb[56].mxu1 }
 0x35e   : > { %4929 = vst.msk [vmem:[#allocation2 + $0x38] sm:$0xff] %vm4921_vm3, %v4887_v3  ;;  %v4847_v12 = vadd.f32 %v17200_v49, %v4799_v30  ;;  %v12807_v40 = vpop.f32.mrb[57].mxu1  ;;  %v4321_v27 = vadd.f32 %v4153_v6, %v16934_v56 }
 0x35f   : > { %v17251_v55 = vpop.f32.mrb[56].mxu0 }
 0x360   : > { %v4888_v1 = vmax.f32 %v4847_v12, 0.0  ;;  %v4800_v57 = vadd.f32 %v17211_v38, %v4321_v27  ;;  %v12953_v31 = vpop.f32.mrb[57].mxu0 }
 0x361   : > { %v4158_v33 = vpop.f32.mrb[58].mxu1 }
 0x362   : > { %4930 = vst.msk [vmem:[#allocation2 + $0x40] sm:$0xff] %vm4921_vm3, %v4888_v1  ;;  %v4848_v0 = vadd.f32 %v17200_v49, %v4800_v57  ;;  %v12810_v7 = vpop.f32.mrb[59].mxu1  ;;  %v4322_v21 = vadd.f32 %v4158_v33, %v16948_v63 }
 0x363   : > { %v17257_v11 = vpop.f32.mrb[58].mxu0 }
 0x364   : > { %v4889_v46 = vmax.f32 %v4848_v0, 0.0  ;;  %v4801_v4 = vadd.f32 %v17216_v36, %v4322_v21  ;;  %v12956_v56 = vpop.f32.mrb[59].mxu0 }
 0x365   : > { %v4163_v48 = vpop.f32.mrb[60].mxu1 }
 0x366   : > { %4931 = vst.msk [vmem:[#allocation2 + $0x48] sm:$0xff] %vm4921_vm3, %v4889_v46  ;;  %v4849_v38 = vadd.f32 %v17200_v49, %v4801_v4  ;;  %v12813_v13 = vpop.f32.mrb[61].mxu1  ;;  %v4323_v60 = vadd.f32 %v4163_v48, %v16962_v42 }
 0x367   : > { %v17263_v39 = vpop.f32.mrb[60].mxu0 }
 0x368   : > { %v4890_v50 = vmax.f32 %v4849_v38, 0.0  ;;  %v4802_v25 = vadd.f32 %v17221_v17, %v4323_v60  ;;  %v12959_v63 = vpop.f32.mrb[61].mxu0 }
 0x369   : > { %v4168_v62 = vpop.f32.mrb[62].mxu1 }
 0x36a   : > { %4932 = vst.msk [vmem:[#allocation2 + $0x50] sm:$0xff] %vm4921_vm3, %v4890_v50  ;;  %v4850_v36 = vadd.f32 %v17200_v49, %v4802_v25  ;;  %v12816_v3 = vpop.f32.mrb[63].mxu1  ;;  %v4324_v30 = vadd.f32 %v4168_v62, %v16976_v53 }
 0x36b   : > { %v17269_v35 = vpop.f32.mrb[62].mxu0 }
 0x36c   : > { %v4891_v6 = vmax.f32 %v4850_v36, 0.0  ;;  %v4803_v12 = vadd.f32 %v17226_v29, %v4324_v30  ;;  %v12962_v42 = vpop.f32.mrb[63].mxu0 }
 0x36d   : > { %v4173_v40 = vpop.f32.mrb[64].mxu1 }
 0x36e   : > { %4933 = vst.msk [vmem:[#allocation2 + $0x58] sm:$0xff] %vm4921_vm3, %v4891_v6  ;;  %v4851_v17 = vadd.f32 %v17200_v49, %v4803_v12  ;;  %v12819_v27 = vpop.f32.mrb[65].mxu1  ;;  %v4325_v1 = vadd.f32 %v4173_v40, %v16990_v19 }
 0x36f   : > { %v17275_v57 = vpop.f32.mrb[64].mxu0 }
 0x370   : > { %v4892_v31 = vmax.f32 %v4851_v17, 0.0  ;;  %v4804_v33 = vadd.f32 %v17231_v16, %v4325_v1  ;;  %v12965_v53 = vpop.f32.mrb[65].mxu0 }
 0x371   : > { %v4178_v0 = vpop.f32.mrb[66].mxu1 }
 0x372   : > { %4934 = vst.msk [vmem:[#allocation2 + $0x60] sm:$0xff] %vm4921_vm3, %v4892_v31  ;;  %v4852_v29 = vadd.f32 %v17200_v49, %v4804_v33  ;;  %v12822_v7 = vpop.f32.mrb[67].mxu1  ;;  %v4326_v21 = vadd.f32 %v4178_v0, %v17004_v32 }
 0x373   : > { %v17281_v46 = vpop.f32.mrb[66].mxu0 }
 0x374   : > { %v4893_v4 = vmax.f32 %v4852_v29, 0.0  ;;  %v4805_v56 = vadd.f32 %v17236_v14, %v4326_v21  ;;  %v12968_v19 = vpop.f32.mrb[67].mxu0 }
 0x375   : > { %v4183_v48 = vpop.f32.mrb[68].mxu1 }
 0x376   : > { %4935 = vst.msk [vmem:[#allocation2 + $0x68] sm:$0xff] %vm4921_vm3, %v4893_v4  ;;  %v4853_v16 = vadd.f32 %v17200_v49, %v4805_v56  ;;  %v12825_v38 = vpop.f32.mrb[69].mxu1  ;;  %v4327_v13 = vadd.f32 %v4183_v48, %v17018_v23 }
 0x377   : > { %v17287_v60 = vpop.f32.mrb[68].mxu0 }
 0x378   : > { %v4894_v50 = vmax.f32 %v4853_v16, 0.0  ;;  %v4806_v25 = vadd.f32 %v17242_v5, %v4327_v13  ;;  %v12971_v32 = vpop.f32.mrb[69].mxu0 }
 0x379   : > { %v4188_v63 = vpop.f32.mrb[70].mxu1 }
 0x37a   : > { %4936 = vst.msk [vmem:[#allocation2 + $0x70] sm:$0xff] %vm4921_vm3, %v4894_v50  ;;  %v4854_v14 = vadd.f32 %v17200_v49, %v4806_v25  ;;  %v12828_v62 = vpop.f32.mrb[71].mxu1  ;;  %v4328_v36 = vadd.f32 %v4188_v63, %v17032_v54 }
 0x37b   : > { %v17293_v3 = vpop.f32.mrb[70].mxu0 }
 0x37c   : > { %v4895_v30 = vmax.f32 %v4854_v14, 0.0  ;;  %v4807_v6 = vadd.f32 %v17251_v55, %v4328_v36  ;;  %v12974_v23 = vpop.f32.mrb[71].mxu0 }
 0x37d   : > { %v4193_v12 = vpop.f32.mrb[72].mxu1 }
 0x37e   : > { %4937 = vst.msk [vmem:[#allocation2 + $0x78] sm:$0xff] %vm4921_vm3, %v4895_v30  ;;  %v4855_v5 = vadd.f32 %v17200_v49, %v4807_v6  ;;  %v12831_v42 = vpop.f32.mrb[73].mxu1  ;;  %v4329_v40 = vadd.f32 %v4193_v12, %v17046_v44 }
 0x37f   : > { %v17299_v17 = vpop.f32.mrb[72].mxu0 }
 0x380   : > { %v4896_v27 = vmax.f32 %v4855_v5, 0.0  ;;  %v4808_v1 = vadd.f32 %v17257_v11, %v4329_v40  ;;  %v12977_v54 = vpop.f32.mrb[73].mxu0 }
 0x381   : > { %v4198_v31 = vpop.f32.mrb[74].mxu1  ;;  %v5121_v54 = vld [vmem:[#allocation2 + $0x1b] sm:$0xff] }
 0x382   : > { %4938 = vst.msk [vmem:[#allocation2 + $0x80] sm:$0xff] %vm4921_vm3, %v4896_v27  ;;  %v4856_v55 = vadd.f32 %v17200_v49, %v4808_v1  ;;  %v12834_v33 = vpop.f32.mrb[75].mxu1  ;;  %v4330_v53 = vadd.f32 %v4198_v31, %v17060_v52  ;;  %v5082_v1 = vld [vmem:[#allocation2 + $0x1a] sm:$0xff] }
 0x383   : > { %v17305_v0 = vpop.f32.mrb[74].mxu0 }
 0x384   : > { %v4897_v29 = vmax.f32 %v4856_v55, 0.0  ;;  %v4809_v7 = vadd.f32 %v17263_v39, %v4330_v53  ;;  %v12980_v44 = vpop.f32.mrb[75].mxu0  ;;  %v5004_v53 = vld [vmem:[#allocation2 + $0x9] sm:$0xff] }
 0x385   : > { %v4203_v21 = vpop.f32.mrb[76].mxu1 }
 0x386   : > { %4939 = vst.msk [vmem:[#allocation2 + $0x88] sm:$0xff] %vm4921_vm3, %v4897_v29  ;;  %v4857_v11 = vadd.f32 %v17200_v49, %v4809_v7  ;;  %v12837_v4 = vpop.f32.mrb[77].mxu1  ;;  %v4331_v56 = vadd.f32 %v4203_v21, %v17074_v22  ;;  %v5081_v21 = vld [vmem:[#allocation2 + $0x12] sm:$0xff] }
 0x387   : > { %v17311_v19 = vpop.f32.mrb[76].mxu0 }
 0x388   : > { %v4898_v48 = vmax.f32 %v4857_v11, 0.0  ;;  %v4810_v16 = vadd.f32 %v17269_v35, %v4331_v56  ;;  %v12983_v52 = vpop.f32.mrb[77].mxu0  ;;  %v5120_v11 = vld [vmem:[#allocation2 + $0x13] sm:$0xff]  ;;  %v5160_v56 = vmax.f32 %v5082_v1, %v5121_v54 }
 0x389   : > { %v4208_v38 = vpop.f32.mrb[78].mxu1  ;;  %v4980_v52 = vld [vmem:[#allocation2 + $0x80] sm:$0xff] }
 0x38a   : > { %4940 = vst.msk [vmem:[#allocation2 + $0x90] sm:$0xff] %vm4921_vm3, %v4898_v48  ;;  %v4858_v39 = vadd.f32 %v17200_v49, %v4810_v16  ;;  %v12840_v13 = vpop.f32.mrb[79].mxu1  ;;  %v4332_v50 = vadd.f32 %v4208_v38, %v17088_v34 }
 0x38b   : > { %v17317_v25 = vpop.f32.mrb[78].mxu0  ;;  %v5003_v13 = vld [vmem:[#allocation2 + $0x1] sm:$0xff] }
 0x38c   : > { %v4899_v32 = vmax.f32 %v4858_v39, 0.0  ;;  %v4811_v63 = vadd.f32 %v17275_v57, %v4332_v50  ;;  %v12986_v22 = vpop.f32.mrb[79].mxu0  ;;  %v4965_v39 = vld [vmem:[#allocation2 + $0x8] sm:$0xff] }
 0x38d   : > { %v4213_v14 = vpop.f32.mrb[80].mxu1  ;;  %v5019_v44 = vld [vmem:[#allocation2 + $0x81] sm:$0xff] }
 0x38e   : > { %4941 = vst.msk [vmem:[#allocation2 + $0x98] sm:$0xff] %vm4921_vm3, %v4899_v32  ;;  %v4859_v35 = vadd.f32 %v17200_v49, %v4811_v63  ;;  %v4333_v62 = vadd.f32 %v4213_v14, %v17102_v9  ;;  %v12843_v36 = vpop.f32.mrb[81].mxu1  ;;  %v4981_v63 = vld [vmem:[#allocation2 + $0x88] sm:$0xff]  ;;  %v5058_v22 = vmax.f32 %v4980_v52, %v5019_v44 }
 0x38f   : > { %v17323_v30 = vpop.f32.mrb[80].mxu0 }
 0x390   : > { %v4900_v6 = vmax.f32 %v4859_v35, 0.0  ;;  %v4812_v23 = vadd.f32 %v17281_v46, %v4333_v62  ;;  %v12989_v34 = vpop.f32.mrb[81].mxu0  ;;  %v5043_v35 = vmax.f32 %v4965_v39, %v5004_v53  ;;  %v5159_v62 = vmax.f32 %v5081_v21, %v5120_v11 }
 0x391   : > { %v4218_v12 = vpop.f32.mrb[82].mxu1  ;;  %v5020_v4 = vld [vmem:[#allocation2 + $0x89] sm:$0xff] }
 0x392   : > { %4942 = vst.msk [vmem:[#allocation2 + $0xa0] sm:$0xff] %vm4921_vm3, %v4900_v6  ;;  %v4860_v57 = vadd.f32 %v17200_v49, %v4812_v23  ;;  %v4334_v5 = vadd.f32 %v4218_v12, %v17113_v15  ;;  %v12846_v42 = vpop.f32.mrb[83].mxu1  ;;  %v4964_v12 = vld [vmem:[#allocation2] sm:$0xff] }
 0x393   : > { %v17329_v40 = vpop.f32.mrb[82].mxu0 }
 0x394   : > { %v4901_v27 = vmax.f32 %v4860_v57, 0.0  ;;  %v4813_v9 = vadd.f32 %v17287_v60, %v4334_v5  ;;  %v12992_v31 = vpop.f32.mrb[83].mxu0  ;;  %v5042_v57 = vmax.f32 %v4964_v12, %v5003_v13  ;;  %v5199_v5 = vmax.f32 %v5043_v35, %v5160_v56  ;;  %v5122_v56 = vld [vmem:[#allocation2 + $0x23] sm:$0xff] }
 0x395   : > { %v4223_v55 = vpop.f32.mrb[84].mxu1  ;;  %v5097_v33 = vld [vmem:[#allocation2 + $0x92] sm:$0xff]  ;;  %v5084_v31 = vld [vmem:[#allocation2 + $0x2a] sm:$0xff] }
 0x396   : > { %v5136_v46 = vld [vmem:[#allocation2 + $0x93] sm:$0xff]  ;;  %4943 = vst.msk [vmem:[#allocation2 + $0xa8] sm:$0xff] %vm4921_vm3, %v4901_v27  ;;  %v4861_v29 = vadd.f32 %v17200_v49, %v4813_v9  ;;  %v4335_v7 = vadd.f32 %v4223_v55, %v17121_v61  ;;  %v12849_v15 = vpop.f32.mrb[85].mxu1  ;;  %v5123_v55 = vld [vmem:[#allocation2 + $0x2b] sm:$0xff]  ;;  %v5198_v53 = vmax.f32 %v5042_v57, %v5159_v62 }
 0x397   : > { %v17335_v60 = vpop.f32.mrb[84].mxu0  ;;  %v5175_v38 = vmax.f32 %v5097_v33, %v5136_v46  ;;  %v5162_v52 = vmax.f32 %v5084_v31, %v5123_v55 }
 0x398   : > { %v4902_v48 = vmax.f32 %v4861_v29, 0.0  ;;  %v4814_v16 = vadd.f32 %v17293_v3, %v4335_v7  ;;  %v12995_v50 = vpop.f32.mrb[85].mxu0  ;;  %v5059_v3 = vmax.f32 %v4981_v63, %v5020_v4  ;;  %v5006_v7 = vld [vmem:[#allocation2 + $0x19] sm:$0xff]  ;;  %v5021_v4 = vld [vmem:[#allocation2 + $0x91] sm:$0xff] }
 0x399   : > { %v4228_v32 = vpop.f32.mrb[86].mxu1  ;;  %v5098_v61 = vld [vmem:[#allocation2 + $0x9a] sm:$0xff]  ;;  %v5214_v1 = vmax.f32 %v5058_v22, %v5175_v38  ;;  %v4982_v50 = vld [vmem:[#allocation2 + $0x90] sm:$0xff] }
 0x39a   : > { %v5137_v14 = vld [vmem:[#allocation2 + $0x9b] sm:$0xff]  ;;  %4944 = vst.msk [vmem:[#allocation2 + $0xb0] sm:$0xff] %vm4921_vm3, %v4902_v48  ;;  %v4862_v36 = vadd.f32 %v17200_v49, %v4814_v16  ;;  %v4336_v6 = vadd.f32 %v4228_v32, %v17129_v18  ;;  %v12852_v23 = vpop.f32.mrb[87].mxu1  ;;  %v13881_v48 = vpack.c.bf16 %v5199_v5, %v5198_v53  ;;  %v5005_v22 = vld [vmem:[#allocation2 + $0x11] sm:$0xff]  ;;  %v5060_v35 = vmax.f32 %v4982_v50, %v5021_v4 }
 0x39b   : > { %v5176_v34 = vmax.f32 %v5098_v61, %v5137_v14  ;;  %v17341_v42 = vpop.f32.mrb[86].mxu0  ;;  %v5022_v16 = vld [vmem:[#allocation2 + $0x99] sm:$0xff]  ;;  %v4966_v5 = vld [vmem:[#allocation2 + $0x10] sm:$0xff] }
 0x39c   : > { %v4903_v27 = vmax.f32 %v4862_v36, 0.0  ;;  %v4815_v9 = vadd.f32 %v17299_v17, %v4336_v6  ;;  %v12998_v33 = vpop.f32.mrb[87].mxu0  ;;  %v5083_v17 = vld [vmem:[#allocation2 + $0x22] sm:$0xff]  ;;  %v4967_v63 = vld [vmem:[#allocation2 + $0x18] sm:$0xff] }
 0x39d   : > { %v5215_v54 = vmax.f32 %v5059_v3, %v5176_v34  ;;  %v4233_v46 = vpop.f32.mrb[88].mxu1  ;;  %v5099_v29 = vld [vmem:[#allocation2 + $0xa2] sm:$0xff]  ;;  %v4983_v14 = vld [vmem:[#allocation2 + $0x98] sm:$0xff]  ;;  %v5045_v6 = vmax.f32 %v4967_v63, %v5006_v7  ;;  %v5161_v23 = vmax.f32 %v5083_v17, %v5122_v56 }
 0x39e   : > { %v5138_v18 = vld [vmem:[#allocation2 + $0xa3] sm:$0xff]  ;;  %4945 = vst.msk [vmem:[#allocation2 + $0xb8] sm:$0xff] %vm4921_vm3, %v4903_v27  ;;  %v4863_v15 = vadd.f32 %v17200_v49, %v4815_v9  ;;  %v4337_v44 = vadd.f32 %v4233_v46, %v17137_v10  ;;  %v12855_v21 = vpop.f32.mrb[89].mxu1  ;;  %v5061_v12 = vmax.f32 %v4983_v14, %v5022_v16  ;;  %v5044_v27 = vmax.f32 %v4966_v5, %v5005_v22  ;;  %v5086_v46 = vld [vmem:[#allocation2 + $0x3a] sm:$0xff] }
 0x39f   : > { %v13879_v11 = vpack.c.bf16 %v5215_v54, %v5214_v1  ;;  %v17347_v38 = vpop.f32.mrb[88].mxu0  ;;  %v5177_v32 = vmax.f32 %v5099_v29, %v5138_v18  ;;  %v5201_v9 = vmax.f32 %v5045_v6, %v5162_v52  ;;  %v5125_v53 = vld [vmem:[#allocation2 + $0x3b] sm:$0xff] }
 0x3a0   : > { %v4904_v39 = vmax.f32 %v4863_v15, 0.0  ;;  %v4816_v13 = vadd.f32 %v17305_v0, %v4337_v44  ;;  %v13001_v61 = vpop.f32.mrb[89].mxu0  ;;  %v5200_v7 = vmax.f32 %v5044_v27, %v5161_v23  ;;  %v5008_v44 = vld [vmem:[#allocation2 + $0x29] sm:$0xff]  ;;  %v5023_v56 = vld [vmem:[#allocation2 + $0xa1] sm:$0xff] }
 0x3a1   : > { %13880 = vmatprep.subr.bf16.mxu1 %v13879_v11  ;;  %v4238_v10 = vpop.f32.mrb[90].mxu1  ;;  %v5100_v62 = vld [vmem:[#allocation2 + $0xaa] sm:$0xff]  ;;  %v5216_v55 = vmax.f32 %v5060_v35, %v5177_v32  ;;  %v4984_v63 = vld [vmem:[#allocation2 + $0xa0] sm:$0xff] }
 0x3a2   : > { %13882 = vmatpush3.bf16.msra.mxu1 %v13881_v48  ;;  %v5139_v36 = vld [vmem:[#allocation2 + $0xab] sm:$0xff]  ;;  %4946 = vst.msk [vmem:[#allocation2 + $0xc0] sm:$0xff] %vm4921_vm3, %v4904_v39  ;;  %v4864_v3 = vadd.f32 %v17200_v49, %v4816_v13  ;;  %v4338_v0 = vadd.f32 %v4238_v10, %v17145_v24  ;;  %v12858_v34 = vpop.f32.mrb[91].mxu1  ;;  %v5124_v48 = vld [vmem:[#allocation2 + $0x33] sm:$0xff]  ;;  %v13885_v16 = vpack.c.bf16 %v5201_v9, %v5200_v7  ;;  %v5007_v10 = vld [vmem:[#allocation2 + $0x21] sm:$0xff] }
 0x3a3   : > { %v5178_v57 = vmax.f32 %v5100_v62, %v5139_v36  ;;  %v17353_v1 = vpop.f32.mrb[90].mxu0  ;;  %v5024_v52 = vld [vmem:[#allocation2 + $0xa9] sm:$0xff]  ;;  %v5164_v39 = vmax.f32 %v5086_v46, %v5125_v53  ;;  %v5062_v62 = vmax.f32 %v4984_v63, %v5023_v56  ;;  %v4968_v27 = vld [vmem:[#allocation2 + $0x20] sm:$0xff] }
 0x3a4   : > { %v4905_v54 = vmax.f32 %v4864_v3, 0.0  ;;  %v4817_v31 = vadd.f32 %v17311_v19, %v4338_v0  ;;  %v13004_v29 = vpop.f32.mrb[91].mxu0  ;;  %v5085_v19 = vld [vmem:[#allocation2 + $0x32] sm:$0xff]  ;;  %v4969_v61 = vld [vmem:[#allocation2 + $0x28] sm:$0xff]  ;;  %v5046_v9 = vmax.f32 %v4968_v27, %v5007_v10 }
 0x3a5   : > { %v5217_v33 = vmax.f32 %v5061_v12, %v5178_v57  ;;  %v4243_v18 = vpop.f32.mrb[92].mxu1  ;;  %v5101_v15 = vld [vmem:[#allocation2 + $0xb2] sm:$0xff]  ;;  %v4985_v35 = vld [vmem:[#allocation2 + $0xa8] sm:$0xff]  ;;  %v5047_v23 = vmax.f32 %v4969_v61, %v5008_v44  ;;  %v5163_v3 = vmax.f32 %v5085_v19, %v5124_v48 }
 0x3a6   : > { %v5140_v24 = vld [vmem:[#allocation2 + $0xb3] sm:$0xff]  ;;  %4947 = vst.msk [vmem:[#allocation2 + $0xc8] sm:$0xff] %vm4921_vm3, %v4905_v54  ;;  %v4865_v21 = vadd.f32 %v17200_v49, %v4817_v31  ;;  %v4339_v11 = vadd.f32 %v4243_v18, %v17153_v45  ;;  %v12861_v4 = vpop.f32.mrb[93].mxu1  ;;  %v20220_v34 = vld [vmem:[#allocation13_spill] sm:$0xff]  ;;  %v5063_v57 = vmax.f32 %v4985_v35, %v5024_v52 }
 0x3a7   : > { %v13883_v17 = vpack.c.bf16 %v5217_v33, %v5216_v55  ;;  %v17359_v13 = vpop.f32.mrb[92].mxu0  ;;  %v5179_v22 = vmax.f32 %v5101_v15, %v5140_v24  ;;  %v5203_v54 = vmax.f32 %v5047_v23, %v5164_v39  ;;  %v5088_v29 = vld [vmem:[#allocation2 + $0x4a] sm:$0xff]  ;;  %v5202_v24 = vmax.f32 %v5046_v9, %v5163_v3 }
 0x3a8   : > { %v4906_v50 = vmax.f32 %v4865_v21, 0.0  ;;  %v4818_v32 = vadd.f32 %v17317_v25, %v4339_v11  ;;  %v13007_v14 = vpop.f32.mrb[93].mxu0  ;;  %v5127_v18 = vld [vmem:[#allocation2 + $0x4b] sm:$0xff]  ;;  %v5010_v11 = vld [vmem:[#allocation2 + $0x39] sm:$0xff] }
 0x3a9   : > { %13884 = vmatprep.subr.bf16.mxu1 %v13883_v17  ;;  %v4248_v45 = vpop.f32.mrb[94].mxu1  ;;  %v5102_v36 = vld [vmem:[#allocation2 + $0xba] sm:$0xff]  ;;  %v5218_v46 = vmax.f32 %v5062_v62, %v5179_v22  ;;  %v5025_v48 = vld [vmem:[#allocation2 + $0xb1] sm:$0xff]  ;;  %v13889_v52 = vpack.c.bf16 %v5203_v54, %v5202_v24 }
 0x3aa   : > { %13886 = vmatpush3.bf16.msra.mxu1 %v13885_v16  ;;  %v5141_v6 = vld [vmem:[#allocation2 + $0xbb] sm:$0xff]  ;;  %4948 = vst.msk [vmem:[#allocation2 + $0xd0] sm:$0xff] %vm4921_vm3, %v4906_v50  ;;  %v4866_v0 = vadd.f32 %v17200_v49, %v4818_v32  ;;  %v4340_v25 = vadd.f32 %v4248_v45, %v20220_v34  ;;  %v12864_v12 = vpop.f32.mrb[95].mxu1  ;;  %v5126_v16 = vld [vmem:[#allocation2 + $0x43] sm:$0xff]  ;;  %v5166_v50 = vmax.f32 %v5088_v29, %v5127_v18  ;;  %v4986_v61 = vld [vmem:[#allocation2 + $0xb0] sm:$0xff] }
 0x3ab   : > { %v5180_v5 = vmax.f32 %v5102_v36, %v5141_v6  ;;  %v17365_v31 = vpop.f32.mrb[94].mxu0  ;;  %v5026_v39 = vld [vmem:[#allocation2 + $0xb9] sm:$0xff]  ;;  %v5009_v45 = vld [vmem:[#allocation2 + $0x31] sm:$0xff]  ;;  %v5064_v36 = vmax.f32 %v4986_v61, %v5025_v48 }
 0x3ac   : > { %v4907_v55 = vmax.f32 %v4866_v0, 0.0  ;;  %v4819_v33 = vadd.f32 %v17323_v30, %v4340_v25  ;;  %v13010_v7 = vpop.f32.mrb[95].mxu0  ;;  %v5087_v30 = vld [vmem:[#allocation2 + $0x42] sm:$0xff]  ;;  %v4971_v14 = vld [vmem:[#allocation2 + $0x38] sm:$0xff] }
 0x3ad   : > { %v5219_v53 = vmax.f32 %v5063_v57, %v5180_v5  ;;  %v4253_v15 = vpop.f32.mrb[96].mxu1  ;;  %v5103_v44 = vld [vmem:[#allocation2 + $0xc2] sm:$0xff]  ;;  %v4987_v62 = vld [vmem:[#allocation2 + $0xb8] sm:$0xff]  ;;  %v5049_v3 = vmax.f32 %v4971_v14, %v5010_v11  ;;  %v5165_v0 = vmax.f32 %v5087_v30, %v5126_v16  ;;  %v4970_v5 = vld [vmem:[#allocation2 + $0x30] sm:$0xff] }
 0x3ae   : > { %v5142_v21 = vld [vmem:[#allocation2 + $0xc3] sm:$0xff]  ;;  %4949 = vst.msk [vmem:[#allocation2 + $0xd8] sm:$0xff] %vm4921_vm3, %v4907_v55  ;;  %v4867_v4 = vadd.f32 %v17200_v49, %v4819_v33  ;;  %v4341_v17 = vadd.f32 %v4253_v15, %v17161_v26  ;;  %v12867_v56 = vpop.f32.mrb[97].mxu1  ;;  %v5065_v12 = vmax.f32 %v4987_v62, %v5026_v39  ;;  %v5048_v27 = vmax.f32 %v4970_v5, %v5009_v45  ;;  %v5090_v29 = vld [vmem:[#allocation2 + $0x5a] sm:$0xff] }
 0x3af   : > { %v13887_v19 = vpack.c.bf16 %v5219_v53, %v5218_v46  ;;  %v17371_v32 = vpop.f32.mrb[96].mxu0  ;;  %v5181_v10 = vmax.f32 %v5103_v44, %v5142_v21  ;;  %v5205_v9 = vmax.f32 %v5049_v3, %v5166_v50  ;;  %v5129_v18 = vld [vmem:[#allocation2 + $0x5b] sm:$0xff]  ;;  %v5012_v21 = vld [vmem:[#allocation2 + $0x49] sm:$0xff]  ;;  %v5128_v48 = vld [vmem:[#allocation2 + $0x53] sm:$0xff] }
 0x3b0   : > { %v4908_v63 = vmax.f32 %v4867_v4, 0.0  ;;  %v4820_v22 = vadd.f32 %v17329_v40, %v4341_v17  ;;  %v13013_v35 = vpop.f32.mrb[97].mxu0  ;;  %v5204_v24 = vmax.f32 %v5048_v27, %v5165_v0  ;;  %v5011_v14 = vld [vmem:[#allocation2 + $0x41] sm:$0xff] }
 0x3b1   : > { %13888 = vmatprep.subr.bf16.mxu1 %v13887_v19  ;;  %v4258_v26 = vpop.f32.mrb[98].mxu1  ;;  %v5104_v6 = vld [vmem:[#allocation2 + $0xca] sm:$0xff]  ;;  %v5220_v46 = vmax.f32 %v5064_v36, %v5181_v10  ;;  %v5027_v19 = vld [vmem:[#allocation2 + $0xc1] sm:$0xff] }
 0x3b2   : > { %13890 = vmatpush3.bf16.msra.mxu1 %v13889_v52  ;;  %v5143_v23 = vld [vmem:[#allocation2 + $0xcb] sm:$0xff]  ;;  %4950 = vst.msk [vmem:[#allocation2 + $0xe0] sm:$0xff] %vm4921_vm3, %v4908_v63  ;;  %v4868_v34 = vadd.f32 %v17200_v49, %v4820_v22  ;;  %v4342_v40 = vadd.f32 %v4258_v26, %v17164_v28  ;;  %v12870_v25 = vpop.f32.mrb[99].mxu1  ;;  %v13893_v30 = vpack.c.bf16 %v5205_v9, %v5204_v24  ;;  %v4988_v22 = vld [vmem:[#allocation2 + $0xc0] sm:$0xff] }
 0x3b3   : > { %v5182_v57 = vmax.f32 %v5104_v6, %v5143_v23  ;;  %v17377_v54 = vpop.f32.mrb[98].mxu0  ;;  %v5028_v16 = vld [vmem:[#allocation2 + $0xc9] sm:$0xff]  ;;  %v5168_v52 = vmax.f32 %v5090_v29, %v5129_v18  ;;  %v5066_v26 = vmax.f32 %v4988_v22, %v5027_v19  ;;  %v4972_v25 = vld [vmem:[#allocation2 + $0x40] sm:$0xff]  ;;  %v5013_v22 = vld [vmem:[#allocation2 + $0x51] sm:$0xff] }
 0x3b4   : > { %v4909_v55 = vmax.f32 %v4868_v34, 0.0  ;;  %v4821_v33 = vadd.f32 %v17335_v60, %v4342_v40  ;;  %v13016_v7 = vpop.f32.mrb[99].mxu0  ;;  %v5089_v60 = vld [vmem:[#allocation2 + $0x52] sm:$0xff]  ;;  %v4973_v10 = vld [vmem:[#allocation2 + $0x48] sm:$0xff] }
 0x3b5   : > { %v5221_v53 = vmax.f32 %v5065_v12, %v5182_v57  ;;  %v4263_v15 = vpop.f32.mrb[100].mxu1  ;;  %v5105_v44 = vld [vmem:[#allocation2 + $0xd2] sm:$0xff]  ;;  %v4989_v35 = vld [vmem:[#allocation2 + $0xc8] sm:$0xff]  ;;  %v5051_v6 = vmax.f32 %v4973_v10, %v5012_v21  ;;  %v5167_v23 = vmax.f32 %v5089_v60, %v5128_v48  ;;  %v5050_v12 = vmax.f32 %v4972_v25, %v5011_v14 }
 0x3b6   : > { %v5144_v28 = vld [vmem:[#allocation2 + $0xd3] sm:$0xff]  ;;  %4951 = vst.msk [vmem:[#allocation2 + $0xe8] sm:$0xff] %vm4921_vm3, %v4909_v55  ;;  %v4869_v11 = vadd.f32 %v17200_v49, %v4821_v33  ;;  %v4343_v4 = vadd.f32 %v4263_v15, %v17167_v51  ;;  %v12873_v17 = vpop.f32.mrb[101].mxu1  ;;  %v5067_v34 = vmax.f32 %v4989_v35, %v5028_v16 }
 0x3b7   : > { %v13891_v56 = vpack.c.bf16 %v5221_v53, %v5220_v46  ;;  %v17383_v39 = vpop.f32.mrb[100].mxu0  ;;  %v5183_v61 = vmax.f32 %v5105_v44, %v5144_v28  ;;  %v5207_v57 = vmax.f32 %v5051_v6, %v5168_v52  ;;  %v5092_v46 = vld [vmem:[#allocation2 + $0x6a] sm:$0xff]  ;;  %v5206_v7 = vmax.f32 %v5050_v12, %v5167_v23  ;;  %v5014_v24 = vld [vmem:[#allocation2 + $0x59] sm:$0xff] }
 0x3b8   : > { %v4910_v50 = vmax.f32 %v4869_v11, 0.0  ;;  %v4822_v63 = vadd.f32 %v17341_v42, %v4343_v4  ;;  %v13019_v45 = vpop.f32.mrb[101].mxu0  ;;  %v5131_v53 = vld [vmem:[#allocation2 + $0x6b] sm:$0xff]  ;;  %v5130_v17 = vld [vmem:[#allocation2 + $0x63] sm:$0xff]  ;;  %v4991_v10 = vld [vmem:[#allocation2 + $0xd8] sm:$0xff] }
 0x3b9   : > { %13892 = vmatprep.subr.bf16.mxu1 %v13891_v56  ;;  %v4268_v51 = vpop.f32.mrb[102].mxu1  ;;  %v5106_v62 = vld [vmem:[#allocation2 + $0xda] sm:$0xff]  ;;  %v5222_v55 = vmax.f32 %v5066_v26, %v5183_v61  ;;  %v5029_v4 = vld [vmem:[#allocation2 + $0xd1] sm:$0xff]  ;;  %v13897_v56 = vpack.c.bf16 %v5207_v57, %v5206_v7  ;;  %v5170_v60 = vmax.f32 %v5092_v46, %v5131_v53  ;;  %v5016_v53 = vld [vmem:[#allocation2 + $0x69] sm:$0xff] }
 0x3ba   : > { %13894 = vmatpush3.bf16.msra.mxu1 %v13893_v30  ;;  %v5145_v36 = vld [vmem:[#allocation2 + $0xdb] sm:$0xff]  ;;  %4952 = vst.msk [vmem:[#allocation2 + $0xf0] sm:$0xff] %vm4921_vm3, %v4910_v50  ;;  %v4870_v3 = vadd.f32 %v17200_v49, %v4822_v63  ;;  %v4344_v42 = vadd.f32 %v4268_v51, %v17170_v41  ;;  %v12876_v0 = vpop.f32.mrb[103].mxu1  ;;  %v4990_v52 = vld [vmem:[#allocation2 + $0xd0] sm:$0xff] }
 0x3bb   : > { %v5184_v40 = vmax.f32 %v5106_v62, %v5145_v36  ;;  %v17389_v5 = vpop.f32.mrb[102].mxu0  ;;  %v5030_v19 = vld [vmem:[#allocation2 + $0xd9] sm:$0xff]  ;;  %v5068_v14 = vmax.f32 %v4990_v52, %v5029_v4 }
 0x3bc   : > { %v4911_v27 = vmax.f32 %v4870_v3, 0.0  ;;  %v4823_v9 = vadd.f32 %v17347_v38, %v4344_v42  ;;  %v13022_v29 = vpop.f32.mrb[103].mxu0  ;;  %v5091_v38 = vld [vmem:[#allocation2 + $0x62] sm:$0xff]  ;;  %v4975_v63 = vld [vmem:[#allocation2 + $0x58] sm:$0xff]  ;;  %v5069_v6 = vmax.f32 %v4991_v10, %v5030_v19  ;;  %v4974_v3 = vld [vmem:[#allocation2 + $0x50] sm:$0xff] }
 0x3bd   : > { %v5223_v33 = vmax.f32 %v5067_v34, %v5184_v40  ;;  %v4273_v18 = vpop.f32.mrb[104].mxu1  ;;  %v5107_v15 = vld [vmem:[#allocation2 + $0xe2] sm:$0xff]  ;;  %v5053_v35 = vmax.f32 %v4975_v63, %v5014_v24  ;;  %v5169_v26 = vmax.f32 %v5091_v38, %v5130_v17  ;;  %v5052_v42 = vmax.f32 %v4974_v3, %v5013_v22  ;;  %v5094_v57 = vld [vmem:[#allocation2 + $0x7a] sm:$0xff] }
 0x3be   : > { %v5146_v41 = vld [vmem:[#allocation2 + $0xe3] sm:$0xff]  ;;  %4953 = vst.msk [vmem:[#allocation2 + $0xf8] sm:$0xff] %vm4921_vm3, %v4911_v27  ;;  %v4871_v44 = vadd.f32 %v17200_v49, %v4823_v9  ;;  %v4345_v28 = vadd.f32 %v4273_v18, %v17173_v8  ;;  %v12879_v21 = vpop.f32.mrb[105].mxu1  ;;  %v5133_v27 = vld [vmem:[#allocation2 + $0x7b] sm:$0xff] }
 0x3bf   : > { %v13895_v11 = vpack.c.bf16 %v5223_v33, %v5222_v55  ;;  %v17395_v48 = vpop.f32.mrb[104].mxu0  ;;  %v5185_v50 = vmax.f32 %v5107_v15, %v5146_v41  ;;  %v5209_v0 = vmax.f32 %v5053_v35, %v5170_v60  ;;  %v5208_v55 = vmax.f32 %v5052_v42, %v5169_v26  ;;  %v5031_v15 = vld [vmem:[#allocation2 + $0xe1] sm:$0xff]  ;;  %v5093_v41 = vld [vmem:[#allocation2 + $0x72] sm:$0xff] }
 0x3c0   : > { %v4912_v30 = vmax.f32 %v4871_v44, 0.0  ;;  %v4824_v16 = vadd.f32 %v17353_v1, %v4345_v28  ;;  %v13025_v61 = vpop.f32.mrb[105].mxu0  ;;  %v5172_v28 = vmax.f32 %v5094_v57, %v5133_v27  ;;  %v4992_v4 = vld [vmem:[#allocation2 + $0xe0] sm:$0xff]  ;;  %v4977_v17 = vld [vmem:[#allocation2 + $0x68] sm:$0xff] }
 0x3c1   : > { %13896 = vmatprep.subr.bf16.mxu1 %v13895_v11  ;;  %v4278_v8 = vpop.f32.mrb[106].mxu1  ;;  %v5108_v45 = vld [vmem:[#allocation2 + $0xea] sm:$0xff]  ;;  %v5224_v25 = vmax.f32 %v5068_v14, %v5185_v50  ;;  %v13901_v24 = vpack.c.bf16 %v5209_v0, %v5208_v55  ;;  %v17410_v50 = vld [vmem:[%s20218_s30] ss:$0 sm:$0xff]  ;;  %v5095_v57 = vld [vmem:[#allocation2 + $0x82] sm:$0xff] }
 0x3c2   : > { %13898 = vmatpush3.bf16.msra.mxu1 %v13897_v56  ;;  %v5147_v51 = vld [vmem:[#allocation2 + $0xeb] sm:$0xff]  ;;  %4954 = vst.msk [vmem:[#allocation2 + $0x100] sm:$0xff] %vm4921_vm3, %v4912_v30  ;;  %v4872_v62 = vadd.f32 %v17200_v49, %v4824_v16  ;;  %v4346_v1 = vadd.f32 %v4278_v8, %v17176_v20  ;;  %v12882_v36 = vpop.f32.mrb[107].mxu1  ;;  %v5015_v56 = vld [vmem:[#allocation2 + $0x61] sm:$0xff]  ;;  %v5055_v16 = vmax.f32 %v4977_v17, %v5016_v53  ;;  %v5018_v0 = vld [vmem:[#allocation2 + $0x79] sm:$0xff] }
 0x3c3   : > { %v5186_v23 = vmax.f32 %v5108_v45, %v5147_v51  ;;  %v5032_v44 = vld [vmem:[#allocation2 + $0xe9] sm:$0xff]  ;;  %v4976_v10 = vld [vmem:[#allocation2 + $0x60] sm:$0xff] }
 0x3c4   : > { %v4913_v34 = vmax.f32 %v4872_v62, 0.0  ;;  %v4825_v40 = vadd.f32 %v17359_v13, %v4346_v1  ;;  %v5132_v13 = vld [vmem:[#allocation2 + $0x73] sm:$0xff]  ;;  %v5054_v14 = vmax.f32 %v4976_v10, %v5015_v56  ;;  %v5211_v45 = vmax.f32 %v5055_v16, %v5172_v28  ;;  %v5096_v1 = vld [vmem:[#allocation2 + $0x8a] sm:$0xff] }
 0x3c5   : > { %v5225_v12 = vmax.f32 %v5069_v6, %v5186_v23  ;;  %v4283_v9 = vpop.f32.mrb[108].mxu1  ;;  %v5109_v33 = vld [vmem:[#allocation2 + $0xf2] sm:$0xff]  ;;  %v5171_v52 = vmax.f32 %v5093_v41, %v5132_v13 }
 0x3c6   : > { %v5148_v46 = vld [vmem:[#allocation2 + $0xf3] sm:$0xff]  ;;  %4955 = vst.msk [vmem:[#allocation2 + $0x108] sm:$0xff] %vm4921_vm3, %v4913_v34  ;;  %v4873_v20 = vadd.f32 %v17200_v49, %v4825_v40  ;;  %v4347_v29 = vadd.f32 %v4283_v9, %v17179_v47  ;;  %v12885_v18 = vpop.f32.mrb[109].mxu1  ;;  %v4993_v49 = vld [vmem:[#allocation2 + $0xe8] sm:$0xff]  ;;  %v5070_v47 = vmax.f32 %v4992_v4, %v5031_v15 }
 0x3c7   : > { %v13899_v7 = vpack.c.bf16 %v5225_v12, %v5224_v25  ;;  %v5187_v38 = vmax.f32 %v5109_v33, %v5148_v46  ;;  %v5071_v61 = vmax.f32 %v4993_v49, %v5032_v44  ;;  %v5135_v36 = vld [vmem:[#allocation2 + $0x8b] sm:$0xff]  ;;  %v5210_v23 = vmax.f32 %v5054_v14, %v5171_v52  ;;  %v4995_v15 = vld [vmem:[#allocation2 + $0xf8] sm:$0xff] }
 0x3c8   : > { %v4914_v21 = vmax.f32 %v4873_v20, 0.0  ;;  %v4826_v11 = vadd.f32 %v17365_v31, %v4347_v29  ;;  %v5033_v12 = vld [vmem:[#allocation2 + $0xf1] sm:$0xff]  ;;  %v5174_v55 = vmax.f32 %v5096_v1, %v5135_v36 }
 0x3c9   : > { %13900 = vmatprep.subr.bf16.mxu1 %v13899_v7  ;;  %v4288_v19 = vpop.f32.mrb[110].mxu1  ;;  %v5110_v60 = vld [vmem:[#allocation2 + $0xfa] sm:$0xff]  ;;  %v5226_v26 = vmax.f32 %v5070_v47, %v5187_v38  ;;  %v13905_v27 = vpack.c.bf16 %v5211_v45, %v5210_v23  ;;  %v4994_v53 = vld [vmem:[#allocation2 + $0xf0] sm:$0xff] }
 0x3ca   : > { %13902 = vmatpush3.bf16.msra.mxu1 %v13901_v24  ;;  %v5149_v30 = vld [vmem:[#allocation2 + $0xfb] sm:$0xff]  ;;  %4956 = vst.msk [vmem:[#allocation2 + $0x110] sm:$0xff] %vm4921_vm3, %v4914_v21  ;;  %v4874_v31 = vadd.f32 %v17410_v50, %v4826_v11  ;;  %v4348_v63 = vadd.f32 %v4288_v19, %v17182_v2  ;;  %v12888_v22 = vpop.f32.mrb[111].mxu1  ;;  %v5017_v18 = vld [vmem:[#allocation2 + $0x71] sm:$0xff] }
 0x3cb   : > { %v5188_v8 = vmax.f32 %v5110_v60, %v5149_v30  ;;  %v5034_v9 = vld [vmem:[#allocation2 + $0xf9] sm:$0xff]  ;;  %v4978_v38 = vld [vmem:[#allocation2 + $0x70] sm:$0xff] }
 0x3cc   : > { %v4915_v51 = vmax.f32 %v4874_v31, 0.0  ;;  %v4827_v35 = vadd.f32 %v17371_v32, %v4348_v63  ;;  %v5134_v32 = vld [vmem:[#allocation2 + $0x83] sm:$0xff]  ;;  %v4979_v29 = vld [vmem:[#allocation2 + $0x78] sm:$0xff]  ;;  %v5073_v11 = vmax.f32 %v4995_v15, %v5034_v9  ;;  %v5056_v17 = vmax.f32 %v4978_v38, %v5017_v18  ;;  %v5247_v15 = vld [vmem:[%s20219_s18 + $0x50] sm:$0xff] }
 0x3cd   : > { %v5227_v62 = vmax.f32 %v5071_v61, %v5188_v8  ;;  %v4293_v6 = vpop.f32.mrb[112].mxu1  ;;  %v5111_v3 = vld [vmem:[#allocation2 + $0x102] sm:$0xff]  ;;  %v5057_v24 = vmax.f32 %v4979_v29, %v5018_v0  ;;  %v5173_v44 = vmax.f32 %v5095_v57, %v5134_v32  ;;  %v5240_v57 = vld [vmem:[%s20219_s18 + $0x18] sm:$0xff] }
 0x3ce   : > { %v5150_v42 = vld [vmem:[#allocation2 + $0x103] sm:$0xff]  ;;  %4957 = vst.msk [vmem:[#allocation2 + $0x118] sm:$0xff] %vm4921_vm3, %v4915_v51  ;;  %v4875_v2 = vadd.f32 %v17410_v50, %v4827_v35  ;;  %v4349_v34 = vadd.f32 %v4293_v6, %v17185_v59  ;;  %v12891_v40 = vpop.f32.mrb[113].mxu1  ;;  %v5072_v59 = vmax.f32 %v4994_v53, %v5033_v12  ;;  %v5243_v53 = vld [vmem:[%s20219_s18 + $0x30] sm:$0xff] }
 0x3cf   : > { %v13903_v25 = vpack.c.bf16 %v5227_v62, %v5226_v26  ;;  %v5189_v20 = vmax.f32 %v5111_v3, %v5150_v42  ;;  %v5213_v56 = vmax.f32 %v5057_v24, %v5174_v55  ;;  %v5212_v16 = vmax.f32 %v5056_v17, %v5173_v44  ;;  %v5035_v8 = vld [vmem:[#allocation2 + $0x101] sm:$0xff]  ;;  %v5244_v55 = vld [vmem:[%s20219_s18 + $0x38] sm:$0xff] }
 0x3d0   : > { %v4916_v33 = vmax.f32 %v4875_v2, 0.0  ;;  %v4828_v46 = vadd.f32 %v17377_v54, %v4349_v34  ;;  %v5237_v51 = vld [vmem:[%s20219_s18] sm:$0xff]  ;;  %v4997_v1 = vld [vmem:[#allocation2 + $0x108] sm:$0xff] }
 0x3d1   : > { %13904 = vmatprep.subr.bf16.mxu1 %v13903_v25  ;;  %v4298_v7 = vpop.f32.mrb[114].mxu1  ;;  %v5112_v41 = vld [vmem:[#allocation2 + $0x10a] sm:$0xff]  ;;  %v5228_v47 = vmax.f32 %v5072_v59, %v5189_v20  ;;  %v13909_v10 = vpack.c.bf16 %v5213_v56, %v5212_v16  ;;  %v4996_v35 = vld [vmem:[#allocation2 + $0x100] sm:$0xff] }
 0x3d2   : > { %13906 = vmatpush3.bf16.msra.mxu1 %v13905_v27  ;;  %v5151_v13 = vld [vmem:[#allocation2 + $0x10b] sm:$0xff]  ;;  %4958 = vst.msk [vmem:[#allocation2 + $0x120] sm:$0xff] %vm4921_vm3, %v4916_v33  ;;  %v4876_v28 = vadd.f32 %v17410_v50, %v4828_v46  ;;  %v4350_v21 = vadd.f32 %v4298_v7, %v17188_v43  ;;  %v12894_v54 = vpop.f32.mrb[115].mxu1  ;;  %v5074_v36 = vmax.f32 %v4996_v35, %v5035_v8  ;;  %v5249_v56 = vld [vmem:[%s20219_s18 + $0x60] sm:$0xff] }
 0x3d3   : > { %v5190_v4 = vmax.f32 %v5112_v41, %v5151_v13  ;;  %v5036_v14 = vld [vmem:[#allocation2 + $0x109] sm:$0xff] }
 0x3d4   : > { %v4917_v19 = vmax.f32 %v4876_v28, 0.0  ;;  %v4829_v49 = vadd.f32 %v17383_v39, %v4350_v21  ;;  %v5075_v42 = vmax.f32 %v4997_v1, %v5036_v14  ;;  %v4998_v20 = vld [vmem:[#allocation2 + $0x110] sm:$0xff]  ;;  %v5246_v28 = vld [vmem:[%s20219_s18 + $0x48] sm:$0xff] }
 0x3d5   : > { %v5229_v60 = vmax.f32 %v5073_v11, %v5190_v4  ;;  %v4303_v30 = vpop.f32.mrb[116].mxu1  ;;  %v5113_v52 = vld [vmem:[#allocation2 + $0x112] sm:$0xff]  ;;  %v5250_v4 = vld [vmem:[%s20219_s18 + $0x68] sm:$0xff] }
 0x3d6   : > { %v5152_v31 = vld [vmem:[#allocation2 + $0x113] sm:$0xff]  ;;  %4959 = vst.msk [vmem:[#allocation2 + $0x128] sm:$0xff] %vm4921_vm3, %v4917_v19  ;;  %v4877_v63 = vadd.f32 %v17410_v50, %v4829_v49  ;;  %v4351_v43 = vadd.f32 %v4303_v30, %v17191_v37  ;;  %v12897_v22 = vpop.f32.mrb[117].mxu1 }
 0x3d7   : > { %v13907_v61 = vpack.c.bf16 %v5229_v60, %v5228_v47  ;;  %v5191_v26 = vmax.f32 %v5113_v52, %v5152_v31  ;;  %v5253_v52 = vld [vmem:[%s20219_s18 + $0x80] sm:$0xff]  ;;  %v5255_v1 = vld [vmem:[%s20219_s18 + $0x90] sm:$0xff] }
 0x3d8   : > { %v4918_v45 = vmax.f32 %v4877_v63, 0.0  ;;  %v4830_v39 = vadd.f32 %v17389_v5, %v4351_v43  ;;  %v5241_v5 = vld [vmem:[%s20219_s18 + $0x20] sm:$0xff] }
 0x3d9   : > { %13908 = vmatprep.subr.bf16.mxu1 %v13907_v61  ;;  %v4308_v62 = vpop.f32.mrb[118].mxu1  ;;  %v5114_v37 = vld [vmem:[#allocation2 + $0x11a] sm:$0xff]  ;;  %v5230_v25 = vmax.f32 %v5074_v36, %v5191_v26  ;;  %v5259_v36 = vld [vmem:[%s20219_s18 + $0xb0] sm:$0xff] }
 0x3da   : > { %13910 = vmatpush3.bf16.msra.mxu1 %v13909_v10  ;;  %v5153_v6 = vld [vmem:[#allocation2 + $0x11b] sm:$0xff]  ;;  %4960 = vst.msk [vmem:[#allocation2 + $0x130] sm:$0xff] %vm4921_vm3, %v4918_v45  ;;  %v4878_v23 = vadd.f32 %v17410_v50, %v4830_v39  ;;  %v4352_v3 = vadd.f32 %v4308_v62, %v17194_v58  ;;  %v12900_v2 = vpop.f32.mrb[119].mxu1 }
 0x3db   : > { %v5192_v0 = vmax.f32 %v5114_v37, %v5153_v6  ;;  %v5038_v33 = vld [vmem:[#allocation2 + $0x119] sm:$0xff]  ;;  %v5258_v37 = vld [vmem:[%s20219_s18 + $0xa8] sm:$0xff]  ;;  %v5271_v2 = vld [vmem:[%s20219_s18 + $0x110] sm:$0xff] }
 0x3dc   : > { %v4919_v34 = vmax.f32 %v4878_v23, 0.0  ;;  %v4831_v40 = vadd.f32 %v17395_v48, %v4352_v3  ;;  %v5037_v48 = vld [vmem:[#allocation2 + $0x111] sm:$0xff]  ;;  %v5000_v19 = vld [vmem:[#allocation2 + $0x120] sm:$0xff]  ;;  %v5262_v6 = vld [vmem:[%s20219_s18 + $0xc8] sm:$0xff] }
 0x3dd   : > { %5403 = vmatmul.mubr.f32.vlgmr.msra.gmra.mrb[120].mxu1 %v5237_v51  ;;  %v5231_v12 = vmax.f32 %v5075_v42, %v5192_v0  ;;  %v5115_v32 = vld [vmem:[#allocation2 + $0x122] sm:$0xff]  ;;  %v5076_v59 = vmax.f32 %v4998_v20, %v5037_v48  ;;  %v5252_v39 = vld [vmem:[%s20219_s18 + $0x78] sm:$0xff]  ;;  %v5267_v0 = vld [vmem:[%s20219_s18 + $0xf0] sm:$0xff] }
 0x3de   : > { %5407 = vmatprep.mubr.f32.mxu1 %v5241_v5  ;;  %v5154_v58 = vld [vmem:[#allocation2 + $0x123] sm:$0xff]  ;;  %4961 = vst.msk [vmem:[#allocation2 + $0x138] sm:$0xff] %vm4921_vm3, %v4919_v34  ;;  %v4879_v27 = vadd.f32 %v17410_v50, %v4831_v40  ;;  %v4999_v50 = vld [vmem:[#allocation2 + $0x118] sm:$0xff] }
 0x3df   : > { %v13911_v9 = vpack.c.bf16 %v5231_v12, %v5230_v25  ;;  %v5193_v29 = vmax.f32 %v5115_v32, %v5154_v58  ;;  %v5077_v41 = vmax.f32 %v4999_v50, %v5038_v33  ;;  %v5039_v38 = vld [vmem:[#allocation2 + $0x121] sm:$0xff]  ;;  %v5256_v26 = vld [vmem:[%s20219_s18 + $0x98] sm:$0xff]  ;;  %v5279_v58 = vld [vmem:[%s20219_s18 + $0x150] sm:$0xff] }
 0x3e0   : > { %v4920_v46 = vmax.f32 %v4879_v27, 0.0  ;;  %v5001_v49 = vld [vmem:[#allocation2 + $0x128] sm:$0xff]  ;;  %v5078_v31 = vmax.f32 %v5000_v19, %v5039_v38  ;;  %v5261_v23 = vld [vmem:[%s20219_s18 + $0xc0] sm:$0xff]  ;;  %v5264_v5 = vld [vmem:[%s20219_s18 + $0xd8] sm:$0xff] }
 0x3e1   : > { %5408 = vmatmul.mubr.f32.gmra.mrb[122].mxu1 %v5240_v57  ;;  %13912 = vmatprep.subr.bf16.mxu1 %v13911_v9  ;;  %v5116_v18 = vld [vmem:[#allocation2 + $0x12a] sm:$0xff]  ;;  %v5232_v24 = vmax.f32 %v5076_v59, %v5193_v29  ;;  %v5265_v3 = vld [vmem:[%s20219_s18 + $0xe0] sm:$0xff]  ;;  %v5268_v42 = vld [vmem:[%s20219_s18 + $0xf8] sm:$0xff] }
 0x3e2   : > { %13914 = vmatpush3.bf16.msra.mxu1 %v13911_v9  ;;  %5412 = vmatprep.mubr.f32.mxu1 %v5244_v55  ;;  %v5155_v7 = vld [vmem:[#allocation2 + $0x12b] sm:$0xff]  ;;  %4963 = vst.msk [vmem:[#allocation2 + $0x140] sm:$0xf] %vm4962_vm4, %v4920_v46  ;;  %v5273_v25 = vld [vmem:[%s20219_s18 + $0x120] sm:$0xff]  ;;  %v5276_v57 = vld [vmem:[%s20219_s18 + $0x138] sm:$0xff]  ;;  %vm10047_vm4 = vcmask 1043456  }
 0x3e3   : > { %v5194_v13 = vmax.f32 %v5116_v18, %v5155_v7  ;;  %v5040_v17 = vld [vmem:[#allocation2 + $0x129] sm:$0xff]  ;;  %v5041_v8 = vld [vmem:[#allocation2 + $0x131] sm:$0x1]  ;;  %v5277_v12 = vld [vmem:[%s20219_s18 + $0x140] sm:$0xff] }
 0x3e4   : > { %v5079_v63 = vmax.f32 %v5001_v49, %v5040_v17  ;;  %v5002_v61 = vld [vmem:[#allocation2 + $0x130] sm:$0x1]  ;;  %v5270_v34 = vld [vmem:[%s20219_s18 + $0x108] sm:$0xff]  ;;  %v5280_v32 = vld [vmem:[%s20219_s18 + $0x158] sm:$0xff]  ;;  %v14538_v17 = vmov 0.0|0.0  }
 0x3e5   : > { %5413 = vmatmul.mubr.f32.gmra.mrb[124].mxu1 %v5243_v53  ;;  %v5233_v44 = vmax.f32 %v5077_v41, %v5194_v13  ;;  %v5117_v21 = vld [vmem:[#allocation2 + $0x132] sm:$0xff]  ;;  %v5080_v35 = vmax.f32 %v5002_v61, %v5041_v8  ;;  %v5274_v40 = vld [vmem:[%s20219_s18 + $0x128] sm:$0xff]  ;;  %v5283_v27 = vld [vmem:[%s20219_s18 + $0x170] sm:$0x3]  ;;  %13935 = vmatprep.subr.bf16.mxu0 %v14538_v17 }
 0x3e6   : > { %5417 = vmatprep.mubr.f32.mxu1 %v5247_v15  ;;  %v5156_v54 = vld [vmem:[#allocation2 + $0x133] sm:$0xff]  ;;  %v5282_v9 = vld [vmem:[%s20219_s18 + $0x168] sm:$0x3]  ;;  %v5245_v33 = vld [vmem:[%s20219_s18 + $0x40] sm:$0xff] }
 0x3e7   : > { %v13915_v11 = vpack.c.bf16 %v5233_v44, %v5232_v24  ;;  %v5195_v47 = vmax.f32 %v5117_v21, %v5156_v54  ;;  %v5239_v55 = vld [vmem:[%s20219_s18 + $0x10] sm:$0xff]  ;;  %v5242_v48 = vld [vmem:[%s20219_s18 + $0x28] sm:$0xff]  ;;  %v5248_v46 = vld [vmem:[%s20219_s18 + $0x58] sm:$0xff] }
 0x3e8   : > { %v5251_v53 = vld [vmem:[%s20219_s18 + $0x70] sm:$0xff]  ;;  %v5254_v20 = vld [vmem:[%s20219_s18 + $0x88] sm:$0xff]  ;;  %v5257_v29 = vld [vmem:[%s20219_s18 + $0xa0] sm:$0xff] }
 0x3e9   : > { %5418 = vmatmul.mubr.f32.gmra.mrb[126].mxu1 %v5246_v28  ;;  %13916 = vmatprep.subr.bf16.mxu1 %v13915_v11  ;;  %v5118_v60 = vld [vmem:[#allocation2 + $0x13a] sm:$0xff]  ;;  %v5119_v16 = vld [vmem:[#allocation2 + $0x142] sm:$0x1]  ;;  %v5158_v22 = vld [vmem:[#allocation2 + $0x143] sm:$0x1]  ;;  %v5234_v10 = vmax.f32 %v5078_v31, %v5195_v47  ;;  %v20221_v28 = vmov 0.0  }
 0x3ea   : > { %13918 = vmatpush3.bf16.msra.mxu1 %v13915_v11  ;;  %5422 = vmatprep.mubr.f32.mxu1 %v5250_v4  ;;  %v5157_v30 = vld [vmem:[#allocation2 + $0x13b] sm:$0xff]  ;;  %v5197_v45 = vmax.f32 %v5119_v16, %v5158_v22  ;;  %v5263_v18 = vld [vmem:[%s20219_s18 + $0xd0] sm:$0xff]  ;;  %v5266_v7 = vld [vmem:[%s20219_s18 + $0xe8] sm:$0xff] }
 0x3eb   : > { %v5196_v43 = vmax.f32 %v5118_v60, %v5157_v30  ;;  %v5260_v50 = vld [vmem:[%s20219_s18 + $0xb8] sm:$0xff]  ;;  %v5269_v15 = vld [vmem:[%s20219_s18 + $0x100] sm:$0xff]  ;;  %v5275_v41 = vld [vmem:[%s20219_s18 + $0x130] sm:$0xff] }
 0x3ec   : > { %v5236_v62 = vmax.f32 %v5080_v35, %v5197_v45  ;;  %v5272_v59 = vld [vmem:[%s20219_s18 + $0x118] sm:$0xff]  ;;  %v5278_v13 = vld [vmem:[%s20219_s18 + $0x148] sm:$0xff]  ;;  %v5281_v24 = vld [vmem:[%s20219_s18 + $0x160] sm:$0xff] }
 0x3ed   : > { %5423 = vmatmul.mubr.f32.gmra.mrb[128].mxu1 %v5249_v56  ;;  %v5235_v14 = vmax.f32 %v5079_v63, %v5196_v43  ;;  %v5284_v44 = vld [vmem:[%s20219_s18 + $0x178] sm:$0x3]  ;;  %v5675_v21 = vld [vmem:[%s20146_s4 + $0x20] sm:$0xff]  ;;  %v5676_v54 = vld [vmem:[%s20146_s4 + $0x28] sm:$0xff] }
 0x3ee   : > { %5427 = vmatprep.mubr.f32.mxu1 %v5253_v52  ;;  %v6030_v11 = vld [vmem:[%s20146_s4 + $0x40] sm:$0xff]  ;;  %v13924_v4 = vpack.c.bf16 %v5676_v54, %v5675_v21  ;;  %v6031_v38 = vld [vmem:[%s20146_s4 + $0x48] sm:$0xff]  ;;  %v5677_v19 = vld [vmem:[%s20146_s4 + $0x30] sm:$0xff] }
 0x3ef   : > { %v13919_v51 = vpack.c.bf16 %v5235_v14, %v5234_v10  ;;  %v13936_v56 = vpack.c.bf16 %v6031_v38, %v6030_v11  ;;  %v5678_v49 = vld [vmem:[%s20146_s4 + $0x38] sm:$0xff]  ;;  %v6032_v47 = vld [vmem:[%s20146_s4 + $0x50] sm:$0xff] }
 0x3f0   : > { %v13927_v60 = vpack.c.bf16 %v5678_v49, %v5677_v19  ;;  %v6033_v30 = vld [vmem:[%s20146_s4 + $0x58] sm:$0xff]  ;;  %v5658_v19 = vld [vmem:[%s20146_s4] sm:$0xff]  ;;  %v5659_v49 = vld [vmem:[%s20146_s4 + $0x8] sm:$0xff] }
 0x3f1   : > { %5428 = vmatmul.mubr.f32.gmra.mrb[130].mxu1 %v5252_v39  ;;  %13920 = vmatprep.subr.bf16.mxu1 %v13919_v51  ;;  %v13939_v16 = vpack.c.bf16 %v6033_v30, %v6032_v47  ;;  %v6428_v47 = vld [vmem:[%s20146_s4 + $0x80] sm:$0xff] }
 0x3f2   : > { %13922 = vmatpush3.bf16.msra.mxu1 %v13919_v51  ;;  %5432 = vmatprep.mubr.f32.mxu1 %v5256_v26 }
 0x3f3   : > { %13038 = vmatprep.subr.msk.mxu1 %vm5334_vm5, %v5236_v62  ;;  %13937 = vmatpush3.bf16.msra.mxu0 %v13936_v56 }
 0x3f4   : > { %13938 = vmatprep.subr.bf16.mxu0 %v14538_v17 }
 0x3f5   : > { %5433 = vmatmul.mubr.f32.gmra.mrb[132].mxu1 %v5255_v1 }
 0x3f6   : > { %13039 = vmatpush3.msk.msra.mxu1 %vm5334_vm5, %v5236_v62  ;;  %5437 = vmatprep.mubr.f32.mxu1 %v5259_v36  ;;  %vm14403_vm5 = vmpackc.low %vm809_vm0, %vm14539_vm10  ;;  %vm10063_vm0 = vcmask 89088  }
 0x3f7   : > { %13923 = vmatprep.subr.bf16.mxu1 %v14538_v17  ;;  %13940 = vmatpush3.bf16.msra.mxu0 %v13939_v16 }
 0x3f8   : > { %13947 = vmatprep.subr.bf16.mxu0 %v14538_v17 }
 0x3f9   : > { %5438 = vmatmul.mubr.f32.gmra.mrb[134].mxu1 %v5258_v37 }
 0x3fa   : > { %5442 = vmatprep.mubr.f32.mxu1 %v5262_v6 }
 0x3fd   : > { %5443 = vmatmul.mubr.f32.gmra.mrb[136].mxu1 %v5261_v23 }
 0x3fe   : > { %5447 = vmatprep.mubr.f32.mxu1 %v5265_v3 }
 0x401   : > { %5448 = vmatmul.mubr.f32.gmra.mrb[138].mxu1 %v5264_v5 }
 0x402   : > { %5452 = vmatprep.mubr.f32.mxu1 %v5268_v42 }
 0x405   : > { %5453 = vmatmul.mubr.f32.gmra.mrb[140].mxu1 %v5267_v0 }
 0x406   : > { %5457 = vmatprep.mubr.f32.mxu1 %v5271_v2 }
 0x409   : > { %5458 = vmatmul.mubr.f32.gmra.mrb[142].mxu1 %v5270_v34 }
 0x40a   : > { %5462 = vmatprep.mubr.f32.mxu1 %v5274_v40 }
 0x40d   : > { %5463 = vmatmul.mubr.f32.gmra.mrb[144].mxu1 %v5273_v25 }
 0x40e   : > { %5467 = vmatprep.mubr.f32.mxu1 %v5277_v12 }
 0x411   : > { %5468 = vmatmul.mubr.f32.gmra.mrb[146].mxu1 %v5276_v57 }
 0x412   : > { %5472 = vmatprep.mubr.f32.mxu1 %v5280_v32 }
 0x415   : > { %5473 = vmatmul.mubr.f32.gmra.mrb[148].mxu1 %v5279_v58 }
 0x416   : > { %5477 = vmatprep.mubr.f32.mxu1 %v5283_v27 }
 0x419   : > { %5478 = vmatmul.mubr.f32.gmra.mrb[150].mxu1 %v5282_v9 }
 0x41a   : > { %13040 = vmatprep.mubr.msk.f32.mxu1 %vm5285_vm6, %v5239_v55 }
 0x41d   : > { %13041 = vmatmul.mubr.msk.f32.vlgmr.msra.gmra.mrb[152].mxu1 %vm5285_vm6, %v5242_v48 }
 0x41e   : > { %13043 = vmatprep.mubr.msk.f32.mxu1 %vm5285_vm6, %v5245_v33  ;;  %13925 = vmatpush3.bf16.msra.mxu1 %v13924_v4 }
 0x41f   : > { %13926 = vmatprep.subr.bf16.mxu1 %v14538_v17 }
 0x421   : > { %13044 = vmatmul.mubr.msk.f32.gmra.mrb[154].mxu1 %vm5285_vm6, %v5248_v46 }
 0x422   : > { %13046 = vmatprep.mubr.msk.f32.mxu1 %vm5285_vm6, %v5251_v53  ;;  %13928 = vmatpush3.bf16.msra.mxu1 %v13927_v60  ;;  %v6429_v60 = vld [vmem:[%s20146_s4 + $0x88] sm:$0xff] }
 0x423   : > { %13929 = vmatprep.subr.bf16.mxu1 %v14538_v17 }
 0x425   : > { %13047 = vmatmul.mubr.msk.f32.gmra.mrb[156].mxu1 %vm5285_vm6, %v5254_v20 }
 0x426   : > { %13049 = vmatprep.mubr.msk.f32.mxu1 %vm5285_vm6, %v5257_v29 }
 0x429   : > { %13050 = vmatmul.mubr.msk.f32.gmra.mrb[158].mxu1 %vm5285_vm6, %v5260_v50 }
 0x42a   : > { %13052 = vmatprep.mubr.msk.f32.mxu1 %vm5285_vm6, %v5263_v18 }
 0x42d   : > { %13053 = vmatmul.mubr.msk.f32.gmra.mrb[160].mxu1 %vm5285_vm6, %v5266_v7 }
 0x42e   : > { %13055 = vmatprep.mubr.msk.f32.mxu1 %vm5285_vm6, %v5269_v15 }
 0x431   : > { %13056 = vmatmul.mubr.msk.f32.gmra.mrb[162].mxu1 %vm5285_vm6, %v5272_v59 }
 0x432   : > { %13058 = vmatprep.mubr.msk.f32.mxu1 %vm5285_vm6, %v5275_v41 }
 0x435   : > { %13059 = vmatmul.mubr.msk.f32.gmra.mrb[164].mxu1 %vm5285_vm6, %v5278_v13 }
 0x436   : > { %13061 = vmatprep.mubr.msk.f32.mxu1 %vm5285_vm6, %v5281_v24 }
 0x439   : > { %13062 = vmatmul.mubr.msk.f32.gmra.mrb[166].mxu1 %vm5285_vm6, %v5284_v44 }
 0x43a   : > { %13072 = vmatprep.mubr.msk.f32.mxu1 %vm14537_vm1, %v20221_v28 }
 0x4b0   : > { %v11472_v52 = vpop.f32.mrb[120].mxu1 }
 0x4b1   : > { %v11473_v31 = vpop.f32.mrb[121].mxu1 }
 0x4b2   : > { %v11474_v63 = vadd.f32 %v11473_v31, %v11472_v52 }
 0x4b4   : > { %v11475_v43 = vpop.f32.mrb[122].mxu1 }
 0x4b5   : > { %v11476_v22 = vpop.f32.mrb[123].mxu1 }
 0x4b6   : > { %v11477_v61 = vadd.f32 %v11476_v22, %v11475_v43  ;;  %v13948_v43 = vpack.c.bf16 %v6429_v60, %v6428_v47  ;;  %v5660_v22 = vld [vmem:[%s20146_s4 + $0x10] sm:$0xff]  ;;  %v6827_v60 = vld [vmem:[%s20146_s4 + $0xc8] sm:$0xff] }
 0x4b8   : > { %v11478_v8 = vpop.f32.mrb[124].mxu1 }
 0x4b9   : > { %v11479_v10 = vpop.f32.mrb[125].mxu1 }
 0x4ba   : > { %v11480_v14 = vadd.f32 %v11479_v10, %v11478_v8  ;;  %v6430_v8 = vld [vmem:[%s20146_s4 + $0x90] sm:$0xff] }
 0x4bc   : > { %v11481_v45 = vpop.f32.mrb[126].mxu1 }
 0x4bd   : > { %v11482_v39 = vpop.f32.mrb[127].mxu1 }
 0x4be   : > { %v11483_v51 = vadd.f32 %v11482_v39, %v11481_v45  ;;  %v6431_v45 = vld [vmem:[%s20146_s4 + $0x98] sm:$0xff] }
 0x4c0   : > { %v11484_v35 = vpop.f32.mrb[128].mxu1 }
 0x4c1   : > { %v11485_v26 = vpop.f32.mrb[129].mxu1 }
 0x4c2   : > { %v11486_v62 = vadd.f32 %v11485_v26, %v11484_v35 }
 0x4c4   : > { %v11487_v1 = vpop.f32.mrb[130].mxu1 }
 0x4c5   : > { %v11488_v36 = vpop.f32.mrb[131].mxu1 }
 0x4c6   : > { %v11489_v37 = vadd.f32 %v11488_v36, %v11487_v1  ;;  %v13951_v1 = vpack.c.bf16 %v6431_v45, %v6430_v8 }
 0x4c8   : > { %v11490_v6 = vpop.f32.mrb[132].mxu1 }
 0x4c9   : > { %v11491_v23 = vpop.f32.mrb[133].mxu1 }
 0x4ca   : > { %v17624_v3 = vadd.f32 %v11491_v23, %v11490_v6 }
 0x4cc   : > { %v11493_v5 = vpop.f32.mrb[134].mxu1 }
 0x4cd   : > { %v11494_v42 = vpop.f32.mrb[135].mxu1 }
 0x4ce   : > { %v11495_v0 = vadd.f32 %v11494_v42, %v11493_v5 }
 0x4d0   : > { %v11496_v2 = vpop.f32.mrb[136].mxu1 }
 0x4d1   : > { %v11497_v34 = vpop.f32.mrb[137].mxu1 }
 0x4d2   : > { %v17626_v40 = vadd.f32 %v11497_v34, %v11496_v2 }
 0x4d4   : > { %v11499_v25 = vpop.f32.mrb[138].mxu1 }
 0x4d5   : > { %v11500_v12 = vpop.f32.mrb[139].mxu1 }
 0x4d6   : > { %v17628_v57 = vadd.f32 %v11500_v12, %v11499_v25 }
 0x4d8   : > { %v11502_v32 = vpop.f32.mrb[140].mxu1 }
 0x4d9   : > { %v11503_v58 = vpop.f32.mrb[141].mxu1 }
 0x4da   : > { %v17630_v27 = vadd.f32 %v11503_v58, %v11502_v32 }
 0x4dc   : > { %v11505_v9 = vpop.f32.mrb[142].mxu1 }
 0x4dd   : > { %v11506_v55 = vpop.f32.mrb[143].mxu1 }
 0x4de   : > { %v17632_v48 = vadd.f32 %v11506_v55, %v11505_v9 }
 0x4e0   : > { %v11508_v33 = vpop.f32.mrb[144].mxu1 }
 0x4e1   : > { %v11509_v46 = vpop.f32.mrb[145].mxu1 }
 0x4e2   : > { %v17634_v53 = vadd.f32 %v11509_v46, %v11508_v33 }
 0x4e4   : > { %v11511_v20 = vpop.f32.mrb[146].mxu1 }
 0x4e5   : > { %v11512_v29 = vpop.f32.mrb[147].mxu1 }
 0x4e6   : > { %v17636_v50 = vadd.f32 %v11512_v29, %v11511_v20 }
 0x4e8   : > { %v11514_v18 = vpop.f32.mrb[148].mxu1 }
 0x4e9   : > { %v11515_v7 = vpop.f32.mrb[149].mxu1 }
 0x4ea   : > { %v17638_v15 = vadd.f32 %v11515_v7, %v11514_v18 }
 0x4ec   : > { %v11517_v59 = vpop.f32.mrb[150].mxu1 }
 0x4ed   : > { %v11518_v41 = vpop.f32.mrb[151].mxu1 }
 0x4ee   : > { %v17640_v13 = vadd.f32 %v11518_v41, %v11517_v59 }
 0x4f0   : > { %v13042_v24 = vpop.f32.mrb[152].mxu1 }
 0x4f1   : > { %v5555_v44 = vadd.f32 %v13042_v24, %v11477_v61  ;;  %v5549_v21 = vpop.f32.mrb[153].mxu1  ;;  %v5661_v61 = vld [vmem:[%s20146_s4 + $0x18] sm:$0xff] }
 0x4f2   : > { %v5550_v54 = vadd.f32 %v11474_v63, %v5549_v21  ;;  %v13930_v63 = vpack.c.bf16 %v5659_v49, %v5658_v19  ;;  %v6826_v19 = vld [vmem:[%s20146_s4 + $0xc0] sm:$0xff] }
 0x4f3   : > { %5629 = vst.msk [vmem:[#allocation6 + $0x8] sm:$0xff] %vm4921_vm3, %v5555_v44 }
 0x4f4   : > { %5628 = vst.msk [vmem:[#allocation6] sm:$0xff] %vm4921_vm3, %v5550_v54  ;;  %v13045_v11 = vpop.f32.mrb[154].mxu1 }
 0x4f5   : > { %v5565_v4 = vadd.f32 %v13045_v11, %v11483_v51  ;;  %v5559_v38 = vpop.f32.mrb[155].mxu1 }
 0x4f6   : > { %v5560_v56 = vadd.f32 %v11480_v14, %v5559_v38  ;;  %v6229_v38 = vld [vmem:[%s20146_s4 + $0x60] sm:$0xff] }
 0x4f7   : > { %5631 = vst.msk [vmem:[#allocation6 + $0x18] sm:$0xff] %vm4921_vm3, %v5565_v4 }
 0x4f8   : > { %5630 = vst.msk [vmem:[#allocation6 + $0x10] sm:$0xff] %vm4921_vm3, %v5560_v56  ;;  %v13048_v30 = vpop.f32.mrb[156].mxu1  ;;  %v6230_v56 = vld [vmem:[%s20146_s4 + $0x68] sm:$0xff] }
 0x4f9   : > { %v5575_v16 = vadd.f32 %v13048_v30, %v11489_v37  ;;  %v5569_v52 = vpop.f32.mrb[157].mxu1  ;;  %v13942_v30 = vpack.c.bf16 %v6230_v56, %v6229_v38 }
 0x4fa   : > { %v5570_v31 = vadd.f32 %v11486_v62, %v5569_v52  ;;  %v13933_v62 = vpack.c.bf16 %v5661_v61, %v5660_v22  ;;  %v6231_v52 = vld [vmem:[%s20146_s4 + $0x70] sm:$0xff]  ;;  %v6829_v61 = vld [vmem:[%s20146_s4 + $0xd8] sm:$0xff] }
 0x4fb   : > { %5633 = vst.msk [vmem:[#allocation6 + $0x28] sm:$0xff] %vm4921_vm3, %v5575_v16  ;;  %v5662_v10 = vld [vmem:[#allocation6 + $0x1] sm:$0xff]  ;;  %v13960_v16 = vpack.c.bf16 %v6827_v60, %v6826_v19 }
 0x4fc   : > { %v6017_v14 = vld [vmem:[#allocation6 + $0x2] sm:$0xff]  ;;  %13073 = vmatmul.mubr.msk.f32.vlgmr.msra.gmra.mrb[168].mxu1 %vm4921_vm3, %v5662_v10  ;;  %5632 = vst.msk [vmem:[#allocation6 + $0x20] sm:$0xff] %vm4921_vm3, %v5570_v31  ;;  %v13051_v39 = vpop.f32.mrb[158].mxu1 }
 0x4fd   : > { %13167 = vmatmul.mubr.msk.f32.vlgmr.msra.gmra.mrb[106].mxu0 %vm4921_vm3, %v6017_v14  ;;  %13075 = vmatprep.mubr.msk.f32.mxu1 %vm14537_vm1, %v20221_v28  ;;  %v5585_v51 = vadd.f32 %v13051_v39, %v11495_v0  ;;  %v5579_v35 = vpop.f32.mrb[159].mxu1  ;;  %v6232_v31 = vld [vmem:[%s20146_s4 + $0x78] sm:$0xff]  ;;  %v5646_v14 = vld [vmem:[#allocation6 + $0x8] sm:$0xff] }
 0x4fe   : > { %13169 = vmatprep.mubr.msk.f32.mxu0 %vm14537_vm1, %v20221_v28  ;;  %v5580_v26 = vadd.f32 %v17624_v3, %v5579_v35  ;;  %13931 = vmatpush3.bf16.msra.mxu1 %v13930_v63  ;;  %v6828_v63 = vld [vmem:[%s20146_s4 + $0xd0] sm:$0xff]  ;;  %v13945_v8 = vpack.c.bf16 %v6232_v31, %v6231_v52  ;;  %v7025_v60 = vld [vmem:[%s20146_s4 + $0xe0] sm:$0xff] }
 0x4ff   : > { %13949 = vmatpush3.bf16.msra.mxu0 %v13948_v43  ;;  %v5663_v36 = vld [vmem:[#allocation6 + $0x9] sm:$0xff]  ;;  %5635 = vst.msk [vmem:[#allocation6 + $0x38] sm:$0xff] %vm4921_vm3, %v5585_v51  ;;  %13932 = vmatprep.subr.bf16.mxu1 %v14538_v17  ;;  %v5664_v42 = vld [vmem:[#allocation6 + $0x11] sm:$0xff]  ;;  %v5645_v43 = vld [vmem:[#allocation6] sm:$0xff]  ;;  %v13963_v10 = vpack.c.bf16 %v6829_v61, %v6828_v63 }
 0x500   : > { %v17679_v37 = vld [vmem:[#allocation6 + $0xa] sm:$0xff]  ;;  %13950 = vmatprep.subr.bf16.mxu0 %v14538_v17  ;;  %13076 = vmatmul.mubr.msk.f32.gmra.mrb[170].mxu1 %vm4921_vm3, %v5663_v36  ;;  %5634 = vst.msk [vmem:[#allocation6 + $0x30] sm:$0xff] %vm4921_vm3, %v5580_v26  ;;  %v13054_v6 = vpop.f32.mrb[160].mxu1  ;;  %v17694_v0 = vld [vmem:[#allocation6 + $0x12] sm:$0xff] }
 0x501   : > { %13170 = vmatmul.mubr.msk.f32.gmra.mrb[108].mxu0 %vm4921_vm3, %v17679_v37  ;;  %13078 = vmatprep.mubr.msk.f32.mxu1 %vm14537_vm1, %v20221_v28  ;;  %v5595_v23 = vadd.f32 %v13054_v6, %v17628_v57  ;;  %v5589_v3 = vpop.f32.mrb[161].mxu1  ;;  %v6415_v22 = vld [vmem:[#allocation6 + $0xb] sm:$0xff]  ;;  %v6416_v45 = vld [vmem:[#allocation6 + $0x13] sm:$0xff] }
 0x502   : > { %13172 = vmatprep.mubr.msk.f32.mxu0 %vm14537_vm1, %v20221_v28  ;;  %v5590_v5 = vadd.f32 %v17626_v40, %v5589_v3  ;;  %13934 = vmatpush3.bf16.msra.mxu1 %v13933_v62  ;;  %v5647_v39 = vld [vmem:[#allocation6 + $0x10] sm:$0xff]  ;;  %v5648_v35 = vld [vmem:[#allocation6 + $0x18] sm:$0xff]  ;;  %v5650_v36 = vld [vmem:[#allocation6 + $0x28] sm:$0xff] }
 0x503   : > { %13952 = vmatpush3.bf16.msra.mxu0 %v13951_v1  ;;  %5637 = vst.msk [vmem:[#allocation6 + $0x48] sm:$0xff] %vm4921_vm3, %v5595_v23  ;;  %13941 = vmatprep.subr.bf16.mxu1 %v14538_v17  ;;  %v5665_v12 = vld [vmem:[#allocation6 + $0x19] sm:$0xff]  ;;  %v5666_v55 = vld [vmem:[#allocation6 + $0x21] sm:$0xff] }
 0x504   : > { %13959 = vmatprep.subr.bf16.mxu0 %v14538_v17  ;;  %13079 = vmatmul.mubr.msk.f32.gmra.mrb[172].mxu1 %vm4921_vm3, %v5664_v42  ;;  %5636 = vst.msk [vmem:[#allocation6 + $0x40] sm:$0xff] %vm4921_vm3, %v5590_v5  ;;  %v13057_v2 = vpop.f32.mrb[162].mxu1  ;;  %v17709_v57 = vld [vmem:[#allocation6 + $0x1a] sm:$0xff]  ;;  %v6418_v26 = vld [vmem:[#allocation6 + $0x23] sm:$0xff] }
 0x505   : > { %13173 = vmatmul.mubr.msk.f32.gmra.mrb[110].mxu0 %vm4921_vm3, %v17694_v0  ;;  %13081 = vmatprep.mubr.msk.f32.mxu1 %vm14537_vm1, %v20221_v28  ;;  %v5605_v34 = vadd.f32 %v13057_v2, %v17632_v48  ;;  %v5599_v40 = vpop.f32.mrb[163].mxu1  ;;  %v17722_v48 = vld [vmem:[#allocation6 + $0x22] sm:$0xff]  ;;  %v7211_v31 = vld [vmem:[#allocation6 + $0x16] sm:$0xff] }
 0x506   : > { %13175 = vmatprep.mubr.msk.f32.mxu0 %vm14537_vm1, %v20221_v28  ;;  %v5600_v25 = vadd.f32 %v17630_v27, %v5599_v40  ;;  %v6417_v51 = vld [vmem:[#allocation6 + $0x1b] sm:$0xff] }
 0x507   : > { %5639 = vst.msk [vmem:[#allocation6 + $0x58] sm:$0xff] %vm4921_vm3, %v5605_v34  ;;  %v5667_v29 = vld [vmem:[#allocation6 + $0x29] sm:$0xff]  ;;  %v5668_v18 = vld [vmem:[#allocation6 + $0x31] sm:$0xff]  ;;  %v5649_v62 = vld [vmem:[#allocation6 + $0x20] sm:$0xff] }
 0x508   : > { %13082 = vmatmul.mubr.msk.f32.gmra.mrb[174].mxu1 %vm4921_vm3, %v5665_v12  ;;  %5638 = vst.msk [vmem:[#allocation6 + $0x50] sm:$0xff] %vm4921_vm3, %v5600_v25  ;;  %v13060_v32 = vpop.f32.mrb[164].mxu1  ;;  %v17745_v7 = vld [vmem:[#allocation6 + $0x32] sm:$0xff]  ;;  %v17945_v19 = vld [vmem:[#allocation6 + $0x1c] sm:$0xff] }
 0x509   : > { %13176 = vmatmul.mubr.msk.f32.gmra.mrb[112].mxu0 %vm4921_vm3, %v17709_v57  ;;  %13084 = vmatprep.mubr.msk.f32.mxu1 %vm14537_vm1, %v20221_v28  ;;  %v5615_v58 = vadd.f32 %v13060_v32, %v17636_v50  ;;  %v5609_v27 = vpop.f32.mrb[165].mxu1  ;;  %v17735_v50 = vld [vmem:[#allocation6 + $0x2a] sm:$0xff]  ;;  %v6420_v6 = vld [vmem:[#allocation6 + $0x33] sm:$0xff]  ;;  %v7212_v61 = vld [vmem:[#allocation6 + $0x1e] sm:$0xff] }
 0x50a   : > { %13178 = vmatprep.mubr.msk.f32.mxu0 %vm14537_vm1, %v20221_v28  ;;  %v5610_v9 = vadd.f32 %v17634_v53, %v5609_v27  ;;  %v6419_v1 = vld [vmem:[#allocation6 + $0x2b] sm:$0xff]  ;;  %v5652_v5 = vld [vmem:[#allocation6 + $0x38] sm:$0xff] }
 0x50b   : > { %5641 = vst.msk [vmem:[#allocation6 + $0x68] sm:$0xff] %vm4921_vm3, %v5615_v58  ;;  %v17754_v59 = vld [vmem:[#allocation6 + $0x3a] sm:$0xff]  ;;  %v5651_v23 = vld [vmem:[#allocation6 + $0x30] sm:$0xff]  ;;  %v6422_v42 = vld [vmem:[#allocation6 + $0x43] sm:$0xff] }
 0x50c   : > { %13085 = vmatmul.mubr.msk.f32.gmra.mrb[176].mxu1 %vm4921_vm3, %v5666_v55  ;;  %5640 = vst.msk [vmem:[#allocation6 + $0x60] sm:$0xff] %vm4921_vm3, %v5610_v9  ;;  %v13063_v33 = vpop.f32.mrb[166].mxu1  ;;  %v5670_v41 = vld [vmem:[#allocation6 + $0x41] sm:$0xff]  ;;  %v7027_v63 = vld [vmem:[%s20146_s4 + $0xf0] sm:$0xff] }
 0x50d   : > { %13179 = vmatmul.mubr.msk.f32.gmra.mrb[114].mxu0 %vm4921_vm3, %v17722_v48  ;;  %13087 = vmatprep.mubr.msk.f32.mxu1 %vm14537_vm1, %v20221_v28  ;;  %v5625_v46 = vadd.f32 %v13063_v33, %v17640_v13  ;;  %v5619_v53 = vpop.f32.mrb[167].mxu1  ;;  %v17763_v13 = vld [vmem:[#allocation6 + $0x42] sm:$0xff]  ;;  %v6628_v33 = vld [vmem:[%s20146_s4 + $0xa8] sm:$0xff] }
 0x50e   : > { %13181 = vmatprep.mubr.msk.f32.mxu0 %vm14537_vm1, %v20221_v28  ;;  %v5620_v20 = vadd.f32 %v17638_v15, %v5619_v53  ;;  %v5669_v15 = vld [vmem:[#allocation6 + $0x39] sm:$0xff]  ;;  %v5654_v40 = vld [vmem:[#allocation6 + $0x48] sm:$0xff] }
 0x50f   : > { %5644 = vst.msk [vmem:[#allocation6 + $0x78] sm:$0x3] %vm5643_vm7, %v5625_v46  ;;  %v5671_v24 = vld [vmem:[#allocation6 + $0x49] sm:$0xff]  ;;  %v5672_v21 = vld [vmem:[#allocation6 + $0x51] sm:$0xff]  ;;  %v6421_v3 = vld [vmem:[#allocation6 + $0x3b] sm:$0xff] }
 0x510   : > { %13088 = vmatmul.mubr.msk.f32.gmra.mrb[178].mxu1 %vm4921_vm3, %v5667_v29  ;;  %5642 = vst.msk [vmem:[#allocation6 + $0x70] sm:$0xff] %vm4921_vm3, %v5620_v20  ;;  %v17772_v44 = vld [vmem:[#allocation6 + $0x4a] sm:$0xff]  ;;  %v17781_v54 = vld [vmem:[#allocation6 + $0x52] sm:$0xff]  ;;  %v5653_v2 = vld [vmem:[#allocation6 + $0x40] sm:$0xff] }
 0x511   : > { %13182 = vmatmul.mubr.msk.f32.gmra.mrb[116].mxu0 %vm4921_vm3, %v17735_v50  ;;  %13090 = vmatprep.mubr.msk.f32.mxu1 %vm14537_vm1, %v20221_v28  ;;  %v6423_v34 = vld [vmem:[#allocation6 + $0x4b] sm:$0xff]  ;;  %v6424_v25 = vld [vmem:[#allocation6 + $0x53] sm:$0xff] }
 0x512   : > { %13184 = vmatprep.mubr.msk.f32.mxu0 %vm14537_vm1, %v20221_v28  ;;  %v5655_v12 = vld [vmem:[#allocation6 + $0x50] sm:$0xff]  ;;  %v5656_v58 = vld [vmem:[#allocation6 + $0x58] sm:$0xff]  ;;  %v6427_v9 = vld [vmem:[#allocation6 + $0x6b] sm:$0xf] }
 0x513   : > { %v5673_v11 = vld [vmem:[#allocation6 + $0x59] sm:$0xff]  ;;  %v5674_v49 = vld [vmem:[#allocation6 + $0x61] sm:$0xf]  ;;  %v6627_v55 = vld [vmem:[%s20146_s4 + $0xa0] sm:$0xff] }
 0x514   : > { %13091 = vmatmul.mubr.msk.f32.gmra.mrb[180].mxu1 %vm4921_vm3, %v5668_v18  ;;  %v17790_v4 = vld [vmem:[#allocation6 + $0x5a] sm:$0xff]  ;;  %v6029_v47 = vld [vmem:[#allocation6 + $0x62] sm:$0xf]  ;;  %v7224_v53 = vld [vmem:[%s20146_s4 + $0x100] sm:$0xff]  ;;  %v13954_v18 = vpack.c.bf16 %v6628_v33, %v6627_v55 }
 0x515   : > { %13185 = vmatmul.mubr.msk.f32.gmra.mrb[118].mxu0 %vm4921_vm3, %v17745_v7  ;;  %13093 = vmatprep.mubr.msk.f32.mxu1 %vm14537_vm1, %v20221_v28  ;;  %v6425_v32 = vld [vmem:[#allocation6 + $0x5b] sm:$0xff]  ;;  %v6426_v27 = vld [vmem:[#allocation6 + $0x63] sm:$0xff]  ;;  %v7225_v20 = vld [vmem:[%s20146_s4 + $0x108] sm:$0xff] }
 0x516   : > { %13187 = vmatprep.mubr.msk.f32.mxu0 %vm14537_vm1, %v20221_v28  ;;  %v5657_v46 = vld [vmem:[#allocation6 + $0x60] sm:$0xf]  ;;  %v17923_v29 = vld [vmem:[#allocation6 + $0x14] sm:$0xff] }
 0x518   : > { %13094 = vmatmul.mubr.msk.f32.gmra.mrb[182].mxu1 %vm4921_vm3, %v5669_v15  ;;  %v13972_v15 = vpack.c.bf16 %v7225_v20, %v7224_v53  ;;  %v7016_v53 = vld [vmem:[#allocation6 + $0x35] sm:$0xff] }
 0x519   : > { %13188 = vmatmul.mubr.msk.f32.gmra.mrb[120].mxu0 %vm4921_vm3, %v17754_v59  ;;  %13096 = vmatprep.mubr.msk.f32.mxu1 %vm14537_vm1, %v20221_v28 }
 0x51a   : > { %13190 = vmatprep.mubr.msk.f32.mxu0 %vm14537_vm1, %v20221_v28 }
 0x51c   : > { %13097 = vmatmul.mubr.msk.f32.gmra.mrb[184].mxu1 %vm4921_vm3, %v5670_v41  ;;  %v6629_v41 = vld [vmem:[%s20146_s4 + $0xb0] sm:$0xff] }
 0x51d   : > { %13191 = vmatmul.mubr.msk.f32.gmra.mrb[122].mxu0 %vm4921_vm3, %v17763_v13  ;;  %13099 = vmatprep.mubr.msk.f32.mxu1 %vm14537_vm1, %v20221_v28 }
 0x51e   : > { %13193 = vmatprep.mubr.msk.f32.mxu0 %vm14537_vm1, %v20221_v28 }
 0x520   : > { %13100 = vmatmul.mubr.msk.f32.gmra.mrb[186].mxu1 %vm4921_vm3, %v5671_v24  ;;  %v6630_v24 = vld [vmem:[%s20146_s4 + $0xb8] sm:$0xff] }
 0x521   : > { %13194 = vmatmul.mubr.msk.f32.gmra.mrb[124].mxu0 %vm4921_vm3, %v17772_v44  ;;  %13102 = vmatprep.mubr.msk.f32.mxu1 %vm14537_vm1, %v20221_v28  ;;  %v13957_v38 = vpack.c.bf16 %v6630_v24, %v6629_v41  ;;  %v7017_v41 = vld [vmem:[#allocation6 + $0x3d] sm:$0xff] }
 0x522   : > { %13196 = vmatprep.mubr.msk.f32.mxu0 %vm14537_vm1, %v20221_v28 }
 0x524   : > { %13103 = vmatmul.mubr.msk.f32.gmra.mrb[188].mxu1 %vm4921_vm3, %v5672_v21  ;;  %v7226_v21 = vld [vmem:[%s20146_s4 + $0x110] sm:$0xff] }
 0x525   : > { %13197 = vmatmul.mubr.msk.f32.gmra.mrb[126].mxu0 %vm4921_vm3, %v17781_v54  ;;  %13105 = vmatprep.mubr.msk.f32.mxu1 %vm14537_vm1, %v20221_v28 }
 0x526   : > { %13199 = vmatprep.mubr.msk.f32.mxu0 %vm14537_vm1, %v20221_v28 }
 0x528   : > { %13106 = vmatmul.mubr.msk.f32.gmra.mrb[190].mxu1 %vm4921_vm3, %v5673_v11  ;;  %v7227_v11 = vld [vmem:[%s20146_s4 + $0x118] sm:$0xff] }
 0x529   : > { %13200 = vmatmul.mubr.msk.f32.gmra.mrb[128].mxu0 %vm4921_vm3, %v17790_v4  ;;  %13108 = vmatprep.mubr.msk.f32.mxu1 %vm14537_vm1, %v20221_v28  ;;  %v13975_v56 = vpack.c.bf16 %v7227_v11, %v7226_v21 }
 0x52a   : > { %13202 = vmatprep.mubr.msk.f32.mxu0 %vm14537_vm1, %v20221_v28 }
 0x52c   : > { %13109 = vmatmul.mubr.msk.f32.gmra.mrb[192].mxu1 %vm4921_vm3, %v5674_v49  ;;  %v6824_v49 = vld [vmem:[#allocation6 + $0x6c] sm:$0xff] }
 0x52d   : > { %13203 = vmatmul.mubr.msk.f32.gmra.mrb[130].mxu0 %vm4921_vm3, %v6029_v47  ;;  %13119 = vmatprep.mubr.msk.f32.mxu1 %vm14537_vm1, %v20221_v28  ;;  %v6825_v47 = vld [vmem:[#allocation6 + $0x74] sm:$0xf] }
 0x52e   : > { %13260 = vmatprep.mubr.msk.f32.mxu0 %vm14537_vm1, %v20221_v28 }
 0x530   : > { %13120 = vmatmul.mubr.msk.f32.vlgmr.msra.gmra.mrb[194].mxu1 %vm4921_vm3, %v5645_v43  ;;  %v7028_v43 = vld [vmem:[%s20146_s4 + $0xf8] sm:$0xff] }
 0x531   : > { %13261 = vmatmul.mubr.msk.f32.vlgmr.msra.gmra.mrb[132].mxu0 %vm4921_vm3, %v6415_v22  ;;  %13122 = vmatprep.mubr.msk.f32.mxu1 %vm14537_vm1, %v20221_v28  ;;  %v13969_v22 = vpack.c.bf16 %v7028_v43, %v7027_v63  ;;  %v7022_v63 = vld [vmem:[#allocation6 + $0x65] sm:$0xff] }
 0x532   : > { %13263 = vmatprep.mubr.msk.f32.mxu0 %vm14537_vm1, %v20221_v28  ;;  %13943 = vmatpush3.bf16.msra.mxu1 %v13942_v30  ;;  %v7026_v30 = vld [vmem:[%s20146_s4 + $0xe8] sm:$0xff] }
 0x533   : > { %13961 = vmatpush3.bf16.msra.mxu0 %v13960_v16  ;;  %13944 = vmatprep.subr.bf16.mxu1 %v14538_v17  ;;  %v6614_v16 = vld [vmem:[#allocation6 + $0xc] sm:$0xff]  ;;  %v13966_v52 = vpack.c.bf16 %v7026_v30, %v7025_v60  ;;  %v7021_v60 = vld [vmem:[#allocation6 + $0x5d] sm:$0xff] }
 0x534   : > { %13962 = vmatprep.subr.bf16.mxu0 %v14538_v17  ;;  %13123 = vmatmul.mubr.msk.f32.gmra.mrb[196].mxu1 %vm4921_vm3, %v5646_v14  ;;  %v7215_v14 = vld [vmem:[#allocation6 + $0x36] sm:$0xff] }
 0x535   : > { %13264 = vmatmul.mubr.msk.f32.gmra.mrb[134].mxu0 %vm4921_vm3, %v6416_v45  ;;  %13125 = vmatprep.mubr.msk.f32.mxu1 %vm14537_vm1, %v20221_v28  ;;  %v7216_v45 = vld [vmem:[#allocation6 + $0x3e] sm:$0xff] }
 0x536   : > { %13266 = vmatprep.mubr.msk.f32.mxu0 %vm14537_vm1, %v20221_v28  ;;  %13946 = vmatpush3.bf16.msra.mxu1 %v13945_v8  ;;  %v7213_v8 = vld [vmem:[#allocation6 + $0x26] sm:$0xff] }
 0x537   : > { %13964 = vmatpush3.bf16.msra.mxu0 %v13963_v10  ;;  %13953 = vmatprep.subr.bf16.mxu1 %v14538_v17  ;;  %v7214_v10 = vld [vmem:[#allocation6 + $0x2e] sm:$0xff] }
 0x538   : > { %13971 = vmatprep.subr.bf16.mxu0 %v14538_v17  ;;  %13126 = vmatmul.mubr.msk.f32.gmra.mrb[198].mxu1 %vm4921_vm3, %v5647_v39  ;;  %v7217_v39 = vld [vmem:[#allocation6 + $0x46] sm:$0xff] }
 0x539   : > { %13267 = vmatmul.mubr.msk.f32.gmra.mrb[136].mxu0 %vm4921_vm3, %v6417_v51  ;;  %13128 = vmatprep.mubr.msk.f32.mxu1 %vm14537_vm1, %v20221_v28  ;;  %v7218_v51 = vld [vmem:[#allocation6 + $0x4e] sm:$0xff] }
 0x53a   : > { %13269 = vmatprep.mubr.msk.f32.mxu0 %vm14537_vm1, %v20221_v28 }
 0x53c   : > { %13129 = vmatmul.mubr.msk.f32.gmra.mrb[200].mxu1 %vm4921_vm3, %v5648_v35  ;;  %v7219_v35 = vld [vmem:[#allocation6 + $0x56] sm:$0xff] }
 0x53d   : > { %13270 = vmatmul.mubr.msk.f32.gmra.mrb[138].mxu0 %vm4921_vm3, %v6418_v26  ;;  %13131 = vmatprep.mubr.msk.f32.mxu1 %vm14537_vm1, %v20221_v28  ;;  %v7220_v26 = vld [vmem:[#allocation6 + $0x5e] sm:$0xff] }
 0x53e   : > { %13272 = vmatprep.mubr.msk.f32.mxu0 %vm14537_vm1, %v20221_v28 }
 0x540   : > { %13132 = vmatmul.mubr.msk.f32.gmra.mrb[202].mxu1 %vm4921_vm3, %v5649_v62  ;;  %v7221_v62 = vld [vmem:[#allocation6 + $0x66] sm:$0xff] }
 0x541   : > { %13273 = vmatmul.mubr.msk.f32.gmra.mrb[140].mxu0 %vm4921_vm3, %v6419_v1  ;;  %13134 = vmatprep.mubr.msk.f32.mxu1 %vm14537_vm1, %v20221_v28  ;;  %v7222_v1 = vld [vmem:[#allocation6 + $0x6e] sm:$0xff] }
 0x542   : > { %13275 = vmatprep.mubr.msk.f32.mxu0 %vm14537_vm1, %v20221_v28 }
 0x544   : > { %13135 = vmatmul.mubr.msk.f32.gmra.mrb[204].mxu1 %vm4921_vm3, %v5650_v36  ;;  %v6626_v36 = vld [vmem:[#allocation6 + $0x6c] sm:$0xf] }
 0x545   : > { %13276 = vmatmul.mubr.msk.f32.gmra.mrb[142].mxu0 %vm4921_vm3, %v6420_v6  ;;  %13137 = vmatprep.mubr.msk.f32.mxu1 %vm14537_vm1, %v20221_v28  ;;  %v7223_v6 = vld [vmem:[#allocation6 + $0x76] sm:$0xf] }
 0x546   : > { %13278 = vmatprep.mubr.msk.f32.mxu0 %vm14537_vm1, %v20221_v28 }
 0x548   : > { %13138 = vmatmul.mubr.msk.f32.gmra.mrb[206].mxu1 %vm4921_vm3, %v5651_v23  ;;  %v7012_v23 = vld [vmem:[#allocation6 + $0x15] sm:$0xff] }
 0x549   : > { %13279 = vmatmul.mubr.msk.f32.gmra.mrb[144].mxu0 %vm4921_vm3, %v6421_v3  ;;  %13140 = vmatprep.mubr.msk.f32.mxu1 %vm14537_vm1, %v20221_v28  ;;  %v7013_v3 = vld [vmem:[#allocation6 + $0x1d] sm:$0xff] }
 0x54a   : > { %13281 = vmatprep.mubr.msk.f32.mxu0 %vm14537_vm1, %v20221_v28 }
 0x54c   : > { %13141 = vmatmul.mubr.msk.f32.gmra.mrb[208].mxu1 %vm4921_vm3, %v5652_v5 }
 0x54d   : > { %13282 = vmatmul.mubr.msk.f32.gmra.mrb[146].mxu0 %vm4921_vm3, %v6422_v42  ;;  %13143 = vmatprep.mubr.msk.f32.mxu1 %vm14537_vm1, %v20221_v28 }
 0x54e   : > { %13284 = vmatprep.mubr.msk.f32.mxu0 %vm14537_vm1, %v20221_v28 }
 0x550   : > { %13144 = vmatmul.mubr.msk.f32.gmra.mrb[210].mxu1 %vm4921_vm3, %v5653_v2 }
 0x551   : > { %13285 = vmatmul.mubr.msk.f32.gmra.mrb[148].mxu0 %vm4921_vm3, %v6423_v34  ;;  %13146 = vmatprep.mubr.msk.f32.mxu1 %vm14537_vm1, %v20221_v28 }
 0x552   : > { %13287 = vmatprep.mubr.msk.f32.mxu0 %vm14537_vm1, %v20221_v28 }
 0x554   : > { %13147 = vmatmul.mubr.msk.f32.gmra.mrb[212].mxu1 %vm4921_vm3, %v5654_v40  ;;  %v7014_v40 = vld [vmem:[#allocation6 + $0x25] sm:$0xff] }
 0x555   : > { %13288 = vmatmul.mubr.msk.f32.gmra.mrb[150].mxu0 %vm4921_vm3, %v6424_v25  ;;  %13149 = vmatprep.mubr.msk.f32.mxu1 %vm14537_vm1, %v20221_v28 }
 0x556   : > { %13290 = vmatprep.mubr.msk.f32.mxu0 %vm14537_vm1, %v20221_v28 }
 0x558   : > { %13150 = vmatmul.mubr.msk.f32.gmra.mrb[214].mxu1 %vm4921_vm3, %v5655_v12 }
 0x559   : > { %13291 = vmatmul.mubr.msk.f32.gmra.mrb[152].mxu0 %vm4921_vm3, %v6425_v32  ;;  %13152 = vmatprep.mubr.msk.f32.mxu1 %vm14537_vm1, %v20221_v28 }
 0x55a   : > { %13293 = vmatprep.mubr.msk.f32.mxu0 %vm14537_vm1, %v20221_v28 }
 0x55c   : > { %13153 = vmatmul.mubr.msk.f32.gmra.mrb[216].mxu1 %vm4921_vm3, %v5656_v58 }
 0x55d   : > { %13294 = vmatmul.mubr.msk.f32.gmra.mrb[154].mxu0 %vm4921_vm3, %v6426_v27  ;;  %13155 = vmatprep.mubr.msk.f32.mxu1 %vm14537_vm1, %v20221_v28  ;;  %v7015_v27 = vld [vmem:[#allocation6 + $0x2d] sm:$0xff] }
 0x55e   : > { %13296 = vmatprep.mubr.msk.f32.mxu0 %vm14537_vm1, %v20221_v28 }
 0x560   : > { %13156 = vmatmul.mubr.msk.f32.gmra.mrb[218].mxu1 %vm4921_vm3, %v5657_v46 }
 0x561   : > { %13297 = vmatmul.mubr.msk.f32.gmra.mrb[156].mxu0 %vm4921_vm3, %v6427_v9  ;;  %13213 = vmatprep.mubr.msk.f32.mxu1 %vm14537_vm1, %v20221_v28 }
 0x562   : > { %13354 = vmatprep.mubr.msk.f32.mxu0 %vm14537_vm1, %v20221_v28 }
 0x564   : > { %13214 = vmatmul.mubr.msk.f32.vlgmr.msra.gmra.mrb[220].mxu1 %vm4921_vm3, %v17679_v37  ;;  %v17957_v37 = vld [vmem:[#allocation6 + $0x24] sm:$0xff] }
 0x565   : > { %13355 = vmatmul.mubr.msk.f32.vlgmr.msra.gmra.mrb[158].mxu0 %vm4921_vm3, %v17923_v29  ;;  %13216 = vmatprep.mubr.msk.f32.mxu1 %vm14537_vm1, %v20221_v28 }
 0x566   : > { %13357 = vmatprep.mubr.msk.f32.mxu0 %vm14537_vm1, %v20221_v28  ;;  %13955 = vmatpush3.bf16.msra.mxu1 %v13954_v18 }
 0x567   : > { %13973 = vmatpush3.bf16.msra.mxu0 %v13972_v15  ;;  %13956 = vmatprep.subr.bf16.mxu1 %v14538_v17 }
 0x568   : > { %13974 = vmatprep.subr.bf16.mxu0 %v14538_v17  ;;  %13217 = vmatmul.mubr.msk.f32.gmra.mrb[222].mxu1 %vm4921_vm3, %v17694_v0  ;;  %v17969_v0 = vld [vmem:[#allocation6 + $0x2c] sm:$0xff] }
 0x569   : > { %13358 = vmatmul.mubr.msk.f32.gmra.mrb[160].mxu0 %vm4921_vm3, %v17945_v19  ;;  %13219 = vmatprep.mubr.msk.f32.mxu1 %vm14537_vm1, %v20221_v28 }
 0x56a   : > { %13360 = vmatprep.mubr.msk.f32.mxu0 %vm14537_vm1, %v20221_v28  ;;  %13958 = vmatpush3.bf16.msra.mxu1 %v13957_v38 }
 0x56b   : > { %13976 = vmatpush3.bf16.msra.mxu0 %v13975_v56  ;;  %13965 = vmatprep.subr.bf16.mxu1 %v14538_v17  ;;  %v7018_v56 = vld [vmem:[#allocation6 + $0x45] sm:$0xff] }
 0x56c   : > { %13996 = vmatprep.subr.bf16.mxu0 %v14538_v17  ;;  %13220 = vmatmul.mubr.msk.f32.gmra.mrb[224].mxu1 %vm4921_vm3, %v17709_v57  ;;  %v17979_v57 = vld [vmem:[#allocation6 + $0x34] sm:$0xff] }
 0x56d   : > { %13361 = vmatmul.mubr.msk.f32.gmra.mrb[162].mxu0 %vm4921_vm3, %v17957_v37  ;;  %13222 = vmatprep.mubr.msk.f32.mxu1 %vm14537_vm1, %v20221_v28 }
 0x56e   : > { %13363 = vmatprep.mubr.msk.f32.mxu0 %vm14537_vm1, %v20221_v28 }
 0x570   : > { %13223 = vmatmul.mubr.msk.f32.gmra.mrb[226].mxu1 %vm4921_vm3, %v17722_v48  ;;  %v17989_v48 = vld [vmem:[#allocation6 + $0x3c] sm:$0xff] }
 0x571   : > { %13364 = vmatmul.mubr.msk.f32.gmra.mrb[164].mxu0 %vm4921_vm3, %v17969_v0  ;;  %13225 = vmatprep.mubr.msk.f32.mxu1 %vm14537_vm1, %v20221_v28 }
 0x572   : > { %13366 = vmatprep.mubr.msk.f32.mxu0 %vm14537_vm1, %v20221_v28 }
 0x574   : > { %13226 = vmatmul.mubr.msk.f32.gmra.mrb[228].mxu1 %vm4921_vm3, %v17735_v50  ;;  %v17999_v50 = vld [vmem:[#allocation6 + $0x44] sm:$0xff] }
 0x575   : > { %13367 = vmatmul.mubr.msk.f32.gmra.mrb[166].mxu0 %vm4921_vm3, %v17979_v57  ;;  %13228 = vmatprep.mubr.msk.f32.mxu1 %vm14537_vm1, %v20221_v28 }
 0x576   : > { %13369 = vmatprep.mubr.msk.f32.mxu0 %vm14537_vm1, %v20221_v28 }
 0x578   : > { %13229 = vmatmul.mubr.msk.f32.gmra.mrb[230].mxu1 %vm4921_vm3, %v17745_v7  ;;  %v18009_v7 = vld [vmem:[#allocation6 + $0x4c] sm:$0xff] }
 0x579   : > { %13370 = vmatmul.mubr.msk.f32.gmra.mrb[168].mxu0 %vm4921_vm3, %v17989_v48  ;;  %13231 = vmatprep.mubr.msk.f32.mxu1 %vm14537_vm1, %v20221_v28 }
 0x57a   : > { %13372 = vmatprep.mubr.msk.f32.mxu0 %vm14537_vm1, %v20221_v28 }
 0x57c   : > { %13232 = vmatmul.mubr.msk.f32.gmra.mrb[232].mxu1 %vm4921_vm3, %v17754_v59  ;;  %v18019_v59 = vld [vmem:[#allocation6 + $0x54] sm:$0xff] }
 0x57d   : > { %13373 = vmatmul.mubr.msk.f32.gmra.mrb[170].mxu0 %vm4921_vm3, %v17999_v50  ;;  %13234 = vmatprep.mubr.msk.f32.mxu1 %vm14537_vm1, %v20221_v28 }
 0x57e   : > { %13375 = vmatprep.mubr.msk.f32.mxu0 %vm14537_vm1, %v20221_v28 }
 0x580   : > { %13235 = vmatmul.mubr.msk.f32.gmra.mrb[234].mxu1 %vm4921_vm3, %v17763_v13  ;;  %v18029_v13 = vld [vmem:[#allocation6 + $0x5c] sm:$0xff] }
 0x581   : > { %13376 = vmatmul.mubr.msk.f32.gmra.mrb[172].mxu0 %vm4921_vm3, %v18009_v7  ;;  %13237 = vmatprep.mubr.msk.f32.mxu1 %vm14537_vm1, %v20221_v28 }
 0x582   : > { %13378 = vmatprep.mubr.msk.f32.mxu0 %vm14537_vm1, %v20221_v28 }
 0x584   : > { %13238 = vmatmul.mubr.msk.f32.gmra.mrb[236].mxu1 %vm4921_vm3, %v17772_v44  ;;  %v18039_v44 = vld [vmem:[#allocation6 + $0x64] sm:$0xff] }
 0x585   : > { %13379 = vmatmul.mubr.msk.f32.gmra.mrb[174].mxu0 %vm4921_vm3, %v18019_v59  ;;  %13240 = vmatprep.mubr.msk.f32.mxu1 %vm14537_vm1, %v20221_v28 }
 0x586   : > { %13381 = vmatprep.mubr.msk.f32.mxu0 %vm14537_vm1, %v20221_v28 }
 0x588   : > { %13241 = vmatmul.mubr.msk.f32.gmra.mrb[238].mxu1 %vm4921_vm3, %v17781_v54  ;;  %v6227_v54 = vld [vmem:[#allocation6 + $0x62] sm:$0xff] }
 0x589   : > { %13382 = vmatmul.mubr.msk.f32.gmra.mrb[176].mxu0 %vm4921_vm3, %v18029_v13  ;;  %13243 = vmatprep.mubr.msk.f32.mxu1 %vm14537_vm1, %v20221_v28 }
 0x58a   : > { %13384 = vmatprep.mubr.msk.f32.mxu0 %vm14537_vm1, %v20221_v28 }
 0x58c   : > { %13244 = vmatmul.mubr.msk.f32.gmra.mrb[240].mxu1 %vm4921_vm3, %v17790_v4  ;;  %v6228_v4 = vld [vmem:[#allocation6 + $0x6a] sm:$0xf] }
 0x58d   : > { %13385 = vmatmul.mubr.msk.f32.gmra.mrb[178].mxu0 %vm4921_vm3, %v18039_v44  ;;  %13246 = vmatprep.mubr.msk.f32.mxu1 %vm14537_vm1, %v20221_v28 }
 0x58e   : > { %13387 = vmatprep.mubr.msk.f32.mxu0 %vm14537_vm1, %v20221_v28 }
 0x590   : > { %13247 = vmatmul.mubr.msk.f32.gmra.mrb[242].mxu1 %vm4921_vm3, %v6227_v54 }
 0x591   : > { %13388 = vmatmul.mubr.msk.f32.gmra.mrb[180].mxu0 %vm4921_vm3, %v6824_v49  ;;  %13249 = vmatprep.mubr.msk.f32.mxu1 %vm14537_vm1, %v20221_v28 }
 0x592   : > { %13390 = vmatprep.mubr.msk.f32.mxu0 %vm14537_vm1, %v20221_v28 }
 0x594   : > { %13250 = vmatmul.mubr.msk.f32.gmra.mrb[244].mxu1 %vm4921_vm3, %v6228_v4 }
 0x595   : > { %13391 = vmatmul.mubr.msk.f32.gmra.mrb[182].mxu0 %vm4921_vm3, %v6825_v47  ;;  %13307 = vmatprep.mubr.msk.f32.mxu1 %vm14537_vm1, %v20221_v28 }
 0x596   : > { %13448 = vmatprep.mubr.msk.f32.mxu0 %vm14537_vm1, %v20221_v28 }
 0x598   : > { %13308 = vmatmul.mubr.msk.f32.vlgmr.msra.gmra.mrb[246].mxu1 %vm4921_vm3, %v6614_v16 }
 0x599   : > { %13449 = vmatmul.mubr.msk.f32.vlgmr.msra.gmra.mrb[184].mxu0 %vm4921_vm3, %v7211_v31  ;;  %13310 = vmatprep.mubr.msk.f32.mxu1 %vm14537_vm1, %v20221_v28 }
 0x59a   : > { %13451 = vmatprep.mubr.msk.f32.mxu0 %vm14537_vm1, %v20221_v28  ;;  %13967 = vmatpush3.bf16.msra.mxu1 %v13966_v52 }
 0x59b   : > { %13968 = vmatprep.subr.bf16.mxu1 %v14538_v17 }
 0x59c   : > { %13311 = vmatmul.mubr.msk.f32.gmra.mrb[248].mxu1 %vm4921_vm3, %v17923_v29 }
 0x59d   : > { %13452 = vmatmul.mubr.msk.f32.gmra.mrb[186].mxu0 %vm4921_vm3, %v7212_v61  ;;  %13313 = vmatprep.mubr.msk.f32.mxu1 %vm14537_vm1, %v20221_v28 }
 0x59e   : > { %13454 = vmatprep.mubr.msk.f32.mxu0 %vm14537_vm1, %v20221_v28  ;;  %13970 = vmatpush3.bf16.msra.mxu1 %v13969_v22 }
 0x59f   : > { %13977 = vmatprep.subr.bf16.mxu1 %v14538_v17 }
 0x5a0   : > { %13314 = vmatmul.mubr.msk.f32.gmra.mrb[250].mxu1 %vm4921_vm3, %v17945_v19 }
 0x5a1   : > { %13455 = vmatmul.mubr.msk.f32.gmra.mrb[188].mxu0 %vm4921_vm3, %v7213_v8  ;;  %13316 = vmatprep.mubr.msk.f32.mxu1 %vm14537_vm1, %v20221_v28 }
 0x5a2   : > { %13457 = vmatprep.mubr.msk.f32.mxu0 %vm14537_vm1, %v20221_v28 }
 0x5a4   : > { %13317 = vmatmul.mubr.msk.f32.gmra.mrb[252].mxu1 %vm4921_vm3, %v17957_v37 }
 0x5a5   : > { %13458 = vmatmul.mubr.msk.f32.gmra.mrb[190].mxu0 %vm4921_vm3, %v7214_v10  ;;  %13319 = vmatprep.mubr.msk.f32.mxu1 %vm14537_vm1, %v20221_v28  ;;  %v7023_v10 = vld [vmem:[#allocation6 + $0x6d] sm:$0xff] }
 0x5a6   : > { %13460 = vmatprep.mubr.msk.f32.mxu0 %vm14537_vm1, %v20221_v28 }
 0x5a8   : > { %13320 = vmatmul.mubr.msk.f32.gmra.mrb[254].mxu1 %vm4921_vm3, %v17969_v0 }
 0x5a9   : > { %13461 = vmatmul.mubr.msk.f32.gmra.mrb[192].mxu0 %vm4921_vm3, %v7215_v14  ;;  %13322 = vmatprep.mubr.msk.f32.mxu1 %vm14537_vm1, %v20221_v28 }
 0x5aa   : > { %13463 = vmatprep.mubr.msk.f32.mxu0 %vm14537_vm1, %v20221_v28 }
 0x5ac   : > { %13323 = vmatmul.mubr.msk.f32.gmra.mrb[0].mxu1 %vm4921_vm3, %v17979_v57 }
 0x5ad   : > { %13464 = vmatmul.mubr.msk.f32.gmra.mrb[194].mxu0 %vm4921_vm3, %v7216_v45  ;;  %13325 = vmatprep.mubr.msk.f32.mxu1 %vm14537_vm1, %v20221_v28 }
 0x5ae   : > { %13466 = vmatprep.mubr.msk.f32.mxu0 %vm14537_vm1, %v20221_v28 }
 0x5b0   : > { %13326 = vmatmul.mubr.msk.f32.gmra.mrb[2].mxu1 %vm4921_vm3, %v17989_v48  ;;  %v7019_v48 = vld [vmem:[#allocation6 + $0x4d] sm:$0xff] }
 0x5b1   : > { %13467 = vmatmul.mubr.msk.f32.gmra.mrb[196].mxu0 %vm4921_vm3, %v7217_v39  ;;  %13328 = vmatprep.mubr.msk.f32.mxu1 %vm14537_vm1, %v20221_v28 }
 0x5b2   : > { %13469 = vmatprep.mubr.msk.f32.mxu0 %vm14537_vm1, %v20221_v28 }
 0x5b4   : > { %13329 = vmatmul.mubr.msk.f32.gmra.mrb[4].mxu1 %vm4921_vm3, %v17999_v50 }
 0x5b5   : > { %13470 = vmatmul.mubr.msk.f32.gmra.mrb[198].mxu0 %vm4921_vm3, %v7218_v51  ;;  %13331 = vmatprep.mubr.msk.f32.mxu1 %vm14537_vm1, %v20221_v28 }
 0x5b6   : > { %13472 = vmatprep.mubr.msk.f32.mxu0 %vm14537_vm1, %v20221_v28 }
 0x5b8   : > { %13332 = vmatmul.mubr.msk.f32.gmra.mrb[6].mxu1 %vm4921_vm3, %v18009_v7 }
 0x5b9   : > { %13473 = vmatmul.mubr.msk.f32.gmra.mrb[200].mxu0 %vm4921_vm3, %v7219_v35  ;;  %13334 = vmatprep.mubr.msk.f32.mxu1 %vm14537_vm1, %v20221_v28  ;;  %v7024_v35 = vld [vmem:[#allocation6 + $0x75] sm:$0xf] }
 0x5ba   : > { %13475 = vmatprep.mubr.msk.f32.mxu0 %vm14537_vm1, %v20221_v28 }
 0x5bc   : > { %13335 = vmatmul.mubr.msk.f32.gmra.mrb[8].mxu1 %vm4921_vm3, %v18019_v59 }
 0x5bd   : > { %13476 = vmatmul.mubr.msk.f32.gmra.mrb[202].mxu0 %vm4921_vm3, %v7220_v26  ;;  %13337 = vmatprep.mubr.msk.f32.mxu1 %vm14537_vm1, %v20221_v28 }
 0x5be   : > { %13478 = vmatprep.mubr.msk.f32.mxu0 %vm14537_vm1, %v20221_v28 }
 0x5c0   : > { %13338 = vmatmul.mubr.msk.f32.gmra.mrb[10].mxu1 %vm4921_vm3, %v18029_v13 }
 0x5c1   : > { %13479 = vmatmul.mubr.msk.f32.gmra.mrb[204].mxu0 %vm4921_vm3, %v7221_v62  ;;  %13340 = vmatprep.mubr.msk.f32.mxu1 %vm14537_vm1, %v20221_v28 }
 0x5c2   : > { %13481 = vmatprep.mubr.msk.f32.mxu0 %vm14537_vm1, %v20221_v28 }
 0x5c4   : > { %13341 = vmatmul.mubr.msk.f32.gmra.mrb[12].mxu1 %vm4921_vm3, %v18039_v44  ;;  %v7020_v44 = vld [vmem:[#allocation6 + $0x55] sm:$0xff] }
 0x5c5   : > { %13482 = vmatmul.mubr.msk.f32.gmra.mrb[206].mxu0 %vm4921_vm3, %v7222_v1  ;;  %13343 = vmatprep.mubr.msk.f32.mxu1 %vm14537_vm1, %v20221_v28 }
 0x5c6   : > { %13484 = vmatprep.mubr.msk.f32.mxu0 %vm14537_vm1, %v20221_v28 }
 0x5c8   : > { %13344 = vmatmul.mubr.msk.f32.gmra.mrb[14].mxu1 %vm4921_vm3, %v6626_v36 }
 0x5c9   : > { %13485 = vmatmul.mubr.msk.f32.gmra.mrb[208].mxu0 %vm4921_vm3, %v7223_v6  ;;  %13401 = vmatprep.mubr.msk.f32.mxu1 %vm14537_vm1, %v20221_v28 }
 0x5ca   : > { %13548 = vmatprep.mubr.msk.f32.mxu0 %vm14537_vm1, %v20221_v28 }
 0x5cc   : > { %13402 = vmatmul.mubr.msk.f32.vlgmr.msra.gmra.mrb[16].mxu1 %vm4921_vm3, %v7012_v23 }
 0x5cd   : > { %13404 = vmatprep.mubr.msk.f32.mxu1 %vm14537_vm1, %v20221_v28 }
 0x5cf   : > { %v18167_v5 = vpop.f32.mrb[168].mxu1 }
 0x5d0   : > { %v18169_v42 = vpop.f32.mrb[106].mxu0  ;;  %13405 = vmatmul.mubr.msk.f32.gmra.mrb[18].mxu1 %vm4921_vm3, %v7013_v3  ;;  %v13074_v2 = vpop.f32.mrb[169].mxu1 }
 0x5d1   : > { %v13168_v34 = vpop.f32.mrb[107].mxu0  ;;  %13407 = vmatprep.mubr.msk.f32.mxu1 %vm14537_vm1, %v20221_v28 }
 0x5d3   : > { %v18174_v25 = vpop.f32.mrb[170].mxu1 }
 0x5d4   : > { %v18176_v12 = vpop.f32.mrb[108].mxu0  ;;  %13408 = vmatmul.mubr.msk.f32.gmra.mrb[20].mxu1 %vm4921_vm3, %v7014_v40  ;;  %v13077_v32 = vpop.f32.mrb[171].mxu1 }
 0x5d5   : > { %v13171_v58 = vpop.f32.mrb[109].mxu0  ;;  %13410 = vmatprep.mubr.msk.f32.mxu1 %vm14537_vm1, %v20221_v28 }
 0x5d7   : > { %v18181_v9 = vpop.f32.mrb[172].mxu1 }
 0x5d8   : > { %v18183_v55 = vpop.f32.mrb[110].mxu0  ;;  %13411 = vmatmul.mubr.msk.f32.gmra.mrb[22].mxu1 %vm4921_vm3, %v7015_v27  ;;  %v13080_v33 = vpop.f32.mrb[173].mxu1 }
 0x5d9   : > { %v13174_v46 = vpop.f32.mrb[111].mxu0  ;;  %13413 = vmatprep.mubr.msk.f32.mxu1 %vm14537_vm1, %v20221_v28 }
 0x5db   : > { %v18188_v20 = vpop.f32.mrb[174].mxu1 }
 0x5dc   : > { %v18190_v29 = vpop.f32.mrb[112].mxu0  ;;  %13414 = vmatmul.mubr.msk.f32.gmra.mrb[24].mxu1 %vm4921_vm3, %v7016_v53  ;;  %v13083_v18 = vpop.f32.mrb[175].mxu1 }
 0x5dd   : > { %v13177_v15 = vpop.f32.mrb[113].mxu0  ;;  %13416 = vmatprep.mubr.msk.f32.mxu1 %vm14537_vm1, %v20221_v28 }
 0x5df   : > { %v18195_v24 = vpop.f32.mrb[176].mxu1 }
 0x5e0   : > { %v18197_v21 = vpop.f32.mrb[114].mxu0  ;;  %13417 = vmatmul.mubr.msk.f32.gmra.mrb[26].mxu1 %vm4921_vm3, %v7017_v41  ;;  %v13086_v11 = vpop.f32.mrb[177].mxu1 }
 0x5e1   : > { %v13180_v38 = vpop.f32.mrb[115].mxu0  ;;  %13419 = vmatprep.mubr.msk.f32.mxu1 %vm14537_vm1, %v20221_v28 }
 0x5e3   : > { %v18202_v19 = vpop.f32.mrb[178].mxu1 }
 0x5e4   : > { %v18204_v37 = vpop.f32.mrb[116].mxu0  ;;  %13420 = vmatmul.mubr.msk.f32.gmra.mrb[28].mxu1 %vm4921_vm3, %v7018_v56  ;;  %v13089_v0 = vpop.f32.mrb[179].mxu1 }
 0x5e5   : > { %v13183_v57 = vpop.f32.mrb[117].mxu0  ;;  %13422 = vmatprep.mubr.msk.f32.mxu1 %vm14537_vm1, %v20221_v28 }
 0x5e7   : > { %v18209_v50 = vpop.f32.mrb[180].mxu1 }
 0x5e8   : > { %v18211_v7 = vpop.f32.mrb[118].mxu0  ;;  %13423 = vmatmul.mubr.msk.f32.gmra.mrb[30].mxu1 %vm4921_vm3, %v7019_v48  ;;  %v13092_v59 = vpop.f32.mrb[181].mxu1 }
 0x5e9   : > { %v13186_v13 = vpop.f32.mrb[119].mxu0  ;;  %13425 = vmatprep.mubr.msk.f32.mxu1 %vm14537_vm1, %v20221_v28 }
 0x5eb   : > { %v18216_v54 = vpop.f32.mrb[182].mxu1 }
 0x5ec   : > { %v18218_v49 = vpop.f32.mrb[120].mxu0  ;;  %13426 = vmatmul.mubr.msk.f32.gmra.mrb[32].mxu1 %vm4921_vm3, %v7020_v44  ;;  %v13095_v4 = vpop.f32.mrb[183].mxu1 }
 0x5ed   : > { %v13189_v47 = vpop.f32.mrb[121].mxu0  ;;  %13428 = vmatprep.mubr.msk.f32.mxu1 %vm14537_vm1, %v20221_v28 }
 0x5ef   : > { %v18223_v30 = vpop.f32.mrb[184].mxu1 }
 0x5f0   : > { %v18225_v16 = vpop.f32.mrb[122].mxu0  ;;  %13429 = vmatmul.mubr.msk.f32.gmra.mrb[34].mxu1 %vm4921_vm3, %v7021_v60  ;;  %v13098_v52 = vpop.f32.mrb[185].mxu1 }
 0x5f1   : > { %v13192_v31 = vpop.f32.mrb[123].mxu0  ;;  %13431 = vmatprep.mubr.msk.f32.mxu1 %vm14537_vm1, %v20221_v28 }
 0x5f3   : > { %v18230_v43 = vpop.f32.mrb[186].mxu1 }
 0x5f4   : > { %v18232_v22 = vpop.f32.mrb[124].mxu0  ;;  %13432 = vmatmul.mubr.msk.f32.gmra.mrb[36].mxu1 %vm4921_vm3, %v7022_v63  ;;  %v13101_v61 = vpop.f32.mrb[187].mxu1 }
 0x5f5   : > { %v13195_v8 = vpop.f32.mrb[125].mxu0  ;;  %13434 = vmatprep.mubr.msk.f32.mxu1 %vm14537_vm1, %v20221_v28 }
 0x5f7   : > { %v18237_v14 = vpop.f32.mrb[188].mxu1 }
 0x5f8   : > { %v18239_v45 = vpop.f32.mrb[126].mxu0  ;;  %13435 = vmatmul.mubr.msk.f32.gmra.mrb[38].mxu1 %vm4921_vm3, %v7023_v10  ;;  %v13104_v39 = vpop.f32.mrb[189].mxu1 }
 0x5f9   : > { %v13198_v51 = vpop.f32.mrb[127].mxu0  ;;  %13437 = vmatprep.mubr.msk.f32.mxu1 %vm14537_vm1, %v20221_v28 }
 0x5fb   : > { %v18244_v26 = vpop.f32.mrb[190].mxu1 }
 0x5fc   : > { %v18246_v62 = vpop.f32.mrb[128].mxu0  ;;  %13438 = vmatmul.mubr.msk.f32.gmra.mrb[40].mxu1 %vm4921_vm3, %v7024_v35  ;;  %v13107_v1 = vpop.f32.mrb[191].mxu1  ;;  %vm10002_vm3 = vcmask 1046528  }
 0x5fd   : > { %v13201_v36 = vpop.f32.mrb[129].mxu0  ;;  %13511 = vmatprep.mubr.msk.f32.mxu1 %vm14537_vm1, %v20221_v28 }
 0x5ff   : > { %v18251_v6 = vpop.f32.mrb[192].mxu1 }
 0x600   : > { %v18253_v23 = vpop.f32.mrb[130].mxu0  ;;  %v13110_v3 = vpop.f32.mrb[193].mxu1 }
 0x601   : > { %v13204_v2 = vpop.f32.mrb[131].mxu0 }
 0x603   : > { %v5953_v34 = vpop.f32.mrb[194].mxu1 }
 0x604   : > { %v18255_v40 = vpop.f32.mrb[132].mxu0  ;;  %v5954_v32 = vadd.f32 %v5953_v34, %v18167_v5  ;;  %v13121_v58 = vpop.f32.mrb[195].mxu1 }
 0x605   : > { %v13262_v27 = vpop.f32.mrb[133].mxu0 }
 0x606   : > { %v18259_v33 = vadd.f32 %v18169_v42, %v5954_v32 }
 0x607   : > { %v5958_v46 = vpop.f32.mrb[196].mxu1 }
 0x608   : > { %v18261_v53 = vpop.f32.mrb[134].mxu0  ;;  %v5959_v18 = vadd.f32 %v5958_v46, %v18174_v25  ;;  %v13124_v15 = vpop.f32.mrb[197].mxu1 }
 0x609   : > { %v13265_v41 = vpop.f32.mrb[135].mxu0 }
 0x60a   : > { %v18265_v11 = vadd.f32 %v18176_v12, %v5959_v18 }
 0x60b   : > { %v5963_v38 = vpop.f32.mrb[198].mxu1 }
 0x60c   : > { %v18267_v56 = vpop.f32.mrb[136].mxu0  ;;  %v5964_v5 = vadd.f32 %v5963_v38, %v18181_v9  ;;  %v13127_v0 = vpop.f32.mrb[199].mxu1 }
 0x60d   : > { %v13268_v57 = vpop.f32.mrb[137].mxu0 }
 0x60e   : > { %v18271_v42 = vadd.f32 %v18183_v55, %v5964_v5 }
 0x60f   : > { %v5968_v48 = vpop.f32.mrb[200].mxu1 }
 0x610   : > { %v18273_v59 = vpop.f32.mrb[138].mxu0  ;;  %v5969_v25 = vadd.f32 %v5968_v48, %v18188_v20  ;;  %v13130_v13 = vpop.f32.mrb[201].mxu1 }
 0x611   : > { %v13271_v44 = vpop.f32.mrb[139].mxu0 }
 0x612   : > { %v18277_v12 = vadd.f32 %v18190_v29, %v5969_v25 }
 0x613   : > { %v5973_v4 = vpop.f32.mrb[202].mxu1 }
 0x614   : > { %v18279_v47 = vpop.f32.mrb[140].mxu0  ;;  %v5974_v9 = vadd.f32 %v5973_v4, %v18195_v24  ;;  %v13133_v60 = vpop.f32.mrb[203].mxu1 }
 0x615   : > { %v13274_v52 = vpop.f32.mrb[141].mxu0 }
 0x616   : > { %v18283_v55 = vadd.f32 %v18197_v21, %v5974_v9 }
 0x617   : > { %v5978_v31 = vpop.f32.mrb[204].mxu1 }
 0x618   : > { %v18285_v63 = vpop.f32.mrb[142].mxu0  ;;  %v5979_v20 = vadd.f32 %v5978_v31, %v18202_v19  ;;  %v13136_v61 = vpop.f32.mrb[205].mxu1 }
 0x619   : > { %v13277_v8 = vpop.f32.mrb[143].mxu0 }
 0x61a   : > { %v18289_v29 = vadd.f32 %v18204_v37, %v5979_v20 }
 0x61b   : > { %v5983_v10 = vpop.f32.mrb[206].mxu1 }
 0x61c   : > { %v18291_v39 = vpop.f32.mrb[144].mxu0  ;;  %v5984_v24 = vadd.f32 %v5983_v10, %v18209_v50  ;;  %v13139_v51 = vpop.f32.mrb[207].mxu1 }
 0x61d   : > { %v13280_v35 = vpop.f32.mrb[145].mxu0 }
 0x61e   : > { %v18295_v21 = vadd.f32 %v18211_v7, %v5984_v24 }
 0x61f   : > { %v5988_v1 = vpop.f32.mrb[208].mxu1 }
 0x620   : > { %v18297_v36 = vpop.f32.mrb[146].mxu0  ;;  %v5989_v19 = vadd.f32 %v5988_v1, %v18216_v54  ;;  %v13142_v3 = vpop.f32.mrb[209].mxu1 }
 0x621   : > { %v13283_v2 = vpop.f32.mrb[147].mxu0 }
 0x622   : > { %v18301_v37 = vadd.f32 %v18218_v49, %v5989_v19 }
 0x623   : > { %v5993_v34 = vpop.f32.mrb[210].mxu1 }
 0x624   : > { %v18303_v32 = vpop.f32.mrb[148].mxu0  ;;  %v5994_v50 = vadd.f32 %v5993_v34, %v18223_v30  ;;  %v13145_v58 = vpop.f32.mrb[211].mxu1 }
 0x625   : > { %v13286_v27 = vpop.f32.mrb[149].mxu0 }
 0x626   : > { %v18307_v7 = vadd.f32 %v18225_v16, %v5994_v50 }
 0x627   : > { %v5998_v46 = vpop.f32.mrb[212].mxu1 }
 0x628   : > { %v18309_v18 = vpop.f32.mrb[150].mxu0  ;;  %v5999_v54 = vadd.f32 %v5998_v46, %v18230_v43  ;;  %v13148_v15 = vpop.f32.mrb[213].mxu1 }
 0x629   : > { %v13289_v41 = vpop.f32.mrb[151].mxu0 }
 0x62a   : > { %v18313_v49 = vadd.f32 %v18232_v22, %v5999_v54 }
 0x62b   : > { %v6003_v38 = vpop.f32.mrb[214].mxu1 }
 0x62c   : > { %v18315_v5 = vpop.f32.mrb[152].mxu0  ;;  %v6004_v30 = vadd.f32 %v6003_v38, %v18237_v14  ;;  %v13151_v0 = vpop.f32.mrb[215].mxu1 }
 0x62d   : > { %v13292_v57 = vpop.f32.mrb[153].mxu0 }
 0x62e   : > { %v18319_v16 = vadd.f32 %v18239_v45, %v6004_v30 }
 0x62f   : > { %v6008_v48 = vpop.f32.mrb[216].mxu1 }
 0x630   : > { %v18321_v25 = vpop.f32.mrb[154].mxu0  ;;  %v6009_v43 = vadd.f32 %v6008_v48, %v18244_v26  ;;  %v13154_v13 = vpop.f32.mrb[217].mxu1 }
 0x631   : > { %v13295_v44 = vpop.f32.mrb[155].mxu0 }
 0x632   : > { %v18325_v22 = vadd.f32 %v18246_v62, %v6009_v43 }
 0x633   : > { %v6013_v4 = vpop.f32.mrb[218].mxu1 }
 0x634   : > { %v18327_v9 = vpop.f32.mrb[156].mxu0  ;;  %v6014_v14 = vadd.f32 %v6013_v4, %v18251_v6  ;;  %v13157_v60 = vpop.f32.mrb[219].mxu1 }
 0x635   : > { %v13298_v52 = vpop.f32.mrb[157].mxu0 }
 0x636   : > { %v18331_v45 = vadd.f32 %v18253_v23, %v6014_v14 }
 0x637   : > { %v6338_v31 = vpop.f32.mrb[220].mxu1 }
 0x638   : > { %v18333_v20 = vpop.f32.mrb[158].mxu0  ;;  %v6402_v26 = vadd.f32 %v6338_v31, %v18259_v33  ;;  %v13215_v61 = vpop.f32.mrb[221].mxu1 }
 0x639   : > { %v13356_v8 = vpop.f32.mrb[159].mxu0 }
 0x63a   : > { %v18337_v62 = vadd.f32 %v18255_v40, %v6402_v26 }
 0x63b   : > { %v6343_v10 = vpop.f32.mrb[222].mxu1 }
 0x63c   : > { %v18339_v24 = vpop.f32.mrb[160].mxu0  ;;  %v6403_v6 = vadd.f32 %v6343_v10, %v18265_v11  ;;  %v13218_v51 = vpop.f32.mrb[223].mxu1 }
 0x63d   : > { %v13359_v35 = vpop.f32.mrb[161].mxu0 }
 0x63e   : > { %v18343_v23 = vadd.f32 %v18261_v53, %v6403_v6 }
 0x63f   : > { %v6348_v1 = vpop.f32.mrb[224].mxu1 }
 0x640   : > { %v18345_v19 = vpop.f32.mrb[162].mxu0  ;;  %v6404_v33 = vadd.f32 %v6348_v1, %v18271_v42  ;;  %v13221_v3 = vpop.f32.mrb[225].mxu1 }
 0x641   : > { %v13362_v2 = vpop.f32.mrb[163].mxu0 }
 0x642   : > { %v18349_v40 = vadd.f32 %v18267_v56, %v6404_v33 }
 0x643   : > { %v6353_v34 = vpop.f32.mrb[226].mxu1 }
 0x644   : > { %v18351_v50 = vpop.f32.mrb[164].mxu0  ;;  %v6405_v11 = vadd.f32 %v6353_v34, %v18277_v12  ;;  %v13224_v58 = vpop.f32.mrb[227].mxu1 }
 0x645   : > { %v13365_v27 = vpop.f32.mrb[165].mxu0 }
 0x646   : > { %v18355_v53 = vadd.f32 %v18273_v59, %v6405_v11 }
 0x647   : > { %v6358_v46 = vpop.f32.mrb[228].mxu1 }
 0x648   : > { %v18357_v54 = vpop.f32.mrb[166].mxu0  ;;  %v6406_v42 = vadd.f32 %v6358_v46, %v18283_v55  ;;  %v13227_v15 = vpop.f32.mrb[229].mxu1 }
 0x649   : > { %v13368_v41 = vpop.f32.mrb[167].mxu0 }
 0x64a   : > { %v18361_v56 = vadd.f32 %v18279_v47, %v6406_v42 }
 0x64b   : > { %v6363_v38 = vpop.f32.mrb[230].mxu1 }
 0x64c   : > { %v18363_v30 = vpop.f32.mrb[168].mxu0  ;;  %v6407_v12 = vadd.f32 %v6363_v38, %v18289_v29  ;;  %v13230_v0 = vpop.f32.mrb[231].mxu1 }
 0x64d   : > { %v13371_v57 = vpop.f32.mrb[169].mxu0 }
 0x64e   : > { %v18367_v59 = vadd.f32 %v18285_v63, %v6407_v12 }
 0x64f   : > { %v6368_v48 = vpop.f32.mrb[232].mxu1 }
 0x650   : > { %v18369_v43 = vpop.f32.mrb[170].mxu0  ;;  %v6408_v55 = vadd.f32 %v6368_v48, %v18295_v21  ;;  %v13233_v13 = vpop.f32.mrb[233].mxu1 }
 0x651   : > { %v13374_v44 = vpop.f32.mrb[171].mxu0 }
 0x652   : > { %v18373_v47 = vadd.f32 %v18291_v39, %v6408_v55 }
 0x653   : > { %v6373_v4 = vpop.f32.mrb[234].mxu1 }
 0x654   : > { %v18375_v14 = vpop.f32.mrb[172].mxu0  ;;  %v6409_v29 = vadd.f32 %v6373_v4, %v18301_v37  ;;  %v13236_v60 = vpop.f32.mrb[235].mxu1 }
 0x655   : > { %v13377_v52 = vpop.f32.mrb[173].mxu0 }
 0x656   : > { %v18379_v63 = vadd.f32 %v18297_v36, %v6409_v29 }
 0x657   : > { %v6378_v31 = vpop.f32.mrb[236].mxu1 }
 0x658   : > { %v18381_v26 = vpop.f32.mrb[174].mxu0  ;;  %v6410_v21 = vadd.f32 %v6378_v31, %v18307_v7  ;;  %v13239_v61 = vpop.f32.mrb[237].mxu1 }
 0x659   : > { %v13380_v8 = vpop.f32.mrb[175].mxu0 }
 0x65a   : > { %v18385_v39 = vadd.f32 %v18303_v32, %v6410_v21 }
 0x65b   : > { %v6383_v10 = vpop.f32.mrb[238].mxu1 }
 0x65c   : > { %v18387_v6 = vpop.f32.mrb[176].mxu0  ;;  %v6411_v37 = vadd.f32 %v6383_v10, %v18313_v49  ;;  %v13242_v51 = vpop.f32.mrb[239].mxu1 }
 0x65d   : > { %v13383_v35 = vpop.f32.mrb[177].mxu0 }
 0x65e   : > { %v18391_v36 = vadd.f32 %v18309_v18, %v6411_v37 }
 0x65f   : > { %v6388_v1 = vpop.f32.mrb[240].mxu1 }
 0x660   : > { %v18393_v33 = vpop.f32.mrb[178].mxu0  ;;  %v6412_v7 = vadd.f32 %v6388_v1, %v18319_v16  ;;  %v13245_v3 = vpop.f32.mrb[241].mxu1 }
 0x661   : > { %v13386_v2 = vpop.f32.mrb[179].mxu0 }
 0x662   : > { %v18397_v32 = vadd.f32 %v18315_v5, %v6412_v7 }
 0x663   : > { %v6393_v34 = vpop.f32.mrb[242].mxu1 }
 0x664   : > { %v18399_v11 = vpop.f32.mrb[180].mxu0  ;;  %v6413_v49 = vadd.f32 %v6393_v34, %v18325_v22  ;;  %v13248_v58 = vpop.f32.mrb[243].mxu1  ;;  %v7700_v34 = vld [vmem:[%s20149_s7 + $0x40] sm:$0xff] }
 0x665   : > { %v13389_v27 = vpop.f32.mrb[181].mxu0 }
 0x666   : > { %v18403_v18 = vadd.f32 %v18321_v25, %v6413_v49 }
 0x667   : > { %v6398_v46 = vpop.f32.mrb[244].mxu1 }
 0x668   : > { %v18405_v42 = vpop.f32.mrb[182].mxu0  ;;  %v6414_v16 = vadd.f32 %v6398_v46, %v18331_v45  ;;  %v13251_v15 = vpop.f32.mrb[245].mxu1 }
 0x669   : > { %v13392_v41 = vpop.f32.mrb[183].mxu0 }
 0x66a   : > { %v18409_v5 = vadd.f32 %v18327_v9, %v6414_v16 }
 0x66b   : > { %v6736_v38 = vpop.f32.mrb[246].mxu1 }
 0x66c   : > { %v18411_v12 = vpop.f32.mrb[184].mxu0  ;;  %v6800_v22 = vadd.f32 %v6736_v38, %v18337_v62  ;;  %v13309_v0 = vpop.f32.mrb[247].mxu1 }
 0x66d   : > { %v13450_v57 = vpop.f32.mrb[185].mxu0 }
 0x66e   : > { %v18415_v25 = vadd.f32 %v18333_v20, %v6800_v22 }
 0x66f   : > { %v6741_v48 = vpop.f32.mrb[248].mxu1 }
 0x670   : > { %v18417_v55 = vpop.f32.mrb[186].mxu0  ;;  %v6801_v45 = vadd.f32 %v6741_v48, %v18343_v23  ;;  %v13312_v13 = vpop.f32.mrb[249].mxu1 }
 0x671   : > { %v13453_v44 = vpop.f32.mrb[187].mxu0 }
 0x672   : > { %v18421_v9 = vadd.f32 %v18339_v24, %v6801_v45 }
 0x673   : > { %v6746_v4 = vpop.f32.mrb[250].mxu1 }
 0x674   : > { %v18423_v29 = vpop.f32.mrb[188].mxu0  ;;  %v6802_v62 = vadd.f32 %v6746_v4, %v18349_v40  ;;  %v13315_v60 = vpop.f32.mrb[251].mxu1 }
 0x675   : > { %v13456_v52 = vpop.f32.mrb[189].mxu0 }
 0x676   : > { %v18427_v20 = vadd.f32 %v18345_v19, %v6802_v62 }
 0x677   : > { %v6751_v31 = vpop.f32.mrb[252].mxu1 }
 0x678   : > { %v18429_v21 = vpop.f32.mrb[190].mxu0  ;;  %v6803_v23 = vadd.f32 %v6751_v31, %v18355_v53  ;;  %v13318_v61 = vpop.f32.mrb[253].mxu1 }
 0x679   : > { %v13459_v8 = vpop.f32.mrb[191].mxu0 }
 0x67a   : > { %v18433_v24 = vadd.f32 %v18351_v50, %v6803_v23 }
 0x67b   : > { %v6756_v10 = vpop.f32.mrb[254].mxu1 }
 0x67c   : > { %v18435_v37 = vpop.f32.mrb[192].mxu0  ;;  %v6804_v40 = vadd.f32 %v6756_v10, %v18361_v56  ;;  %v13321_v51 = vpop.f32.mrb[255].mxu1  ;;  %v7701_v56 = vld [vmem:[%s20149_s7 + $0x48] sm:$0xff] }
 0x67d   : > { %v13462_v35 = vpop.f32.mrb[193].mxu0  ;;  %v13997_v58 = vpack.c.bf16 %v7701_v56, %v7700_v34 }
 0x67e   : > { %v18439_v19 = vadd.f32 %v18357_v54, %v6804_v40 }
 0x67f   : > { %v6761_v1 = vpop.f32.mrb[0].mxu1  ;;  %13998 = vmatpush3.bf16.msra.mxu0 %v13997_v58 }
 0x680   : > { %v18441_v7 = vpop.f32.mrb[194].mxu0  ;;  %v6805_v53 = vadd.f32 %v6761_v1, %v18367_v59  ;;  %v13324_v3 = vpop.f32.mrb[1].mxu1  ;;  %13999 = vmatprep.subr.bf16.mxu0 %v14538_v17 }
 0x681   : > { %v13465_v2 = vpop.f32.mrb[195].mxu0 }
 0x682   : > { %v18445_v50 = vadd.f32 %v18363_v30, %v6805_v53 }
 0x683   : > { %v6766_v54 = vpop.f32.mrb[2].mxu1 }
 0x684   : > { %v18453_v49 = vpop.f32.mrb[196].mxu0  ;;  %v6806_v27 = vadd.f32 %v6766_v54, %v18373_v47  ;;  %v13327_v59 = vpop.f32.mrb[3].mxu1 }
 0x685   : > { %v13468_v46 = vpop.f32.mrb[197].mxu0 }
 0x686   : > { %v18457_v30 = vadd.f32 %v18369_v43, %v6806_v27 }
 0x687   : > { %v6771_v16 = vpop.f32.mrb[4].mxu1 }
 0x688   : > { %v18460_v15 = vpop.f32.mrb[198].mxu0  ;;  %v6807_v41 = vadd.f32 %v6771_v16, %v18379_v63  ;;  %v13330_v38 = vpop.f32.mrb[5].mxu1 }
 0x689   : > { %v13471_v22 = vpop.f32.mrb[199].mxu0 }
 0x68a   : > { %v18464_v0 = vadd.f32 %v18375_v14, %v6807_v41 }
 0x68b   : > { %v6776_v57 = vpop.f32.mrb[6].mxu1 }
 0x68c   : > { %v18466_v47 = vpop.f32.mrb[200].mxu0  ;;  %v6808_v48 = vadd.f32 %v6776_v57, %v18385_v39  ;;  %v13333_v45 = vpop.f32.mrb[7].mxu1 }
 0x68d   : > { %v13474_v43 = vpop.f32.mrb[201].mxu0 }
 0x68e   : > { %v18470_v13 = vadd.f32 %v18381_v26, %v6808_v48 }
 0x68f   : > { %v6781_v44 = vpop.f32.mrb[8].mxu1 }
 0x690   : > { %v18472_v4 = vpop.f32.mrb[202].mxu0  ;;  %v6809_v63 = vadd.f32 %v6781_v44, %v18391_v36  ;;  %v13336_v62 = vpop.f32.mrb[9].mxu1 }
 0x691   : > { %v13477_v60 = vpop.f32.mrb[203].mxu0 }
 0x692   : > { %v18476_v14 = vadd.f32 %v18387_v6, %v6809_v63 }
 0x693   : > { %v6786_v52 = vpop.f32.mrb[10].mxu1 }
 0x694   : > { %v18478_v31 = vpop.f32.mrb[204].mxu0  ;;  %v6810_v39 = vadd.f32 %v6786_v52, %v18397_v32  ;;  %v13339_v23 = vpop.f32.mrb[11].mxu1 }
 0x695   : > { %v13480_v61 = vpop.f32.mrb[205].mxu0 }
 0x696   : > { %v18482_v26 = vadd.f32 %v18393_v33, %v6810_v39 }
 0x697   : > { %v6791_v8 = vpop.f32.mrb[12].mxu1 }
 0x698   : > { %v18484_v10 = vpop.f32.mrb[206].mxu0  ;;  %v6811_v36 = vadd.f32 %v6791_v8, %v18403_v18  ;;  %v13342_v40 = vpop.f32.mrb[13].mxu1  ;;  %v18500_v18 = vld [vmem:[%s20147_s5] ss:$0 sm:$0xff] }
 0x699   : > { %v13483_v51 = vpop.f32.mrb[207].mxu0 }
 0x69a   : > { %v18488_v6 = vadd.f32 %v18399_v11, %v6811_v36 }
 0x69b   : > { %v6796_v35 = vpop.f32.mrb[14].mxu1 }
 0x69c   : > { %v18490_v1 = vpop.f32.mrb[208].mxu0  ;;  %v6812_v32 = vadd.f32 %v6796_v35, %v18409_v5  ;;  %v13345_v53 = vpop.f32.mrb[15].mxu1 }
 0x69d   : > { %v13486_v3 = vpop.f32.mrb[209].mxu0 }
 0x69e   : > { %v18494_v33 = vadd.f32 %v18405_v42, %v6812_v32 }
 0x69f   : > { %v7134_v2 = vpop.f32.mrb[16].mxu1 }
 0x6a0   : > { %v7198_v34 = vadd.f32 %v7134_v2, %v18415_v25  ;;  %v13403_v56 = vpop.f32.mrb[17].mxu1 }
 0x6a2   : > { %v7397_v11 = vadd.f32 %v18411_v12, %v7198_v34 }
 0x6a3   : > { %v7139_v54 = vpop.f32.mrb[18].mxu1 }
 0x6a4   : > { %v7417_v58 = vadd.f32 %v18500_v18, %v7397_v11  ;;  %v7199_v5 = vadd.f32 %v7139_v54, %v18421_v9  ;;  %v13406_v27 = vpop.f32.mrb[19].mxu1 }
 0x6a6   : > { %v7430_v42 = vmax.f32 %v7417_v58, 0.0  ;;  %v7398_v59 = vadd.f32 %v18417_v55, %v7199_v5 }
 0x6a7   : > { %v7144_v46 = vpop.f32.mrb[20].mxu1 }
 0x6a8   : > { %7444 = vst.msk [vmem:[#allocation3] sm:$0xff] %vm7443_vm8, %v7430_v42  ;;  %v7418_v25 = vadd.f32 %v18500_v18, %v7398_v59  ;;  %v7200_v16 = vadd.f32 %v7144_v46, %v18427_v20  ;;  %v13409_v41 = vpop.f32.mrb[21].mxu1 }
 0x6aa   : > { %v7431_v38 = vmax.f32 %v7418_v25, 0.0  ;;  %v7399_v12 = vadd.f32 %v18423_v29, %v7200_v16 }
 0x6ab   : > { %v7149_v22 = vpop.f32.mrb[22].mxu1 }
 0x6ac   : > { %7445 = vst.msk [vmem:[#allocation3 + $0x8] sm:$0xff] %vm7443_vm8, %v7431_v38  ;;  %v7419_v9 = vadd.f32 %v18500_v18, %v7399_v12  ;;  %v7201_v57 = vadd.f32 %v7149_v22, %v18433_v24  ;;  %v13412_v48 = vpop.f32.mrb[23].mxu1 }
 0x6ae   : > { %v7432_v55 = vmax.f32 %v7419_v9, 0.0  ;;  %v7400_v45 = vadd.f32 %v18429_v21, %v7201_v57 }
 0x6af   : > { %v7154_v43 = vpop.f32.mrb[24].mxu1 }
 0x6b0   : > { %7446 = vst.msk [vmem:[#allocation3 + $0x10] sm:$0xff] %vm7443_vm8, %v7432_v55  ;;  %v7420_v20 = vadd.f32 %v18500_v18, %v7400_v45  ;;  %v7202_v44 = vadd.f32 %v7154_v43, %v18439_v19  ;;  %v13415_v63 = vpop.f32.mrb[25].mxu1 }
 0x6b2   : > { %v7433_v29 = vmax.f32 %v7420_v20, 0.0  ;;  %v7401_v62 = vadd.f32 %v18435_v37, %v7202_v44 }
 0x6b3   : > { %v7159_v60 = vpop.f32.mrb[26].mxu1  ;;  %v7470_v51 = vld [vmem:[#allocation3 + $0x1] sm:$0xff] }
 0x6b4   : > { %7447 = vst.msk [vmem:[#allocation3 + $0x18] sm:$0xff] %vm7443_vm8, %v7433_v29  ;;  %v7421_v24 = vadd.f32 %v18500_v18, %v7401_v62  ;;  %v7203_v52 = vadd.f32 %v7159_v60, %v18445_v50  ;;  %v13418_v39 = vpop.f32.mrb[27].mxu1  ;;  %v7458_v50 = vld [vmem:[#allocation3] sm:$0xff]  ;;  %v7459_v34 = vld [vmem:[#allocation3 + $0x8] sm:$0xff] }
 0x6b6   : > { %v7434_v21 = vmax.f32 %v7421_v24, 0.0  ;;  %v7402_v23 = vadd.f32 %v18441_v7, %v7203_v52  ;;  %v7482_v7 = vmax.f32 %v7458_v50, %v7470_v51 }
 0x6b7   : > { %v7164_v61 = vpop.f32.mrb[28].mxu1  ;;  %v7494_v8 = vld [vmem:[#allocation3 + $0xa] sm:$0xff] }
 0x6b8   : > { %v7506_v36 = vld [vmem:[#allocation3 + $0xb] sm:$0xff]  ;;  %7448 = vst.msk [vmem:[#allocation3 + $0x20] sm:$0xff] %vm7443_vm8, %v7434_v21  ;;  %v7422_v19 = vadd.f32 %v18500_v18, %v7402_v23  ;;  %v7204_v37 = vadd.f32 %v7164_v61, %v18457_v30  ;;  %v13421_v40 = vpop.f32.mrb[29].mxu1 }
 0x6b9   : > { %v7471_v35 = vld [vmem:[#allocation3 + $0x9] sm:$0xff]  ;;  %v7518_v3 = vmax.f32 %v7494_v8, %v7506_v36 }
 0x6ba   : > { %v7435_v32 = vmax.f32 %v7422_v19, 0.0  ;;  %v7403_v53 = vadd.f32 %v18453_v49, %v7204_v37  ;;  %v7483_v5 = vmax.f32 %v7459_v34, %v7471_v35 }
 0x6bb   : > { %v7169_v2 = vpop.f32.mrb[30].mxu1  ;;  %v7495_v56 = vld [vmem:[#allocation3 + $0x12] sm:$0xff]  ;;  %v7530_v49 = vmax.f32 %v7482_v7, %v7518_v3 }
 0x6bc   : > { %v7507_v11 = vld [vmem:[#allocation3 + $0x13] sm:$0xff]  ;;  %7449 = vst.msk [vmem:[#allocation3 + $0x28] sm:$0xff] %vm7443_vm8, %v7435_v32  ;;  %v7423_v54 = vadd.f32 %v18500_v18, %v7403_v53  ;;  %v7205_v58 = vadd.f32 %v7169_v2, %v18464_v0  ;;  %v13424_v30 = vpop.f32.mrb[31].mxu1 }
 0x6bd   : > { %v7519_v27 = vmax.f32 %v7495_v56, %v7507_v11  ;;  %v7472_v0 = vld [vmem:[#allocation3 + $0x11] sm:$0xff] }
 0x6be   : > { %v7436_v42 = vmax.f32 %v7423_v54, 0.0  ;;  %v7404_v59 = vadd.f32 %v18460_v15, %v7205_v58  ;;  %v7460_v15 = vld [vmem:[#allocation3 + $0x10] sm:$0xff]  ;;  %v7461_v20 = vld [vmem:[#allocation3 + $0x18] sm:$0xff] }
 0x6bf   : > { %v7531_v46 = vmax.f32 %v7483_v5, %v7519_v27  ;;  %v7174_v25 = vpop.f32.mrb[32].mxu1  ;;  %v7496_v16 = vld [vmem:[#allocation3 + $0x1a] sm:$0xff]  ;;  %v7484_v44 = vmax.f32 %v7460_v15, %v7472_v0 }
 0x6c0   : > { %v7508_v41 = vld [vmem:[#allocation3 + $0x1b] sm:$0xff]  ;;  %7450 = vst.msk [vmem:[#allocation3 + $0x30] sm:$0xff] %vm7443_vm8, %v7436_v42  ;;  %v7424_v38 = vadd.f32 %v18500_v18, %v7404_v59  ;;  %v7206_v12 = vadd.f32 %v7174_v25, %v18470_v13  ;;  %v13427_v22 = vpop.f32.mrb[33].mxu1 }
 0x6c1   : > { %v13978_v9 = vpack.c.bf16 %v7531_v46, %v7530_v49  ;;  %v7473_v57 = vld [vmem:[#allocation3 + $0x19] sm:$0xff]  ;;  %v7520_v45 = vmax.f32 %v7496_v16, %v7508_v41 }
 0x6c2   : > { %v7437_v48 = vmax.f32 %v7424_v38, 0.0  ;;  %v7405_v55 = vadd.f32 %v18466_v47, %v7206_v12  ;;  %v7485_v24 = vmax.f32 %v7461_v20, %v7473_v57 }
 0x6c3   : > { %13979 = vmatpush3.bf16.msra.mxu1 %v13978_v9  ;;  %v7179_v43 = vpop.f32.mrb[34].mxu1  ;;  %v7497_v63 = vld [vmem:[#allocation3 + $0x22] sm:$0xff]  ;;  %v7532_v21 = vmax.f32 %v7484_v44, %v7520_v45 }
 0x6c4   : > { %13980 = vmatprep.subr.bf16.mxu1 %v14538_v17  ;;  %v7509_v29 = vld [vmem:[#allocation3 + $0x23] sm:$0xff]  ;;  %7451 = vst.msk [vmem:[#allocation3 + $0x38] sm:$0xff] %vm7443_vm8, %v7437_v48  ;;  %v7425_v13 = vadd.f32 %v18500_v18, %v7405_v55  ;;  %v7207_v62 = vadd.f32 %v7179_v43, %v18476_v14  ;;  %v13430_v60 = vpop.f32.mrb[35].mxu1 }
 0x6c5   : > { %v7521_v52 = vmax.f32 %v7497_v63, %v7509_v29  ;;  %v7474_v14 = vld [vmem:[#allocation3 + $0x21] sm:$0xff] }
 0x6c6   : > { %v7438_v47 = vmax.f32 %v7425_v13, 0.0  ;;  %v7406_v39 = vadd.f32 %v18472_v4, %v7207_v62  ;;  %v7462_v4 = vld [vmem:[#allocation3 + $0x20] sm:$0xff]  ;;  %v7463_v2 = vld [vmem:[#allocation3 + $0x28] sm:$0xff] }
 0x6c7   : > { %v7533_v23 = vmax.f32 %v7485_v24, %v7521_v52  ;;  %v7184_v61 = vpop.f32.mrb[36].mxu1  ;;  %v7498_v8 = vld [vmem:[#allocation3 + $0x2a] sm:$0xff]  ;;  %v7486_v34 = vmax.f32 %v7462_v4, %v7474_v14 }
 0x6c8   : > { %v7510_v36 = vld [vmem:[#allocation3 + $0x2b] sm:$0xff]  ;;  %7452 = vst.msk [vmem:[#allocation3 + $0x40] sm:$0xff] %vm7443_vm8, %v7438_v47  ;;  %v7426_v19 = vadd.f32 %v18500_v18, %v7406_v39  ;;  %v7208_v37 = vadd.f32 %v7184_v61, %v18482_v26  ;;  %v13433_v40 = vpop.f32.mrb[37].mxu1 }
 0x6c9   : > { %v13981_v51 = vpack.c.bf16 %v7533_v23, %v7532_v21  ;;  %v7475_v35 = vld [vmem:[#allocation3 + $0x29] sm:$0xff]  ;;  %v7522_v50 = vmax.f32 %v7498_v8, %v7510_v36 }
 0x6ca   : > { %v7439_v32 = vmax.f32 %v7426_v19, 0.0  ;;  %v7407_v53 = vadd.f32 %v18478_v31, %v7208_v37  ;;  %v7487_v58 = vmax.f32 %v7463_v2, %v7475_v35 }
 0x6cb   : > { %13982 = vmatpush3.bf16.msra.mxu1 %v13981_v51  ;;  %v7189_v3 = vpop.f32.mrb[38].mxu1  ;;  %v7499_v7 = vld [vmem:[#allocation3 + $0x32] sm:$0xff]  ;;  %v7534_v27 = vmax.f32 %v7486_v34, %v7522_v50 }
 0x6cc   : > { %13983 = vmatprep.subr.bf16.mxu1 %v14538_v17  ;;  %v7511_v56 = vld [vmem:[#allocation3 + $0x33] sm:$0xff]  ;;  %7453 = vst.msk [vmem:[#allocation3 + $0x48] sm:$0xff] %vm7443_vm8, %v7439_v32  ;;  %v7427_v26 = vadd.f32 %v18500_v18, %v7407_v53  ;;  %v7209_v11 = vadd.f32 %v7189_v3, %v18488_v6  ;;  %v13436_v54 = vpop.f32.mrb[39].mxu1 }
 0x6cd   : > { %v7523_v30 = vmax.f32 %v7499_v7, %v7511_v56  ;;  %v7476_v6 = vld [vmem:[#allocation3 + $0x31] sm:$0xff]  ;;  %v7543_v54 = vld [vmem:[%s20148_s6 + $0x8] sm:$0xff] }
 0x6ce   : > { %v7440_v31 = vmax.f32 %v7427_v26, 0.0  ;;  %v7408_v5 = vadd.f32 %v18484_v10, %v7209_v11  ;;  %v7464_v10 = vld [vmem:[#allocation3 + $0x30] sm:$0xff]  ;;  %v7465_v57 = vld [vmem:[#allocation3 + $0x38] sm:$0xff] }
 0x6cf   : > { %v7535_v42 = vmax.f32 %v7487_v58, %v7523_v30  ;;  %v7194_v59 = vpop.f32.mrb[40].mxu1  ;;  %v7500_v49 = vld [vmem:[#allocation3 + $0x3a] sm:$0xff]  ;;  %v7544_v58 = vld [vmem:[%s20148_s6 + $0x10] sm:$0xff]  ;;  %v7545_v30 = vld [vmem:[%s20148_s6 + $0x18] sm:$0xff] }
 0x6d0   : > { %v7512_v46 = vld [vmem:[#allocation3 + $0x3b] sm:$0xff]  ;;  %7454 = vst.msk [vmem:[#allocation3 + $0x50] sm:$0xff] %vm7443_vm8, %v7440_v31  ;;  %v7428_v25 = vadd.f32 %v18500_v18, %v7408_v5  ;;  %v7210_v16 = vadd.f32 %v7194_v59, %v18494_v33  ;;  %v13439_v41 = vpop.f32.mrb[41].mxu1  ;;  %v7488_v33 = vmax.f32 %v7464_v10, %v7476_v6  ;;  %v7703_v59 = vld [vmem:[%s20149_s7 + $0x58] sm:$0xff]  ;;  %v7689_v10 = vld [vmem:[%s20149_s7 + $0x10] sm:$0xff] }
 0x6d1   : > { %v13984_v38 = vpack.c.bf16 %v7535_v42, %v7534_v27  ;;  %v7477_v12 = vld [vmem:[#allocation3 + $0x39] sm:$0xff]  ;;  %v7524_v0 = vmax.f32 %v7500_v49, %v7512_v46  ;;  %v7548_v27 = vld [vmem:[%s20148_s6 + $0x30] sm:$0x3] }
 0x6d2   : > { %v7441_v22 = vmax.f32 %v7428_v25, 0.0  ;;  %v7409_v9 = vadd.f32 %v18490_v1, %v7210_v16  ;;  %v7489_v45 = vmax.f32 %v7465_v57, %v7477_v12  ;;  %v7466_v24 = vld [vmem:[#allocation3 + $0x40] sm:$0xff]  ;;  %v7542_v11 = vld [vmem:[%s20148_s6] sm:$0xff]  ;;  %v7702_v42 = vld [vmem:[%s20149_s7 + $0x50] sm:$0xff] }
 0x6d3   : > { %13985 = vmatpush3.bf16.msra.mxu1 %v13984_v38  ;;  %v7501_v48 = vld [vmem:[#allocation3 + $0x42] sm:$0xff]  ;;  %v7536_v44 = vmax.f32 %v7488_v33, %v7524_v0  ;;  %v7546_v31 = vld [vmem:[%s20148_s6 + $0x20] sm:$0xff]  ;;  %v14000_v49 = vpack.c.bf16 %v7703_v59, %v7702_v42  ;;  %v7707_v38 = vld [vmem:[%s20149_s7 + $0x78] sm:$0xff] }
 0x6d4   : > { %13986 = vmatprep.subr.bf16.mxu1 %v14538_v17  ;;  %v7513_v55 = vld [vmem:[#allocation3 + $0x43] sm:$0xff]  ;;  %7455 = vst.msk [vmem:[#allocation3 + $0x58] sm:$0xff] %vm7443_vm8, %v7441_v22  ;;  %v7429_v15 = vadd.f32 %v18500_v18, %v7409_v9  ;;  %v7704_v46 = vld [vmem:[%s20149_s7 + $0x60] sm:$0xff]  ;;  %v7690_v0 = vld [vmem:[%s20149_s7 + $0x18] sm:$0xff] }
 0x6d5   : > { %v7525_v43 = vmax.f32 %v7501_v48, %v7513_v55  ;;  %v7478_v62 = vld [vmem:[#allocation3 + $0x41] sm:$0xff]  ;;  %14001 = vmatpush3.bf16.msra.mxu0 %v14000_v49  ;;  %v7687_v12 = vld [vmem:[%s20149_s7] sm:$0xff]  ;;  %v14012_v57 = vpack.c.bf16 %v7690_v0, %v7689_v10  ;;  %v8295_v0 = vld [vmem:[%s20149_s7 + $0x158] sm:$0xff] }
 0x6d6   : > { %v7442_v20 = vmax.f32 %v7429_v15, 0.0  ;;  %v7467_v47 = vld [vmem:[#allocation3 + $0x48] sm:$0xff]  ;;  %v7490_v21 = vmax.f32 %v7466_v24, %v7478_v62  ;;  %v7547_v5 = vld [vmem:[%s20148_s6 + $0x28] sm:$0xff]  ;;  %14002 = vmatprep.subr.bf16.mxu0 %v14538_v17  ;;  %v7691_v48 = vld [vmem:[%s20149_s7 + $0x20] sm:$0xff] }
 0x6d7   : > { %v7537_v63 = vmax.f32 %v7489_v45, %v7525_v43  ;;  %v7502_v1 = vld [vmem:[#allocation3 + $0x4a] sm:$0xff]  ;;  %v7705_v25 = vld [vmem:[%s20149_s7 + $0x68] sm:$0xff] }
 0x6d8   : > { %v7514_v29 = vld [vmem:[#allocation3 + $0x4b] sm:$0xff]  ;;  %7457 = vst.msk [vmem:[#allocation3 + $0x60] sm:$0xf] %vm7456_vm9, %v7442_v20  ;;  %v14003_v16 = vpack.c.bf16 %v7705_v25, %v7704_v46  ;;  %v7688_v22 = vld [vmem:[%s20149_s7 + $0x8] sm:$0xff] }
 0x6d9   : > { %v13987_v13 = vpack.c.bf16 %v7537_v63, %v7536_v44  ;;  %v7479_v60 = vld [vmem:[#allocation3 + $0x49] sm:$0xff]  ;;  %v7526_v52 = vmax.f32 %v7502_v1, %v7514_v29  ;;  %v14009_v9 = vpack.c.bf16 %v7688_v22, %v7687_v12  ;;  %v7692_v55 = vld [vmem:[%s20149_s7 + $0x28] sm:$0xff]  ;;  %v8046_v63 = vld [vmem:[%s20149_s7 + $0xc0] sm:$0xff] }
 0x6da   : > { %v7491_v23 = vmax.f32 %v7467_v47, %v7479_v60  ;;  %v7468_v37 = vld [vmem:[#allocation3 + $0x50] sm:$0xff]  ;;  %14004 = vmatpush3.bf16.msra.mxu0 %v14003_v16  ;;  %v7706_v41 = vld [vmem:[%s20149_s7 + $0x70] sm:$0xff]  ;;  %v14015_v15 = vpack.c.bf16 %v7692_v55, %v7691_v48  ;;  %v8047_v1 = vld [vmem:[%s20149_s7 + $0xc8] sm:$0xff] }
 0x6db   : > { %13988 = vmatpush3.bf16.msra.mxu1 %v13987_v13  ;;  %v7503_v18 = vld [vmem:[#allocation3 + $0x52] sm:$0xff]  ;;  %v7538_v36 = vmax.f32 %v7490_v21, %v7526_v52  ;;  %14005 = vmatprep.subr.bf16.mxu0 %v14538_v17  ;;  %v14006_v6 = vpack.c.bf16 %v7707_v38, %v7706_v41  ;;  %v7693_v33 = vld [vmem:[%s20149_s7 + $0x30] sm:$0xff]  ;;  %v14033_v62 = vpack.c.bf16 %v8047_v1, %v8046_v63  ;;  %v7924_v24 = vld [vmem:[%s20149_s7 + $0x88] sm:$0xff] }
 0x6dc   : > { %13989 = vmatprep.subr.bf16.mxu1 %v14538_v17  ;;  %v7515_v39 = vld [vmem:[#allocation3 + $0x53] sm:$0xff]  ;;  %v8293_v41 = vld [vmem:[%s20149_s7 + $0x148] sm:$0xff]  ;;  %v8294_v10 = vld [vmem:[%s20149_s7 + $0x150] sm:$0xff] }
 0x6dd   : > { %v7527_v61 = vmax.f32 %v7503_v18, %v7515_v39  ;;  %v7480_v8 = vld [vmem:[#allocation3 + $0x51] sm:$0xff]  ;;  %v7481_v51 = vld [vmem:[#allocation3 + $0x59] sm:$0x1]  ;;  %v8048_v39 = vld [vmem:[%s20149_s7 + $0xd0] sm:$0xff] }
 0x6de   : > { %v7469_v40 = vld [vmem:[#allocation3 + $0x58] sm:$0x1]  ;;  %v7492_v4 = vmax.f32 %v7468_v37, %v7480_v8  ;;  %14007 = vmatpush3.bf16.msra.mxu0 %v14006_v6  ;;  %v7694_v45 = vld [vmem:[%s20149_s7 + $0x38] sm:$0xff]  ;;  %v8170_v12 = vld [vmem:[%s20149_s7 + $0x108] sm:$0xff] }
 0x6df   : > { %v7539_v19 = vmax.f32 %v7491_v23, %v7527_v61  ;;  %v7504_v14 = vld [vmem:[#allocation3 + $0x5a] sm:$0xff]  ;;  %v7505_v35 = vld [vmem:[#allocation3 + $0x62] sm:$0x1]  ;;  %v7517_v50 = vld [vmem:[#allocation3 + $0x63] sm:$0x1]  ;;  %v7493_v2 = vmax.f32 %v7469_v40, %v7481_v51  ;;  %14020 = vmatprep.subr.bf16.mxu0 %v14538_v17  ;;  %v14018_v43 = vpack.c.bf16 %v7694_v45, %v7693_v33  ;;  %v14060_v45 = vpack.c.bf16 %v8295_v0, %v8294_v10 }
 0x6e0   : > { %v7516_v32 = vld [vmem:[#allocation3 + $0x5b] sm:$0xff]  ;;  %v7529_v34 = vmax.f32 %v7505_v35, %v7517_v50  ;;  %v8049_v21 = vld [vmem:[%s20149_s7 + $0xd8] sm:$0xff]  ;;  %v7925_v61 = vld [vmem:[%s20149_s7 + $0x90] sm:$0xff] }
 0x6e1   : > { %v13990_v53 = vpack.c.bf16 %v7539_v19, %v7538_v36  ;;  %v7528_v3 = vmax.f32 %v7504_v14, %v7516_v32  ;;  %v7923_v60 = vld [vmem:[%s20149_s7 + $0x80] sm:$0xff]  ;;  %v7926_v8 = vld [vmem:[%s20149_s7 + $0x98] sm:$0xff]  ;;  %v14036_v40 = vpack.c.bf16 %v8049_v21, %v8048_v39  ;;  %v7928_v32 = vld [vmem:[%s20149_s7 + $0xa8] sm:$0xff] }
 0x6e2   : > { %v7541_v56 = vmax.f32 %v7493_v2, %v7529_v34  ;;  %v14021_v23 = vpack.c.bf16 %v7924_v24, %v7923_v60  ;;  %v14024_v14 = vpack.c.bf16 %v7926_v8, %v7925_v61  ;;  %v7927_v35 = vld [vmem:[%s20149_s7 + $0xa0] sm:$0xff]  ;;  %v8051_v2 = vld [vmem:[%s20149_s7 + $0xe8] sm:$0xff]  ;;  %v8171_v55 = vld [vmem:[%s20149_s7 + $0x110] sm:$0xff] }
 0x6e3   : > { %13991 = vmatpush3.bf16.msra.mxu1 %v13990_v53  ;;  %v7540_v7 = vmax.f32 %v7492_v4, %v7528_v3  ;;  %v8050_v53 = vld [vmem:[%s20149_s7 + $0xe0] sm:$0xff]  ;;  %v8298_v60 = vld [vmem:[%s20149_s7 + $0x170] sm:$0xff]  ;;  %v8299_v24 = vld [vmem:[%s20149_s7 + $0x178] sm:$0xff] }
 0x6e4   : > { %13992 = vmatprep.subr.bf16.mxu1 %v14538_v17  ;;  %v8292_v16 = vld [vmem:[%s20149_s7 + $0x140] sm:$0xff]  ;;  %v8176_v39 = vld [vmem:[%s20149_s7 + $0x138] sm:$0xff] }
 0x6e5   : > { %v13993_v26 = vpack.c.bf16 %v7541_v56, %v7540_v7  ;;  %v14027_v7 = vpack.c.bf16 %v7928_v32, %v7927_v35  ;;  %v7929_v56 = vld [vmem:[%s20149_s7 + $0xb0] sm:$0xff]  ;;  %v8169_v6 = vld [vmem:[%s20149_s7 + $0x100] sm:$0xff]  ;;  %v8416_v35 = vld [vmem:[%s20149_s7 + $0x188] sm:$0xff] }
 0x6e6   : > { %v8173_v1 = vld [vmem:[%s20149_s7 + $0x120] sm:$0xff] }
 0x6e7   : > { %13995 = vmatpush3.bf16.msk.msra.mxu1 %vm13994_vm11, %v13993_v26  ;;  %v7930_v26 = vld [vmem:[%s20149_s7 + $0xb8] sm:$0xff] }
 0x6e8   : > { %14008 = vmatprep.subr.bf16.mxu1 %v14538_v17  ;;  %v14030_v42 = vpack.c.bf16 %v7930_v26, %v7929_v56 }
 0x6ea   : > { %13512 = vmatmul.mubr.msk.f32.vlgmr.msra.gmra.mrb[42].mxu1 %vm7549_vm12, %v7542_v11  ;;  %v14039_v11 = vpack.c.bf16 %v8051_v2, %v8050_v53 }
 0x6eb   : > { %13514 = vmatprep.mubr.msk.f32.mxu1 %vm14537_vm1, %v20221_v28  ;;  %14010 = vmatpush3.bf16.msra.mxu1 %v14009_v9  ;;  %v14057_v9 = vpack.c.bf16 %v8293_v41, %v8292_v16 }
 0x6ec   : > { %14011 = vmatprep.subr.bf16.mxu1 %v14538_v17 }
 0x6ee   : > { %13515 = vmatmul.mubr.msk.f32.gmra.mrb[44].mxu1 %vm7549_vm12, %v7543_v54 }
 0x6ef   : > { %13517 = vmatprep.mubr.msk.f32.mxu1 %vm14537_vm1, %v20221_v28  ;;  %14013 = vmatpush3.bf16.msra.mxu1 %v14012_v57  ;;  %v14045_v57 = vpack.c.bf16 %v8170_v12, %v8169_v6  ;;  %v8661_v12 = vld [vmem:[%s20149_s7 + $0x200] sm:$0xff] }
 0x6f0   : > { %14014 = vmatprep.subr.bf16.mxu1 %v14538_v17 }
 0x6f2   : > { %13518 = vmatmul.mubr.msk.f32.gmra.mrb[46].mxu1 %vm7549_vm12, %v7544_v58 }
 0x6f3   : > { %13520 = vmatprep.mubr.msk.f32.mxu1 %vm14537_vm1, %v20221_v28  ;;  %14016 = vmatpush3.bf16.msra.mxu1 %v14015_v15  ;;  %v8172_v15 = vld [vmem:[%s20149_s7 + $0x118] sm:$0xff] }
 0x6f4   : > { %14017 = vmatprep.subr.bf16.mxu1 %v14538_v17 }
 0x6f6   : > { %13521 = vmatmul.mubr.msk.f32.gmra.mrb[48].mxu1 %vm7549_vm12, %v7545_v30 }
 0x6f7   : > { %13523 = vmatprep.mubr.msk.f32.mxu1 %vm14537_vm1, %v20221_v28  ;;  %14019 = vmatpush3.bf16.msra.mxu1 %v14018_v43  ;;  %v8296_v43 = vld [vmem:[%s20149_s7 + $0x160] sm:$0xff] }
 0x6f8   : > { %14032 = vmatprep.subr.bf16.mxu1 %v14538_v17 }
 0x6fa   : > { %13524 = vmatmul.mubr.msk.f32.gmra.mrb[50].mxu1 %vm7549_vm12, %v7546_v31  ;;  %v8052_v31 = vld [vmem:[%s20149_s7 + $0xf0] sm:$0xff] }
 0x6fb   : > { %13526 = vmatprep.mubr.msk.f32.mxu1 %vm14537_vm1, %v20221_v28 }
 0x6fe   : > { %13527 = vmatmul.mubr.msk.f32.gmra.mrb[52].mxu1 %vm7549_vm12, %v7547_v5  ;;  %v8053_v5 = vld [vmem:[%s20149_s7 + $0xf8] sm:$0xff] }
 0x6ff   : > { %13529 = vmatprep.mubr.msk.f32.mxu1 %vm14537_vm1, %v20221_v28  ;;  %v14042_v49 = vpack.c.bf16 %v8053_v5, %v8052_v31  ;;  %v8420_v31 = vld [vmem:[%s20149_s7 + $0x1a8] sm:$0xff] }
 0x702   : > { %13530 = vmatmul.mubr.msk.f32.gmra.mrb[54].mxu1 %vm7549_vm12, %v7548_v27 }
 0x703   : > { %13579 = vmatprep.mubr.msk.f32.mxu1 %vm14537_vm1, %v20221_v28 }
 0x7bd   : > { %v7640_v20 = vpop.f32.mrb[42].mxu1 }
 0x7be   : > { %7674 = vst.msk [vmem:[#allocation7] sm:$0xff] %vm7443_vm8, %v7640_v20  ;;  %v13513_v44 = vpop.f32.mrb[43].mxu1  ;;  %v8297_v20 = vld [vmem:[%s20149_s7 + $0x168] sm:$0xff] }
 0x7bf   : > { %v14048_v44 = vpack.c.bf16 %v8172_v15, %v8171_v55 }
 0x7c1   : > { %v7645_v29 = vpop.f32.mrb[44].mxu1 }
 0x7c2   : > { %7675 = vst.msk [vmem:[#allocation7 + $0x8] sm:$0xff] %vm7443_vm8, %v7645_v29  ;;  %v13516_v13 = vpop.f32.mrb[45].mxu1  ;;  %v8174_v29 = vld [vmem:[%s20149_s7 + $0x128] sm:$0xff] }
 0x7c5   : > { %v7650_v52 = vpop.f32.mrb[46].mxu1  ;;  %v7682_v47 = vld [vmem:[#allocation7] sm:$0xff] }
 0x7c6   : > { %7676 = vst.msk [vmem:[#allocation7 + $0x10] sm:$0xff] %vm7443_vm8, %v7650_v52  ;;  %v13519_v18 = vpop.f32.mrb[47].mxu1  ;;  %13580 = vmatmul.mubr.msk.f32.vlgmr.msra.gmra.mrb[56].mxu1 %vm7443_vm8, %v7682_v47  ;;  %v14051_v52 = vpack.c.bf16 %v8174_v29, %v8173_v1  ;;  %v8667_v29 = vld [vmem:[%s20149_s7 + $0x230] sm:$0xff] }
 0x7c7   : > { %13582 = vmatprep.mubr.msk.f32.mxu1 %vm14537_vm1, %v20221_v28  ;;  %14034 = vmatpush3.bf16.msra.mxu1 %v14033_v62  ;;  %v14063_v62 = vpack.c.bf16 %v8297_v20, %v8296_v43  ;;  %v8175_v18 = vld [vmem:[%s20149_s7 + $0x130] sm:$0xff]  ;;  %v8666_v43 = vld [vmem:[%s20149_s7 + $0x228] sm:$0xff] }
 0x7c8   : > { %14035 = vmatprep.subr.bf16.mxu1 %v14538_v17  ;;  %v14054_v61 = vpack.c.bf16 %v8176_v39, %v8175_v18 }
 0x7c9   : > { %v7655_v36 = vpop.f32.mrb[48].mxu1  ;;  %v7695_v19 = vld [vmem:[#allocation7 + $0x1] sm:$0xff] }
 0x7ca   : > { %v18682_v37 = vld [vmem:[#allocation7 + $0x8] sm:$0xff]  ;;  %7677 = vst.msk [vmem:[#allocation7 + $0x18] sm:$0xff] %vm7443_vm8, %v7655_v36  ;;  %13549 = vmatmul.mubr.msk.f32.vlgmr.msra.gmra.mrb[210].mxu0 %vm7443_vm8, %v7695_v19  ;;  %v13522_v51 = vpop.f32.mrb[49].mxu1 }
 0x7cb   : > { %13583 = vmatmul.mubr.msk.f32.gmra.mrb[58].mxu1 %vm7443_vm8, %v18682_v37  ;;  %13551 = vmatprep.mubr.msk.f32.mxu0 %vm14537_vm1, %v20221_v28  ;;  %v8041_v48 = vld [vmem:[#allocation7 + $0x6] sm:$0xff] }
 0x7cc   : > { %14022 = vmatpush3.bf16.msra.mxu0 %v14021_v23  ;;  %13585 = vmatprep.mubr.msk.f32.mxu1 %vm14537_vm1, %v20221_v28  ;;  %v7918_v33 = vld [vmem:[#allocation7 + $0x2] sm:$0xff]  ;;  %v14066_v23 = vpack.c.bf16 %v8299_v24, %v8298_v60 }
 0x7cd   : > { %14023 = vmatprep.subr.bf16.mxu0 %v14538_v17  ;;  %v7660_v4 = vpop.f32.mrb[50].mxu1  ;;  %v7696_v50 = vld [vmem:[#allocation7 + $0x9] sm:$0xff]  ;;  %14037 = vmatpush3.bf16.msra.mxu1 %v14036_v40 }
 0x7ce   : > { %v18702_v3 = vld [vmem:[#allocation7 + $0x10] sm:$0xff]  ;;  %7678 = vst.msk [vmem:[#allocation7 + $0x20] sm:$0xff] %vm7443_vm8, %v7660_v4  ;;  %13552 = vmatmul.mubr.msk.f32.gmra.mrb[212].mxu0 %vm7443_vm8, %v7696_v50  ;;  %v13525_v34 = vpop.f32.mrb[51].mxu1  ;;  %14038 = vmatprep.subr.bf16.mxu1 %v14538_v17  ;;  %v8538_v19 = vld [vmem:[%s20149_s7 + $0x1c0] sm:$0xff]  ;;  %v8540_v4 = vld [vmem:[%s20149_s7 + $0x1d0] sm:$0xff] }
 0x7cf   : > { %13586 = vmatmul.mubr.msk.f32.gmra.mrb[60].mxu1 %vm7443_vm8, %v18702_v3  ;;  %13554 = vmatprep.mubr.msk.f32.mxu0 %vm14537_vm1, %v20221_v28  ;;  %v18789_v63 = vld [vmem:[#allocation7 + $0xe] sm:$0xff]  ;;  %v8541_v50 = vld [vmem:[%s20149_s7 + $0x1d8] sm:$0xff]  ;;  %v8417_v34 = vld [vmem:[%s20149_s7 + $0x190] sm:$0xff] }
 0x7d0   : > { %14025 = vmatpush3.bf16.msra.mxu0 %v14024_v14  ;;  %13588 = vmatprep.mubr.msk.f32.mxu1 %vm14537_vm1, %v20221_v28  ;;  %v7919_v13 = vld [vmem:[#allocation7 + $0xa] sm:$0xff]  ;;  %v14084_v26 = vpack.c.bf16 %v8541_v50, %v8540_v4  ;;  %v8981_v50 = vld [vmem:[%s20152_s10 + $0x130] sm:$0xff] }
 0x7d1   : > { %14026 = vmatprep.subr.bf16.mxu0 %v14538_v17  ;;  %v7697_v54 = vld [vmem:[#allocation7 + $0x11] sm:$0xff]  ;;  %v7665_v30 = vpop.f32.mrb[52].mxu1  ;;  %14040 = vmatpush3.bf16.msra.mxu1 %v14039_v11  ;;  %v8415_v14 = vld [vmem:[%s20149_s7 + $0x180] sm:$0xff] }
 0x7d2   : > { %v18722_v58 = vld [vmem:[#allocation7 + $0x18] sm:$0xff]  ;;  %13555 = vmatmul.mubr.msk.f32.gmra.mrb[214].mxu0 %vm7443_vm8, %v7697_v54  ;;  %7679 = vst.msk [vmem:[#allocation7 + $0x28] sm:$0xff] %vm7443_vm8, %v7665_v30  ;;  %v13528_v27 = vpop.f32.mrb[53].mxu1  ;;  %14041 = vmatprep.subr.bf16.mxu1 %v14538_v17  ;;  %v8539_v40 = vld [vmem:[%s20149_s7 + $0x1c8] sm:$0xff]  ;;  %v14069_v2 = vpack.c.bf16 %v8416_v35, %v8415_v14  ;;  %v8164_v56 = vld [vmem:[#allocation7 + $0x7] sm:$0xff] }
 0x7d3   : > { %13589 = vmatmul.mubr.msk.f32.gmra.mrb[62].mxu1 %vm7443_vm8, %v18722_v58  ;;  %13557 = vmatprep.mubr.msk.f32.mxu0 %vm14537_vm1, %v20221_v28  ;;  %v18812_v47 = vld [vmem:[#allocation7 + $0x16] sm:$0xff]  ;;  %v14081_v53 = vpack.c.bf16 %v8539_v40, %v8538_v19  ;;  %v8542_v11 = vld [vmem:[%s20149_s7 + $0x1e0] sm:$0xff]  ;;  %v8982_v35 = vld [vmem:[%s20152_s10 + $0x138] sm:$0xff] }
 0x7d4   : > { %14028 = vmatpush3.bf16.msra.mxu0 %v14027_v7  ;;  %13591 = vmatprep.mubr.msk.f32.mxu1 %vm14537_vm1, %v20221_v28  ;;  %v7920_v21 = vld [vmem:[#allocation7 + $0x12] sm:$0xff]  ;;  %v8418_v7 = vld [vmem:[%s20149_s7 + $0x198] sm:$0xff]  ;;  %v8419_v30 = vld [vmem:[%s20149_s7 + $0x1a0] sm:$0xff] }
 0x7d5   : > { %14029 = vmatprep.subr.bf16.mxu0 %v14538_v17  ;;  %v7698_v59 = vld [vmem:[#allocation7 + $0x19] sm:$0xff]  ;;  %v7670_v46 = vpop.f32.mrb[54].mxu1  ;;  %v7699_v22 = vld [vmem:[#allocation7 + $0x21] sm:$0xf]  ;;  %14043 = vmatpush3.bf16.msra.mxu1 %v14042_v49  ;;  %v8543_v54 = vld [vmem:[%s20149_s7 + $0x1e8] sm:$0xff] }
 0x7d6   : > { %13558 = vmatmul.mubr.msk.f32.gmra.mrb[216].mxu0 %vm7443_vm8, %v7698_v59  ;;  %v7686_v25 = vld [vmem:[#allocation7 + $0x20] sm:$0xf]  ;;  %7681 = vst.msk [vmem:[#allocation7 + $0x30] sm:$0x3] %vm7680_vm13, %v7670_v46  ;;  %v13531_v38 = vpop.f32.mrb[55].mxu1  ;;  %14056 = vmatprep.subr.bf16.mxu1 %v14538_v17  ;;  %v8165_v5 = vld [vmem:[#allocation7 + $0xf] sm:$0xff]  ;;  %v14087_v27 = vpack.c.bf16 %v8543_v54, %v8542_v11 }
 0x7d7   : > { %13560 = vmatprep.mubr.msk.f32.mxu0 %vm14537_vm1, %v20221_v28  ;;  %13592 = vmatmul.mubr.msk.f32.gmra.mrb[64].mxu1 %vm7443_vm8, %v7686_v25  ;;  %v18829_v8 = vld [vmem:[#allocation7 + $0x1e] sm:$0xff]  ;;  %v8533_v0 = vld [vmem:[#allocation7 + $0xd] sm:$0xff] }
 0x7d8   : > { %14031 = vmatpush3.bf16.msra.mxu0 %v14030_v42  ;;  %13641 = vmatprep.mubr.msk.f32.mxu1 %vm14537_vm1, %v20221_v28  ;;  %v7921_v36 = vld [vmem:[#allocation7 + $0x1a] sm:$0xff]  ;;  %v7922_v32 = vld [vmem:[#allocation7 + $0x22] sm:$0xf]  ;;  %v8410_v55 = vld [vmem:[#allocation7 + $0xc] sm:$0xff] }
 0x7d9   : > { %14044 = vmatprep.subr.bf16.mxu0 %v14538_v17  ;;  %v8045_v51 = vld [vmem:[#allocation7 + $0x26] sm:$0xf]  ;;  %v8544_v42 = vld [vmem:[%s20149_s7 + $0x1f0] sm:$0xff]  ;;  %v8414_v39 = vld [vmem:[#allocation7 + $0x2c] sm:$0xf] }
 0x7da   : > { %13561 = vmatmul.mubr.msk.f32.gmra.mrb[218].mxu0 %vm7443_vm8, %v7699_v22  ;;  %v8545_v59 = vld [vmem:[%s20149_s7 + $0x1f8] sm:$0xff]  ;;  %v8421_v49 = vld [vmem:[%s20149_s7 + $0x1b0] sm:$0xff]  ;;  %v8291_v6 = vld [vmem:[#allocation7 + $0x28] sm:$0xf] }
 0x7db   : > { %13610 = vmatprep.mubr.msk.f32.mxu0 %vm14537_vm1, %v20221_v28  ;;  %13642 = vmatmul.mubr.msk.f32.vlgmr.msra.gmra.mrb[66].mxu1 %vm7443_vm8, %v8041_v48  ;;  %v8422_v46 = vld [vmem:[%s20149_s7 + $0x1b8] sm:$0xff]  ;;  %v8166_v25 = vld [vmem:[#allocation7 + $0x17] sm:$0xff]  ;;  %v14090_v16 = vpack.c.bf16 %v8545_v59, %v8544_v42  ;;  %v8975_v19 = vld [vmem:[%s20152_s10 + $0x100] sm:$0xff] }
 0x7dc   : > { %13644 = vmatprep.mubr.msk.f32.mxu1 %vm14537_vm1, %v20221_v28  ;;  %14058 = vmatpush3.bf16.msra.mxu1 %v14057_v9  ;;  %v14078_v41 = vpack.c.bf16 %v8422_v46, %v8421_v49  ;;  %v8290_v38 = vld [vmem:[#allocation7 + $0x20] sm:$0xff]  ;;  %v8662_v22 = vld [vmem:[%s20149_s7 + $0x208] sm:$0xff]  ;;  %v8979_v4 = vld [vmem:[%s20152_s10 + $0x120] sm:$0xff] }
 0x7dd   : > { %14059 = vmatprep.subr.bf16.mxu1 %v14538_v17  ;;  %v8168_v9 = vld [vmem:[#allocation7 + $0x27] sm:$0xf]  ;;  %v14093_v10 = vpack.c.bf16 %v8662_v22, %v8661_v12  ;;  %v8411_v20 = vld [vmem:[#allocation7 + $0x14] sm:$0xff]  ;;  %v8535_v1 = vld [vmem:[#allocation7 + $0x1d] sm:$0xff] }
 0x7de   : > { %13611 = vmatmul.mubr.msk.f32.vlgmr.msra.gmra.mrb[220].mxu0 %vm7443_vm8, %v7918_v33  ;;  %v8664_v48 = vld [vmem:[%s20149_s7 + $0x218] sm:$0xff]  ;;  %v8534_v33 = vld [vmem:[#allocation7 + $0x15] sm:$0xff]  ;;  %v8537_v18 = vld [vmem:[#allocation7 + $0x2d] sm:$0xf] }
 0x7df   : > { %13613 = vmatprep.mubr.msk.f32.mxu0 %vm14537_vm1, %v20221_v28  ;;  %14046 = vmatpush3.bf16.msra.mxu0 %v14045_v57  ;;  %v8663_v57 = vld [vmem:[%s20149_s7 + $0x210] sm:$0xff]  ;;  %v8536_v24 = vld [vmem:[#allocation7 + $0x25] sm:$0xff]  ;;  %v8980_v14 = vld [vmem:[%s20152_s10 + $0x128] sm:$0xff] }
 0x7e0   : > { %14047 = vmatprep.subr.bf16.mxu0 %v14538_v17  ;;  %13645 = vmatmul.mubr.msk.f32.gmra.mrb[68].mxu1 %vm7443_vm8, %v18789_v63  ;;  %v14096_v15 = vpack.c.bf16 %v8664_v48, %v8663_v57  ;;  %v8990_v42 = vld [vmem:[%s20152_s10 + $0x178] sm:$0xff] }
 0x7e1   : > { %13647 = vmatprep.mubr.msk.f32.mxu1 %vm14537_vm1, %v20221_v28  ;;  %14061 = vmatpush3.bf16.msra.mxu1 %v14060_v45  ;;  %v8665_v45 = vld [vmem:[%s20149_s7 + $0x220] sm:$0xff]  ;;  %v8994_v12 = vld [vmem:[%s20152_s10 + $0x198] sm:$0xff] }
 0x7e2   : > { %13614 = vmatmul.mubr.msk.f32.gmra.mrb[222].mxu0 %vm7443_vm8, %v7919_v13  ;;  %14062 = vmatprep.subr.bf16.mxu1 %v14538_v17  ;;  %v8668_v13 = vld [vmem:[%s20149_s7 + $0x238] sm:$0xff] }
 0x7e3   : > { %13616 = vmatprep.mubr.msk.f32.mxu0 %vm14537_vm1, %v20221_v28  ;;  %14049 = vmatpush3.bf16.msra.mxu0 %v14048_v44  ;;  %v14099_v44 = vpack.c.bf16 %v8666_v43, %v8665_v45  ;;  %v14102_v60 = vpack.c.bf16 %v8668_v13, %v8667_v29  ;;  %v8996_v45 = vld [vmem:[%s20152_s10 + $0x1a8] sm:$0xff]  ;;  %v8998_v43 = vld [vmem:[%s20152_s10 + $0x1b8] sm:$0xff] }
 0x7e4   : > { %14050 = vmatprep.subr.bf16.mxu0 %v14538_v17  ;;  %13648 = vmatmul.mubr.msk.f32.gmra.mrb[70].mxu1 %vm7443_vm8, %v18812_v47 }
 0x7e5   : > { %13650 = vmatprep.mubr.msk.f32.mxu1 %vm14537_vm1, %v20221_v28  ;;  %14064 = vmatpush3.bf16.msra.mxu1 %v14063_v62  ;;  %v8412_v62 = vld [vmem:[#allocation7 + $0x1c] sm:$0xff] }
 0x7e6   : > { %13617 = vmatmul.mubr.msk.f32.gmra.mrb[224].mxu0 %vm7443_vm8, %v7920_v21  ;;  %14065 = vmatprep.subr.bf16.mxu1 %v14538_v17  ;;  %v8659_v21 = vld [vmem:[#allocation7 + $0x26] sm:$0xff] }
 0x7e7   : > { %13619 = vmatprep.mubr.msk.f32.mxu0 %vm14537_vm1, %v20221_v28  ;;  %14052 = vmatpush3.bf16.msra.mxu0 %v14051_v52  ;;  %v8413_v52 = vld [vmem:[#allocation7 + $0x24] sm:$0xff] }
 0x7e8   : > { %14053 = vmatprep.subr.bf16.mxu0 %v14538_v17  ;;  %13651 = vmatmul.mubr.msk.f32.gmra.mrb[72].mxu1 %vm7443_vm8, %v18829_v8 }
 0x7e9   : > { %13653 = vmatprep.mubr.msk.f32.mxu1 %vm14537_vm1, %v20221_v28  ;;  %14067 = vmatpush3.bf16.msra.mxu1 %v14066_v23 }
 0x7ea   : > { %13620 = vmatmul.mubr.msk.f32.gmra.mrb[226].mxu0 %vm7443_vm8, %v7921_v36  ;;  %14080 = vmatprep.subr.bf16.mxu1 %v14538_v17  ;;  %v8978_v36 = vld [vmem:[%s20152_s10 + $0x118] sm:$0xff] }
 0x7eb   : > { %13622 = vmatprep.mubr.msk.f32.mxu0 %vm14537_vm1, %v20221_v28  ;;  %14055 = vmatpush3.bf16.msra.mxu0 %v14054_v61 }
 0x7ec   : > { %14068 = vmatprep.subr.bf16.mxu0 %v14538_v17  ;;  %13654 = vmatmul.mubr.msk.f32.gmra.mrb[74].mxu1 %vm7443_vm8, %v8045_v51  ;;  %v8977_v51 = vld [vmem:[%s20152_s10 + $0x110] sm:$0xff] }
 0x7ed   : > { %13703 = vmatprep.mubr.msk.f32.mxu1 %vm14537_vm1, %v20221_v28 }
 0x7ee   : > { %13623 = vmatmul.mubr.msk.f32.gmra.mrb[228].mxu0 %vm7443_vm8, %v7922_v32  ;;  %v14116_v32 = vpack.c.bf16 %v8977_v51, %v8975_v19 }
 0x7ef   : > { %13672 = vmatprep.mubr.msk.f32.mxu0 %vm14537_vm1, %v20221_v28 }
 0x7f0   : > { %13704 = vmatmul.mubr.msk.f32.vlgmr.msra.gmra.mrb[76].mxu1 %vm7443_vm8, %v18682_v37  ;;  %v14072_v37 = vpack.c.bf16 %v8418_v7, %v8417_v34 }
 0x7f1   : > { %13706 = vmatprep.mubr.msk.f32.mxu1 %vm14537_vm1, %v20221_v28  ;;  %14082 = vmatpush3.bf16.msra.mxu1 %v14081_v53  ;;  %v14118_v53 = vpack.c.bf16 %v8982_v35, %v8980_v14 }
 0x7f2   : > { %13673 = vmatmul.mubr.msk.f32.vlgmr.msra.gmra.mrb[230].mxu0 %vm7443_vm8, %v8164_v56  ;;  %14083 = vmatprep.subr.bf16.mxu1 %v14538_v17  ;;  %v8986_v56 = vld [vmem:[%s20152_s10 + $0x158] sm:$0xff] }
 0x7f3   : > { %13675 = vmatprep.mubr.msk.f32.mxu0 %vm14537_vm1, %v20221_v28  ;;  %14070 = vmatpush3.bf16.msra.mxu0 %v14069_v2  ;;  %v8984_v2 = vld [vmem:[%s20152_s10 + $0x148] sm:$0xff] }
 0x7f4   : > { %14071 = vmatprep.subr.bf16.mxu0 %v14538_v17  ;;  %13707 = vmatmul.mubr.msk.f32.gmra.mrb[78].mxu1 %vm7443_vm8, %v18702_v3  ;;  %v14075_v3 = vpack.c.bf16 %v8420_v31, %v8419_v30  ;;  %v14122_v30 = vpack.c.bf16 %v8986_v56, %v8984_v2  ;;  %v8983_v31 = vld [vmem:[%s20152_s10 + $0x140] sm:$0xff] }
 0x7f5   : > { %13709 = vmatprep.mubr.msk.f32.mxu1 %vm14537_vm1, %v20221_v28  ;;  %14085 = vmatpush3.bf16.msra.mxu1 %v14084_v26 }
 0x7f6   : > { %13676 = vmatmul.mubr.msk.f32.gmra.mrb[232].mxu0 %vm7443_vm8, %v8165_v5  ;;  %14086 = vmatprep.subr.bf16.mxu1 %v14538_v17  ;;  %v8985_v5 = vld [vmem:[%s20152_s10 + $0x150] sm:$0xff] }
 0x7f7   : > { %13678 = vmatprep.mubr.msk.f32.mxu0 %vm14537_vm1, %v20221_v28  ;;  %14073 = vmatpush3.bf16.msra.mxu0 %v14072_v37  ;;  %v14120_v37 = vpack.c.bf16 %v8981_v50, %v8979_v4 }
 0x7f8   : > { %14074 = vmatprep.subr.bf16.mxu0 %v14538_v17  ;;  %13710 = vmatmul.mubr.msk.f32.gmra.mrb[80].mxu1 %vm7443_vm8, %v18722_v58  ;;  %v8167_v58 = vld [vmem:[#allocation7 + $0x1f] sm:$0xff] }
 0x7f9   : > { %13712 = vmatprep.mubr.msk.f32.mxu1 %vm14537_vm1, %v20221_v28  ;;  %14088 = vmatpush3.bf16.msra.mxu1 %v14087_v27  ;;  %v8988_v27 = vld [vmem:[%s20152_s10 + $0x168] sm:$0xff] }
 0x7fa   : > { %13679 = vmatmul.mubr.msk.f32.gmra.mrb[234].mxu0 %vm7443_vm8, %v8166_v25  ;;  %14089 = vmatprep.subr.bf16.mxu1 %v14538_v17 }
 0x7fb   : > { %13681 = vmatprep.mubr.msk.f32.mxu0 %vm14537_vm1, %v20221_v28  ;;  %14076 = vmatpush3.bf16.msra.mxu0 %v14075_v3 }
 0x7fc   : > { %14077 = vmatprep.subr.bf16.mxu0 %v14538_v17  ;;  %13713 = vmatmul.mubr.msk.f32.gmra.mrb[82].mxu1 %vm7443_vm8, %v8290_v38  ;;  %v8987_v38 = vld [vmem:[%s20152_s10 + $0x160] sm:$0xff] }
 0x7fd   : > { %13715 = vmatprep.mubr.msk.f32.mxu1 %vm14537_vm1, %v20221_v28  ;;  %14091 = vmatpush3.bf16.msra.mxu1 %v14090_v16  ;;  %v14124_v16 = vpack.c.bf16 %v8985_v5, %v8983_v31 }
 0x7fe   : > { %13682 = vmatmul.mubr.msk.f32.gmra.mrb[236].mxu0 %vm7443_vm8, %v8167_v58  ;;  %v8989_v58 = vld [vmem:[%s20152_s10 + $0x170] sm:$0xff] }
 0x7ff   : > { %13684 = vmatprep.mubr.msk.f32.mxu0 %vm14537_vm1, %v20221_v28  ;;  %14079 = vmatpush3.bf16.msra.mxu0 %v14078_v41  ;;  %v14126_v41 = vpack.c.bf16 %v8990_v42, %v8988_v27  ;;  %v14128_v48 = vpack.c.bf16 %v8989_v58, %v8987_v38 }
 0x800   : > { %14092 = vmatprep.subr.bf16.mxu0 %v14538_v17  ;;  %13716 = vmatmul.mubr.msk.f32.gmra.mrb[84].mxu1 %vm7443_vm8, %v8291_v6  ;;  %v8992_v6 = vld [vmem:[%s20152_s10 + $0x188] sm:$0xff] }
 0x801   : > { %13765 = vmatprep.mubr.msk.f32.mxu1 %vm14537_vm1, %v20221_v28 }
 0x802   : > { %13685 = vmatmul.mubr.msk.f32.gmra.mrb[238].mxu0 %vm7443_vm8, %v8168_v9 }
 0x803   : > { %13734 = vmatprep.mubr.msk.f32.mxu0 %vm14537_vm1, %v20221_v28 }
 0x804   : > { %13766 = vmatmul.mubr.msk.f32.vlgmr.msra.gmra.mrb[86].mxu1 %vm7443_vm8, %v8533_v0 }
 0x805   : > { %13768 = vmatprep.mubr.msk.f32.mxu1 %vm14537_vm1, %v20221_v28 }
 0x806   : > { %13735 = vmatmul.mubr.msk.f32.vlgmr.msra.gmra.mrb[240].mxu0 %vm7443_vm8, %v8410_v55  ;;  %v14130_v55 = vpack.c.bf16 %v8994_v12, %v8992_v6 }
 0x807   : > { %13737 = vmatprep.mubr.msk.f32.mxu0 %vm14537_vm1, %v20221_v28  ;;  %14094 = vmatpush3.bf16.msra.mxu0 %v14093_v10 }
 0x808   : > { %14095 = vmatprep.subr.bf16.mxu0 %v14538_v17  ;;  %13769 = vmatmul.mubr.msk.f32.gmra.mrb[88].mxu1 %vm7443_vm8, %v8534_v33  ;;  %v8993_v33 = vld [vmem:[%s20152_s10 + $0x190] sm:$0xff] }
 0x809   : > { %13771 = vmatprep.mubr.msk.f32.mxu1 %vm14537_vm1, %v20221_v28 }
 0x80a   : > { %13738 = vmatmul.mubr.msk.f32.gmra.mrb[242].mxu0 %vm7443_vm8, %v8411_v20 }
 0x80b   : > { %13740 = vmatprep.mubr.msk.f32.mxu0 %vm14537_vm1, %v20221_v28  ;;  %14097 = vmatpush3.bf16.msra.mxu0 %v14096_v15  ;;  %v8991_v15 = vld [vmem:[%s20152_s10 + $0x180] sm:$0xff] }
 0x80c   : > { %14098 = vmatprep.subr.bf16.mxu0 %v14538_v17  ;;  %13772 = vmatmul.mubr.msk.f32.gmra.mrb[90].mxu1 %vm7443_vm8, %v8535_v1  ;;  %v14132_v29 = vpack.c.bf16 %v8993_v33, %v8991_v15 }
 0x80d   : > { %13774 = vmatprep.mubr.msk.f32.mxu1 %vm14537_vm1, %v20221_v28 }
 0x80e   : > { %13741 = vmatmul.mubr.msk.f32.gmra.mrb[244].mxu0 %vm7443_vm8, %v8412_v62  ;;  %v14134_v62 = vpack.c.bf16 %v8998_v43, %v8996_v45 }
 0x80f   : > { %13743 = vmatprep.mubr.msk.f32.mxu0 %vm14537_vm1, %v20221_v28  ;;  %14100 = vmatpush3.bf16.msra.mxu0 %v14099_v44 }
 0x810   : > { %14101 = vmatprep.subr.bf16.mxu0 %v14538_v17  ;;  %13775 = vmatmul.mubr.msk.f32.gmra.mrb[92].mxu1 %vm7443_vm8, %v8536_v24  ;;  %v8997_v24 = vld [vmem:[%s20152_s10 + $0x1b0] sm:$0xff] }
 0x811   : > { %13777 = vmatprep.mubr.msk.f32.mxu1 %vm14537_vm1, %v20221_v28 }
 0x812   : > { %13744 = vmatmul.mubr.msk.f32.gmra.mrb[246].mxu0 %vm7443_vm8, %v8413_v52 }
 0x813   : > { %13746 = vmatprep.mubr.msk.f32.mxu0 %vm14537_vm1, %v20221_v28  ;;  %14103 = vmatpush3.bf16.msra.mxu0 %v14102_v60  ;;  %v8995_v60 = vld [vmem:[%s20152_s10 + $0x1a0] sm:$0xff] }
 0x814   : > { %13778 = vmatmul.mubr.msk.f32.gmra.mrb[94].mxu1 %vm7443_vm8, %v8537_v18 }
 0x816   : > { %13747 = vmatmul.mubr.msk.f32.gmra.mrb[248].mxu0 %vm7443_vm8, %v8414_v39 }
 0x817   : > { %13796 = vmatprep.mubr.msk.f32.mxu0 %vm14537_vm1, %v20221_v28 }
 0x81a   : > { %13797 = vmatmul.mubr.msk.f32.vlgmr.msra.gmra.mrb[250].mxu0 %vm7443_vm8, %v18789_v63  ;;  %v8660_v63 = vld [vmem:[#allocation7 + $0x2e] sm:$0xf] }
 0x81b   : > { %13799 = vmatprep.mubr.msk.f32.mxu0 %vm14537_vm1, %v20221_v28 }
 0x81e   : > { %13800 = vmatmul.mubr.msk.f32.gmra.mrb[252].mxu0 %vm7443_vm8, %v18812_v47  ;;  %v8829_v47 = vld [vmem:[%s20151_s9] sm:$0xff] }
 0x81f   : > { %13802 = vmatprep.mubr.msk.f32.mxu0 %vm14537_vm1, %v20221_v28  ;;  %13819 = vmatprep.mubr.msk.f32.mxu1 %vm8833_vm14, %v8829_v47 }
 0x822   : > { %13803 = vmatmul.mubr.msk.f32.gmra.mrb[254].mxu0 %vm7443_vm8, %v18829_v8  ;;  %v8976_v8 = vld [vmem:[%s20152_s10 + $0x108] sm:$0xff] }
 0x823   : > { %13805 = vmatprep.mubr.msk.f32.mxu0 %vm14537_vm1, %v20221_v28  ;;  %v14114_v40 = vpack.c.bf16 %v8978_v36, %v8976_v8 }
 0x825   : > { %14115 = vmatprep.subr.bf16.mxu0 %v14114_v40 }
 0x826   : > { %13806 = vmatmul.mubr.msk.f32.gmra.mrb[0].mxu0 %vm7443_vm8, %v8659_v21 }
 0x827   : > { %13808 = vmatprep.mubr.msk.f32.mxu0 %vm14537_vm1, %v20221_v28  ;;  %14117 = vmatpush1.bf16.msra.mxu0 %v14116_v32 }
 0x828   : > { %14119 = vmatprep.subr.bf16.mxu0 %v14118_v53 }
 0x82a   : > { %13809 = vmatmul.mubr.msk.f32.gmra.mrb[2].mxu0 %vm7443_vm8, %v8660_v63  ;;  %v14136_v63 = vpack.c.bf16 %v8997_v24, %v8995_v60 }
 0x82b   : > { %9071 = vmatprep.mubr.f32.mxu0 %v20221_v28  ;;  %14121 = vmatpush1.bf16.msra.mxu0 %v14120_v37 }
 0x82c   : > { %14123 = vmatprep.subr.bf16.mxu0 %v14122_v30 }
 0x82f   : > { %14125 = vmatpush1.bf16.msra.mxu0 %v14124_v16 }
 0x830   : > { %14127 = vmatprep.subr.bf16.mxu0 %v14126_v41 }
 0x833   : > { %14129 = vmatpush1.bf16.msra.mxu0 %v14128_v48 }
 0x834   : > { %14131 = vmatprep.subr.bf16.mxu0 %v14130_v55 }
 0x837   : > { %14133 = vmatpush1.bf16.msra.mxu0 %v14132_v29 }
 0x838   : > { %14135 = vmatprep.subr.bf16.mxu0 %v14134_v62 }
 0x83b   : > { %14137 = vmatpush1.bf16.msra.mxu0 %v14136_v63 }
 0x899   : > { %v7894_v23 = vpop.f32.mrb[56].mxu1 }
 0x89a   : > { %v13581_v61 = vpop.f32.mrb[57].mxu1 }
 0x89d   : > { %v7789_v34 = vpop.f32.mrb[210].mxu0 }
 0x89e   : > { %v7899_v7 = vpop.f32.mrb[58].mxu1  ;;  %v13550_v26 = vpop.f32.mrb[211].mxu0  ;;  %v7895_v11 = vadd.f32 %v7894_v23, %v7789_v34 }
 0x89f   : > { %v13584_v54 = vpop.f32.mrb[59].mxu1 }
 0x8a1   : > { %v7794_v59 = vpop.f32.mrb[212].mxu0 }
 0x8a2   : > { %v7904_v3 = vpop.f32.mrb[60].mxu1  ;;  %v13553_v49 = vpop.f32.mrb[213].mxu0  ;;  %v7900_v46 = vadd.f32 %v7899_v7, %v7794_v59 }
 0x8a3   : > { %v13587_v25 = vpop.f32.mrb[61].mxu1 }
 0x8a5   : > { %v7799_v22 = vpop.f32.mrb[214].mxu0 }
 0x8a6   : > { %v7909_v9 = vpop.f32.mrb[62].mxu1  ;;  %v13556_v10 = vpop.f32.mrb[215].mxu0  ;;  %v7905_v0 = vadd.f32 %v7904_v3, %v7799_v22 }
 0x8a7   : > { %v13590_v57 = vpop.f32.mrb[63].mxu1 }
 0x8a9   : > { %v7804_v20 = vpop.f32.mrb[216].mxu0 }
 0x8aa   : > { %v13559_v44 = vpop.f32.mrb[217].mxu0  ;;  %v7910_v1 = vadd.f32 %v7909_v9, %v7804_v20  ;;  %v7914_v13 = vpop.f32.mrb[64].mxu1 }
 0x8ab   : > { %v13593_v52 = vpop.f32.mrb[65].mxu1 }
 0x8ad   : > { %v7809_v18 = vpop.f32.mrb[218].mxu0 }
 0x8ae   : > { %v13562_v39 = vpop.f32.mrb[219].mxu0  ;;  %v7915_v21 = vadd.f32 %v7914_v13, %v7809_v18  ;;  %v8135_v47 = vpop.f32.mrb[66].mxu1 }
 0x8af   : > { %v13643_v23 = vpop.f32.mrb[67].mxu1 }
 0x8b1   : > { %v8012_v61 = vpop.f32.mrb[220].mxu0 }
 0x8b2   : > { %v8036_v8 = vadd.f32 %v8012_v61, %v7895_v11  ;;  %v13612_v36 = vpop.f32.mrb[221].mxu0 }
 0x8b3   : > { %v8140_v19 = vpop.f32.mrb[68].mxu1 }
 0x8b4   : > { %v8159_v40 = vadd.f32 %v8135_v47, %v8036_v8  ;;  %v13646_v51 = vpop.f32.mrb[69].mxu1 }
 0x8b5   : > { %v8017_v14 = vpop.f32.mrb[222].mxu0 }
 0x8b6   : > { %v8037_v35 = vadd.f32 %v8017_v14, %v7900_v46  ;;  %v13615_v32 = vpop.f32.mrb[223].mxu0 }
 0x8b7   : > { %v8145_v53 = vpop.f32.mrb[70].mxu1 }
 0x8b8   : > { %v8160_v4 = vadd.f32 %v8140_v19, %v8037_v35  ;;  %v13649_v50 = vpop.f32.mrb[71].mxu1 }
 0x8b9   : > { %v8022_v2 = vpop.f32.mrb[224].mxu0 }
 0x8ba   : > { %v8038_v34 = vadd.f32 %v8022_v2, %v7905_v0  ;;  %v13618_v7 = vpop.f32.mrb[225].mxu0 }
 0x8bb   : > { %v8150_v56 = vpop.f32.mrb[72].mxu1 }
 0x8bc   : > { %v8161_v26 = vadd.f32 %v8145_v53, %v8038_v34  ;;  %v13652_v54 = vpop.f32.mrb[73].mxu1 }
 0x8bd   : > { %v8027_v37 = vpop.f32.mrb[226].mxu0 }
 0x8be   : > { %v8039_v30 = vadd.f32 %v8027_v37, %v7910_v1  ;;  %v13621_v11 = vpop.f32.mrb[227].mxu0 }
 0x8bf   : > { %v8155_v31 = vpop.f32.mrb[74].mxu1 }
 0x8c0   : > { %v8162_v5 = vadd.f32 %v8150_v56, %v8039_v30  ;;  %v13655_v27 = vpop.f32.mrb[75].mxu1 }
 0x8c1   : > { %v8032_v42 = vpop.f32.mrb[228].mxu0 }
 0x8c2   : > { %v8040_v59 = vadd.f32 %v8032_v42, %v7915_v21  ;;  %v13624_v3 = vpop.f32.mrb[229].mxu0 }
 0x8c3   : > { %v8381_v49 = vpop.f32.mrb[76].mxu1 }
 0x8c4   : > { %v8163_v46 = vadd.f32 %v8155_v31, %v8040_v59  ;;  %v13705_v25 = vpop.f32.mrb[77].mxu1 }
 0x8c5   : > { %v8258_v16 = vpop.f32.mrb[230].mxu0 }
 0x8c6   : > { %v8282_v41 = vadd.f32 %v8258_v16, %v8159_v40  ;;  %v13674_v38 = vpop.f32.mrb[231].mxu0 }
 0x8c7   : > { %v8386_v58 = vpop.f32.mrb[78].mxu1 }
 0x8c8   : > { %v8405_v6 = vadd.f32 %v8381_v49, %v8282_v41  ;;  %v13708_v12 = vpop.f32.mrb[79].mxu1  ;;  %v11050_v49 = vld [vmem:[%s20150_s8] ss:$0 sm:$0xff] }
 0x8c9   : > { %v8263_v22 = vpop.f32.mrb[232].mxu0 }
 0x8ca   : > { %v8283_v9 = vadd.f32 %v8263_v22, %v8160_v4  ;;  %v13677_v10 = vpop.f32.mrb[233].mxu0 }
 0x8cb   : > { %v8391_v0 = vpop.f32.mrb[80].mxu1 }
 0x8cc   : > { %v8406_v57 = vadd.f32 %v8386_v58, %v8283_v9  ;;  %v13711_v48 = vpop.f32.mrb[81].mxu1 }
 0x8cd   : > { %v8268_v55 = vpop.f32.mrb[234].mxu0 }
 0x8ce   : > { %v8284_v15 = vadd.f32 %v8268_v55, %v8161_v26  ;;  %v13680_v33 = vpop.f32.mrb[235].mxu0 }
 0x8cf   : > { %v8396_v45 = vpop.f32.mrb[82].mxu1 }
 0x8d0   : > { %v8407_v43 = vadd.f32 %v8391_v0, %v8284_v15  ;;  %v13714_v20 = vpop.f32.mrb[83].mxu1 }
 0x8d1   : > { %v8273_v44 = vpop.f32.mrb[236].mxu0 }
 0x8d2   : > { %v8285_v1 = vadd.f32 %v8273_v44, %v8162_v5  ;;  %v13683_v29 = vpop.f32.mrb[237].mxu0 }
 0x8d3   : > { %v8401_v13 = vpop.f32.mrb[84].mxu1 }
 0x8d4   : > { %v8408_v62 = vadd.f32 %v8396_v45, %v8285_v1  ;;  %v13717_v60 = vpop.f32.mrb[85].mxu1 }
 0x8d5   : > { %v8278_v24 = vpop.f32.mrb[238].mxu0 }
 0x8d6   : > { %v8286_v52 = vadd.f32 %v8278_v24, %v8163_v46  ;;  %v13686_v18 = vpop.f32.mrb[239].mxu0 }
 0x8d7   : > { %v8627_v39 = vpop.f32.mrb[86].mxu1 }
 0x8d8   : > { %v8409_v21 = vadd.f32 %v8401_v13, %v8286_v52  ;;  %v13767_v63 = vpop.f32.mrb[87].mxu1 }
 0x8d9   : > { %v8504_v47 = vpop.f32.mrb[240].mxu0 }
 0x8da   : > { %v8528_v23 = vadd.f32 %v8504_v47, %v8405_v6  ;;  %v13736_v61 = vpop.f32.mrb[241].mxu0 }
 0x8db   : > { %v8632_v8 = vpop.f32.mrb[88].mxu1 }
 0x8dc   : > { %v8651_v36 = vadd.f32 %v8627_v39, %v8528_v23  ;;  %v13770_v19 = vpop.f32.mrb[89].mxu1 }
 0x8dd   : > { %v8509_v40 = vpop.f32.mrb[242].mxu0 }
 0x8de   : > { %v8529_v51 = vadd.f32 %v8509_v40, %v8406_v57  ;;  %v13739_v14 = vpop.f32.mrb[243].mxu0 }
 0x8df   : > { %v8637_v35 = vpop.f32.mrb[90].mxu1 }
 0x8e0   : > { %v8652_v32 = vadd.f32 %v8632_v8, %v8529_v51  ;;  %v13773_v53 = vpop.f32.mrb[91].mxu1 }
 0x8e1   : > { %v8514_v4 = vpop.f32.mrb[244].mxu0 }
 0x8e2   : > { %v8530_v50 = vadd.f32 %v8514_v4, %v8407_v43  ;;  %v13742_v2 = vpop.f32.mrb[245].mxu0 }
 0x8e3   : > { %v8642_v34 = vpop.f32.mrb[92].mxu1 }
 0x8e4   : > { %v8653_v7 = vadd.f32 %v8637_v35, %v8530_v50  ;;  %v13776_v56 = vpop.f32.mrb[93].mxu1 }
 0x8e5   : > { %v8519_v26 = vpop.f32.mrb[246].mxu0 }
 0x8e6   : > { %v8531_v54 = vadd.f32 %v8519_v26, %v8408_v62  ;;  %v13745_v37 = vpop.f32.mrb[247].mxu0 }
 0x8e7   : > { %v8647_v30 = vpop.f32.mrb[94].mxu1  ;;  %v8831_v37 = vld [vmem:[%s20151_s9 + $0x10] sm:$0xff] }
 0x8e8   : > { %v8654_v11 = vadd.f32 %v8642_v34, %v8531_v54  ;;  %v13779_v31 = vpop.f32.mrb[95].mxu1  ;;  %v8830_v54 = vld [vmem:[%s20151_s9 + $0x8] sm:$0xff] }
 0x8e9   : > { %v8524_v5 = vpop.f32.mrb[248].mxu0  ;;  %v9002_v31 = vld [vmem:[%s20152_s10 + $0x1d8] sm:$0xff] }
 0x8ea   : > { %v8532_v27 = vadd.f32 %v8524_v5, %v8409_v21  ;;  %v13748_v42 = vpop.f32.mrb[249].mxu0  ;;  %v8999_v5 = vld [vmem:[%s20152_s10 + $0x1c0] sm:$0xff] }
 0x8eb   : > { %v9001_v42 = vld [vmem:[%s20152_s10 + $0x1d0] sm:$0xff] }
 0x8ec   : > { %v8655_v59 = vadd.f32 %v8647_v30, %v8532_v27  ;;  %v8832_v30 = vld [vmem:[%s20151_s9 + $0x18] sm:$0x3] }
 0x8ed   : > { %v8750_v3 = vpop.f32.mrb[250].mxu0 }
 0x8ee   : > { %v8774_v46 = vadd.f32 %v8750_v3, %v8651_v36  ;;  %v13798_v25 = vpop.f32.mrb[251].mxu0  ;;  %v9006_v3 = vld [vmem:[%s20152_s10 + $0x1f8] sm:$0xff] }
 0x8ef   : > { %v9003_v25 = vld [vmem:[%s20152_s10 + $0x1e0] sm:$0xff] }
 0x8f0   : > { %v8786_v16 = vadd.f32 %v11050_v49, %v8774_v46 }
 0x8f1   : > { %v8755_v41 = vpop.f32.mrb[252].mxu0 }
 0x8f2   : > { %v8791_v38 = vmax.f32 %v8786_v16, 0.0  ;;  %v8775_v58 = vadd.f32 %v8755_v41, %v8652_v32  ;;  %v13801_v6 = vpop.f32.mrb[253].mxu0  ;;  %v9005_v16 = vld [vmem:[%s20152_s10 + $0x1f0] sm:$0xff]  ;;  %v8942_v41 = vld [vmem:[%s20152_s10 + $0x8] sm:$0xff] }
 0x8f4   : > { %8796 = vst [vmem:[#allocation4] sm:$0xff] %v8791_v38  ;;  %v8787_v12 = vadd.f32 %v11050_v49, %v8775_v58  ;;  %v14144_v58 = vpack.c.bf16 %v9005_v16, %v9003_v25  ;;  %v9168_v25 = vld [vmem:[%s20152_s10 + $0x228] sm:$0xff]  ;;  %v9170_v16 = vld [vmem:[%s20152_s10 + $0x238] sm:$0xff] }
 0x8f5   : > { %v8760_v22 = vpop.f32.mrb[254].mxu0 }
 0x8f6   : > { %v8792_v9 = vmax.f32 %v8787_v12, 0.0  ;;  %v8776_v10 = vadd.f32 %v8760_v22, %v8653_v7  ;;  %v13804_v0 = vpop.f32.mrb[255].mxu0 }
 0x8f8   : > { %8797 = vst [vmem:[#allocation4 + $0x8] sm:$0xff] %v8792_v9  ;;  %v8788_v57 = vadd.f32 %v11050_v49, %v8776_v10  ;;  %v8943_v10 = vld [vmem:[%s20152_s10 + $0x10] sm:$0xff] }
 0x8f9   : > { %v8765_v48 = vpop.f32.mrb[0].mxu0 }
 0x8fa   : > { %v8793_v55 = vmax.f32 %v8788_v57, 0.0  ;;  %v8777_v15 = vadd.f32 %v8765_v48, %v8654_v11  ;;  %v13807_v33 = vpop.f32.mrb[1].mxu0  ;;  %v9000_v11 = vld [vmem:[%s20152_s10 + $0x1c8] sm:$0xff]  ;;  %v8948_v48 = vld [vmem:[%s20152_s10 + $0x38] sm:$0xff] }
 0x8fb   : > { %v14138_v27 = vpack.c.bf16 %v9002_v31, %v9000_v11  ;;  %v8946_v57 = vld [vmem:[%s20152_s10 + $0x28] sm:$0xff]  ;;  %v8969_v31 = vld [vmem:[%s20152_s10 + $0xe0] sm:$0xff] }
 0x8fc   : > { %8798 = vst [vmem:[#allocation4 + $0x10] sm:$0xff] %v8793_v55  ;;  %v8789_v45 = vadd.f32 %v11050_v49, %v8777_v15  ;;  %v14150_v33 = vpack.c.bf16 %v8948_v48, %v8946_v57  ;;  %v9171_v48 = vld [vmem:[%s20152_s10 + $0x240] sm:$0xff] }
 0x8fd   : > { %v8770_v43 = vpop.f32.mrb[2].mxu0  ;;  %14139 = vmatprep.subr.bf16.mxu0 %v14138_v27  ;;  %v9164_v27 = vld [vmem:[%s20152_s10 + $0x208] sm:$0xff] }
 0x8fe   : > { %v8794_v20 = vmax.f32 %v8789_v45, 0.0  ;;  %v8778_v44 = vadd.f32 %v8770_v43, %v8655_v59  ;;  %v13810_v1 = vpop.f32.mrb[3].mxu0  ;;  %v9004_v59 = vld [vmem:[%s20152_s10 + $0x1e8] sm:$0xff]  ;;  %v8945_v45 = vld [vmem:[%s20152_s10 + $0x20] sm:$0xff]  ;;  %v8947_v43 = vld [vmem:[%s20152_s10 + $0x30] sm:$0xff] }
 0x8ff   : > { %v8805_v29 = vld [vmem:[#allocation4 + $0x1] sm:$0xff]  ;;  %v14142_v46 = vpack.c.bf16 %v9006_v3, %v9004_v59 }
 0x900   : > { %v8813_v13 = vld [vmem:[#allocation4 + $0x6] sm:$0xff]  ;;  %8799 = vst [vmem:[#allocation4 + $0x18] sm:$0xff] %v8794_v20  ;;  %v8790_v60 = vadd.f32 %v11050_v49, %v8778_v44  ;;  %v8809_v52 = vmax.f32 %v8791_v38, %v8805_v29  ;;  %v14140_v49 = vpack.c.bf16 %v9001_v42, %v8999_v5  ;;  %v8950_v44 = vld [vmem:[%s20152_s10 + $0x48] sm:$0xff]  ;;  %v14152_v29 = vpack.c.bf16 %v8947_v43, %v8945_v45 }
 0x901   : > { %v8817_v62 = vld [vmem:[#allocation4 + $0x7] sm:$0xff] }
 0x902   : > { %v8795_v24 = vmax.f32 %v8790_v60, 0.0  ;;  %v8821_v18 = vmax.f32 %v8813_v13, %v8817_v62  ;;  %v8944_v38 = vld [vmem:[%s20152_s10 + $0x18] sm:$0xff]  ;;  %14141 = vmatpush1.bf16.msra.mxu0 %v14140_v49  ;;  %v8949_v62 = vld [vmem:[%s20152_s10 + $0x40] sm:$0xff]  ;;  %v8951_v60 = vld [vmem:[%s20152_s10 + $0x50] sm:$0xff] }
 0x903   : > { %v8806_v39 = vld [vmem:[#allocation4 + $0x9] sm:$0xff]  ;;  %14143 = vmatprep.subr.bf16.mxu0 %v14142_v46  ;;  %v14146_v6 = vpack.c.bf16 %v8944_v38, %v8942_v41  ;;  %v8971_v5 = vld [vmem:[%s20152_s10 + $0xf0] sm:$0xff]  ;;  %v14182_v38 = vpack.c.bf16 %v9170_v16, %v9168_v25 }
 0x904   : > { %v8814_v21 = vld [vmem:[#allocation4 + $0xe] sm:$0xff]  ;;  %8800 = vst [vmem:[#allocation4 + $0x20] sm:$0xf] %v8795_v24  ;;  %v8810_v47 = vmax.f32 %v8792_v9, %v8806_v39  ;;  %v8825_v61 = vmax.f32 %v8809_v52, %v8821_v18  ;;  %v8954_v24 = vld [vmem:[%s20152_s10 + $0x68] sm:$0xff]  ;;  %v14156_v39 = vpack.c.bf16 %v8951_v60, %v8949_v62  ;;  %v14176_v59 = vpack.c.bf16 %v8971_v5, %v8969_v31  ;;  %v9165_v46 = vld [vmem:[%s20152_s10 + $0x210] sm:$0xff] }
 0x905   : > { %v8818_v63 = vld [vmem:[#allocation4 + $0xf] sm:$0xff]  ;;  %v9288_v16 = vld [vmem:[%s20152_s10 + $0x350] sm:$0xff] }
 0x906   : > { %v8822_v23 = vmax.f32 %v8814_v21, %v8818_v63  ;;  %14145 = vmatpush1.bf16.msra.mxu0 %v14144_v58  ;;  %v8941_v9 = vld [vmem:[%s20152_s10] sm:$0xff]  ;;  %v8952_v1 = vld [vmem:[%s20152_s10 + $0x58] sm:$0xff] }
 0x907   : > { %v8807_v36 = vld [vmem:[#allocation4 + $0x11] sm:$0xff]  ;;  %v8808_v35 = vld [vmem:[#allocation4 + $0x19] sm:$0x1f]  ;;  %14147 = vmatprep.subr.bf16.mxu0 %v14146_v6  ;;  %v14148_v15 = vpack.c.bf16 %v8943_v10, %v8941_v9  ;;  %v14154_v13 = vpack.c.bf16 %v8952_v1, %v8950_v44  ;;  %v8956_v52 = vld [vmem:[%s20152_s10 + $0x78] sm:$0xff] }
 0x908   : > { %v8826_v8 = vmax.f32 %v8810_v47, %v8822_v23  ;;  %v8815_v40 = vld [vmem:[#allocation4 + $0x16] sm:$0xff]  ;;  %v8811_v32 = vmax.f32 %v8793_v55, %v8807_v36  ;;  %v14158_v21 = vpack.c.bf16 %v8956_v52, %v8954_v24  ;;  %v8955_v47 = vld [vmem:[%s20152_s10 + $0x70] sm:$0xff]  ;;  %v9166_v42 = vld [vmem:[%s20152_s10 + $0x218] sm:$0xff] }
 0x909   : > { %v8819_v51 = vld [vmem:[#allocation4 + $0x17] sm:$0xff]  ;;  %v14178_v3 = vpack.c.bf16 %v9166_v42, %v9164_v27  ;;  %v9169_v6 = vld [vmem:[%s20152_s10 + $0x230] sm:$0xff]  ;;  %v9174_v10 = vld [vmem:[%s20152_s10 + $0x258] sm:$0xff] }
 0x90a   : > { %v14104_v19 = vpack.c.bf16 %v8826_v8, %v8825_v61  ;;  %v8804_v14 = vld [vmem:[#allocation4 + $0x18] sm:$0x1f]  ;;  %v8823_v53 = vmax.f32 %v8815_v40, %v8819_v51  ;;  %v8953_v63 = vld [vmem:[%s20152_s10 + $0x60] sm:$0xff]  ;;  %v8960_v61 = vld [vmem:[%s20152_s10 + $0x98] sm:$0xff] }
 0x90b   : > { %v8816_v4 = vld [vmem:[#allocation4 + $0x1e] sm:$0x1f]  ;;  %v8812_v2 = vmax.f32 %v8804_v14, %v8808_v35  ;;  %v14160_v8 = vpack.c.bf16 %v8955_v47, %v8953_v63  ;;  %v8964_v14 = vld [vmem:[%s20152_s10 + $0xb8] sm:$0xff]  ;;  %v9163_v49 = vld [vmem:[%s20152_s10 + $0x200] sm:$0xff] }
 0x90c   : > { %14105 = vmatprep.subr.bf16.mxu1 %v14104_v19  ;;  %v8820_v50 = vld [vmem:[#allocation4 + $0x1f] sm:$0x1f]  ;;  %v8827_v7 = vmax.f32 %v8811_v32, %v8823_v53  ;;  %v8961_v53 = vld [vmem:[%s20152_s10 + $0xa0] sm:$0xff]  ;;  %v14180_v41 = vpack.c.bf16 %v9165_v46, %v9163_v49 }
 0x90d   : > { %14107 = vmatpush3.bf16.msra.mxu1 %v14104_v19  ;;  %v8824_v34 = vmax.f32 %v8816_v4, %v8820_v50  ;;  %v8958_v23 = vld [vmem:[%s20152_s10 + $0x88] sm:$0xff]  ;;  %v8957_v19 = vld [vmem:[%s20152_s10 + $0x80] sm:$0xff]  ;;  %v8959_v40 = vld [vmem:[%s20152_s10 + $0x90] sm:$0xff] }
 0x90e   : > { %v14162_v36 = vpack.c.bf16 %v8960_v61, %v8958_v23  ;;  %v8962_v51 = vld [vmem:[%s20152_s10 + $0xa8] sm:$0xff]  ;;  %v14164_v35 = vpack.c.bf16 %v8959_v40, %v8957_v19  ;;  %v8963_v4 = vld [vmem:[%s20152_s10 + $0xb0] sm:$0xff]  ;;  %v9167_v58 = vld [vmem:[%s20152_s10 + $0x220] sm:$0xff] }
 0x90f   : > { %v8828_v56 = vmax.f32 %v8812_v2, %v8824_v34  ;;  %v14166_v32 = vpack.c.bf16 %v8964_v14, %v8962_v51  ;;  %v8966_v50 = vld [vmem:[%s20152_s10 + $0xc8] sm:$0xff]  ;;  %v8968_v2 = vld [vmem:[%s20152_s10 + $0xd8] sm:$0xff]  ;;  %v14168_v34 = vpack.c.bf16 %v8963_v4, %v8961_v53  ;;  %v9177_v44 = vld [vmem:[%s20152_s10 + $0x270] sm:$0xff] }
 0x910   : > { %v9172_v9 = vld [vmem:[%s20152_s10 + $0x248] sm:$0xff]  ;;  %v9179_v60 = vld [vmem:[%s20152_s10 + $0x280] sm:$0xff]  ;;  %v9181_v24 = vld [vmem:[%s20152_s10 + $0x290] sm:$0xff] }
 0x911   : > { %v14108_v26 = vpack.c.bf16 %v8828_v56, %v8827_v7  ;;  %v14170_v7 = vpack.c.bf16 %v8968_v2, %v8966_v50  ;;  %v8965_v56 = vld [vmem:[%s20152_s10 + $0xc0] sm:$0xff]  ;;  %v14186_v57 = vpack.c.bf16 %v9174_v10, %v9172_v9  ;;  %v9180_v1 = vld [vmem:[%s20152_s10 + $0x288] sm:$0xff]  ;;  %v9185_v23 = vld [vmem:[%s20152_s10 + $0x2b0] sm:$0xff] }
 0x912   : > { %v9184_v52 = vld [vmem:[%s20152_s10 + $0x2a8] sm:$0xff]  ;;  %v9183_v47 = vld [vmem:[%s20152_s10 + $0x2a0] sm:$0xff]  ;;  %v9189_v51 = vld [vmem:[%s20152_s10 + $0x2d0] sm:$0xff] }
 0x913   : > { %14110 = vmatprep.subr.msk.bf16.mxu1 %vm14109_vm2, %v14108_v26  ;;  %v9188_v61 = vld [vmem:[%s20152_s10 + $0x2c8] sm:$0xff]  ;;  %v9187_v40 = vld [vmem:[%s20152_s10 + $0x2c0] sm:$0xff]  ;;  %v9193_v50 = vld [vmem:[%s20152_s10 + $0x2f0] sm:$0xff] }
 0x914   : > { %14113 = vmatpush3.bf16.msk.msra.mxu1 %vm14109_vm2, %v14108_v26  ;;  %v8967_v26 = vld [vmem:[%s20152_s10 + $0xd0] sm:$0xff]  ;;  %v9192_v14 = vld [vmem:[%s20152_s10 + $0x2e8] sm:$0xff]  ;;  %v9191_v4 = vld [vmem:[%s20152_s10 + $0x2e0] sm:$0xff] }
 0x915   : > { %v9279_v2 = vld [vmem:[%s20152_s10 + $0x308] sm:$0xff]  ;;  %v9282_v5 = vld [vmem:[%s20152_s10 + $0x320] sm:$0xff]  ;;  %v9284_v27 = vld [vmem:[%s20152_s10 + $0x330] sm:$0xff] }
 0x916   : > { %v14216_v49 = vpack.c.bf16 %v9284_v27, %v9282_v5  ;;  %v9286_v25 = vld [vmem:[%s20152_s10 + $0x340] sm:$0xff]  ;;  %v9406_v27 = vld [vmem:[%s20152_s10 + $0x468] sm:$0xff] }
 0x917   : > { %13820 = vmatmul.mubr.msk.f32.vlgmr.msra.gmra.mrb[96].mxu1 %vm8833_vm14, %v8830_v54  ;;  %v8970_v54 = vld [vmem:[%s20152_s10 + $0xe8] sm:$0xff]  ;;  %v9290_v10 = vld [vmem:[%s20152_s10 + $0x360] sm:$0xff] }
 0x918   : > { %13822 = vmatprep.mubr.msk.f32.mxu1 %vm8833_vm14, %v8831_v37  ;;  %v8972_v37 = vld [vmem:[%s20152_s10 + $0xf8] sm:$0xff] }
 0x919   : > { %v14174_v11 = vpack.c.bf16 %v8972_v37, %v8970_v54  ;;  %v9280_v54 = vld [vmem:[%s20152_s10 + $0x310] sm:$0xff]  ;;  %v9283_v37 = vld [vmem:[%s20152_s10 + $0x328] sm:$0xff] }
 0x91b   : > { %13823 = vmatmul.mubr.msk.f32.gmra.mrb[98].mxu1 %vm8833_vm14, %v8832_v30  ;;  %v14172_v30 = vpack.c.bf16 %v8967_v26, %v8965_v56  ;;  %v9278_v26 = vld [vmem:[%s20152_s10 + $0x300] sm:$0xff] }
 0x91c   : > { %10137 = vmatprep.mubr.f32.mxu1 %v20221_v28 }
 0x9ea   : > { %v19130_v12 = vpop.f32.mrb[96].mxu1 }
 0x9eb   : > { %8936 = vst [vmem:[#allocation8 + $0x8] sm:$0xff] %v19130_v12  ;;  %v19133_v22 = vpop.f32.mrb[97].mxu1 }
 0x9ec   : > { %8935 = vst [vmem:[#allocation8] sm:$0xff] %v19133_v22 }
 0x9ee   : > { %v13824_v0 = vpop.f32.mrb[98].mxu1 }
 0x9ef   : > { %8938 = vst [vmem:[#allocation8 + $0x18] sm:$0x3] %v13824_v0  ;;  %v19148_v55 = vpop.f32.mrb[99].mxu1  ;;  %v14184_v0 = vpack.c.bf16 %v9169_v6, %v9167_v58  ;;  %v14220_v6 = vpack.c.bf16 %v9288_v16, %v9286_v25  ;;  %v9410_v25 = vld [vmem:[%s20152_s10 + $0x488] sm:$0xff]  ;;  %v9412_v16 = vld [vmem:[%s20152_s10 + $0x498] sm:$0xff] }
 0x9f0   : > { %8937 = vst [vmem:[#allocation8 + $0x10] sm:$0xff] %v19148_v55 }
 0x9f3   : > { %v8973_v20 = vld [vmem:[#allocation8 + $0x1] sm:$0xff] }
 0x9f4   : > { %9072 = vmatmul.mubr.f32.vlgmr.msra.gmra.mrb[4].mxu0 %v8973_v20  ;;  %v9175_v20 = vld [vmem:[%s20152_s10 + $0x260] sm:$0xff]  ;;  %v9161_v42 = vld [vmem:[#allocation8 + $0x2] sm:$0xff] }
 0x9f5   : > { %14149 = vmatpush1.bf16.msra.mxu0 %v14148_v15  ;;  %9077 = vmatprep.mubr.f32.mxu0 %v20221_v28  ;;  %v9173_v15 = vld [vmem:[%s20152_s10 + $0x250] sm:$0xff] }
 0x9f6   : > { %14151 = vmatprep.subr.bf16.mxu0 %v14150_v33  ;;  %v9176_v33 = vld [vmem:[%s20152_s10 + $0x268] sm:$0xff]  ;;  %v14188_v45 = vpack.c.bf16 %v9173_v15, %v9171_v48  ;;  %v9297_v48 = vld [vmem:[%s20152_s10 + $0x398] sm:$0xff] }
 0x9f7   : > { %v19176_v18 = vld [vmem:[#allocation8 + $0x9] sm:$0xff] }
 0x9f8   : > { %9078 = vmatmul.mubr.f32.gmra.mrb[6].mxu0 %v19176_v18  ;;  %v19377_v58 = vld [vmem:[#allocation8 + $0xa] sm:$0xff] }
 0x9f9   : > { %14153 = vmatpush1.bf16.msra.mxu0 %v14152_v29  ;;  %9148 = vmatprep.mubr.f32.mxu0 %v20221_v28  ;;  %v9182_v29 = vld [vmem:[%s20152_s10 + $0x298] sm:$0xff] }
 0x9fa   : > { %14155 = vmatprep.subr.bf16.mxu0 %v14154_v13  ;;  %v14192_v13 = vpack.c.bf16 %v9177_v44, %v9175_v20  ;;  %v14194_v62 = vpack.c.bf16 %v9182_v29, %v9180_v1  ;;  %v9301_v20 = vld [vmem:[%s20152_s10 + $0x3b8] sm:$0xff]  ;;  %v9298_v29 = vld [vmem:[%s20152_s10 + $0x3a0] sm:$0xff] }
 0x9fb   : > { %v9277_v5 = vld [vmem:[#allocation8 + $0xc] sm:$0xff] }
 0x9fd   : > { %14157 = vmatpush1.bf16.msra.mxu0 %v14156_v39  ;;  %v9186_v39 = vld [vmem:[%s20152_s10 + $0x2b8] sm:$0xff] }
 0x9fe   : > { %14159 = vmatprep.subr.bf16.mxu0 %v14158_v21  ;;  %v14196_v21 = vpack.c.bf16 %v9181_v24, %v9179_v60  ;;  %v14198_v63 = vpack.c.bf16 %v9186_v39, %v9184_v52  ;;  %v9305_v60 = vld [vmem:[%s20152_s10 + $0x3d8] sm:$0xff]  ;;  %v9302_v39 = vld [vmem:[%s20152_s10 + $0x3c0] sm:$0xff] }
 0xa01   : > { %14161 = vmatpush1.bf16.msra.mxu0 %v14160_v8  ;;  %v9190_v8 = vld [vmem:[%s20152_s10 + $0x2d8] sm:$0xff] }
 0xa02   : > { %14163 = vmatprep.subr.bf16.mxu0 %v14162_v36  ;;  %v14200_v36 = vpack.c.bf16 %v9185_v23, %v9183_v47  ;;  %v14202_v19 = vpack.c.bf16 %v9190_v8, %v9188_v61  ;;  %v9309_v47 = vld [vmem:[%s20152_s10 + $0x3f8] sm:$0xff]  ;;  %v9306_v8 = vld [vmem:[%s20152_s10 + $0x3e0] sm:$0xff] }
 0xa05   : > { %14165 = vmatpush1.bf16.msra.mxu0 %v14164_v35  ;;  %v9194_v35 = vld [vmem:[%s20152_s10 + $0x2f8] sm:$0xff] }
 0xa06   : > { %14167 = vmatprep.subr.bf16.mxu0 %v14166_v32  ;;  %v14204_v32 = vpack.c.bf16 %v9189_v51, %v9187_v40  ;;  %v14206_v53 = vpack.c.bf16 %v9194_v35, %v9192_v14  ;;  %v9396_v40 = vld [vmem:[%s20152_s10 + $0x418] sm:$0xff]  ;;  %v9393_v35 = vld [vmem:[%s20152_s10 + $0x400] sm:$0xff] }
 0xa09   : > { %14169 = vmatpush1.bf16.msra.mxu0 %v14168_v34  ;;  %v9281_v34 = vld [vmem:[%s20152_s10 + $0x318] sm:$0xff] }
 0xa0a   : > { %14171 = vmatprep.subr.bf16.mxu0 %v14170_v7  ;;  %v14208_v7 = vpack.c.bf16 %v9193_v50, %v9191_v4  ;;  %v14210_v56 = vpack.c.bf16 %v9281_v34, %v9279_v2  ;;  %v9400_v4 = vld [vmem:[%s20152_s10 + $0x438] sm:$0xff]  ;;  %v9397_v34 = vld [vmem:[%s20152_s10 + $0x420] sm:$0xff] }
 0xa0d   : > { %14173 = vmatpush1.bf16.msra.mxu0 %v14172_v30  ;;  %v9285_v30 = vld [vmem:[%s20152_s10 + $0x338] sm:$0xff] }
 0xa0e   : > { %14175 = vmatprep.subr.bf16.mxu0 %v14174_v11  ;;  %v14212_v11 = vpack.c.bf16 %v9280_v54, %v9278_v26  ;;  %v14214_v31 = vpack.c.bf16 %v9285_v30, %v9283_v37  ;;  %v9402_v26 = vld [vmem:[%s20152_s10 + $0x448] sm:$0xff]  ;;  %v9404_v54 = vld [vmem:[%s20152_s10 + $0x458] sm:$0xff] }
 0xa0f   : > { %v14250_v30 = vpack.c.bf16 %v9404_v54, %v9402_v26  ;;  %v9523_v26 = vld [vmem:[%s20152_s10 + $0x578] sm:$0xff] }
 0xa11   : > { %14177 = vmatpush1.bf16.msra.mxu0 %v14176_v59  ;;  %v9287_v59 = vld [vmem:[%s20152_s10 + $0x348] sm:$0xff] }
 0xa12   : > { %14179 = vmatprep.subr.bf16.mxu0 %v14178_v3  ;;  %v9289_v3 = vld [vmem:[%s20152_s10 + $0x358] sm:$0xff] }
 0xa13   : > { %v14218_v46 = vpack.c.bf16 %v9289_v3, %v9287_v59 }
 0xa14   : > { %9149 = vmatmul.mubr.f32.vlgmr.msra.gmra.mrb[4].mxu0 %v19133_v22  ;;  %v9178_v22 = vld [vmem:[%s20152_s10 + $0x278] sm:$0xff] }
 0xa15   : > { %14181 = vmatpush1.bf16.msra.mxu0 %v14180_v41  ;;  %9154 = vmatprep.mubr.f32.mxu0 %v20221_v28  ;;  %v14190_v43 = vpack.c.bf16 %v9178_v22, %v9176_v33  ;;  %v9291_v41 = vld [vmem:[%s20152_s10 + $0x368] sm:$0xff]  ;;  %v9294_v22 = vld [vmem:[%s20152_s10 + $0x380] sm:$0xff] }
 0xa16   : > { %14183 = vmatprep.subr.bf16.mxu0 %v14182_v38  ;;  %v9293_v38 = vld [vmem:[%s20152_s10 + $0x378] sm:$0xff] }
 0xa17   : > { %v14222_v9 = vpack.c.bf16 %v9293_v38, %v9291_v41  ;;  %v14258_v38 = vpack.c.bf16 %v9412_v16, %v9410_v25 }
 0xa18   : > { %9155 = vmatmul.mubr.f32.gmra.mrb[6].mxu0 %v19130_v12 }
 0xa19   : > { %14185 = vmatpush1.bf16.msra.mxu0 %v14184_v0  ;;  %9259 = vmatprep.mubr.f32.mxu0 %v20221_v28  ;;  %v9292_v0 = vld [vmem:[%s20152_s10 + $0x370] sm:$0xff] }
 0xa1a   : > { %14187 = vmatprep.subr.bf16.mxu0 %v14186_v57  ;;  %v9295_v57 = vld [vmem:[%s20152_s10 + $0x388] sm:$0xff]  ;;  %v14224_v15 = vpack.c.bf16 %v9292_v0, %v9290_v10  ;;  %v9416_v0 = vld [vmem:[%s20152_s10 + $0x4b8] sm:$0xff] }
 0xa1b   : > { %v14226_v33 = vpack.c.bf16 %v9297_v48, %v9295_v57  ;;  %v9414_v10 = vld [vmem:[%s20152_s10 + $0x4a8] sm:$0xff] }
 0xa1c   : > { %v14262_v48 = vpack.c.bf16 %v9416_v0, %v9414_v10 }
 0xa1d   : > { %14189 = vmatpush1.bf16.msra.mxu0 %v14188_v45  ;;  %v9296_v45 = vld [vmem:[%s20152_s10 + $0x390] sm:$0xff] }
 0xa1e   : > { %14191 = vmatprep.subr.bf16.mxu0 %v14190_v43  ;;  %v9299_v43 = vld [vmem:[%s20152_s10 + $0x3a8] sm:$0xff]  ;;  %v14228_v44 = vpack.c.bf16 %v9296_v45, %v9294_v22  ;;  %v9420_v45 = vld [vmem:[%s20152_s10 + $0x4d8] sm:$0xff] }
 0xa1f   : > { %v14230_v1 = vpack.c.bf16 %v9301_v20, %v9299_v43  ;;  %v9418_v22 = vld [vmem:[%s20152_s10 + $0x4c8] sm:$0xff] }
 0xa20   : > { %v14266_v20 = vpack.c.bf16 %v9420_v45, %v9418_v22 }
 0xa21   : > { %14193 = vmatpush1.bf16.msra.mxu0 %v14192_v13  ;;  %v9300_v13 = vld [vmem:[%s20152_s10 + $0x3b0] sm:$0xff] }
 0xa22   : > { %14195 = vmatprep.subr.bf16.mxu0 %v14194_v62  ;;  %v9303_v62 = vld [vmem:[%s20152_s10 + $0x3c8] sm:$0xff]  ;;  %v14232_v24 = vpack.c.bf16 %v9300_v13, %v9298_v29  ;;  %v9424_v13 = vld [vmem:[%s20152_s10 + $0x4f8] sm:$0xff] }
 0xa23   : > { %v14234_v52 = vpack.c.bf16 %v9305_v60, %v9303_v62  ;;  %v9422_v29 = vld [vmem:[%s20152_s10 + $0x4e8] sm:$0xff] }
 0xa24   : > { %v14270_v60 = vpack.c.bf16 %v9424_v13, %v9422_v29 }
 0xa25   : > { %14197 = vmatpush1.bf16.msra.mxu0 %v14196_v21  ;;  %v9304_v21 = vld [vmem:[%s20152_s10 + $0x3d0] sm:$0xff] }
 0xa26   : > { %14199 = vmatprep.subr.bf16.mxu0 %v14198_v63  ;;  %v9307_v63 = vld [vmem:[%s20152_s10 + $0x3e8] sm:$0xff]  ;;  %v14236_v23 = vpack.c.bf16 %v9304_v21, %v9302_v39  ;;  %v9511_v21 = vld [vmem:[%s20152_s10 + $0x518] sm:$0xff] }
 0xa27   : > { %v14238_v61 = vpack.c.bf16 %v9309_v47, %v9307_v63  ;;  %v9509_v39 = vld [vmem:[%s20152_s10 + $0x508] sm:$0xff] }
 0xa28   : > { %v14274_v47 = vpack.c.bf16 %v9511_v21, %v9509_v39 }
 0xa29   : > { %14201 = vmatpush1.bf16.msra.mxu0 %v14200_v36  ;;  %v9308_v36 = vld [vmem:[%s20152_s10 + $0x3f0] sm:$0xff] }
 0xa2a   : > { %14203 = vmatprep.subr.bf16.mxu0 %v14202_v19  ;;  %v9394_v19 = vld [vmem:[%s20152_s10 + $0x408] sm:$0xff]  ;;  %v14240_v51 = vpack.c.bf16 %v9308_v36, %v9306_v8  ;;  %v9515_v36 = vld [vmem:[%s20152_s10 + $0x538] sm:$0xff] }
 0xa2b   : > { %v14242_v14 = vpack.c.bf16 %v9396_v40, %v9394_v19  ;;  %v9513_v8 = vld [vmem:[%s20152_s10 + $0x528] sm:$0xff] }
 0xa2c   : > { %v14278_v40 = vpack.c.bf16 %v9515_v36, %v9513_v8  ;;  %v9634_v8 = vld [vmem:[%s20152_s10 + $0x658] sm:$0xff] }
 0xa2d   : > { %14205 = vmatpush1.bf16.msra.mxu0 %v14204_v32  ;;  %v9395_v32 = vld [vmem:[%s20152_s10 + $0x410] sm:$0xff] }
 0xa2e   : > { %14207 = vmatprep.subr.bf16.mxu0 %v14206_v53  ;;  %v9398_v53 = vld [vmem:[%s20152_s10 + $0x428] sm:$0xff]  ;;  %v14244_v50 = vpack.c.bf16 %v9395_v32, %v9393_v35  ;;  %v9391_v35 = vld [vmem:[#allocation8 + $0x5] sm:$0xff] }
 0xa2f   : > { %v14246_v2 = vpack.c.bf16 %v9400_v4, %v9398_v53  ;;  %v9517_v32 = vld [vmem:[%s20152_s10 + $0x548] sm:$0xff]  ;;  %v9519_v53 = vld [vmem:[%s20152_s10 + $0x558] sm:$0xff] }
 0xa31   : > { %14209 = vmatpush1.bf16.msra.mxu0 %v14208_v7  ;;  %v9399_v7 = vld [vmem:[%s20152_s10 + $0x430] sm:$0xff] }
 0xa32   : > { %14211 = vmatprep.subr.bf16.mxu0 %v14210_v56  ;;  %v9276_v56 = vld [vmem:[#allocation8 + $0x4] sm:$0xff]  ;;  %v14248_v37 = vpack.c.bf16 %v9399_v7, %v9397_v34  ;;  %v9392_v7 = vld [vmem:[#allocation8 + $0xd] sm:$0xff] }
 0xa33   : > { %v9518_v34 = vld [vmem:[%s20152_s10 + $0x550] sm:$0xff] }
 0xa34   : > { %9260 = vmatmul.mubr.f32.vlgmr.msra.gmra.mrb[4].mxu0 %v9161_v42  ;;  %v9408_v42 = vld [vmem:[%s20152_s10 + $0x478] sm:$0xff] }
 0xa35   : > { %14213 = vmatpush1.bf16.msra.mxu0 %v14212_v11  ;;  %9265 = vmatprep.mubr.f32.mxu0 %v20221_v28  ;;  %v9401_v11 = vld [vmem:[%s20152_s10 + $0x440] sm:$0xff]  ;;  %v14254_v3 = vpack.c.bf16 %v9408_v42, %v9406_v27 }
 0xa36   : > { %14215 = vmatprep.subr.bf16.mxu0 %v14214_v31  ;;  %v9403_v31 = vld [vmem:[%s20152_s10 + $0x450] sm:$0xff] }
 0xa37   : > { %v14252_v59 = vpack.c.bf16 %v9403_v31, %v9401_v11  ;;  %v9522_v11 = vld [vmem:[%s20152_s10 + $0x570] sm:$0xff]  ;;  %v9525_v31 = vld [vmem:[%s20152_s10 + $0x588] sm:$0xff] }
 0xa38   : > { %9266 = vmatmul.mubr.f32.gmra.mrb[6].mxu0 %v19377_v58 }
 0xa39   : > { %14217 = vmatpush1.bf16.msra.mxu0 %v14216_v49  ;;  %9374 = vmatprep.mubr.f32.mxu0 %v20221_v28  ;;  %v9405_v49 = vld [vmem:[%s20152_s10 + $0x460] sm:$0xff] }
 0xa3a   : > { %14219 = vmatprep.subr.bf16.mxu0 %v14218_v46  ;;  %v9407_v46 = vld [vmem:[%s20152_s10 + $0x470] sm:$0xff] }
 0xa3b   : > { %v14256_v41 = vpack.c.bf16 %v9407_v46, %v9405_v49  ;;  %v9529_v49 = vld [vmem:[%s20152_s10 + $0x5a8] sm:$0xff]  ;;  %v9531_v46 = vld [vmem:[%s20152_s10 + $0x5b8] sm:$0xff] }
 0xa3c   : > { %v14294_v16 = vpack.c.bf16 %v9531_v46, %v9529_v49 }
 0xa3d   : > { %14221 = vmatpush1.bf16.msra.mxu0 %v14220_v6  ;;  %v9409_v6 = vld [vmem:[%s20152_s10 + $0x480] sm:$0xff] }
 0xa3e   : > { %14223 = vmatprep.subr.bf16.mxu0 %v14222_v9  ;;  %v9411_v9 = vld [vmem:[%s20152_s10 + $0x490] sm:$0xff] }
 0xa3f   : > { %v14260_v57 = vpack.c.bf16 %v9411_v9, %v9409_v6  ;;  %v9533_v6 = vld [vmem:[%s20152_s10 + $0x5c8] sm:$0xff]  ;;  %v9535_v9 = vld [vmem:[%s20152_s10 + $0x5d8] sm:$0xff] }
 0xa40   : > { %v14298_v0 = vpack.c.bf16 %v9535_v9, %v9533_v6 }
 0xa41   : > { %14225 = vmatpush1.bf16.msra.mxu0 %v14224_v15  ;;  %v9413_v15 = vld [vmem:[%s20152_s10 + $0x4a0] sm:$0xff] }
 0xa42   : > { %14227 = vmatprep.subr.bf16.mxu0 %v14226_v33  ;;  %v9415_v33 = vld [vmem:[%s20152_s10 + $0x4b0] sm:$0xff] }
 0xa43   : > { %v14264_v43 = vpack.c.bf16 %v9415_v33, %v9413_v15  ;;  %v9537_v15 = vld [vmem:[%s20152_s10 + $0x5e8] sm:$0xff]  ;;  %v9539_v33 = vld [vmem:[%s20152_s10 + $0x5f8] sm:$0xff] }
 0xa44   : > { %v14302_v45 = vpack.c.bf16 %v9539_v33, %v9537_v15 }
 0xa45   : > { %14229 = vmatpush1.bf16.msra.mxu0 %v14228_v44  ;;  %v9417_v44 = vld [vmem:[%s20152_s10 + $0x4c0] sm:$0xff] }
 0xa46   : > { %14231 = vmatprep.subr.bf16.mxu0 %v14230_v1  ;;  %v9419_v1 = vld [vmem:[%s20152_s10 + $0x4d0] sm:$0xff] }
 0xa47   : > { %v14268_v62 = vpack.c.bf16 %v9419_v1, %v9417_v44  ;;  %v9624_v44 = vld [vmem:[%s20152_s10 + $0x608] sm:$0xff]  ;;  %v9626_v1 = vld [vmem:[%s20152_s10 + $0x618] sm:$0xff] }
 0xa48   : > { %v14306_v13 = vpack.c.bf16 %v9626_v1, %v9624_v44 }
 0xa49   : > { %14233 = vmatpush1.bf16.msra.mxu0 %v14232_v24  ;;  %v9421_v24 = vld [vmem:[%s20152_s10 + $0x4e0] sm:$0xff] }
 0xa4a   : > { %14235 = vmatprep.subr.bf16.mxu0 %v14234_v52  ;;  %v9423_v52 = vld [vmem:[%s20152_s10 + $0x4f0] sm:$0xff] }
 0xa4b   : > { %v14272_v63 = vpack.c.bf16 %v9423_v52, %v9421_v24  ;;  %v9628_v24 = vld [vmem:[%s20152_s10 + $0x628] sm:$0xff]  ;;  %v9630_v52 = vld [vmem:[%s20152_s10 + $0x638] sm:$0xff] }
 0xa4c   : > { %v14310_v21 = vpack.c.bf16 %v9630_v52, %v9628_v24 }
 0xa4d   : > { %14237 = vmatpush1.bf16.msra.mxu0 %v14236_v23  ;;  %v9508_v23 = vld [vmem:[%s20152_s10 + $0x500] sm:$0xff] }
 0xa4e   : > { %14239 = vmatprep.subr.bf16.mxu0 %v14238_v61  ;;  %v9510_v61 = vld [vmem:[%s20152_s10 + $0x510] sm:$0xff] }
 0xa4f   : > { %v14276_v19 = vpack.c.bf16 %v9510_v61, %v9508_v23  ;;  %v9506_v23 = vld [vmem:[#allocation8 + $0x6] sm:$0xff]  ;;  %v9632_v61 = vld [vmem:[%s20152_s10 + $0x648] sm:$0xff] }
 0xa51   : > { %14241 = vmatpush1.bf16.msra.mxu0 %v14240_v51  ;;  %v9512_v51 = vld [vmem:[%s20152_s10 + $0x520] sm:$0xff] }
 0xa52   : > { %14243 = vmatprep.subr.bf16.mxu0 %v14242_v14  ;;  %v9514_v14 = vld [vmem:[%s20152_s10 + $0x530] sm:$0xff] }
 0xa53   : > { %v14280_v4 = vpack.c.bf16 %v9514_v14, %v9512_v51  ;;  %v9633_v51 = vld [vmem:[%s20152_s10 + $0x650] sm:$0xff]  ;;  %v9507_v14 = vld [vmem:[#allocation8 + $0xe] sm:$0xff] }
 0xa54   : > { %9375 = vmatmul.mubr.f32.vlgmr.msra.gmra.mrb[4].mxu0 %v9276_v56  ;;  %v9521_v56 = vld [vmem:[%s20152_s10 + $0x568] sm:$0xff] }
 0xa55   : > { %14245 = vmatpush1.bf16.msra.mxu0 %v14244_v50  ;;  %9380 = vmatprep.mubr.f32.mxu0 %v20221_v28  ;;  %v14282_v50 = vpack.c.bf16 %v9519_v53, %v9517_v32  ;;  %v9638_v32 = vld [vmem:[%s20152_s10 + $0x678] sm:$0xff] }
 0xa56   : > { %14247 = vmatprep.subr.bf16.mxu0 %v14246_v2  ;;  %v9516_v2 = vld [vmem:[%s20152_s10 + $0x540] sm:$0xff] }
 0xa57   : > { %v14284_v54 = vpack.c.bf16 %v9518_v34, %v9516_v2  ;;  %v9637_v2 = vld [vmem:[%s20152_s10 + $0x670] sm:$0xff]  ;;  %v9640_v34 = vld [vmem:[%s20152_s10 + $0x688] sm:$0xff] }
 0xa58   : > { %9381 = vmatmul.mubr.f32.gmra.mrb[6].mxu0 %v9277_v5  ;;  %v9527_v5 = vld [vmem:[%s20152_s10 + $0x598] sm:$0xff] }
 0xa59   : > { %14249 = vmatpush1.bf16.msra.mxu0 %v14248_v37  ;;  %9489 = vmatprep.mubr.f32.mxu0 %v20221_v28  ;;  %v14286_v37 = vpack.c.bf16 %v9523_v26, %v9521_v56  ;;  %v14290_v42 = vpack.c.bf16 %v9527_v5, %v9525_v31 }
 0xa5a   : > { %14251 = vmatprep.subr.bf16.mxu0 %v14250_v30  ;;  %v9520_v30 = vld [vmem:[%s20152_s10 + $0x560] sm:$0xff] }
 0xa5b   : > { %v14288_v27 = vpack.c.bf16 %v9522_v11, %v9520_v30  ;;  %v9644_v30 = vld [vmem:[%s20152_s10 + $0x6a8] sm:$0xff]  ;;  %v9646_v11 = vld [vmem:[%s20152_s10 + $0x6b8] sm:$0xff] }
 0xa5c   : > { %v14326_v5 = vpack.c.bf16 %v9646_v11, %v9644_v30  ;;  %v9767_v30 = vld [vmem:[%s20152_s10 + $0x7e8] sm:$0xff]  ;;  %v9769_v11 = vld [vmem:[%s20152_s10 + $0x7f8] sm:$0xff] }
 0xa5d   : > { %14253 = vmatpush1.bf16.msra.mxu0 %v14252_v59  ;;  %v9524_v59 = vld [vmem:[%s20152_s10 + $0x580] sm:$0xff] }
 0xa5e   : > { %14255 = vmatprep.subr.bf16.mxu0 %v14254_v3  ;;  %v9526_v3 = vld [vmem:[%s20152_s10 + $0x590] sm:$0xff] }
 0xa5f   : > { %v14292_v25 = vpack.c.bf16 %v9526_v3, %v9524_v59  ;;  %v9648_v59 = vld [vmem:[%s20152_s10 + $0x6c8] sm:$0xff]  ;;  %v9650_v3 = vld [vmem:[%s20152_s10 + $0x6d8] sm:$0xff] }
 0xa60   : > { %v14330_v46 = vpack.c.bf16 %v9650_v3, %v9648_v59  ;;  %v9854_v59 = vld [vmem:[%s20152_s10 + $0x808] sm:$0xff]  ;;  %v9856_v3 = vld [vmem:[%s20152_s10 + $0x818] sm:$0xff] }
 0xa61   : > { %14257 = vmatpush1.bf16.msra.mxu0 %v14256_v41  ;;  %v9528_v41 = vld [vmem:[%s20152_s10 + $0x5a0] sm:$0xff] }
 0xa62   : > { %14259 = vmatprep.subr.bf16.mxu0 %v14258_v38  ;;  %v9530_v38 = vld [vmem:[%s20152_s10 + $0x5b0] sm:$0xff] }
 0xa63   : > { %v14296_v10 = vpack.c.bf16 %v9530_v38, %v9528_v41  ;;  %v9652_v41 = vld [vmem:[%s20152_s10 + $0x6e8] sm:$0xff]  ;;  %v9654_v38 = vld [vmem:[%s20152_s10 + $0x6f8] sm:$0xff] }
 0xa64   : > { %v14334_v9 = vpack.c.bf16 %v9654_v38, %v9652_v41  ;;  %v9858_v41 = vld [vmem:[%s20152_s10 + $0x828] sm:$0xff]  ;;  %v9860_v38 = vld [vmem:[%s20152_s10 + $0x838] sm:$0xff] }
 0xa65   : > { %14261 = vmatpush1.bf16.msra.mxu0 %v14260_v57  ;;  %v9532_v57 = vld [vmem:[%s20152_s10 + $0x5c0] sm:$0xff] }
 0xa66   : > { %14263 = vmatprep.subr.bf16.mxu0 %v14262_v48  ;;  %v9534_v48 = vld [vmem:[%s20152_s10 + $0x5d0] sm:$0xff] }
 0xa67   : > { %v14300_v22 = vpack.c.bf16 %v9534_v48, %v9532_v57  ;;  %v9739_v57 = vld [vmem:[%s20152_s10 + $0x708] sm:$0xff]  ;;  %v9741_v48 = vld [vmem:[%s20152_s10 + $0x718] sm:$0xff] }
 0xa68   : > { %v14338_v33 = vpack.c.bf16 %v9741_v48, %v9739_v57  ;;  %v9862_v57 = vld [vmem:[%s20152_s10 + $0x848] sm:$0xff]  ;;  %v9864_v48 = vld [vmem:[%s20152_s10 + $0x858] sm:$0xff] }
 0xa69   : > { %14265 = vmatpush1.bf16.msra.mxu0 %v14264_v43  ;;  %v9536_v43 = vld [vmem:[%s20152_s10 + $0x5e0] sm:$0xff] }
 0xa6a   : > { %14267 = vmatprep.subr.bf16.mxu0 %v14266_v20  ;;  %v9538_v20 = vld [vmem:[%s20152_s10 + $0x5f0] sm:$0xff] }
 0xa6b   : > { %v14304_v29 = vpack.c.bf16 %v9538_v20, %v9536_v43  ;;  %v9743_v43 = vld [vmem:[%s20152_s10 + $0x728] sm:$0xff]  ;;  %v9745_v20 = vld [vmem:[%s20152_s10 + $0x738] sm:$0xff] }
 0xa6c   : > { %v14342_v1 = vpack.c.bf16 %v9745_v20, %v9743_v43  ;;  %v9737_v43 = vld [vmem:[#allocation8 + $0x11] sm:$0xff] }
 0xa6d   : > { %14269 = vmatpush1.bf16.msra.mxu0 %v14268_v62  ;;  %v9623_v62 = vld [vmem:[%s20152_s10 + $0x600] sm:$0xff]  ;;  %v9866_v20 = vld [vmem:[%s20152_s10 + $0x868] sm:$0xff] }
 0xa6e   : > { %14271 = vmatprep.subr.bf16.mxu0 %v14270_v60  ;;  %v9625_v60 = vld [vmem:[%s20152_s10 + $0x610] sm:$0xff] }
 0xa6f   : > { %v14308_v39 = vpack.c.bf16 %v9625_v60, %v9623_v62  ;;  %v9747_v62 = vld [vmem:[%s20152_s10 + $0x748] sm:$0xff]  ;;  %v9749_v60 = vld [vmem:[%s20152_s10 + $0x758] sm:$0xff] }
 0xa70   : > { %v14346_v52 = vpack.c.bf16 %v9749_v60, %v9747_v62  ;;  %v9870_v62 = vld [vmem:[%s20152_s10 + $0x888] sm:$0xff]  ;;  %v9872_v60 = vld [vmem:[%s20152_s10 + $0x898] sm:$0xff] }
 0xa71   : > { %14273 = vmatpush1.bf16.msra.mxu0 %v14272_v63  ;;  %v9627_v63 = vld [vmem:[%s20152_s10 + $0x620] sm:$0xff] }
 0xa72   : > { %14275 = vmatprep.subr.bf16.mxu0 %v14274_v47  ;;  %v9629_v47 = vld [vmem:[%s20152_s10 + $0x630] sm:$0xff] }
 0xa73   : > { %v14312_v36 = vpack.c.bf16 %v9629_v47, %v9627_v63  ;;  %v9751_v63 = vld [vmem:[%s20152_s10 + $0x768] sm:$0xff] }
 0xa74   : > { %9490 = vmatmul.mubr.f32.vlgmr.msra.gmra.mrb[4].mxu0 %v9391_v35  ;;  %v9636_v35 = vld [vmem:[%s20152_s10 + $0x668] sm:$0xff] }
 0xa75   : > { %14277 = vmatpush1.bf16.msra.mxu0 %v14276_v19  ;;  %9495 = vmatprep.mubr.f32.mxu0 %v20221_v28  ;;  %v14314_v19 = vpack.c.bf16 %v9634_v8, %v9632_v61  ;;  %v9750_v61 = vld [vmem:[%s20152_s10 + $0x760] sm:$0xff]  ;;  %v9752_v8 = vld [vmem:[%s20152_s10 + $0x770] sm:$0xff] }
 0xa76   : > { %14279 = vmatprep.subr.bf16.mxu0 %v14278_v40  ;;  %v9631_v40 = vld [vmem:[%s20152_s10 + $0x640] sm:$0xff] }
 0xa77   : > { %v14316_v53 = vpack.c.bf16 %v9633_v51, %v9631_v40  ;;  %v9754_v51 = vld [vmem:[%s20152_s10 + $0x780] sm:$0xff] }
 0xa78   : > { %9496 = vmatmul.mubr.f32.gmra.mrb[6].mxu0 %v9392_v7  ;;  %v9642_v7 = vld [vmem:[%s20152_s10 + $0x698] sm:$0xff] }
 0xa79   : > { %14281 = vmatpush1.bf16.msra.mxu0 %v14280_v4  ;;  %9604 = vmatprep.mubr.f32.mxu0 %v20221_v28  ;;  %v14318_v4 = vpack.c.bf16 %v9638_v32, %v9636_v35  ;;  %v14322_v26 = vpack.c.bf16 %v9642_v7, %v9640_v34  ;;  %v9759_v35 = vld [vmem:[%s20152_s10 + $0x7a8] sm:$0xff]  ;;  %v9761_v32 = vld [vmem:[%s20152_s10 + $0x7b8] sm:$0xff] }
 0xa7a   : > { %14283 = vmatprep.subr.bf16.mxu0 %v14282_v50  ;;  %v9635_v50 = vld [vmem:[%s20152_s10 + $0x660] sm:$0xff]  ;;  %v9763_v34 = vld [vmem:[%s20152_s10 + $0x7c8] sm:$0xff]  ;;  %v9765_v7 = vld [vmem:[%s20152_s10 + $0x7d8] sm:$0xff] }
 0xa7b   : > { %v14320_v56 = vpack.c.bf16 %v9637_v2, %v9635_v50  ;;  %v9758_v50 = vld [vmem:[%s20152_s10 + $0x7a0] sm:$0xff]  ;;  %v9760_v2 = vld [vmem:[%s20152_s10 + $0x7b0] sm:$0xff] }
 0xa7d   : > { %14285 = vmatpush1.bf16.msra.mxu0 %v14284_v54  ;;  %v9639_v54 = vld [vmem:[%s20152_s10 + $0x680] sm:$0xff] }
 0xa7e   : > { %14287 = vmatprep.subr.bf16.mxu0 %v14286_v37  ;;  %v9641_v37 = vld [vmem:[%s20152_s10 + $0x690] sm:$0xff] }
 0xa7f   : > { %v14324_v31 = vpack.c.bf16 %v9641_v37, %v9639_v54  ;;  %v9762_v54 = vld [vmem:[%s20152_s10 + $0x7c0] sm:$0xff]  ;;  %v9764_v37 = vld [vmem:[%s20152_s10 + $0x7d0] sm:$0xff] }
 0xa81   : > { %14289 = vmatpush1.bf16.msra.mxu0 %v14288_v27  ;;  %v9643_v27 = vld [vmem:[%s20152_s10 + $0x6a0] sm:$0xff] }
 0xa82   : > { %14291 = vmatprep.subr.bf16.mxu0 %v14290_v42  ;;  %v9645_v42 = vld [vmem:[%s20152_s10 + $0x6b0] sm:$0xff] }
 0xa83   : > { %v14328_v49 = vpack.c.bf16 %v9645_v42, %v9643_v27  ;;  %v9766_v27 = vld [vmem:[%s20152_s10 + $0x7e0] sm:$0xff]  ;;  %v9768_v42 = vld [vmem:[%s20152_s10 + $0x7f0] sm:$0xff] }
 0xa85   : > { %14293 = vmatpush1.bf16.msra.mxu0 %v14292_v25  ;;  %v9647_v25 = vld [vmem:[%s20152_s10 + $0x6c0] sm:$0xff] }
 0xa86   : > { %14295 = vmatprep.subr.bf16.mxu0 %v14294_v16  ;;  %v9649_v16 = vld [vmem:[%s20152_s10 + $0x6d0] sm:$0xff] }
 0xa87   : > { %v14332_v6 = vpack.c.bf16 %v9649_v16, %v9647_v25  ;;  %v9853_v25 = vld [vmem:[%s20152_s10 + $0x800] sm:$0xff]  ;;  %v9855_v16 = vld [vmem:[%s20152_s10 + $0x810] sm:$0xff] }
 0xa89   : > { %14297 = vmatpush1.bf16.msra.mxu0 %v14296_v10  ;;  %v9651_v10 = vld [vmem:[%s20152_s10 + $0x6e0] sm:$0xff] }
 0xa8a   : > { %14299 = vmatprep.subr.bf16.mxu0 %v14298_v0  ;;  %v9653_v0 = vld [vmem:[%s20152_s10 + $0x6f0] sm:$0xff] }
 0xa8b   : > { %v14336_v15 = vpack.c.bf16 %v9653_v0, %v9651_v10  ;;  %v9857_v10 = vld [vmem:[%s20152_s10 + $0x820] sm:$0xff]  ;;  %v9859_v0 = vld [vmem:[%s20152_s10 + $0x830] sm:$0xff] }
 0xa8d   : > { %14301 = vmatpush1.bf16.msra.mxu0 %v14300_v22  ;;  %v9738_v22 = vld [vmem:[%s20152_s10 + $0x700] sm:$0xff] }
 0xa8e   : > { %14303 = vmatprep.subr.bf16.mxu0 %v14302_v45  ;;  %v9740_v45 = vld [vmem:[%s20152_s10 + $0x710] sm:$0xff] }
 0xa8f   : > { %v14340_v44 = vpack.c.bf16 %v9740_v45, %v9738_v22  ;;  %v9861_v22 = vld [vmem:[%s20152_s10 + $0x840] sm:$0xff]  ;;  %v9863_v45 = vld [vmem:[%s20152_s10 + $0x850] sm:$0xff] }
 0xa91   : > { %14305 = vmatpush1.bf16.msra.mxu0 %v14304_v29  ;;  %v9742_v29 = vld [vmem:[%s20152_s10 + $0x720] sm:$0xff] }
 0xa92   : > { %14307 = vmatprep.subr.bf16.mxu0 %v14306_v13  ;;  %v9744_v13 = vld [vmem:[%s20152_s10 + $0x730] sm:$0xff] }
 0xa93   : > { %v14344_v24 = vpack.c.bf16 %v9744_v13, %v9742_v29  ;;  %v9865_v29 = vld [vmem:[%s20152_s10 + $0x860] sm:$0xff]  ;;  %v9867_v13 = vld [vmem:[%s20152_s10 + $0x870] sm:$0xff] }
 0xa94   : > { %9605 = vmatmul.mubr.f32.vlgmr.msra.gmra.mrb[4].mxu0 %v9506_v23 }
 0xa95   : > { %14309 = vmatpush1.bf16.msra.mxu0 %v14308_v39  ;;  %9610 = vmatprep.mubr.f32.mxu0 %v20221_v28  ;;  %v9746_v39 = vld [vmem:[%s20152_s10 + $0x740] sm:$0xff] }
 0xa96   : > { %14311 = vmatprep.subr.bf16.mxu0 %v14310_v21  ;;  %v9748_v21 = vld [vmem:[%s20152_s10 + $0x750] sm:$0xff] }
 0xa97   : > { %v14348_v47 = vpack.c.bf16 %v9748_v21, %v9746_v39  ;;  %v9869_v39 = vld [vmem:[%s20152_s10 + $0x880] sm:$0xff]  ;;  %v9871_v21 = vld [vmem:[%s20152_s10 + $0x890] sm:$0xff] }
 0xa98   : > { %9611 = vmatmul.mubr.f32.gmra.mrb[6].mxu0 %v9507_v14  ;;  %v9756_v14 = vld [vmem:[%s20152_s10 + $0x790] sm:$0xff] }
 0xa99   : > { %14313 = vmatpush1.bf16.msra.mxu0 %v14312_v36  ;;  %9719 = vmatprep.mubr.f32.mxu0 %v20221_v28  ;;  %v9755_v36 = vld [vmem:[%s20152_s10 + $0x788] sm:$0xff] }
 0xa9a   : > { %14315 = vmatprep.subr.bf16.mxu0 %v14314_v19  ;;  %v14352_v19 = vpack.c.bf16 %v9752_v8, %v9750_v61  ;;  %v9873_v61 = vld [vmem:[%s20152_s10 + $0x8a0] sm:$0xff]  ;;  %v9875_v8 = vld [vmem:[%s20152_s10 + $0x8b0] sm:$0xff] }
 0xa9d   : > { %14317 = vmatpush1.bf16.msra.mxu0 %v14316_v53  ;;  %v14356_v53 = vpack.c.bf16 %v9756_v14, %v9754_v51  ;;  %v9877_v51 = vld [vmem:[%s20152_s10 + $0x8c0] sm:$0xff]  ;;  %v9879_v14 = vld [vmem:[%s20152_s10 + $0x8d0] sm:$0xff] }
 0xa9e   : > { %14319 = vmatprep.subr.bf16.mxu0 %v14318_v4  ;;  %v14358_v4 = vpack.c.bf16 %v9761_v32, %v9759_v35  ;;  %v9882_v35 = vld [vmem:[%s20152_s10 + $0x8e8] sm:$0xff]  ;;  %v9884_v32 = vld [vmem:[%s20152_s10 + $0x8f8] sm:$0xff] }
 0xaa1   : > { %14321 = vmatpush1.bf16.msra.mxu0 %v14320_v56  ;;  %v14360_v56 = vpack.c.bf16 %v9760_v2, %v9758_v50  ;;  %v9881_v50 = vld [vmem:[%s20152_s10 + $0x8e0] sm:$0xff]  ;;  %v9883_v2 = vld [vmem:[%s20152_s10 + $0x8f0] sm:$0xff] }
 0xaa2   : > { %14323 = vmatprep.subr.bf16.mxu0 %v14322_v26  ;;  %v14362_v26 = vpack.c.bf16 %v9765_v7, %v9763_v34  ;;  %v14400_v34 = vpack.c.bf16 %v9883_v2, %v9881_v50  ;;  %v9852_v7 = vld [vmem:[#allocation8 + $0x12] sm:$0xff] }
 0xaa3   : > { %v10160_v50 = vld [vmem:[%s20155_s13 + $0x80] sm:$0xff]  ;;  %v10161_v2 = vld [vmem:[%s20155_s13 + $0x88] sm:$0xff] }
 0xaa5   : > { %14325 = vmatpush1.bf16.msra.mxu0 %v14324_v31  ;;  %v14364_v31 = vpack.c.bf16 %v9764_v37, %v9762_v54  ;;  %v9966_v37 = vld [vmem:[%s20153_s11] sm:$0x3] }
 0xaa6   : > { %14327 = vmatprep.subr.bf16.mxu0 %v14326_v5  ;;  %v14366_v5 = vpack.c.bf16 %v9769_v11, %v9767_v30 }
 0xaa9   : > { %14329 = vmatpush1.bf16.msra.mxu0 %v14328_v49  ;;  %v14368_v49 = vpack.c.bf16 %v9768_v42, %v9766_v27 }
 0xaaa   : > { %14331 = vmatprep.subr.bf16.mxu0 %v14330_v46  ;;  %v14370_v46 = vpack.c.bf16 %v9856_v3, %v9854_v59 }
 0xaad   : > { %14333 = vmatpush1.bf16.msra.mxu0 %v14332_v6  ;;  %v14372_v6 = vpack.c.bf16 %v9855_v16, %v9853_v25 }
 0xaae   : > { %14335 = vmatprep.subr.bf16.mxu0 %v14334_v9  ;;  %v14374_v9 = vpack.c.bf16 %v9860_v38, %v9858_v41 }
 0xab1   : > { %14337 = vmatpush1.bf16.msra.mxu0 %v14336_v15  ;;  %v14376_v15 = vpack.c.bf16 %v9859_v0, %v9857_v10 }
 0xab2   : > { %14339 = vmatprep.subr.bf16.mxu0 %v14338_v33  ;;  %v14378_v33 = vpack.c.bf16 %v9864_v48, %v9862_v57 }
 0xab4   : > { %9720 = vmatmul.mubr.f32.vlgmr.msra.gmra.mrb[4].mxu0 %v19130_v12  ;;  %v9753_v12 = vld [vmem:[%s20152_s10 + $0x778] sm:$0xff] }
 0xab5   : > { %14341 = vmatpush1.bf16.msra.mxu0 %v14340_v44  ;;  %9725 = vmatprep.mubr.f32.mxu0 %v20221_v28  ;;  %v14350_v23 = vpack.c.bf16 %v9753_v12, %v9751_v63  ;;  %v14380_v44 = vpack.c.bf16 %v9863_v45, %v9861_v22  ;;  %v9874_v63 = vld [vmem:[%s20152_s10 + $0x8a8] sm:$0xff]  ;;  %v9876_v12 = vld [vmem:[%s20152_s10 + $0x8b8] sm:$0xff] }
 0xab6   : > { %14343 = vmatprep.subr.bf16.mxu0 %v14342_v1 }
 0xab8   : > { %9726 = vmatmul.mubr.f32.gmra.mrb[6].mxu0 %v19148_v55  ;;  %v9757_v55 = vld [vmem:[%s20152_s10 + $0x798] sm:$0xff] }
 0xab9   : > { %14345 = vmatpush1.bf16.msra.mxu0 %v14344_v24  ;;  %9834 = vmatprep.mubr.f32.mxu0 %v20221_v28  ;;  %v14354_v40 = vpack.c.bf16 %v9757_v55, %v9755_v36  ;;  %v14384_v24 = vpack.c.bf16 %v9867_v13, %v9865_v29  ;;  %v9878_v36 = vld [vmem:[%s20152_s10 + $0x8c8] sm:$0xff]  ;;  %v9880_v55 = vld [vmem:[%s20152_s10 + $0x8d8] sm:$0xff] }
 0xaba   : > { %14347 = vmatprep.subr.bf16.mxu0 %v14346_v52  ;;  %v14386_v52 = vpack.c.bf16 %v9872_v60, %v9870_v62 }
 0xabd   : > { %14349 = vmatpush1.bf16.msra.mxu0 %v14348_v47  ;;  %v14388_v47 = vpack.c.bf16 %v9871_v21, %v9869_v39 }
 0xabe   : > { %14351 = vmatprep.subr.bf16.mxu0 %v14350_v23  ;;  %v14390_v23 = vpack.c.bf16 %v9876_v12, %v9874_v63 }
 0xac1   : > { %14353 = vmatpush1.bf16.msra.mxu0 %v14352_v19  ;;  %v14392_v19 = vpack.c.bf16 %v9875_v8, %v9873_v61 }
 0xac2   : > { %14355 = vmatprep.subr.bf16.mxu0 %v14354_v40  ;;  %v14394_v40 = vpack.c.bf16 %v9880_v55, %v9878_v36 }
 0xac5   : > { %14357 = vmatpush1.bf16.msra.mxu0 %v14356_v53  ;;  %v14396_v53 = vpack.c.bf16 %v9879_v14, %v9877_v51 }
 0xac6   : > { %14359 = vmatprep.subr.bf16.mxu0 %v14358_v4  ;;  %v14398_v4 = vpack.c.bf16 %v9884_v32, %v9882_v35 }
 0xac9   : > { %14361 = vmatpush1.bf16.msra.mxu0 %v14360_v56  ;;  %v9968_v56 = vlaneseq }
 0xaca   : > { %14363 = vmatprep.subr.bf16.mxu0 %v14362_v26 }
 0xacb   : > { %v9969_v26 = vshrl.u32 %v9968_v56, 7 }
 0xacd   : > { %14365 = vmatpush1.bf16.msra.mxu0 %v14364_v31  ;;  %v9970_v54 = vsub.s32 0, %v9969_v26  ;;  %v9974_v30 = vsub.s32 1, %v9969_v26 }
 0xace   : > { %14367 = vmatprep.subr.bf16.mxu0 %v14366_v5 }
 0xacf   : > { %v9971_v11 = vrot.slane %v9966_v37, %v9970_v54  ;;  %v9975_v31 = vrot.slane %v9966_v37, %v9974_v30  ;;  %v14408_v37 = vpack.c.bf16 %v10161_v2, %v10160_v50  ;;  %v10144_v30 = vld [vmem:[%s20155_s13] sm:$0xff]  ;;  %v10253_v2 = vld [vmem:[%s20157_s15 + $0x28] sm:$0xff] }
 0xad0   : > { %v10252_v50 = vld [vmem:[%s20157_s15 + $0x20] sm:$0xff] }
 0xad1   : > { %14369 = vmatpush1.bf16.msra.mxu0 %v14368_v49 }
 0xad2   : > { %14371 = vmatprep.subr.bf16.mxu0 %v14370_v46 }
 0xad4   : > { %9835 = vmatmul.mubr.f32.vlgmr.msra.gmra.mrb[4].mxu0 %v19176_v18  ;;  %v9868_v18 = vld [vmem:[%s20152_s10 + $0x878] sm:$0xff] }
 0xad5   : > { %14373 = vmatpush1.bf16.msra.mxu0 %v14372_v6  ;;  %9840 = vmatprep.mubr.f32.mxu0 %v20221_v28  ;;  %v14382_v1 = vpack.c.bf16 %v9868_v18, %v9866_v20 }
 0xad6   : > { %14375 = vmatprep.subr.bf16.mxu0 %v14374_v9 }
 0xad8   : > { %9841 = vmatmul.mubr.f32.gmra.mrb[6].mxu0 %v9737_v43 }
 0xad9   : > { %14377 = vmatpush1.bf16.msra.mxu0 %v14376_v15  ;;  %9949 = vmatprep.mubr.f32.mxu0 %v20221_v28 }
 0xada   : > { %14379 = vmatprep.subr.bf16.mxu0 %v14378_v33 }
 0xadd   : > { %14381 = vmatpush1.bf16.msra.mxu0 %v14380_v44 }
 0xade   : > { %14383 = vmatprep.subr.bf16.mxu0 %v14382_v1 }
 0xae1   : > { %14385 = vmatpush1.bf16.msra.mxu0 %v14384_v24 }
 0xae2   : > { %14387 = vmatprep.subr.bf16.mxu0 %v14386_v52 }
 0xae5   : > { %14389 = vmatpush1.bf16.msra.mxu0 %v14388_v47 }
 0xae6   : > { %14391 = vmatprep.subr.bf16.mxu0 %v14390_v23 }
 0xae9   : > { %14393 = vmatpush1.bf16.msra.mxu0 %v14392_v19 }
 0xaea   : > { %14395 = vmatprep.subr.bf16.mxu0 %v14394_v40 }
 0xaed   : > { %14397 = vmatpush1.bf16.msra.mxu0 %v14396_v53 }
 0xaee   : > { %14399 = vmatprep.subr.bf16.mxu0 %v14398_v4 }
 0xaf1   : > { %14401 = vmatpush1.bf16.msra.mxu0 %v14400_v34 }
 0xaf4   : > { %9950 = vmatmul.mubr.f32.vlgmr.msra.gmra.mrb[4].mxu0 %v19377_v58 }
 0xaf5   : > { %9955 = vmatprep.mubr.f32.mxu0 %v20221_v28 }
 0xaf8   : > { %9956 = vmatmul.mubr.f32.gmra.mrb[6].mxu0 %v9852_v7 }
 0xbc7   : > { %v9951_v5 = vpop.f32.mrb[4].mxu0 }
 0xbc8   : > { %v9978_v27 = vadd.f32 %v9971_v11, %v9951_v5  ;;  %v9953_v42 = vpop.f32.mrb[5].mxu0  ;;  %v10163_v5 = vld [vmem:[%s20155_s13 + $0x98] sm:$0xff] }
 0xbc9   : > { %v9979_v59 = vadd.f32 %v9975_v31, %v9953_v42 }
 0xbca   : > { %v9982_v3 = vmax.f32 %v9978_v27, 0.0  ;;  %v10062_v27 = vld [vmem:[%s20154_s12] sm:$0x1] }
 0xbcb   : > { %v9983_v58 = vmax.f32 %v9979_v59, 0.0  ;;  %v9957_v49 = vpop.f32.mrb[6].mxu0 }
 0xbcc   : > { %9986 = vst [vmem:[#allocation5] sm:$0xff] %v9982_v3  ;;  %v9980_v46 = vadd.f32 %v9971_v11, %v9957_v49  ;;  %v9959_v25 = vpop.f32.mrb[7].mxu0  ;;  %v10145_v11 = vld [vmem:[%s20155_s13 + $0x8] sm:$0xff]  ;;  %v10164_v49 = vld [vmem:[%s20155_s13 + $0xa0] sm:$0xff] }
 0xbcd   : > { %9987 = vst [vmem:[#allocation5 + $0x8] sm:$0xff] %v9983_v58  ;;  %v9981_v16 = vadd.f32 %v9975_v31, %v9959_v25  ;;  %v10162_v31 = vld [vmem:[%s20155_s13 + $0x90] sm:$0xff]  ;;  %v14410_v42 = vpack.c.bf16 %v10145_v11, %v10144_v30 }
 0xbce   : > { %v9984_v41 = vmax.f32 %v9980_v46, 0.0  ;;  %v14412_v59 = vpack.c.bf16 %v10163_v5, %v10162_v31  ;;  %v10165_v46 = vld [vmem:[%s20155_s13 + $0xa8] sm:$0xff]  ;;  %v10258_v11 = vld [vmem:[%s20157_s15 + $0x50] sm:$0xff]  ;;  %v10259_v31 = vld [vmem:[%s20157_s15 + $0x58] sm:$0xff] }
 0xbcf   : > { %v9985_v38 = vmax.f32 %v9981_v16, 0.0  ;;  %v14416_v16 = vpack.c.bf16 %v10165_v46, %v10164_v49  ;;  %v14456_v5 = vpack.c.bf16 %v10259_v31, %v10258_v11 }
 0xbd0   : > { %9988 = vst [vmem:[#allocation5 + $0x10] sm:$0xff] %v9984_v41  ;;  %v10030_v15 = vrot.slane %v9984_v41, 1  ;;  %v10148_v41 = vld [vmem:[%s20155_s13 + $0x20] sm:$0xff] }
 0xbd1   : > { %9989 = vst [vmem:[#allocation5 + $0x18] sm:$0xff] %v9985_v38  ;;  %v10033_v57 = vrot.slane %v9985_v38, 1  ;;  %v10149_v38 = vld [vmem:[%s20155_s13 + $0x28] sm:$0xff] }
 0xbd3   : > { %v10021_v6 = vld [vmem:[#allocation5] sm:$0xe0] }
 0xbd4   : > { %v10022_v9 = vld [vmem:[#allocation5 + $0x8] sm:$0xe0]  ;;  %v10029_v48 = vrot.slane %v10021_v6, 1  ;;  %v9994_v33 = vld [vmem:[#allocation5] sm:$0xfe]  ;;  %v10166_v6 = vld [vmem:[%s20155_s13 + $0xb0] sm:$0xff] }
 0xbd5   : > { %v9995_v10 = vld [vmem:[#allocation5 + $0x8] sm:$0xfe]  ;;  %v10032_v0 = vrot.slane %v10022_v9, 1  ;;  %v10017_v22 = vld [vmem:[#allocation5] sm:$0xf0]  ;;  %v10003_v21 = vrot.slane %v9994_v33, 1 }
 0xbd6   : > { %v10018_v45 = vld [vmem:[#allocation5 + $0x8] sm:$0xf0]  ;;  %v10031_v44 = vsel %vm10002_vm3, %v10029_v48, %v10030_v15  ;;  %v10006_v29 = vrot.slane %v9995_v10, 1  ;;  %v10167_v9 = vld [vmem:[%s20155_s13 + $0xb8] sm:$0xff]  ;;  %v14418_v10 = vpack.c.bf16 %v10149_v38, %v10148_v41  ;;  %v10169_v33 = vld [vmem:[%s20155_s13 + $0xc8] sm:$0xff] }
 0xbd7   : > { %v10034_v43 = vsel %vm10002_vm3, %v10032_v0, %v10033_v57  ;;  %v9996_v20 = vld [vmem:[#allocation5 + $0x10] sm:$0xf]  ;;  %v10039_v60 = vmax.f32 %v10017_v22, %v10031_v44  ;;  %v14420_v0 = vpack.c.bf16 %v10167_v9, %v10166_v6  ;;  %v10151_v48 = vld [vmem:[%s20155_s13 + $0x38] sm:$0xff]  ;;  %v10336_v38 = vld [vmem:[%s20159_s17] sm:$0xff] }
 0xbd8   : > { %v10019_v18 = vld [vmem:[#allocation5 + $0x10] sm:$0x7f]  ;;  %v9997_v1 = vld [vmem:[#allocation5 + $0x18] sm:$0xf]  ;;  %v10040_v62 = vmax.f32 %v10018_v45, %v10034_v43  ;;  %v10004_v63 = vrot.slane %v9996_v20, 1  ;;  %v10152_v43 = vld [vmem:[%s20155_s13 + $0x40] sm:$0xff] }
 0xbd9   : > { %v10020_v13 = vld [vmem:[#allocation5 + $0x18] sm:$0x7f]  ;;  %v10041_v24 = vmax.f32 %v10019_v18, %v10030_v15  ;;  %v10007_v52 = vrot.slane %v9997_v1, 1  ;;  %v10048_v23 = vrot.slane %v10039_v60, 4  ;;  %v9992_v19 = vld [vmem:[#allocation5 + $0x10] sm:$0x7] }
 0xbda   : > { %v10042_v39 = vmax.f32 %v10020_v13, %v10033_v57  ;;  %v9993_v12 = vld [vmem:[#allocation5 + $0x18] sm:$0x7]  ;;  %v10051_v47 = vrot.slane %v10040_v62, 4  ;;  %v10005_v40 = vsel %vm10002_vm3, %v10003_v21, %v10004_v63  ;;  %v10015_v35 = vmax.f32 %v9992_v19, %v10004_v63  ;;  %v10168_v15 = vld [vmem:[%s20155_s13 + $0xc0] sm:$0xff]  ;;  %v10153_v20 = vld [vmem:[%s20155_s13 + $0x48] sm:$0xff] }
 0xbdb   : > { %v10049_v61 = vrot.slane %v10041_v24, 4  ;;  %v10008_v8 = vsel %vm10002_vm3, %v10006_v29, %v10007_v52  ;;  %v10016_v36 = vmax.f32 %v9993_v12, %v10007_v52  ;;  %v10013_v14 = vmax.f32 %v9982_v3, %v10005_v40  ;;  %v10146_v3 = vld [vmem:[%s20155_s13 + $0x10] sm:$0xff]  ;;  %v10171_v44 = vld [vmem:[%s20155_s13 + $0xd8] sm:$0xff]  ;;  %v10172_v60 = vld [vmem:[%s20155_s13 + $0xe0] sm:$0xff] }
 0xbdc   : > { %v10052_v55 = vrot.slane %v10042_v39, 4  ;;  %v10014_v51 = vmax.f32 %v9983_v58, %v10008_v8  ;;  %v10147_v58 = vld [vmem:[%s20155_s13 + $0x18] sm:$0xff]  ;;  %v10150_v57 = vld [vmem:[%s20155_s13 + $0x30] sm:$0xff]  ;;  %v14424_v45 = vpack.c.bf16 %v10169_v33, %v10168_v15  ;;  %v14426_v1 = vpack.c.bf16 %v10153_v20, %v10152_v43  ;;  %v10173_v24 = vld [vmem:[%s20155_s13 + $0xe8] sm:$0xff] }
 0xbdd   : > { %v10050_v32 = vsel %vm10047_vm4, %v10048_v23, %v10049_v61  ;;  %v10060_v56 = vmax.f32 %v10015_v35, %v10049_v61  ;;  %v14414_v25 = vpack.c.bf16 %v10147_v58, %v10146_v3  ;;  %v14422_v22 = vpack.c.bf16 %v10151_v48, %v10150_v57  ;;  %v10170_v18 = vld [vmem:[%s20155_s13 + $0xd0] sm:$0xff]  ;;  %v10155_v62 = vld [vmem:[%s20155_s13 + $0x58] sm:$0xff]  ;;  %v10156_v21 = vld [vmem:[%s20155_s13 + $0x60] sm:$0xff] }
 0xbde   : > { %v10053_v53 = vsel %vm10047_vm4, %v10051_v47, %v10052_v55  ;;  %v10061_v4 = vmax.f32 %v10016_v36, %v10052_v55  ;;  %v10058_v7 = vmax.f32 %v10013_v14, %v10050_v32  ;;  %v14428_v29 = vpack.c.bf16 %v10171_v44, %v10170_v18  ;;  %v10154_v13 = vld [vmem:[%s20155_s13 + $0x50] sm:$0xff]  ;;  %v10157_v63 = vld [vmem:[%s20155_s13 + $0x68] sm:$0xff]  ;;  %v10175_v47 = vld [vmem:[%s20155_s13 + $0xf8] sm:$0xff] }
 0xbdf   : > { %v10059_v34 = vmax.f32 %v10014_v51, %v10053_v53  ;;  %v14430_v52 = vpack.c.bf16 %v10155_v62, %v10154_v13  ;;  %v14432_v39 = vpack.c.bf16 %v10173_v24, %v10172_v60  ;;  %v10174_v12 = vld [vmem:[%s20155_s13 + $0xf0] sm:$0xff]  ;;  %v14434_v23 = vpack.c.bf16 %v10157_v63, %v10156_v21  ;;  %v10159_v36 = vld [vmem:[%s20155_s13 + $0x78] sm:$0xff]  ;;  %v10248_v19 = vld [vmem:[%s20157_s15] sm:$0xff] }
 0xbe0   : > { %v14405_v54 = vpack.c.bf16 %v10060_v56, %v10058_v7  ;;  %v14436_v61 = vpack.c.bf16 %v10175_v47, %v10174_v12  ;;  %v10158_v8 = vld [vmem:[%s20155_s13 + $0x70] sm:$0xff]  ;;  %v10249_v40 = vld [vmem:[%s20157_s15 + $0x8] sm:$0xff]  ;;  %v10251_v53 = vld [vmem:[%s20157_s15 + $0x18] sm:$0xff] }
 0xbe1   : > { %v14402_v26 = vpack.c.bf16 %v10061_v4, %v10059_v34  ;;  %v14438_v55 = vpack.c.bf16 %v10159_v36, %v10158_v8  ;;  %v14441_v14 = vpack.c.bf16 %v10249_v40, %v10248_v19  ;;  %v10250_v32 = vld [vmem:[%s20157_s15 + $0x10] sm:$0xff]  ;;  %v14447_v34 = vpack.c.bf16 %v10253_v2, %v10252_v50  ;;  %v10255_v56 = vld [vmem:[%s20157_s15 + $0x38] sm:$0xff]  ;;  %v10337_v6 = vld [vmem:[%s20159_s17 + $0x8] sm:$0xff] }
 0xbe2   : > { %v14444_v4 = vpack.c.bf16 %v10251_v53, %v10250_v32  ;;  %v10254_v7 = vld [vmem:[%s20157_s15 + $0x30] sm:$0xff]  ;;  %v10263_v58 = vld [vmem:[%s20157_s15 + $0x78] sm:$0xff]  ;;  %v10340_v33 = vld [vmem:[%s20159_s17 + $0x20] sm:$0xff] }
 0xbe3   : > { %14404 = vmatprep.subr.msk.bf16.mxu1 %vm14403_vm5, %v14402_v26  ;;  %v14450_v26 = vpack.c.bf16 %v10255_v56, %v10254_v7  ;;  %v10338_v57 = vld [vmem:[%s20159_s17 + $0x10] sm:$0xff]  ;;  %v10339_v48 = vld [vmem:[%s20159_s17 + $0x18] sm:$0xff]  ;;  %v10264_v18 = vld [vmem:[%s20158_s16] sm:$0x1] }
 0xbe4   : > { %14407 = vmatpush1.bf16.msk.msra.mxu1 %vm14403_vm5, %v14405_v54  ;;  %v10256_v54 = vld [vmem:[%s20157_s15 + $0x40] sm:$0xff]  ;;  %v14468_v15 = vpack.c.bf16 %v10339_v48, %v10338_v57  ;;  %v10343_v43 = vld [vmem:[%s20159_s17 + $0x38] sm:$0xff] }
 0xbe5   : > { %14409 = vmatprep.subr.bf16.mxu1 %v14408_v37  ;;  %v10257_v37 = vld [vmem:[%s20157_s15 + $0x48] sm:$0xff] }
 0xbe6   : > { %v14453_v30 = vpack.c.bf16 %v10257_v37, %v10256_v54 }
 0xbe7   : > { %11058 = vmatmul.mubr.msk.f32.vlgmr.msra.gmra.mrb[100].mxu1 %vm10063_vm0, %v10062_v27  ;;  %v10260_v27 = vld [vmem:[%s20157_s15 + $0x60] sm:$0xff] }
 0xbe8   : > { %14411 = vmatpush3.bf16.msra.mxu1 %v14410_v42  ;;  %v10261_v42 = vld [vmem:[%s20157_s15 + $0x68] sm:$0xff] }
 0xbe9   : > { %14413 = vmatprep.subr.bf16.mxu1 %v14412_v59  ;;  %v10262_v59 = vld [vmem:[%s20157_s15 + $0x70] sm:$0xff]  ;;  %v14459_v3 = vpack.c.bf16 %v10261_v42, %v10260_v27 }
 0xbea   : > { %v14462_v49 = vpack.c.bf16 %v10263_v58, %v10262_v59 }
 0xbec   : > { %14415 = vmatpush3.bf16.msra.mxu1 %v14414_v25  ;;  %v10176_v25 = vld [vmem:[%s20156_s14] sm:$0x1] }
 0xbed   : > { %14417 = vmatprep.subr.bf16.mxu1 %v14416_v16 }
 0xbf0   : > { %14419 = vmatpush3.bf16.msra.mxu1 %v14418_v10  ;;  %v14465_v10 = vpack.c.bf16 %v10337_v6, %v10336_v38 }
 0xbf1   : > { %14421 = vmatprep.subr.bf16.mxu1 %v14420_v0 }
 0xbf4   : > { %14423 = vmatpush3.bf16.msra.mxu1 %v14422_v22  ;;  %v10341_v22 = vld [vmem:[%s20159_s17 + $0x28] sm:$0xff] }
 0xbf5   : > { %14425 = vmatprep.subr.bf16.mxu1 %v14424_v45  ;;  %v14471_v45 = vpack.c.bf16 %v10341_v22, %v10340_v33 }
 0xbf8   : > { %14427 = vmatpush3.bf16.msra.mxu1 %v14426_v1 }
 0xbf9   : > { %14429 = vmatprep.subr.bf16.mxu1 %v14428_v29 }
 0xbfc   : > { %14431 = vmatpush3.bf16.msra.mxu1 %v14430_v52 }
 0xbfd   : > { %14433 = vmatprep.subr.bf16.mxu1 %v14432_v39 }
 0xc00   : > { %14435 = vmatpush3.bf16.msra.mxu1 %v14434_v23 }
 0xc01   : > { %14437 = vmatprep.subr.bf16.mxu1 %v14436_v61 }
 0xc04   : > { %14439 = vmatpush3.bf16.msra.mxu1 %v14438_v55 }
 0xc05   : > { %14440 = vmatprep.subr.bf16.mxu1 %v14538_v17 }
 0xcba   : > { %v10139_v51 = vpop.f32.mrb[100].mxu1 }
 0xcbb   : > { %v10141_v35 = vpop.f32.mrb[101].mxu1 }
 0xcbc   : > { %10241 = vmatprep.mubr.f32.mxu1 %v10141_v35 }
 0xcbd   : > { %10242 = vmatmul.mubr.f32.vlgmr.msra.gmra.mrb[102].mxu1 %v10139_v51 }
 0xcbe   : > { %14442 = vmatpush3.bf16.msra.mxu1 %v14441_v14  ;;  %13857 = vmatprep.mubr.msk.f32.mxu1 %vm14537_vm1, %v20221_v28 }
 0xcbf   : > { %14443 = vmatprep.subr.bf16.mxu1 %v14538_v17 }
 0xcc2   : > { %14445 = vmatpush3.bf16.msra.mxu1 %v14444_v4 }
 0xcc3   : > { %14446 = vmatprep.subr.bf16.mxu1 %v14538_v17 }
 0xcc6   : > { %14448 = vmatpush3.bf16.msra.mxu1 %v14447_v34 }
 0xcc7   : > { %14449 = vmatprep.subr.bf16.mxu1 %v14538_v17 }
 0xcca   : > { %14451 = vmatpush3.bf16.msra.mxu1 %v14450_v26 }
 0xccb   : > { %14452 = vmatprep.subr.bf16.mxu1 %v14538_v17 }
 0xcce   : > { %14454 = vmatpush3.bf16.msra.mxu1 %v14453_v30 }
 0xccf   : > { %14455 = vmatprep.subr.bf16.mxu1 %v14538_v17 }
 0xcd2   : > { %14457 = vmatpush3.bf16.msra.mxu1 %v14456_v5 }
 0xcd3   : > { %14458 = vmatprep.subr.bf16.mxu1 %v14538_v17 }
 0xcd6   : > { %14460 = vmatpush3.bf16.msra.mxu1 %v14459_v3 }
 0xcd7   : > { %14461 = vmatprep.subr.bf16.mxu1 %v14538_v17 }
 0xcda   : > { %14463 = vmatpush3.bf16.msra.mxu1 %v14462_v49 }
 0xcdb   : > { %14464 = vmatprep.subr.bf16.mxu1 %v14538_v17 }
 0xd90   : > { %v11872_v46 = vpop.f32.mrb[102].mxu1 }
 0xd91   : > { %v11873_v16 = vpop.f32.mrb[103].mxu1 }
 0xd92   : > { %v11874_v41 = vadd.f32 %v11873_v16, %v11872_v46 }
 0xd94   : > { %v10244_v9 = vadd.f32 %v11874_v41, %v10176_v25 }
 0xd96   : > { %v10247_v0 = vmax.f32 %v10244_v9, 0.0 }
 0xd98   : > { %13858 = vmatmul.mubr.f32.vlgmr.msra.gmra.mrb[104].mxu1 %v10247_v0 }
 0xd99   : > { %14466 = vmatpush3.bf16.msra.mxu1 %v14465_v10  ;;  %13876 = vmatprep.mubr.msk.f32.mxu1 %vm14537_vm1, %v20221_v28  ;;  %v10342_v28 = vld [vmem:[%s20159_s17 + $0x30] sm:$0xff]  ;;  %vm10428_vm1 = vcmask 0  }
 0xd9a   : > { %14467 = vmatprep.subr.bf16.mxu1 %v14538_v17  ;;  %v14474_v20 = vpack.c.bf16 %v10343_v43, %v10342_v28 }
 0xd9d   : > { %14469 = vmatpush3.bf16.msra.mxu1 %v14468_v15 }
 0xd9e   : > { %14470 = vmatprep.subr.bf16.mxu1 %v14538_v17 }
 0xda1   : > { %14472 = vmatpush3.bf16.msra.mxu1 %v14471_v45 }
 0xda2   : > { %14473 = vmatprep.subr.bf16.mxu1 %v14538_v17  ;;  %v10344_v17 = vld [vmem:[#allocation9] sm:$0x1] }
 0xda5   : > { %14475 = vmatpush3.bf16.msra.mxu1 %v14474_v20 }
 0xe6b   : > { %v10331_v44 = vpop.f32.mrb[104].mxu1 }
 0xe6c   : > { %v10332_v1 = vadd.f32 %v10331_v44, %v10264_v18  ;;  %v13859_v29 = vpop.f32.mrb[105].mxu1 }
 0xe6e   : > { %v10335_v13 = vmax.f32 %v10332_v1, 0.0 }
 0xe70   : > { %13877 = vmatmul.mubr.msk.f32.vlgmr.msra.gmra.mrb[106].mxu1 %vm7443_vm8, %v10335_v13 }
 0xf43   : > { %v10414_v62 = vpop.f32.mrb[106].mxu1 }
 0xf44   : > { %v10415_v60 = vadd.f32 %v10414_v62, %v10344_v17  ;;  %v13878_v24 = vpop.f32.mrb[107].mxu1 }
 0xf46   : > { %v10418_v52 = vand.u32 2147483647, %v10415_v60  ;;  %vm10425_vm6 = vcmp.ge.f32.partialorder %v10415_v60, 0.0 }
 0xf48   : > { %v10419_v39 = vsub.f32 0.0, %v10418_v52 }
 0xf4a   : > { %v10420_v21 = vmul.f32 1.442695, %v10419_v39 }
 0xf4c   : > { %14523 = vpow2.f32 %v10420_v21 }
 0xf56   : > { %v14524_v63 = vpop.eup %14523 }
 0xf57   : > { %v10422_v12 = vadd.f32 1.0, %v14524_v63 }
 0xf59   : > { %14525 = vrcp.f32 %v10422_v12 }
 0xf63   : > { %v14526_v47 = vpop.eup %14525 }
 0xf64   : > { %v10426_v23 = vsub.f32 1.0, %v14526_v47 }
 0xf66   : > { %v10427_v61 = vsel %vm10425_vm6, %v14526_v47, %v10426_v23 }
 0xf67   : > { %10429 = vst.msk [vmem:[%s600_s25] sm:$0x1] %vm10428_vm1, %v10427_v61 }
 0xf68 PF: > { %s31_s20 = sadd.s32 1, %s14534_s20  }
 0xf69   : > { %p28_p4 = scmp.ge.s32.totalorder %s31_s20, 4  }
 0xf6b   :  { %30 = sbr.rel (!%p28_p4) target bundleno = 5 (0x5), region = 126 }

</bundles_post_ra>
